<compile_context>
chip_gen: v5e
topology: v5e:2x2
jax: 0.10.0
libtpu: 0.0.40
codegen_flags: <defaults>
</compile_context>

<pallas_src>
import math

import jax
import jax.numpy as jnp
from jax.experimental import pallas as pl
from jax.experimental.pallas import tpu as pltpu


# ----------------------------------------------------------------------------
# Model hyper-parameters (small, consistent with the module's __init__)
# ----------------------------------------------------------------------------
PE_DIM = 8          # unused (positional_encoding=False)
INIT_DIM = 32
HIDDEN_DIM = 32
OUTPUT_DIM = 32     # must equal HIDDEN_DIM for the residual adds in forward()
NUM_LAYERS = 3
NUM_HEADS = 4
HEAD_DIM = HIDDEN_DIM // NUM_HEADS

N_HIGH = 16         # high-level graph nodes, 2 features each
N_LOW = 32          # low-level graph nodes, 1 feature each
N_TOT = N_HIGH + N_LOW

_NEG_INF = -1e30

# misc-slab row layout (16, 32):
#   rows 0-1 : w_mlp_high (2, 32)
#   row  2   : w_mlp_low  (1, 32)
#   row  3   : b_mlp_high
#   row  4   : b_mlp_low
#   row  5   : ln_gamma
#   row  6   : ln_beta
#   rows 8-10: bo_high per layer
#   rows 11-13: bo_low per layer
_ROW_BO_HIGH = 8
_ROW_BO_LOW = 11


def _gelu(x):
    c = math.sqrt(2.0 / math.pi)
    return 0.5 * x * (1.0 + jnp.tanh(c * (x + 0.044715 * x * x * x)))


# ----------------------------------------------------------------------------
# Single fused Pallas kernel: MLPs -> 3 x masked multi-head graph attention
# (separate high / low blocks, no sublane concats) -> shared LayerNorm.
# One grid step == one graph pair (batch axis is the grid).
# ----------------------------------------------------------------------------
def _fused_graph_encoder_kernel(hx_ref, lx_ref, adjh_ref, adjl_ref,
                                wqkv_ref, wo_ref, misc_ref, out_ref):
    f32 = jnp.float32
    scale = 1.0 / math.sqrt(HEAD_DIM)
    misc = misc_ref[...]                                        # (16, 32)

    # ---- input MLPs on the VPU (contraction dims are 1-2; skip the MXU) -----
    hx = hx_ref[0]                                              # (16, 2)
    lx = lx_ref[0]                                              # (32, 1)
    xh = _gelu(hx[:, 0:1] * misc[0:1, :] + hx[:, 1:2] * misc[1:2, :]
               + misc[3:4, :])                                  # (16, 32)
    xl = _gelu(lx * misc[2:3, :] + misc[4:5, :])                # (32, 32)

    # additive attention masks (hoisted out of the layer loop)
    bias_h = jnp.where(adjh_ref[0] > 0.0, 0.0, _NEG_INF)        # (16, 16)
    bias_l = jnp.where(adjl_ref[0] > 0.0, 0.0, _NEG_INF)        # (32, 32)

    def attn(x, bias, wqkv, wo, bo):
        # lane-merged QKV projection: (n,32) @ (32,96) -> (n,96), 96/128 lanes
        qkv = jnp.dot(x, wqkv, preferred_element_type=f32)
        ctx_heads = []
        for h in range(NUM_HEADS):                              # static unroll (4)
            q = qkv[:, h * HEAD_DIM:(h + 1) * HEAD_DIM]
            k = qkv[:, HIDDEN_DIM + h * HEAD_DIM:
                       HIDDEN_DIM + (h + 1) * HEAD_DIM]
            v = qkv[:, 2 * HIDDEN_DIM + h * HEAD_DIM:
                       2 * HIDDEN_DIM + (h + 1) * HEAD_DIM]
            # contract last dims directly (no explicit K transpose)
            s = jax.lax.dot_general(q, k, (((1,), (1,)), ((), ())),
                                    preferred_element_type=f32) * scale + bias
            m = jnp.max(s, axis=-1, keepdims=True)
            p = jnp.exp(s - m)
            p = p / jnp.sum(p, axis=-1, keepdims=True)          # exact softmax
            ctx_heads.append(jnp.dot(p, v, preferred_element_type=f32))
        ctx = jnp.concatenate(ctx_heads, axis=1)                # (n, 32) lane concat
        # single concat-heads output projection per block
        return jnp.dot(ctx, wo, preferred_element_type=f32) + bo

    for l in range(NUM_LAYERS):                                 # static unroll (3)
        nh = attn(xh, bias_h, wqkv_ref[l, 0], wo_ref[l, 0],
                  misc[_ROW_BO_HIGH + l:_ROW_BO_HIGH + l + 1, :])
        nl = attn(xl, bias_l, wqkv_ref[l, 1], wo_ref[l, 1],
                  misc[_ROW_BO_LOW + l:_ROW_BO_LOW + l + 1, :])
        xh = nh if l == 0 else xh + nh       # residual from 2nd layer on
        xl = nl if l == 0 else xl + nl

    # ---- final shared LayerNorm (fused epilogue) -----------------------------
    def layer_norm(x):
        mu = jnp.mean(x, axis=-1, keepdims=True)
        var = jnp.mean((x - mu) * (x - mu), axis=-1, keepdims=True)
        return (x - mu) * jax.lax.rsqrt(var + 1e-5) * misc[5:6, :] + misc[6:7, :]

    # single merged output block; 8-aligned sublane slices, no concatenate
    out_ref[0, 0:N_HIGH, :] = layer_norm(xh)
    out_ref[0, N_HIGH:N_TOT, :] = layer_norm(xl)


# ----------------------------------------------------------------------------
# Cost estimate (scheduler hint only)
# ----------------------------------------------------------------------------
def _cost_estimate(batch):
    per_layer = (
        2 * (N_HIGH + N_LOW) * HIDDEN_DIM * 3 * HIDDEN_DIM                 # qkv
        + 4 * NUM_HEADS * HEAD_DIM * (N_HIGH * N_HIGH + N_LOW * N_LOW)     # scores+ctx
        + 2 * (N_HIGH + N_LOW) * HIDDEN_DIM * OUTPUT_DIM                   # out proj
    )
    flops = batch * (NUM_LAYERS * per_layer
                     + 2 * (N_HIGH * 2 + N_LOW * 1) * INIT_DIM)            # input MLPs
    trans = batch * (NUM_LAYERS * NUM_HEADS * (N_HIGH ** 2 + N_LOW ** 2)   # softmax exp
                     + (N_HIGH + N_LOW) * INIT_DIM)                        # gelu tanh
    byts = (4 * (NUM_LAYERS * 2 * HIDDEN_DIM * (3 * HIDDEN_DIM + OUTPUT_DIM)
                 + 16 * OUTPUT_DIM)
            + batch * 4 * (N_HIGH * 2 + N_LOW + N_HIGH ** 2 + N_LOW ** 2
                           + N_TOT * OUTPUT_DIM))
    return int(flops), int(trans), int(byts)


# ----------------------------------------------------------------------------
# Wrapper: one pallas_call, batch axis = grid ("parallel"), weights resident.
# Accepts unbatched (N, f) or batched (B, N, f) inputs.
# ----------------------------------------------------------------------------
def graph_encoder_forward(params, high_x, high_adj, low_x, low_adj,
                          high_mask=None, low_mask=None):
    squeeze = (high_x.ndim == 2)
    if squeeze:
        high_x, low_x = high_x[None], low_x[None]
        high_adj, low_adj = high_adj[None], low_adj[None]
        if high_mask is not None:
            high_mask = high_mask[None]
        if low_mask is not None:
            low_mask = low_mask[None]

    if high_mask is not None and low_mask is not None:
        high_x = high_x * high_mask
        low_x = low_x * low_mask

    high_x = high_x.astype(jnp.float32)
    low_x = low_x.astype(jnp.float32)
    high_adj = high_adj.astype(jnp.float32)
    low_adj = low_adj.astype(jnp.float32)

    batch = high_x.shape[0]
    wqkv, wo, misc = params["wqkv"], params["wo"], params["misc"]
    flops, trans, byts = _cost_estimate(batch)

    out = pl.pallas_call(
        _fused_graph_encoder_kernel,
        out_shape=jax.ShapeDtypeStruct((batch, N_TOT, OUTPUT_DIM), jnp.float32),
        grid=(batch,),
        in_specs=[
            pl.BlockSpec((1, N_HIGH, 2), lambda i: (i, 0, 0)),
            pl.BlockSpec((1, N_LOW, 1), lambda i: (i, 0, 0)),
            pl.BlockSpec((1, N_HIGH, N_HIGH), lambda i: (i, 0, 0)),
            pl.BlockSpec((1, N_LOW, N_LOW), lambda i: (i, 0, 0)),
            # weights: constant block index -> fetched once, VMEM-resident
            pl.BlockSpec(wqkv.shape, lambda i: (0, 0, 0, 0)),
            pl.BlockSpec(wo.shape, lambda i: (0, 0, 0, 0)),
            pl.BlockSpec(misc.shape, lambda i: (0, 0)),
        ],
        out_specs=pl.BlockSpec((1, N_TOT, OUTPUT_DIM), lambda i: (i, 0, 0)),
        compiler_params=pltpu.CompilerParams(
            dimension_semantics=("parallel",)),
        cost_estimate=pl.CostEstimate(flops=flops, transcendentals=trans,
                                      bytes_accessed=byts),
    )(high_x, low_x, high_adj, low_adj, wqkv, wo, misc)

    out_high = out[:, :N_HIGH, :]
    out_low = out[:, N_HIGH:, :]
    if squeeze:
        out_high, out_low = out_high[0], out_low[0]
    return out_high, out_low


# ----------------------------------------------------------------------------
# Parameter initialization (deterministic, packed into 3 operand slabs)
# ----------------------------------------------------------------------------
def init_params(key):
    keys = iter(jax.random.split(key, 64))

    def unif(shape, fan_in):
        s = 1.0 / math.sqrt(fan_in)
        return jax.random.uniform(next(keys), shape, jnp.float32, -s, s)

    # input MLPs
    w_mh = unif((2, INIT_DIM), 2)
    b_mh = unif((1, INIT_DIM), 2)
    w_ml = unif((1, INIT_DIM), 1)
    b_ml = unif((1, INIT_DIM), 1)

    wqkv_layers, wo_layers, bo_layers = [], [], []
    for _ in range(NUM_LAYERS):
        blk_wqkv, blk_wo, blk_bo = [], [], []
        for _blk in range(2):                       # 0 = high, 1 = low
            din = HIDDEN_DIM
            wq = unif((din, NUM_HEADS * HEAD_DIM), din)
            wk = unif((din, NUM_HEADS * HEAD_DIM), din)
            wv = unif((din, NUM_HEADS * HEAD_DIM), din)
            w_o = unif((NUM_HEADS * HEAD_DIM, OUTPUT_DIM), NUM_HEADS * HEAD_DIM)
            b_o = unif((1, OUTPUT_DIM), NUM_HEADS * HEAD_DIM)
            blk_wqkv.append(jnp.concatenate([wq, wk, wv], axis=1))   # (32, 96)
            blk_wo.append(w_o)                                       # (32, 32)
            blk_bo.append(b_o)                                       # (1, 32)
        wqkv_layers.append(jnp.stack(blk_wqkv))
        wo_layers.append(jnp.stack(blk_wo))
        bo_layers.append(blk_bo)

    wqkv = jnp.stack(wqkv_layers)    # (L, 2, 32, 96)
    wo = jnp.stack(wo_layers)        # (L, 2, 32, 32)

    misc = jnp.zeros((16, OUTPUT_DIM), jnp.float32)
    misc = misc.at[0:2].set(w_mh)
    misc = misc.at[2:3].set(w_ml)
    misc = misc.at[3:4].set(b_mh)
    misc = misc.at[4:5].set(b_ml)
    misc = misc.at[5:6].set(jnp.ones((1, OUTPUT_DIM), jnp.float32))   # ln gamma
    misc = misc.at[6:7].set(jnp.zeros((1, OUTPUT_DIM), jnp.float32))  # ln beta
    for l in range(NUM_LAYERS):
        misc = misc.at[_ROW_BO_HIGH + l:_ROW_BO_HIGH + l + 1].set(bo_layers[l][0])
        misc = misc.at[_ROW_BO_LOW + l:_ROW_BO_LOW + l + 1].set(bo_layers[l][1])

    return {"wqkv": wqkv, "wo": wo, "misc": misc}


# ----------------------------------------------------------------------------
# Pure-JAX reference (per-graph, un-fused) for numerical verification
# ----------------------------------------------------------------------------
def _reference_forward(params, high_x, high_adj, low_x, low_adj):
    misc = params["misc"]
    w_mh, w_ml = misc[0:2], misc[2:3]
    b_mh, b_ml = misc[3:4], misc[4:5]
    ln_g, ln_b = misc[5:6], misc[6:7]

    def attn(x, adj, wqkv, wo, bo):
        n = x.shape[0]
        qkv = x @ wqkv                                           # (n, 96)
        q = qkv[:, :HIDDEN_DIM].reshape(n, NUM_HEADS, HEAD_DIM)
        k = qkv[:, HIDDEN_DIM:2 * HIDDEN_DIM].reshape(n, NUM_HEADS, HEAD_DIM)
        v = qkv[:, 2 * HIDDEN_DIM:].reshape(n, NUM_HEADS, HEAD_DIM)
        s = jnp.einsum('qhd,khd->hqk', q, k) / math.sqrt(HEAD_DIM)
        s = jnp.where(adj[None, :, :] > 0.0, s, _NEG_INF)
        p = jax.nn.softmax(s, axis=-1)
        ctx = jnp.einsum('hqk,khd->qhd', p, v).reshape(n, HIDDEN_DIM)
        return ctx @ wo + bo

    def layer_norm(x):
        mu = jnp.mean(x, axis=-1, keepdims=True)
        var = jnp.mean((x - mu) ** 2, axis=-1, keepdims=True)
        return (x - mu) / jnp.sqrt(var + 1e-5) * ln_g + ln_b

    hh = _gelu(high_x @ w_mh + b_mh)
    ll = _gelu(low_x @ w_ml + b_ml)
    for l in range(NUM_LAYERS):
        nh = attn(hh, high_adj, params["wqkv"][l, 0], params["wo"][l, 0],
                  misc[_ROW_BO_HIGH + l:_ROW_BO_HIGH + l + 1])
        nl = attn(ll, low_adj, params["wqkv"][l, 1], params["wo"][l, 1],
                  misc[_ROW_BO_LOW + l:_ROW_BO_LOW + l + 1])
        hh = nh if l == 0 else hh + nh
        ll = nl if l == 0 else ll + nl
    return layer_norm(hh), layer_norm(ll)


# ----------------------------------------------------------------------------
# Example graph construction (deterministic ring graphs with self-loops)
# ----------------------------------------------------------------------------
def ring_adjacency(n):
    idx = jnp.arange(n)
    adj = jnp.zeros((n, n), jnp.float32)
    adj = adj.at[idx, idx].set(1.0)                       # self-loops
    adj = adj.at[idx, (idx + 1) % n].set(1.0)
    adj = adj.at[idx, (idx - 1) % n].set(1.0)
    return adj


if __name__ == "__main__":
    key = jax.random.PRNGKey(0)
    k_params, k_high, k_low = jax.random.split(key, 3)

    B = 2                                  # batched graphs -> grid axis
    params = init_params(k_params)
    high_x = jax.random.normal(k_high, (B, N_HIGH, 2), jnp.float32)
    low_x = jax.random.normal(k_low, (B, N_LOW, 1), jnp.float32)
    high_adj = jnp.stack([ring_adjacency(N_HIGH)] * B)
    low_adj = jnp.stack([ring_adjacency(N_LOW)] * B)

    fwd = jax.jit(graph_encoder_forward)
    out_high, out_low = fwd(params, high_x, high_adj, low_x, low_adj)
    jax.block_until_ready((out_high, out_low))

    assert out_high.shape == (B, N_HIGH, OUTPUT_DIM)
    assert out_low.shape == (B, N_LOW, OUTPUT_DIM)
    assert jnp.all(jnp.isfinite(out_high)) and jnp.all(jnp.isfinite(out_low))

    # numerical check vs. un-fused pure-JAX reference (exact softmax in-kernel)
    for b in range(B):
        ref_high, ref_low = _reference_forward(params, high_x[b], high_adj[b],
                                               low_x[b], low_adj[b])
        assert jnp.max(jnp.abs(out_high[b] - ref_high)) < 1e-3
        assert jnp.max(jnp.abs(out_low[b] - ref_low)) < 1e-3

    print("KERNEL_OK")
</pallas_src>

<mosaic_0001>
module attributes {stable_mosaic.version = 11 : i64} {
  func.func @_fused_graph_encoder_kernel(%arg0: i32, %arg1: memref<1x16x2xf32, #tpu.memory_space<vmem>>, %arg2: memref<1x32x1xf32, #tpu.memory_space<vmem>>, %arg3: memref<1x16x16xf32, #tpu.memory_space<vmem>>, %arg4: memref<1x32x32xf32, #tpu.memory_space<vmem>>, %arg5: memref<3x2x32x96xf32, #tpu.memory_space<vmem>>, %arg6: memref<3x2x32x32xf32, #tpu.memory_space<vmem>>, %arg7: memref<16x32xf32, #tpu.memory_space<vmem>>, %arg8: memref<1x48x32xf32, #tpu.memory_space<vmem>>) attributes {dimension_semantics = [#tpu.dimension_semantics<parallel>], iteration_bounds = array<i64: 2>, scalar_prefetch = 0 : i64, scratch_operands = 0 : i64, tpu.core_type = #tpu.core_type<tc>, window_params = [{transform_indices = @transform_0, window_bounds = array<i64: 1, 16, 2>}, {transform_indices = @transform_1, window_bounds = array<i64: 1, 32, 1>}, {transform_indices = @transform_2, window_bounds = array<i64: 1, 16, 16>}, {transform_indices = @transform_3, window_bounds = array<i64: 1, 32, 32>}, {pipeline_mode = #tpu.pipeline_mode<synchronous>, transform_indices = @transform_4, window_bounds = array<i64: 3, 2, 32, 96>}, {pipeline_mode = #tpu.pipeline_mode<synchronous>, transform_indices = @transform_5, window_bounds = array<i64: 3, 2, 32, 32>}, {pipeline_mode = #tpu.pipeline_mode<synchronous>, transform_indices = @transform_6, window_bounds = array<i64: 16, 32>}, {transform_indices = @transform_7, window_bounds = array<i64: 1, 48, 32>}]} {
    %c0 = arith.constant 0 : index
    %c0_0 = arith.constant 0 : index
    %0 = vector.load %arg7[%c0, %c0_0] : memref<16x32xf32, #tpu.memory_space<vmem>>, vector<16x32xf32>
    %c0_1 = arith.constant 0 : index
    %c0_2 = arith.constant 0 : index
    %c0_3 = arith.constant 0 : index
    %1 = vector.load %arg1[%c0_1, %c0_2, %c0_3] : memref<1x16x2xf32, #tpu.memory_space<vmem>>, vector<1x16x2xf32>
    %2 = vector.shape_cast %1 : vector<1x16x2xf32> to vector<16x2xf32>
    %c0_4 = arith.constant 0 : index
    %c0_5 = arith.constant 0 : index
    %c0_6 = arith.constant 0 : index
    %3 = vector.load %arg2[%c0_4, %c0_5, %c0_6] : memref<1x32x1xf32, #tpu.memory_space<vmem>>, vector<1x32x1xf32>
    %4 = vector.shape_cast %3 : vector<1x32x1xf32> to vector<32x1xf32>
    %5 = vector.extract_strided_slice %2 {offsets = [0, 0], sizes = [16, 1], strides = [1, 1]} : vector<16x2xf32> to vector<16x1xf32>
    %6 = vector.extract_strided_slice %0 {offsets = [0, 0], sizes = [1, 32], strides = [1, 1]} : vector<16x32xf32> to vector<1x32xf32>
    %7 = vector.broadcast %5 : vector<16x1xf32> to vector<16x32xf32>
    %8 = vector.broadcast %6 : vector<1x32xf32> to vector<16x32xf32>
    %9 = arith.mulf %7, %8 : vector<16x32xf32>
    %10 = vector.extract_strided_slice %2 {offsets = [0, 1], sizes = [16, 1], strides = [1, 1]} : vector<16x2xf32> to vector<16x1xf32>
    %11 = vector.extract_strided_slice %0 {offsets = [1, 0], sizes = [1, 32], strides = [1, 1]} : vector<16x32xf32> to vector<1x32xf32>
    %12 = vector.broadcast %10 : vector<16x1xf32> to vector<16x32xf32>
    %13 = vector.broadcast %11 : vector<1x32xf32> to vector<16x32xf32>
    %14 = arith.mulf %12, %13 : vector<16x32xf32>
    %15 = arith.addf %9, %14 : vector<16x32xf32>
    %16 = vector.extract_strided_slice %0 {offsets = [3, 0], sizes = [1, 32], strides = [1, 1]} : vector<16x32xf32> to vector<1x32xf32>
    %17 = vector.broadcast %16 : vector<1x32xf32> to vector<16x32xf32>
    %18 = arith.addf %15, %17 : vector<16x32xf32>
    %cst = arith.constant 5.000000e-01 : f32
    %19 = vector.broadcast %cst : f32 to vector<16x32xf32>
    %20 = arith.mulf %19, %18 : vector<16x32xf32>
    %cst_7 = arith.constant 4.471500e-02 : f32
    %21 = vector.broadcast %cst_7 : f32 to vector<16x32xf32>
    %22 = arith.mulf %21, %18 : vector<16x32xf32>
    %23 = arith.mulf %22, %18 : vector<16x32xf32>
    %24 = arith.mulf %23, %18 : vector<16x32xf32>
    %25 = arith.addf %18, %24 : vector<16x32xf32>
    %cst_8 = arith.constant 0.797884583 : f32
    %26 = vector.broadcast %cst_8 : f32 to vector<16x32xf32>
    %27 = arith.mulf %26, %25 : vector<16x32xf32>
    %28 = math.tanh %27 : vector<16x32xf32>
    %cst_9 = arith.constant 1.000000e+00 : f32
    %29 = vector.broadcast %cst_9 : f32 to vector<16x32xf32>
    %30 = arith.addf %29, %28 : vector<16x32xf32>
    %31 = arith.mulf %20, %30 : vector<16x32xf32>
    %32 = vector.extract_strided_slice %0 {offsets = [2, 0], sizes = [1, 32], strides = [1, 1]} : vector<16x32xf32> to vector<1x32xf32>
    %33 = vector.broadcast %4 : vector<32x1xf32> to vector<32x32xf32>
    %34 = vector.broadcast %32 : vector<1x32xf32> to vector<32x32xf32>
    %35 = arith.mulf %33, %34 : vector<32x32xf32>
    %36 = vector.extract_strided_slice %0 {offsets = [4, 0], sizes = [1, 32], strides = [1, 1]} : vector<16x32xf32> to vector<1x32xf32>
    %37 = vector.broadcast %36 : vector<1x32xf32> to vector<32x32xf32>
    %38 = arith.addf %35, %37 : vector<32x32xf32>
    %cst_10 = arith.constant 5.000000e-01 : f32
    %39 = vector.broadcast %cst_10 : f32 to vector<32x32xf32>
    %40 = arith.mulf %39, %38 : vector<32x32xf32>
    %cst_11 = arith.constant 4.471500e-02 : f32
    %41 = vector.broadcast %cst_11 : f32 to vector<32x32xf32>
    %42 = arith.mulf %41, %38 : vector<32x32xf32>
    %43 = arith.mulf %42, %38 : vector<32x32xf32>
    %44 = arith.mulf %43, %38 : vector<32x32xf32>
    %45 = arith.addf %38, %44 : vector<32x32xf32>
    %cst_12 = arith.constant 0.797884583 : f32
    %46 = vector.broadcast %cst_12 : f32 to vector<32x32xf32>
    %47 = arith.mulf %46, %45 : vector<32x32xf32>
    %48 = math.tanh %47 : vector<32x32xf32>
    %cst_13 = arith.constant 1.000000e+00 : f32
    %49 = vector.broadcast %cst_13 : f32 to vector<32x32xf32>
    %50 = arith.addf %49, %48 : vector<32x32xf32>
    %51 = arith.mulf %40, %50 : vector<32x32xf32>
    %c0_14 = arith.constant 0 : index
    %c0_15 = arith.constant 0 : index
    %c0_16 = arith.constant 0 : index
    %52 = vector.load %arg3[%c0_14, %c0_15, %c0_16] : memref<1x16x16xf32, #tpu.memory_space<vmem>>, vector<1x16x16xf32>
    %53 = vector.shape_cast %52 : vector<1x16x16xf32> to vector<16x16xf32>
    %cst_17 = arith.constant 0.000000e+00 : f32
    %54 = vector.broadcast %cst_17 : f32 to vector<16x16xf32>
    %55 = arith.cmpf ogt, %53, %54 : vector<16x16xf32>
    %cst_18 = arith.constant 0.000000e+00 : f32
    %cst_19 = arith.constant -1.000000e+30 : f32
    %56 = vector.broadcast %cst_18 : f32 to vector<16x16xf32>
    %57 = vector.broadcast %cst_19 : f32 to vector<16x16xf32>
    %58 = arith.select %55, %56, %57 : vector<16x16xi1>, vector<16x16xf32>
    %c0_20 = arith.constant 0 : index
    %c0_21 = arith.constant 0 : index
    %c0_22 = arith.constant 0 : index
    %59 = vector.load %arg4[%c0_20, %c0_21, %c0_22] : memref<1x32x32xf32, #tpu.memory_space<vmem>>, vector<1x32x32xf32>
    %60 = vector.shape_cast %59 : vector<1x32x32xf32> to vector<32x32xf32>
    %cst_23 = arith.constant 0.000000e+00 : f32
    %61 = vector.broadcast %cst_23 : f32 to vector<32x32xf32>
    %62 = arith.cmpf ogt, %60, %61 : vector<32x32xf32>
    %cst_24 = arith.constant 0.000000e+00 : f32
    %cst_25 = arith.constant -1.000000e+30 : f32
    %63 = vector.broadcast %cst_24 : f32 to vector<32x32xf32>
    %64 = vector.broadcast %cst_25 : f32 to vector<32x32xf32>
    %65 = arith.select %62, %63, %64 : vector<32x32xi1>, vector<32x32xf32>
    %c0_26 = arith.constant 0 : index
    %c0_27 = arith.constant 0 : index
    %c0_28 = arith.constant 0 : index
    %c0_29 = arith.constant 0 : index
    %66 = vector.load %arg5[%c0_26, %c0_27, %c0_28, %c0_29] : memref<3x2x32x96xf32, #tpu.memory_space<vmem>>, vector<1x1x32x96xf32>
    %67 = vector.shape_cast %66 : vector<1x1x32x96xf32> to vector<32x96xf32>
    %c0_30 = arith.constant 0 : index
    %c0_31 = arith.constant 0 : index
    %c0_32 = arith.constant 0 : index
    %c0_33 = arith.constant 0 : index
    %68 = vector.load %arg6[%c0_30, %c0_31, %c0_32, %c0_33] : memref<3x2x32x32xf32, #tpu.memory_space<vmem>>, vector<1x1x32x32xf32>
    %69 = vector.shape_cast %68 : vector<1x1x32x32xf32> to vector<32x32xf32>
    %70 = vector.extract_strided_slice %0 {offsets = [8, 0], sizes = [1, 32], strides = [1, 1]} : vector<16x32xf32> to vector<1x32xf32>
    %cst_34 = arith.constant dense<0.000000e+00> : vector<16x96xf32>
    %71 = tpu.matmul %31, %67, %cst_34 {dimension_numbers = #tpu.dot_dimension_numbers<[1], [0], [0], [1], [0, 0, 1, 1], [], []>} : vector<16x32xf32>, vector<32x96xf32>, vector<16x96xf32> -> vector<16x96xf32>
    %72 = vector.extract_strided_slice %71 {offsets = [0, 0], sizes = [16, 8], strides = [1, 1]} : vector<16x96xf32> to vector<16x8xf32>
    %73 = vector.extract_strided_slice %71 {offsets = [0, 32], sizes = [16, 8], strides = [1, 1]} : vector<16x96xf32> to vector<16x8xf32>
    %74 = vector.extract_strided_slice %71 {offsets = [0, 64], sizes = [16, 8], strides = [1, 1]} : vector<16x96xf32> to vector<16x8xf32>
    %cst_35 = arith.constant dense<0.000000e+00> : vector<16x16xf32>
    %75 = tpu.matmul %72, %73, %cst_35 {dimension_numbers = #tpu.dot_dimension_numbers<[1], [1], [0], [0], [0, 0, 1, 0], [], []>} : vector<16x8xf32>, vector<16x8xf32>, vector<16x16xf32> -> vector<16x16xf32>
    %cst_36 = arith.constant 0.353553385 : f32
    %76 = vector.broadcast %cst_36 : f32 to vector<16x16xf32>
    %77 = arith.mulf %75, %76 : vector<16x16xf32>
    %78 = arith.addf %77, %58 : vector<16x16xf32>
    %cst_37 = arith.constant dense<0xFF800000> : vector<16xf32>
    %79 = vector.multi_reduction <maximumf>, %78, %cst_37 [1] : vector<16x16xf32> to vector<16xf32>
    %80 = vector.shape_cast %79 : vector<16xf32> to vector<16x1xf32>
    %81 = vector.broadcast %80 : vector<16x1xf32> to vector<16x16xf32>
    %82 = arith.subf %78, %81 : vector<16x16xf32>
    %83 = math.exp %82 : vector<16x16xf32>
    %cst_38 = arith.constant dense<0.000000e+00> : vector<16xf32>
    %84 = vector.multi_reduction <add>, %83, %cst_38 [1] : vector<16x16xf32> to vector<16xf32>
    %85 = vector.shape_cast %84 : vector<16xf32> to vector<16x1xf32>
    %86 = vector.broadcast %85 : vector<16x1xf32> to vector<16x16xf32>
    %87 = arith.divf %83, %86 : vector<16x16xf32>
    %cst_39 = arith.constant dense<0.000000e+00> : vector<16x8xf32>
    %88 = tpu.matmul %87, %74, %cst_39 {dimension_numbers = #tpu.dot_dimension_numbers<[1], [0], [0], [1], [0, 0, 1, 1], [], []>} : vector<16x16xf32>, vector<16x8xf32>, vector<16x8xf32> -> vector<16x8xf32>
    %89 = vector.extract_strided_slice %71 {offsets = [0, 8], sizes = [16, 8], strides = [1, 1]} : vector<16x96xf32> to vector<16x8xf32>
    %90 = vector.extract_strided_slice %71 {offsets = [0, 40], sizes = [16, 8], strides = [1, 1]} : vector<16x96xf32> to vector<16x8xf32>
    %91 = vector.extract_strided_slice %71 {offsets = [0, 72], sizes = [16, 8], strides = [1, 1]} : vector<16x96xf32> to vector<16x8xf32>
    %cst_40 = arith.constant dense<0.000000e+00> : vector<16x16xf32>
    %92 = tpu.matmul %89, %90, %cst_40 {dimension_numbers = #tpu.dot_dimension_numbers<[1], [1], [0], [0], [0, 0, 1, 0], [], []>} : vector<16x8xf32>, vector<16x8xf32>, vector<16x16xf32> -> vector<16x16xf32>
    %cst_41 = arith.constant 0.353553385 : f32
    %93 = vector.broadcast %cst_41 : f32 to vector<16x16xf32>
    %94 = arith.mulf %92, %93 : vector<16x16xf32>
    %95 = arith.addf %94, %58 : vector<16x16xf32>
    %cst_42 = arith.constant dense<0xFF800000> : vector<16xf32>
    %96 = vector.multi_reduction <maximumf>, %95, %cst_42 [1] : vector<16x16xf32> to vector<16xf32>
    %97 = vector.shape_cast %96 : vector<16xf32> to vector<16x1xf32>
    %98 = vector.broadcast %97 : vector<16x1xf32> to vector<16x16xf32>
    %99 = arith.subf %95, %98 : vector<16x16xf32>
    %100 = math.exp %99 : vector<16x16xf32>
    %cst_43 = arith.constant dense<0.000000e+00> : vector<16xf32>
    %101 = vector.multi_reduction <add>, %100, %cst_43 [1] : vector<16x16xf32> to vector<16xf32>
    %102 = vector.shape_cast %101 : vector<16xf32> to vector<16x1xf32>
    %103 = vector.broadcast %102 : vector<16x1xf32> to vector<16x16xf32>
    %104 = arith.divf %100, %103 : vector<16x16xf32>
    %cst_44 = arith.constant dense<0.000000e+00> : vector<16x8xf32>
    %105 = tpu.matmul %104, %91, %cst_44 {dimension_numbers = #tpu.dot_dimension_numbers<[1], [0], [0], [1], [0, 0, 1, 1], [], []>} : vector<16x16xf32>, vector<16x8xf32>, vector<16x8xf32> -> vector<16x8xf32>
    %106 = vector.extract_strided_slice %71 {offsets = [0, 16], sizes = [16, 8], strides = [1, 1]} : vector<16x96xf32> to vector<16x8xf32>
    %107 = vector.extract_strided_slice %71 {offsets = [0, 48], sizes = [16, 8], strides = [1, 1]} : vector<16x96xf32> to vector<16x8xf32>
    %108 = vector.extract_strided_slice %71 {offsets = [0, 80], sizes = [16, 8], strides = [1, 1]} : vector<16x96xf32> to vector<16x8xf32>
    %cst_45 = arith.constant dense<0.000000e+00> : vector<16x16xf32>
    %109 = tpu.matmul %106, %107, %cst_45 {dimension_numbers = #tpu.dot_dimension_numbers<[1], [1], [0], [0], [0, 0, 1, 0], [], []>} : vector<16x8xf32>, vector<16x8xf32>, vector<16x16xf32> -> vector<16x16xf32>
    %cst_46 = arith.constant 0.353553385 : f32
    %110 = vector.broadcast %cst_46 : f32 to vector<16x16xf32>
    %111 = arith.mulf %109, %110 : vector<16x16xf32>
    %112 = arith.addf %111, %58 : vector<16x16xf32>
    %cst_47 = arith.constant dense<0xFF800000> : vector<16xf32>
    %113 = vector.multi_reduction <maximumf>, %112, %cst_47 [1] : vector<16x16xf32> to vector<16xf32>
    %114 = vector.shape_cast %113 : vector<16xf32> to vector<16x1xf32>
    %115 = vector.broadcast %114 : vector<16x1xf32> to vector<16x16xf32>
    %116 = arith.subf %112, %115 : vector<16x16xf32>
    %117 = math.exp %116 : vector<16x16xf32>
    %cst_48 = arith.constant dense<0.000000e+00> : vector<16xf32>
    %118 = vector.multi_reduction <add>, %117, %cst_48 [1] : vector<16x16xf32> to vector<16xf32>
    %119 = vector.shape_cast %118 : vector<16xf32> to vector<16x1xf32>
    %120 = vector.broadcast %119 : vector<16x1xf32> to vector<16x16xf32>
    %121 = arith.divf %117, %120 : vector<16x16xf32>
    %cst_49 = arith.constant dense<0.000000e+00> : vector<16x8xf32>
    %122 = tpu.matmul %121, %108, %cst_49 {dimension_numbers = #tpu.dot_dimension_numbers<[1], [0], [0], [1], [0, 0, 1, 1], [], []>} : vector<16x16xf32>, vector<16x8xf32>, vector<16x8xf32> -> vector<16x8xf32>
    %123 = vector.extract_strided_slice %71 {offsets = [0, 24], sizes = [16, 8], strides = [1, 1]} : vector<16x96xf32> to vector<16x8xf32>
    %124 = vector.extract_strided_slice %71 {offsets = [0, 56], sizes = [16, 8], strides = [1, 1]} : vector<16x96xf32> to vector<16x8xf32>
    %125 = vector.extract_strided_slice %71 {offsets = [0, 88], sizes = [16, 8], strides = [1, 1]} : vector<16x96xf32> to vector<16x8xf32>
    %cst_50 = arith.constant dense<0.000000e+00> : vector<16x16xf32>
    %126 = tpu.matmul %123, %124, %cst_50 {dimension_numbers = #tpu.dot_dimension_numbers<[1], [1], [0], [0], [0, 0, 1, 0], [], []>} : vector<16x8xf32>, vector<16x8xf32>, vector<16x16xf32> -> vector<16x16xf32>
    %cst_51 = arith.constant 0.353553385 : f32
    %127 = vector.broadcast %cst_51 : f32 to vector<16x16xf32>
    %128 = arith.mulf %126, %127 : vector<16x16xf32>
    %129 = arith.addf %128, %58 : vector<16x16xf32>
    %cst_52 = arith.constant dense<0xFF800000> : vector<16xf32>
    %130 = vector.multi_reduction <maximumf>, %129, %cst_52 [1] : vector<16x16xf32> to vector<16xf32>
    %131 = vector.shape_cast %130 : vector<16xf32> to vector<16x1xf32>
    %132 = vector.broadcast %131 : vector<16x1xf32> to vector<16x16xf32>
    %133 = arith.subf %129, %132 : vector<16x16xf32>
    %134 = math.exp %133 : vector<16x16xf32>
    %cst_53 = arith.constant dense<0.000000e+00> : vector<16xf32>
    %135 = vector.multi_reduction <add>, %134, %cst_53 [1] : vector<16x16xf32> to vector<16xf32>
    %136 = vector.shape_cast %135 : vector<16xf32> to vector<16x1xf32>
    %137 = vector.broadcast %136 : vector<16x1xf32> to vector<16x16xf32>
    %138 = arith.divf %134, %137 : vector<16x16xf32>
    %cst_54 = arith.constant dense<0.000000e+00> : vector<16x8xf32>
    %139 = tpu.matmul %138, %125, %cst_54 {dimension_numbers = #tpu.dot_dimension_numbers<[1], [0], [0], [1], [0, 0, 1, 1], [], []>} : vector<16x16xf32>, vector<16x8xf32>, vector<16x8xf32> -> vector<16x8xf32>
    %140 = tpu.concatenate %88, %105, %122, %139 in 1 : vector<16x8xf32>, vector<16x8xf32>, vector<16x8xf32>, vector<16x8xf32> -> vector<16x32xf32>
    %cst_55 = arith.constant dense<0.000000e+00> : vector<16x32xf32>
    %141 = tpu.matmul %140, %69, %cst_55 {dimension_numbers = #tpu.dot_dimension_numbers<[1], [0], [0], [1], [0, 0, 1, 1], [], []>} : vector<16x32xf32>, vector<32x32xf32>, vector<16x32xf32> -> vector<16x32xf32>
    %142 = vector.broadcast %70 : vector<1x32xf32> to vector<16x32xf32>
    %143 = arith.addf %141, %142 : vector<16x32xf32>
    %c0_56 = arith.constant 0 : index
    %c1 = arith.constant 1 : index
    %c0_57 = arith.constant 0 : index
    %c0_58 = arith.constant 0 : index
    %144 = vector.load %arg5[%c0_56, %c1, %c0_57, %c0_58] : memref<3x2x32x96xf32, #tpu.memory_space<vmem>>, vector<1x1x32x96xf32>
    %145 = vector.shape_cast %144 : vector<1x1x32x96xf32> to vector<32x96xf32>
    %c0_59 = arith.constant 0 : index
    %c1_60 = arith.constant 1 : index
    %c0_61 = arith.constant 0 : index
    %c0_62 = arith.constant 0 : index
    %146 = vector.load %arg6[%c0_59, %c1_60, %c0_61, %c0_62] : memref<3x2x32x32xf32, #tpu.memory_space<vmem>>, vector<1x1x32x32xf32>
    %147 = vector.shape_cast %146 : vector<1x1x32x32xf32> to vector<32x32xf32>
    %148 = vector.extract_strided_slice %0 {offsets = [11, 0], sizes = [1, 32], strides = [1, 1]} : vector<16x32xf32> to vector<1x32xf32>
    %cst_63 = arith.constant dense<0.000000e+00> : vector<32x96xf32>
    %149 = tpu.matmul %51, %145, %cst_63 {dimension_numbers = #tpu.dot_dimension_numbers<[1], [0], [0], [1], [0, 0, 1, 1], [], []>} : vector<32x32xf32>, vector<32x96xf32>, vector<32x96xf32> -> vector<32x96xf32>
    %150 = vector.extract_strided_slice %149 {offsets = [0, 0], sizes = [32, 8], strides = [1, 1]} : vector<32x96xf32> to vector<32x8xf32>
    %151 = vector.extract_strided_slice %149 {offsets = [0, 32], sizes = [32, 8], strides = [1, 1]} : vector<32x96xf32> to vector<32x8xf32>
    %152 = vector.extract_strided_slice %149 {offsets = [0, 64], sizes = [32, 8], strides = [1, 1]} : vector<32x96xf32> to vector<32x8xf32>
    %cst_64 = arith.constant dense<0.000000e+00> : vector<32x32xf32>
    %153 = tpu.matmul %150, %151, %cst_64 {dimension_numbers = #tpu.dot_dimension_numbers<[1], [1], [0], [0], [0, 0, 1, 0], [], []>} : vector<32x8xf32>, vector<32x8xf32>, vector<32x32xf32> -> vector<32x32xf32>
    %cst_65 = arith.constant 0.353553385 : f32
    %154 = vector.broadcast %cst_65 : f32 to vector<32x32xf32>
    %155 = arith.mulf %153, %154 : vector<32x32xf32>
    %156 = arith.addf %155, %65 : vector<32x32xf32>
    %cst_66 = arith.constant dense<0xFF800000> : vector<32xf32>
    %157 = vector.multi_reduction <maximumf>, %156, %cst_66 [1] : vector<32x32xf32> to vector<32xf32>
    %158 = vector.shape_cast %157 : vector<32xf32> to vector<32x1xf32>
    %159 = vector.broadcast %158 : vector<32x1xf32> to vector<32x32xf32>
    %160 = arith.subf %156, %159 : vector<32x32xf32>
    %161 = math.exp %160 : vector<32x32xf32>
    %cst_67 = arith.constant dense<0.000000e+00> : vector<32xf32>
    %162 = vector.multi_reduction <add>, %161, %cst_67 [1] : vector<32x32xf32> to vector<32xf32>
    %163 = vector.shape_cast %162 : vector<32xf32> to vector<32x1xf32>
    %164 = vector.broadcast %163 : vector<32x1xf32> to vector<32x32xf32>
    %165 = arith.divf %161, %164 : vector<32x32xf32>
    %cst_68 = arith.constant dense<0.000000e+00> : vector<32x8xf32>
    %166 = tpu.matmul %165, %152, %cst_68 {dimension_numbers = #tpu.dot_dimension_numbers<[1], [0], [0], [1], [0, 0, 1, 1], [], []>} : vector<32x32xf32>, vector<32x8xf32>, vector<32x8xf32> -> vector<32x8xf32>
    %167 = vector.extract_strided_slice %149 {offsets = [0, 8], sizes = [32, 8], strides = [1, 1]} : vector<32x96xf32> to vector<32x8xf32>
    %168 = vector.extract_strided_slice %149 {offsets = [0, 40], sizes = [32, 8], strides = [1, 1]} : vector<32x96xf32> to vector<32x8xf32>
    %169 = vector.extract_strided_slice %149 {offsets = [0, 72], sizes = [32, 8], strides = [1, 1]} : vector<32x96xf32> to vector<32x8xf32>
    %cst_69 = arith.constant dense<0.000000e+00> : vector<32x32xf32>
    %170 = tpu.matmul %167, %168, %cst_69 {dimension_numbers = #tpu.dot_dimension_numbers<[1], [1], [0], [0], [0, 0, 1, 0], [], []>} : vector<32x8xf32>, vector<32x8xf32>, vector<32x32xf32> -> vector<32x32xf32>
    %cst_70 = arith.constant 0.353553385 : f32
    %171 = vector.broadcast %cst_70 : f32 to vector<32x32xf32>
    %172 = arith.mulf %170, %171 : vector<32x32xf32>
    %173 = arith.addf %172, %65 : vector<32x32xf32>
    %cst_71 = arith.constant dense<0xFF800000> : vector<32xf32>
    %174 = vector.multi_reduction <maximumf>, %173, %cst_71 [1] : vector<32x32xf32> to vector<32xf32>
    %175 = vector.shape_cast %174 : vector<32xf32> to vector<32x1xf32>
    %176 = vector.broadcast %175 : vector<32x1xf32> to vector<32x32xf32>
    %177 = arith.subf %173, %176 : vector<32x32xf32>
    %178 = math.exp %177 : vector<32x32xf32>
    %cst_72 = arith.constant dense<0.000000e+00> : vector<32xf32>
    %179 = vector.multi_reduction <add>, %178, %cst_72 [1] : vector<32x32xf32> to vector<32xf32>
    %180 = vector.shape_cast %179 : vector<32xf32> to vector<32x1xf32>
    %181 = vector.broadcast %180 : vector<32x1xf32> to vector<32x32xf32>
    %182 = arith.divf %178, %181 : vector<32x32xf32>
    %cst_73 = arith.constant dense<0.000000e+00> : vector<32x8xf32>
    %183 = tpu.matmul %182, %169, %cst_73 {dimension_numbers = #tpu.dot_dimension_numbers<[1], [0], [0], [1], [0, 0, 1, 1], [], []>} : vector<32x32xf32>, vector<32x8xf32>, vector<32x8xf32> -> vector<32x8xf32>
    %184 = vector.extract_strided_slice %149 {offsets = [0, 16], sizes = [32, 8], strides = [1, 1]} : vector<32x96xf32> to vector<32x8xf32>
    %185 = vector.extract_strided_slice %149 {offsets = [0, 48], sizes = [32, 8], strides = [1, 1]} : vector<32x96xf32> to vector<32x8xf32>
    %186 = vector.extract_strided_slice %149 {offsets = [0, 80], sizes = [32, 8], strides = [1, 1]} : vector<32x96xf32> to vector<32x8xf32>
    %cst_74 = arith.constant dense<0.000000e+00> : vector<32x32xf32>
    %187 = tpu.matmul %184, %185, %cst_74 {dimension_numbers = #tpu.dot_dimension_numbers<[1], [1], [0], [0], [0, 0, 1, 0], [], []>} : vector<32x8xf32>, vector<32x8xf32>, vector<32x32xf32> -> vector<32x32xf32>
    %cst_75 = arith.constant 0.353553385 : f32
    %188 = vector.broadcast %cst_75 : f32 to vector<32x32xf32>
    %189 = arith.mulf %187, %188 : vector<32x32xf32>
    %190 = arith.addf %189, %65 : vector<32x32xf32>
    %cst_76 = arith.constant dense<0xFF800000> : vector<32xf32>
    %191 = vector.multi_reduction <maximumf>, %190, %cst_76 [1] : vector<32x32xf32> to vector<32xf32>
    %192 = vector.shape_cast %191 : vector<32xf32> to vector<32x1xf32>
    %193 = vector.broadcast %192 : vector<32x1xf32> to vector<32x32xf32>
    %194 = arith.subf %190, %193 : vector<32x32xf32>
    %195 = math.exp %194 : vector<32x32xf32>
    %cst_77 = arith.constant dense<0.000000e+00> : vector<32xf32>
    %196 = vector.multi_reduction <add>, %195, %cst_77 [1] : vector<32x32xf32> to vector<32xf32>
    %197 = vector.shape_cast %196 : vector<32xf32> to vector<32x1xf32>
    %198 = vector.broadcast %197 : vector<32x1xf32> to vector<32x32xf32>
    %199 = arith.divf %195, %198 : vector<32x32xf32>
    %cst_78 = arith.constant dense<0.000000e+00> : vector<32x8xf32>
    %200 = tpu.matmul %199, %186, %cst_78 {dimension_numbers = #tpu.dot_dimension_numbers<[1], [0], [0], [1], [0, 0, 1, 1], [], []>} : vector<32x32xf32>, vector<32x8xf32>, vector<32x8xf32> -> vector<32x8xf32>
    %201 = vector.extract_strided_slice %149 {offsets = [0, 24], sizes = [32, 8], strides = [1, 1]} : vector<32x96xf32> to vector<32x8xf32>
    %202 = vector.extract_strided_slice %149 {offsets = [0, 56], sizes = [32, 8], strides = [1, 1]} : vector<32x96xf32> to vector<32x8xf32>
    %203 = vector.extract_strided_slice %149 {offsets = [0, 88], sizes = [32, 8], strides = [1, 1]} : vector<32x96xf32> to vector<32x8xf32>
    %cst_79 = arith.constant dense<0.000000e+00> : vector<32x32xf32>
    %204 = tpu.matmul %201, %202, %cst_79 {dimension_numbers = #tpu.dot_dimension_numbers<[1], [1], [0], [0], [0, 0, 1, 0], [], []>} : vector<32x8xf32>, vector<32x8xf32>, vector<32x32xf32> -> vector<32x32xf32>
    %cst_80 = arith.constant 0.353553385 : f32
    %205 = vector.broadcast %cst_80 : f32 to vector<32x32xf32>
    %206 = arith.mulf %204, %205 : vector<32x32xf32>
    %207 = arith.addf %206, %65 : vector<32x32xf32>
    %cst_81 = arith.constant dense<0xFF800000> : vector<32xf32>
    %208 = vector.multi_reduction <maximumf>, %207, %cst_81 [1] : vector<32x32xf32> to vector<32xf32>
    %209 = vector.shape_cast %208 : vector<32xf32> to vector<32x1xf32>
    %210 = vector.broadcast %209 : vector<32x1xf32> to vector<32x32xf32>
    %211 = arith.subf %207, %210 : vector<32x32xf32>
    %212 = math.exp %211 : vector<32x32xf32>
    %cst_82 = arith.constant dense<0.000000e+00> : vector<32xf32>
    %213 = vector.multi_reduction <add>, %212, %cst_82 [1] : vector<32x32xf32> to vector<32xf32>
    %214 = vector.shape_cast %213 : vector<32xf32> to vector<32x1xf32>
    %215 = vector.broadcast %214 : vector<32x1xf32> to vector<32x32xf32>
    %216 = arith.divf %212, %215 : vector<32x32xf32>
    %cst_83 = arith.constant dense<0.000000e+00> : vector<32x8xf32>
    %217 = tpu.matmul %216, %203, %cst_83 {dimension_numbers = #tpu.dot_dimension_numbers<[1], [0], [0], [1], [0, 0, 1, 1], [], []>} : vector<32x32xf32>, vector<32x8xf32>, vector<32x8xf32> -> vector<32x8xf32>
    %218 = tpu.concatenate %166, %183, %200, %217 in 1 : vector<32x8xf32>, vector<32x8xf32>, vector<32x8xf32>, vector<32x8xf32> -> vector<32x32xf32>
    %cst_84 = arith.constant dense<0.000000e+00> : vector<32x32xf32>
    %219 = tpu.matmul %218, %147, %cst_84 {dimension_numbers = #tpu.dot_dimension_numbers<[1], [0], [0], [1], [0, 0, 1, 1], [], []>} : vector<32x32xf32>, vector<32x32xf32>, vector<32x32xf32> -> vector<32x32xf32>
    %220 = vector.broadcast %148 : vector<1x32xf32> to vector<32x32xf32>
    %221 = arith.addf %219, %220 : vector<32x32xf32>
    %c1_85 = arith.constant 1 : index
    %c0_86 = arith.constant 0 : index
    %c0_87 = arith.constant 0 : index
    %c0_88 = arith.constant 0 : index
    %222 = vector.load %arg5[%c1_85, %c0_86, %c0_87, %c0_88] : memref<3x2x32x96xf32, #tpu.memory_space<vmem>>, vector<1x1x32x96xf32>
    %223 = vector.shape_cast %222 : vector<1x1x32x96xf32> to vector<32x96xf32>
    %c1_89 = arith.constant 1 : index
    %c0_90 = arith.constant 0 : index
    %c0_91 = arith.constant 0 : index
    %c0_92 = arith.constant 0 : index
    %224 = vector.load %arg6[%c1_89, %c0_90, %c0_91, %c0_92] : memref<3x2x32x32xf32, #tpu.memory_space<vmem>>, vector<1x1x32x32xf32>
    %225 = vector.shape_cast %224 : vector<1x1x32x32xf32> to vector<32x32xf32>
    %226 = vector.extract_strided_slice %0 {offsets = [9, 0], sizes = [1, 32], strides = [1, 1]} : vector<16x32xf32> to vector<1x32xf32>
    %cst_93 = arith.constant dense<0.000000e+00> : vector<16x96xf32>
    %227 = tpu.matmul %143, %223, %cst_93 {dimension_numbers = #tpu.dot_dimension_numbers<[1], [0], [0], [1], [0, 0, 1, 1], [], []>} : vector<16x32xf32>, vector<32x96xf32>, vector<16x96xf32> -> vector<16x96xf32>
    %228 = vector.extract_strided_slice %227 {offsets = [0, 0], sizes = [16, 8], strides = [1, 1]} : vector<16x96xf32> to vector<16x8xf32>
    %229 = vector.extract_strided_slice %227 {offsets = [0, 32], sizes = [16, 8], strides = [1, 1]} : vector<16x96xf32> to vector<16x8xf32>
    %230 = vector.extract_strided_slice %227 {offsets = [0, 64], sizes = [16, 8], strides = [1, 1]} : vector<16x96xf32> to vector<16x8xf32>
    %cst_94 = arith.constant dense<0.000000e+00> : vector<16x16xf32>
    %231 = tpu.matmul %228, %229, %cst_94 {dimension_numbers = #tpu.dot_dimension_numbers<[1], [1], [0], [0], [0, 0, 1, 0], [], []>} : vector<16x8xf32>, vector<16x8xf32>, vector<16x16xf32> -> vector<16x16xf32>
    %cst_95 = arith.constant 0.353553385 : f32
    %232 = vector.broadcast %cst_95 : f32 to vector<16x16xf32>
    %233 = arith.mulf %231, %232 : vector<16x16xf32>
    %234 = arith.addf %233, %58 : vector<16x16xf32>
    %cst_96 = arith.constant dense<0xFF800000> : vector<16xf32>
    %235 = vector.multi_reduction <maximumf>, %234, %cst_96 [1] : vector<16x16xf32> to vector<16xf32>
    %236 = vector.shape_cast %235 : vector<16xf32> to vector<16x1xf32>
    %237 = vector.broadcast %236 : vector<16x1xf32> to vector<16x16xf32>
    %238 = arith.subf %234, %237 : vector<16x16xf32>
    %239 = math.exp %238 : vector<16x16xf32>
    %cst_97 = arith.constant dense<0.000000e+00> : vector<16xf32>
    %240 = vector.multi_reduction <add>, %239, %cst_97 [1] : vector<16x16xf32> to vector<16xf32>
    %241 = vector.shape_cast %240 : vector<16xf32> to vector<16x1xf32>
    %242 = vector.broadcast %241 : vector<16x1xf32> to vector<16x16xf32>
    %243 = arith.divf %239, %242 : vector<16x16xf32>
    %cst_98 = arith.constant dense<0.000000e+00> : vector<16x8xf32>
    %244 = tpu.matmul %243, %230, %cst_98 {dimension_numbers = #tpu.dot_dimension_numbers<[1], [0], [0], [1], [0, 0, 1, 1], [], []>} : vector<16x16xf32>, vector<16x8xf32>, vector<16x8xf32> -> vector<16x8xf32>
    %245 = vector.extract_strided_slice %227 {offsets = [0, 8], sizes = [16, 8], strides = [1, 1]} : vector<16x96xf32> to vector<16x8xf32>
    %246 = vector.extract_strided_slice %227 {offsets = [0, 40], sizes = [16, 8], strides = [1, 1]} : vector<16x96xf32> to vector<16x8xf32>
    %247 = vector.extract_strided_slice %227 {offsets = [0, 72], sizes = [16, 8], strides = [1, 1]} : vector<16x96xf32> to vector<16x8xf32>
    %cst_99 = arith.constant dense<0.000000e+00> : vector<16x16xf32>
    %248 = tpu.matmul %245, %246, %cst_99 {dimension_numbers = #tpu.dot_dimension_numbers<[1], [1], [0], [0], [0, 0, 1, 0], [], []>} : vector<16x8xf32>, vector<16x8xf32>, vector<16x16xf32> -> vector<16x16xf32>
    %cst_100 = arith.constant 0.353553385 : f32
    %249 = vector.broadcast %cst_100 : f32 to vector<16x16xf32>
    %250 = arith.mulf %248, %249 : vector<16x16xf32>
    %251 = arith.addf %250, %58 : vector<16x16xf32>
    %cst_101 = arith.constant dense<0xFF800000> : vector<16xf32>
    %252 = vector.multi_reduction <maximumf>, %251, %cst_101 [1] : vector<16x16xf32> to vector<16xf32>
    %253 = vector.shape_cast %252 : vector<16xf32> to vector<16x1xf32>
    %254 = vector.broadcast %253 : vector<16x1xf32> to vector<16x16xf32>
    %255 = arith.subf %251, %254 : vector<16x16xf32>
    %256 = math.exp %255 : vector<16x16xf32>
    %cst_102 = arith.constant dense<0.000000e+00> : vector<16xf32>
    %257 = vector.multi_reduction <add>, %256, %cst_102 [1] : vector<16x16xf32> to vector<16xf32>
    %258 = vector.shape_cast %257 : vector<16xf32> to vector<16x1xf32>
    %259 = vector.broadcast %258 : vector<16x1xf32> to vector<16x16xf32>
    %260 = arith.divf %256, %259 : vector<16x16xf32>
    %cst_103 = arith.constant dense<0.000000e+00> : vector<16x8xf32>
    %261 = tpu.matmul %260, %247, %cst_103 {dimension_numbers = #tpu.dot_dimension_numbers<[1], [0], [0], [1], [0, 0, 1, 1], [], []>} : vector<16x16xf32>, vector<16x8xf32>, vector<16x8xf32> -> vector<16x8xf32>
    %262 = vector.extract_strided_slice %227 {offsets = [0, 16], sizes = [16, 8], strides = [1, 1]} : vector<16x96xf32> to vector<16x8xf32>
    %263 = vector.extract_strided_slice %227 {offsets = [0, 48], sizes = [16, 8], strides = [1, 1]} : vector<16x96xf32> to vector<16x8xf32>
    %264 = vector.extract_strided_slice %227 {offsets = [0, 80], sizes = [16, 8], strides = [1, 1]} : vector<16x96xf32> to vector<16x8xf32>
    %cst_104 = arith.constant dense<0.000000e+00> : vector<16x16xf32>
    %265 = tpu.matmul %262, %263, %cst_104 {dimension_numbers = #tpu.dot_dimension_numbers<[1], [1], [0], [0], [0, 0, 1, 0], [], []>} : vector<16x8xf32>, vector<16x8xf32>, vector<16x16xf32> -> vector<16x16xf32>
    %cst_105 = arith.constant 0.353553385 : f32
    %266 = vector.broadcast %cst_105 : f32 to vector<16x16xf32>
    %267 = arith.mulf %265, %266 : vector<16x16xf32>
    %268 = arith.addf %267, %58 : vector<16x16xf32>
    %cst_106 = arith.constant dense<0xFF800000> : vector<16xf32>
    %269 = vector.multi_reduction <maximumf>, %268, %cst_106 [1] : vector<16x16xf32> to vector<16xf32>
    %270 = vector.shape_cast %269 : vector<16xf32> to vector<16x1xf32>
    %271 = vector.broadcast %270 : vector<16x1xf32> to vector<16x16xf32>
    %272 = arith.subf %268, %271 : vector<16x16xf32>
    %273 = math.exp %272 : vector<16x16xf32>
    %cst_107 = arith.constant dense<0.000000e+00> : vector<16xf32>
    %274 = vector.multi_reduction <add>, %273, %cst_107 [1] : vector<16x16xf32> to vector<16xf32>
    %275 = vector.shape_cast %274 : vector<16xf32> to vector<16x1xf32>
    %276 = vector.broadcast %275 : vector<16x1xf32> to vector<16x16xf32>
    %277 = arith.divf %273, %276 : vector<16x16xf32>
    %cst_108 = arith.constant dense<0.000000e+00> : vector<16x8xf32>
    %278 = tpu.matmul %277, %264, %cst_108 {dimension_numbers = #tpu.dot_dimension_numbers<[1], [0], [0], [1], [0, 0, 1, 1], [], []>} : vector<16x16xf32>, vector<16x8xf32>, vector<16x8xf32> -> vector<16x8xf32>
    %279 = vector.extract_strided_slice %227 {offsets = [0, 24], sizes = [16, 8], strides = [1, 1]} : vector<16x96xf32> to vector<16x8xf32>
    %280 = vector.extract_strided_slice %227 {offsets = [0, 56], sizes = [16, 8], strides = [1, 1]} : vector<16x96xf32> to vector<16x8xf32>
    %281 = vector.extract_strided_slice %227 {offsets = [0, 88], sizes = [16, 8], strides = [1, 1]} : vector<16x96xf32> to vector<16x8xf32>
    %cst_109 = arith.constant dense<0.000000e+00> : vector<16x16xf32>
    %282 = tpu.matmul %279, %280, %cst_109 {dimension_numbers = #tpu.dot_dimension_numbers<[1], [1], [0], [0], [0, 0, 1, 0], [], []>} : vector<16x8xf32>, vector<16x8xf32>, vector<16x16xf32> -> vector<16x16xf32>
    %cst_110 = arith.constant 0.353553385 : f32
    %283 = vector.broadcast %cst_110 : f32 to vector<16x16xf32>
    %284 = arith.mulf %282, %283 : vector<16x16xf32>
    %285 = arith.addf %284, %58 : vector<16x16xf32>
    %cst_111 = arith.constant dense<0xFF800000> : vector<16xf32>
    %286 = vector.multi_reduction <maximumf>, %285, %cst_111 [1] : vector<16x16xf32> to vector<16xf32>
    %287 = vector.shape_cast %286 : vector<16xf32> to vector<16x1xf32>
    %288 = vector.broadcast %287 : vector<16x1xf32> to vector<16x16xf32>
    %289 = arith.subf %285, %288 : vector<16x16xf32>
    %290 = math.exp %289 : vector<16x16xf32>
    %cst_112 = arith.constant dense<0.000000e+00> : vector<16xf32>
    %291 = vector.multi_reduction <add>, %290, %cst_112 [1] : vector<16x16xf32> to vector<16xf32>
    %292 = vector.shape_cast %291 : vector<16xf32> to vector<16x1xf32>
    %293 = vector.broadcast %292 : vector<16x1xf32> to vector<16x16xf32>
    %294 = arith.divf %290, %293 : vector<16x16xf32>
    %cst_113 = arith.constant dense<0.000000e+00> : vector<16x8xf32>
    %295 = tpu.matmul %294, %281, %cst_113 {dimension_numbers = #tpu.dot_dimension_numbers<[1], [0], [0], [1], [0, 0, 1, 1], [], []>} : vector<16x16xf32>, vector<16x8xf32>, vector<16x8xf32> -> vector<16x8xf32>
    %296 = tpu.concatenate %244, %261, %278, %295 in 1 : vector<16x8xf32>, vector<16x8xf32>, vector<16x8xf32>, vector<16x8xf32> -> vector<16x32xf32>
    %cst_114 = arith.constant dense<0.000000e+00> : vector<16x32xf32>
    %297 = tpu.matmul %296, %225, %cst_114 {dimension_numbers = #tpu.dot_dimension_numbers<[1], [0], [0], [1], [0, 0, 1, 1], [], []>} : vector<16x32xf32>, vector<32x32xf32>, vector<16x32xf32> -> vector<16x32xf32>
    %298 = vector.broadcast %226 : vector<1x32xf32> to vector<16x32xf32>
    %299 = arith.addf %297, %298 : vector<16x32xf32>
    %c1_115 = arith.constant 1 : index
    %c1_116 = arith.constant 1 : index
    %c0_117 = arith.constant 0 : index
    %c0_118 = arith.constant 0 : index
    %300 = vector.load %arg5[%c1_115, %c1_116, %c0_117, %c0_118] : memref<3x2x32x96xf32, #tpu.memory_space<vmem>>, vector<1x1x32x96xf32>
    %301 = vector.shape_cast %300 : vector<1x1x32x96xf32> to vector<32x96xf32>
    %c1_119 = arith.constant 1 : index
    %c1_120 = arith.constant 1 : index
    %c0_121 = arith.constant 0 : index
    %c0_122 = arith.constant 0 : index
    %302 = vector.load %arg6[%c1_119, %c1_120, %c0_121, %c0_122] : memref<3x2x32x32xf32, #tpu.memory_space<vmem>>, vector<1x1x32x32xf32>
    %303 = vector.shape_cast %302 : vector<1x1x32x32xf32> to vector<32x32xf32>
    %304 = vector.extract_strided_slice %0 {offsets = [12, 0], sizes = [1, 32], strides = [1, 1]} : vector<16x32xf32> to vector<1x32xf32>
    %cst_123 = arith.constant dense<0.000000e+00> : vector<32x96xf32>
    %305 = tpu.matmul %221, %301, %cst_123 {dimension_numbers = #tpu.dot_dimension_numbers<[1], [0], [0], [1], [0, 0, 1, 1], [], []>} : vector<32x32xf32>, vector<32x96xf32>, vector<32x96xf32> -> vector<32x96xf32>
    %306 = vector.extract_strided_slice %305 {offsets = [0, 0], sizes = [32, 8], strides = [1, 1]} : vector<32x96xf32> to vector<32x8xf32>
    %307 = vector.extract_strided_slice %305 {offsets = [0, 32], sizes = [32, 8], strides = [1, 1]} : vector<32x96xf32> to vector<32x8xf32>
    %308 = vector.extract_strided_slice %305 {offsets = [0, 64], sizes = [32, 8], strides = [1, 1]} : vector<32x96xf32> to vector<32x8xf32>
    %cst_124 = arith.constant dense<0.000000e+00> : vector<32x32xf32>
    %309 = tpu.matmul %306, %307, %cst_124 {dimension_numbers = #tpu.dot_dimension_numbers<[1], [1], [0], [0], [0, 0, 1, 0], [], []>} : vector<32x8xf32>, vector<32x8xf32>, vector<32x32xf32> -> vector<32x32xf32>
    %cst_125 = arith.constant 0.353553385 : f32
    %310 = vector.broadcast %cst_125 : f32 to vector<32x32xf32>
    %311 = arith.mulf %309, %310 : vector<32x32xf32>
    %312 = arith.addf %311, %65 : vector<32x32xf32>
    %cst_126 = arith.constant dense<0xFF800000> : vector<32xf32>
    %313 = vector.multi_reduction <maximumf>, %312, %cst_126 [1] : vector<32x32xf32> to vector<32xf32>
    %314 = vector.shape_cast %313 : vector<32xf32> to vector<32x1xf32>
    %315 = vector.broadcast %314 : vector<32x1xf32> to vector<32x32xf32>
    %316 = arith.subf %312, %315 : vector<32x32xf32>
    %317 = math.exp %316 : vector<32x32xf32>
    %cst_127 = arith.constant dense<0.000000e+00> : vector<32xf32>
    %318 = vector.multi_reduction <add>, %317, %cst_127 [1] : vector<32x32xf32> to vector<32xf32>
    %319 = vector.shape_cast %318 : vector<32xf32> to vector<32x1xf32>
    %320 = vector.broadcast %319 : vector<32x1xf32> to vector<32x32xf32>
    %321 = arith.divf %317, %320 : vector<32x32xf32>
    %cst_128 = arith.constant dense<0.000000e+00> : vector<32x8xf32>
    %322 = tpu.matmul %321, %308, %cst_128 {dimension_numbers = #tpu.dot_dimension_numbers<[1], [0], [0], [1], [0, 0, 1, 1], [], []>} : vector<32x32xf32>, vector<32x8xf32>, vector<32x8xf32> -> vector<32x8xf32>
    %323 = vector.extract_strided_slice %305 {offsets = [0, 8], sizes = [32, 8], strides = [1, 1]} : vector<32x96xf32> to vector<32x8xf32>
    %324 = vector.extract_strided_slice %305 {offsets = [0, 40], sizes = [32, 8], strides = [1, 1]} : vector<32x96xf32> to vector<32x8xf32>
    %325 = vector.extract_strided_slice %305 {offsets = [0, 72], sizes = [32, 8], strides = [1, 1]} : vector<32x96xf32> to vector<32x8xf32>
    %cst_129 = arith.constant dense<0.000000e+00> : vector<32x32xf32>
    %326 = tpu.matmul %323, %324, %cst_129 {dimension_numbers = #tpu.dot_dimension_numbers<[1], [1], [0], [0], [0, 0, 1, 0], [], []>} : vector<32x8xf32>, vector<32x8xf32>, vector<32x32xf32> -> vector<32x32xf32>
    %cst_130 = arith.constant 0.353553385 : f32
    %327 = vector.broadcast %cst_130 : f32 to vector<32x32xf32>
    %328 = arith.mulf %326, %327 : vector<32x32xf32>
    %329 = arith.addf %328, %65 : vector<32x32xf32>
    %cst_131 = arith.constant dense<0xFF800000> : vector<32xf32>
    %330 = vector.multi_reduction <maximumf>, %329, %cst_131 [1] : vector<32x32xf32> to vector<32xf32>
    %331 = vector.shape_cast %330 : vector<32xf32> to vector<32x1xf32>
    %332 = vector.broadcast %331 : vector<32x1xf32> to vector<32x32xf32>
    %333 = arith.subf %329, %332 : vector<32x32xf32>
    %334 = math.exp %333 : vector<32x32xf32>
    %cst_132 = arith.constant dense<0.000000e+00> : vector<32xf32>
    %335 = vector.multi_reduction <add>, %334, %cst_132 [1] : vector<32x32xf32> to vector<32xf32>
    %336 = vector.shape_cast %335 : vector<32xf32> to vector<32x1xf32>
    %337 = vector.broadcast %336 : vector<32x1xf32> to vector<32x32xf32>
    %338 = arith.divf %334, %337 : vector<32x32xf32>
    %cst_133 = arith.constant dense<0.000000e+00> : vector<32x8xf32>
    %339 = tpu.matmul %338, %325, %cst_133 {dimension_numbers = #tpu.dot_dimension_numbers<[1], [0], [0], [1], [0, 0, 1, 1], [], []>} : vector<32x32xf32>, vector<32x8xf32>, vector<32x8xf32> -> vector<32x8xf32>
    %340 = vector.extract_strided_slice %305 {offsets = [0, 16], sizes = [32, 8], strides = [1, 1]} : vector<32x96xf32> to vector<32x8xf32>
    %341 = vector.extract_strided_slice %305 {offsets = [0, 48], sizes = [32, 8], strides = [1, 1]} : vector<32x96xf32> to vector<32x8xf32>
    %342 = vector.extract_strided_slice %305 {offsets = [0, 80], sizes = [32, 8], strides = [1, 1]} : vector<32x96xf32> to vector<32x8xf32>
    %cst_134 = arith.constant dense<0.000000e+00> : vector<32x32xf32>
    %343 = tpu.matmul %340, %341, %cst_134 {dimension_numbers = #tpu.dot_dimension_numbers<[1], [1], [0], [0], [0, 0, 1, 0], [], []>} : vector<32x8xf32>, vector<32x8xf32>, vector<32x32xf32> -> vector<32x32xf32>
    %cst_135 = arith.constant 0.353553385 : f32
    %344 = vector.broadcast %cst_135 : f32 to vector<32x32xf32>
    %345 = arith.mulf %343, %344 : vector<32x32xf32>
    %346 = arith.addf %345, %65 : vector<32x32xf32>
    %cst_136 = arith.constant dense<0xFF800000> : vector<32xf32>
    %347 = vector.multi_reduction <maximumf>, %346, %cst_136 [1] : vector<32x32xf32> to vector<32xf32>
    %348 = vector.shape_cast %347 : vector<32xf32> to vector<32x1xf32>
    %349 = vector.broadcast %348 : vector<32x1xf32> to vector<32x32xf32>
    %350 = arith.subf %346, %349 : vector<32x32xf32>
    %351 = math.exp %350 : vector<32x32xf32>
    %cst_137 = arith.constant dense<0.000000e+00> : vector<32xf32>
    %352 = vector.multi_reduction <add>, %351, %cst_137 [1] : vector<32x32xf32> to vector<32xf32>
    %353 = vector.shape_cast %352 : vector<32xf32> to vector<32x1xf32>
    %354 = vector.broadcast %353 : vector<32x1xf32> to vector<32x32xf32>
    %355 = arith.divf %351, %354 : vector<32x32xf32>
    %cst_138 = arith.constant dense<0.000000e+00> : vector<32x8xf32>
    %356 = tpu.matmul %355, %342, %cst_138 {dimension_numbers = #tpu.dot_dimension_numbers<[1], [0], [0], [1], [0, 0, 1, 1], [], []>} : vector<32x32xf32>, vector<32x8xf32>, vector<32x8xf32> -> vector<32x8xf32>
    %357 = vector.extract_strided_slice %305 {offsets = [0, 24], sizes = [32, 8], strides = [1, 1]} : vector<32x96xf32> to vector<32x8xf32>
    %358 = vector.extract_strided_slice %305 {offsets = [0, 56], sizes = [32, 8], strides = [1, 1]} : vector<32x96xf32> to vector<32x8xf32>
    %359 = vector.extract_strided_slice %305 {offsets = [0, 88], sizes = [32, 8], strides = [1, 1]} : vector<32x96xf32> to vector<32x8xf32>
    %cst_139 = arith.constant dense<0.000000e+00> : vector<32x32xf32>
    %360 = tpu.matmul %357, %358, %cst_139 {dimension_numbers = #tpu.dot_dimension_numbers<[1], [1], [0], [0], [0, 0, 1, 0], [], []>} : vector<32x8xf32>, vector<32x8xf32>, vector<32x32xf32> -> vector<32x32xf32>
    %cst_140 = arith.constant 0.353553385 : f32
    %361 = vector.broadcast %cst_140 : f32 to vector<32x32xf32>
    %362 = arith.mulf %360, %361 : vector<32x32xf32>
    %363 = arith.addf %362, %65 : vector<32x32xf32>
    %cst_141 = arith.constant dense<0xFF800000> : vector<32xf32>
    %364 = vector.multi_reduction <maximumf>, %363, %cst_141 [1] : vector<32x32xf32> to vector<32xf32>
    %365 = vector.shape_cast %364 : vector<32xf32> to vector<32x1xf32>
    %366 = vector.broadcast %365 : vector<32x1xf32> to vector<32x32xf32>
    %367 = arith.subf %363, %366 : vector<32x32xf32>
    %368 = math.exp %367 : vector<32x32xf32>
    %cst_142 = arith.constant dense<0.000000e+00> : vector<32xf32>
    %369 = vector.multi_reduction <add>, %368, %cst_142 [1] : vector<32x32xf32> to vector<32xf32>
    %370 = vector.shape_cast %369 : vector<32xf32> to vector<32x1xf32>
    %371 = vector.broadcast %370 : vector<32x1xf32> to vector<32x32xf32>
    %372 = arith.divf %368, %371 : vector<32x32xf32>
    %cst_143 = arith.constant dense<0.000000e+00> : vector<32x8xf32>
    %373 = tpu.matmul %372, %359, %cst_143 {dimension_numbers = #tpu.dot_dimension_numbers<[1], [0], [0], [1], [0, 0, 1, 1], [], []>} : vector<32x32xf32>, vector<32x8xf32>, vector<32x8xf32> -> vector<32x8xf32>
    %374 = tpu.concatenate %322, %339, %356, %373 in 1 : vector<32x8xf32>, vector<32x8xf32>, vector<32x8xf32>, vector<32x8xf32> -> vector<32x32xf32>
    %cst_144 = arith.constant dense<0.000000e+00> : vector<32x32xf32>
    %375 = tpu.matmul %374, %303, %cst_144 {dimension_numbers = #tpu.dot_dimension_numbers<[1], [0], [0], [1], [0, 0, 1, 1], [], []>} : vector<32x32xf32>, vector<32x32xf32>, vector<32x32xf32> -> vector<32x32xf32>
    %376 = vector.broadcast %304 : vector<1x32xf32> to vector<32x32xf32>
    %377 = arith.addf %375, %376 : vector<32x32xf32>
    %378 = arith.addf %143, %299 : vector<16x32xf32>
    %379 = arith.addf %221, %377 : vector<32x32xf32>
    %c2 = arith.constant 2 : index
    %c0_145 = arith.constant 0 : index
    %c0_146 = arith.constant 0 : index
    %c0_147 = arith.constant 0 : index
    %380 = vector.load %arg5[%c2, %c0_145, %c0_146, %c0_147] : memref<3x2x32x96xf32, #tpu.memory_space<vmem>>, vector<1x1x32x96xf32>
    %381 = vector.shape_cast %380 : vector<1x1x32x96xf32> to vector<32x96xf32>
    %c2_148 = arith.constant 2 : index
    %c0_149 = arith.constant 0 : index
    %c0_150 = arith.constant 0 : index
    %c0_151 = arith.constant 0 : index
    %382 = vector.load %arg6[%c2_148, %c0_149, %c0_150, %c0_151] : memref<3x2x32x32xf32, #tpu.memory_space<vmem>>, vector<1x1x32x32xf32>
    %383 = vector.shape_cast %382 : vector<1x1x32x32xf32> to vector<32x32xf32>
    %384 = vector.extract_strided_slice %0 {offsets = [10, 0], sizes = [1, 32], strides = [1, 1]} : vector<16x32xf32> to vector<1x32xf32>
    %cst_152 = arith.constant dense<0.000000e+00> : vector<16x96xf32>
    %385 = tpu.matmul %378, %381, %cst_152 {dimension_numbers = #tpu.dot_dimension_numbers<[1], [0], [0], [1], [0, 0, 1, 1], [], []>} : vector<16x32xf32>, vector<32x96xf32>, vector<16x96xf32> -> vector<16x96xf32>
    %386 = vector.extract_strided_slice %385 {offsets = [0, 0], sizes = [16, 8], strides = [1, 1]} : vector<16x96xf32> to vector<16x8xf32>
    %387 = vector.extract_strided_slice %385 {offsets = [0, 32], sizes = [16, 8], strides = [1, 1]} : vector<16x96xf32> to vector<16x8xf32>
    %388 = vector.extract_strided_slice %385 {offsets = [0, 64], sizes = [16, 8], strides = [1, 1]} : vector<16x96xf32> to vector<16x8xf32>
    %cst_153 = arith.constant dense<0.000000e+00> : vector<16x16xf32>
    %389 = tpu.matmul %386, %387, %cst_153 {dimension_numbers = #tpu.dot_dimension_numbers<[1], [1], [0], [0], [0, 0, 1, 0], [], []>} : vector<16x8xf32>, vector<16x8xf32>, vector<16x16xf32> -> vector<16x16xf32>
    %cst_154 = arith.constant 0.353553385 : f32
    %390 = vector.broadcast %cst_154 : f32 to vector<16x16xf32>
    %391 = arith.mulf %389, %390 : vector<16x16xf32>
    %392 = arith.addf %391, %58 : vector<16x16xf32>
    %cst_155 = arith.constant dense<0xFF800000> : vector<16xf32>
    %393 = vector.multi_reduction <maximumf>, %392, %cst_155 [1] : vector<16x16xf32> to vector<16xf32>
    %394 = vector.shape_cast %393 : vector<16xf32> to vector<16x1xf32>
    %395 = vector.broadcast %394 : vector<16x1xf32> to vector<16x16xf32>
    %396 = arith.subf %392, %395 : vector<16x16xf32>
    %397 = math.exp %396 : vector<16x16xf32>
    %cst_156 = arith.constant dense<0.000000e+00> : vector<16xf32>
    %398 = vector.multi_reduction <add>, %397, %cst_156 [1] : vector<16x16xf32> to vector<16xf32>
    %399 = vector.shape_cast %398 : vector<16xf32> to vector<16x1xf32>
    %400 = vector.broadcast %399 : vector<16x1xf32> to vector<16x16xf32>
    %401 = arith.divf %397, %400 : vector<16x16xf32>
    %cst_157 = arith.constant dense<0.000000e+00> : vector<16x8xf32>
    %402 = tpu.matmul %401, %388, %cst_157 {dimension_numbers = #tpu.dot_dimension_numbers<[1], [0], [0], [1], [0, 0, 1, 1], [], []>} : vector<16x16xf32>, vector<16x8xf32>, vector<16x8xf32> -> vector<16x8xf32>
    %403 = vector.extract_strided_slice %385 {offsets = [0, 8], sizes = [16, 8], strides = [1, 1]} : vector<16x96xf32> to vector<16x8xf32>
    %404 = vector.extract_strided_slice %385 {offsets = [0, 40], sizes = [16, 8], strides = [1, 1]} : vector<16x96xf32> to vector<16x8xf32>
    %405 = vector.extract_strided_slice %385 {offsets = [0, 72], sizes = [16, 8], strides = [1, 1]} : vector<16x96xf32> to vector<16x8xf32>
    %cst_158 = arith.constant dense<0.000000e+00> : vector<16x16xf32>
    %406 = tpu.matmul %403, %404, %cst_158 {dimension_numbers = #tpu.dot_dimension_numbers<[1], [1], [0], [0], [0, 0, 1, 0], [], []>} : vector<16x8xf32>, vector<16x8xf32>, vector<16x16xf32> -> vector<16x16xf32>
    %cst_159 = arith.constant 0.353553385 : f32
    %407 = vector.broadcast %cst_159 : f32 to vector<16x16xf32>
    %408 = arith.mulf %406, %407 : vector<16x16xf32>
    %409 = arith.addf %408, %58 : vector<16x16xf32>
    %cst_160 = arith.constant dense<0xFF800000> : vector<16xf32>
    %410 = vector.multi_reduction <maximumf>, %409, %cst_160 [1] : vector<16x16xf32> to vector<16xf32>
    %411 = vector.shape_cast %410 : vector<16xf32> to vector<16x1xf32>
    %412 = vector.broadcast %411 : vector<16x1xf32> to vector<16x16xf32>
    %413 = arith.subf %409, %412 : vector<16x16xf32>
    %414 = math.exp %413 : vector<16x16xf32>
    %cst_161 = arith.constant dense<0.000000e+00> : vector<16xf32>
    %415 = vector.multi_reduction <add>, %414, %cst_161 [1] : vector<16x16xf32> to vector<16xf32>
    %416 = vector.shape_cast %415 : vector<16xf32> to vector<16x1xf32>
    %417 = vector.broadcast %416 : vector<16x1xf32> to vector<16x16xf32>
    %418 = arith.divf %414, %417 : vector<16x16xf32>
    %cst_162 = arith.constant dense<0.000000e+00> : vector<16x8xf32>
    %419 = tpu.matmul %418, %405, %cst_162 {dimension_numbers = #tpu.dot_dimension_numbers<[1], [0], [0], [1], [0, 0, 1, 1], [], []>} : vector<16x16xf32>, vector<16x8xf32>, vector<16x8xf32> -> vector<16x8xf32>
    %420 = vector.extract_strided_slice %385 {offsets = [0, 16], sizes = [16, 8], strides = [1, 1]} : vector<16x96xf32> to vector<16x8xf32>
    %421 = vector.extract_strided_slice %385 {offsets = [0, 48], sizes = [16, 8], strides = [1, 1]} : vector<16x96xf32> to vector<16x8xf32>
    %422 = vector.extract_strided_slice %385 {offsets = [0, 80], sizes = [16, 8], strides = [1, 1]} : vector<16x96xf32> to vector<16x8xf32>
    %cst_163 = arith.constant dense<0.000000e+00> : vector<16x16xf32>
    %423 = tpu.matmul %420, %421, %cst_163 {dimension_numbers = #tpu.dot_dimension_numbers<[1], [1], [0], [0], [0, 0, 1, 0], [], []>} : vector<16x8xf32>, vector<16x8xf32>, vector<16x16xf32> -> vector<16x16xf32>
    %cst_164 = arith.constant 0.353553385 : f32
    %424 = vector.broadcast %cst_164 : f32 to vector<16x16xf32>
    %425 = arith.mulf %423, %424 : vector<16x16xf32>
    %426 = arith.addf %425, %58 : vector<16x16xf32>
    %cst_165 = arith.constant dense<0xFF800000> : vector<16xf32>
    %427 = vector.multi_reduction <maximumf>, %426, %cst_165 [1] : vector<16x16xf32> to vector<16xf32>
    %428 = vector.shape_cast %427 : vector<16xf32> to vector<16x1xf32>
    %429 = vector.broadcast %428 : vector<16x1xf32> to vector<16x16xf32>
    %430 = arith.subf %426, %429 : vector<16x16xf32>
    %431 = math.exp %430 : vector<16x16xf32>
    %cst_166 = arith.constant dense<0.000000e+00> : vector<16xf32>
    %432 = vector.multi_reduction <add>, %431, %cst_166 [1] : vector<16x16xf32> to vector<16xf32>
    %433 = vector.shape_cast %432 : vector<16xf32> to vector<16x1xf32>
    %434 = vector.broadcast %433 : vector<16x1xf32> to vector<16x16xf32>
    %435 = arith.divf %431, %434 : vector<16x16xf32>
    %cst_167 = arith.constant dense<0.000000e+00> : vector<16x8xf32>
    %436 = tpu.matmul %435, %422, %cst_167 {dimension_numbers = #tpu.dot_dimension_numbers<[1], [0], [0], [1], [0, 0, 1, 1], [], []>} : vector<16x16xf32>, vector<16x8xf32>, vector<16x8xf32> -> vector<16x8xf32>
    %437 = vector.extract_strided_slice %385 {offsets = [0, 24], sizes = [16, 8], strides = [1, 1]} : vector<16x96xf32> to vector<16x8xf32>
    %438 = vector.extract_strided_slice %385 {offsets = [0, 56], sizes = [16, 8], strides = [1, 1]} : vector<16x96xf32> to vector<16x8xf32>
    %439 = vector.extract_strided_slice %385 {offsets = [0, 88], sizes = [16, 8], strides = [1, 1]} : vector<16x96xf32> to vector<16x8xf32>
    %cst_168 = arith.constant dense<0.000000e+00> : vector<16x16xf32>
    %440 = tpu.matmul %437, %438, %cst_168 {dimension_numbers = #tpu.dot_dimension_numbers<[1], [1], [0], [0], [0, 0, 1, 0], [], []>} : vector<16x8xf32>, vector<16x8xf32>, vector<16x16xf32> -> vector<16x16xf32>
    %cst_169 = arith.constant 0.353553385 : f32
    %441 = vector.broadcast %cst_169 : f32 to vector<16x16xf32>
    %442 = arith.mulf %440, %441 : vector<16x16xf32>
    %443 = arith.addf %442, %58 : vector<16x16xf32>
    %cst_170 = arith.constant dense<0xFF800000> : vector<16xf32>
    %444 = vector.multi_reduction <maximumf>, %443, %cst_170 [1] : vector<16x16xf32> to vector<16xf32>
    %445 = vector.shape_cast %444 : vector<16xf32> to vector<16x1xf32>
    %446 = vector.broadcast %445 : vector<16x1xf32> to vector<16x16xf32>
    %447 = arith.subf %443, %446 : vector<16x16xf32>
    %448 = math.exp %447 : vector<16x16xf32>
    %cst_171 = arith.constant dense<0.000000e+00> : vector<16xf32>
    %449 = vector.multi_reduction <add>, %448, %cst_171 [1] : vector<16x16xf32> to vector<16xf32>
    %450 = vector.shape_cast %449 : vector<16xf32> to vector<16x1xf32>
    %451 = vector.broadcast %450 : vector<16x1xf32> to vector<16x16xf32>
    %452 = arith.divf %448, %451 : vector<16x16xf32>
    %cst_172 = arith.constant dense<0.000000e+00> : vector<16x8xf32>
    %453 = tpu.matmul %452, %439, %cst_172 {dimension_numbers = #tpu.dot_dimension_numbers<[1], [0], [0], [1], [0, 0, 1, 1], [], []>} : vector<16x16xf32>, vector<16x8xf32>, vector<16x8xf32> -> vector<16x8xf32>
    %454 = tpu.concatenate %402, %419, %436, %453 in 1 : vector<16x8xf32>, vector<16x8xf32>, vector<16x8xf32>, vector<16x8xf32> -> vector<16x32xf32>
    %cst_173 = arith.constant dense<0.000000e+00> : vector<16x32xf32>
    %455 = tpu.matmul %454, %383, %cst_173 {dimension_numbers = #tpu.dot_dimension_numbers<[1], [0], [0], [1], [0, 0, 1, 1], [], []>} : vector<16x32xf32>, vector<32x32xf32>, vector<16x32xf32> -> vector<16x32xf32>
    %456 = vector.broadcast %384 : vector<1x32xf32> to vector<16x32xf32>
    %457 = arith.addf %455, %456 : vector<16x32xf32>
    %c2_174 = arith.constant 2 : index
    %c1_175 = arith.constant 1 : index
    %c0_176 = arith.constant 0 : index
    %c0_177 = arith.constant 0 : index
    %458 = vector.load %arg5[%c2_174, %c1_175, %c0_176, %c0_177] : memref<3x2x32x96xf32, #tpu.memory_space<vmem>>, vector<1x1x32x96xf32>
    %459 = vector.shape_cast %458 : vector<1x1x32x96xf32> to vector<32x96xf32>
    %c2_178 = arith.constant 2 : index
    %c1_179 = arith.constant 1 : index
    %c0_180 = arith.constant 0 : index
    %c0_181 = arith.constant 0 : index
    %460 = vector.load %arg6[%c2_178, %c1_179, %c0_180, %c0_181] : memref<3x2x32x32xf32, #tpu.memory_space<vmem>>, vector<1x1x32x32xf32>
    %461 = vector.shape_cast %460 : vector<1x1x32x32xf32> to vector<32x32xf32>
    %462 = vector.extract_strided_slice %0 {offsets = [13, 0], sizes = [1, 32], strides = [1, 1]} : vector<16x32xf32> to vector<1x32xf32>
    %cst_182 = arith.constant dense<0.000000e+00> : vector<32x96xf32>
    %463 = tpu.matmul %379, %459, %cst_182 {dimension_numbers = #tpu.dot_dimension_numbers<[1], [0], [0], [1], [0, 0, 1, 1], [], []>} : vector<32x32xf32>, vector<32x96xf32>, vector<32x96xf32> -> vector<32x96xf32>
    %464 = vector.extract_strided_slice %463 {offsets = [0, 0], sizes = [32, 8], strides = [1, 1]} : vector<32x96xf32> to vector<32x8xf32>
    %465 = vector.extract_strided_slice %463 {offsets = [0, 32], sizes = [32, 8], strides = [1, 1]} : vector<32x96xf32> to vector<32x8xf32>
    %466 = vector.extract_strided_slice %463 {offsets = [0, 64], sizes = [32, 8], strides = [1, 1]} : vector<32x96xf32> to vector<32x8xf32>
    %cst_183 = arith.constant dense<0.000000e+00> : vector<32x32xf32>
    %467 = tpu.matmul %464, %465, %cst_183 {dimension_numbers = #tpu.dot_dimension_numbers<[1], [1], [0], [0], [0, 0, 1, 0], [], []>} : vector<32x8xf32>, vector<32x8xf32>, vector<32x32xf32> -> vector<32x32xf32>
    %cst_184 = arith.constant 0.353553385 : f32
    %468 = vector.broadcast %cst_184 : f32 to vector<32x32xf32>
    %469 = arith.mulf %467, %468 : vector<32x32xf32>
    %470 = arith.addf %469, %65 : vector<32x32xf32>
    %cst_185 = arith.constant dense<0xFF800000> : vector<32xf32>
    %471 = vector.multi_reduction <maximumf>, %470, %cst_185 [1] : vector<32x32xf32> to vector<32xf32>
    %472 = vector.shape_cast %471 : vector<32xf32> to vector<32x1xf32>
    %473 = vector.broadcast %472 : vector<32x1xf32> to vector<32x32xf32>
    %474 = arith.subf %470, %473 : vector<32x32xf32>
    %475 = math.exp %474 : vector<32x32xf32>
    %cst_186 = arith.constant dense<0.000000e+00> : vector<32xf32>
    %476 = vector.multi_reduction <add>, %475, %cst_186 [1] : vector<32x32xf32> to vector<32xf32>
    %477 = vector.shape_cast %476 : vector<32xf32> to vector<32x1xf32>
    %478 = vector.broadcast %477 : vector<32x1xf32> to vector<32x32xf32>
    %479 = arith.divf %475, %478 : vector<32x32xf32>
    %cst_187 = arith.constant dense<0.000000e+00> : vector<32x8xf32>
    %480 = tpu.matmul %479, %466, %cst_187 {dimension_numbers = #tpu.dot_dimension_numbers<[1], [0], [0], [1], [0, 0, 1, 1], [], []>} : vector<32x32xf32>, vector<32x8xf32>, vector<32x8xf32> -> vector<32x8xf32>
    %481 = vector.extract_strided_slice %463 {offsets = [0, 8], sizes = [32, 8], strides = [1, 1]} : vector<32x96xf32> to vector<32x8xf32>
    %482 = vector.extract_strided_slice %463 {offsets = [0, 40], sizes = [32, 8], strides = [1, 1]} : vector<32x96xf32> to vector<32x8xf32>
    %483 = vector.extract_strided_slice %463 {offsets = [0, 72], sizes = [32, 8], strides = [1, 1]} : vector<32x96xf32> to vector<32x8xf32>
    %cst_188 = arith.constant dense<0.000000e+00> : vector<32x32xf32>
    %484 = tpu.matmul %481, %482, %cst_188 {dimension_numbers = #tpu.dot_dimension_numbers<[1], [1], [0], [0], [0, 0, 1, 0], [], []>} : vector<32x8xf32>, vector<32x8xf32>, vector<32x32xf32> -> vector<32x32xf32>
    %cst_189 = arith.constant 0.353553385 : f32
    %485 = vector.broadcast %cst_189 : f32 to vector<32x32xf32>
    %486 = arith.mulf %484, %485 : vector<32x32xf32>
    %487 = arith.addf %486, %65 : vector<32x32xf32>
    %cst_190 = arith.constant dense<0xFF800000> : vector<32xf32>
    %488 = vector.multi_reduction <maximumf>, %487, %cst_190 [1] : vector<32x32xf32> to vector<32xf32>
    %489 = vector.shape_cast %488 : vector<32xf32> to vector<32x1xf32>
    %490 = vector.broadcast %489 : vector<32x1xf32> to vector<32x32xf32>
    %491 = arith.subf %487, %490 : vector<32x32xf32>
    %492 = math.exp %491 : vector<32x32xf32>
    %cst_191 = arith.constant dense<0.000000e+00> : vector<32xf32>
    %493 = vector.multi_reduction <add>, %492, %cst_191 [1] : vector<32x32xf32> to vector<32xf32>
    %494 = vector.shape_cast %493 : vector<32xf32> to vector<32x1xf32>
    %495 = vector.broadcast %494 : vector<32x1xf32> to vector<32x32xf32>
    %496 = arith.divf %492, %495 : vector<32x32xf32>
    %cst_192 = arith.constant dense<0.000000e+00> : vector<32x8xf32>
    %497 = tpu.matmul %496, %483, %cst_192 {dimension_numbers = #tpu.dot_dimension_numbers<[1], [0], [0], [1], [0, 0, 1, 1], [], []>} : vector<32x32xf32>, vector<32x8xf32>, vector<32x8xf32> -> vector<32x8xf32>
    %498 = vector.extract_strided_slice %463 {offsets = [0, 16], sizes = [32, 8], strides = [1, 1]} : vector<32x96xf32> to vector<32x8xf32>
    %499 = vector.extract_strided_slice %463 {offsets = [0, 48], sizes = [32, 8], strides = [1, 1]} : vector<32x96xf32> to vector<32x8xf32>
    %500 = vector.extract_strided_slice %463 {offsets = [0, 80], sizes = [32, 8], strides = [1, 1]} : vector<32x96xf32> to vector<32x8xf32>
    %cst_193 = arith.constant dense<0.000000e+00> : vector<32x32xf32>
    %501 = tpu.matmul %498, %499, %cst_193 {dimension_numbers = #tpu.dot_dimension_numbers<[1], [1], [0], [0], [0, 0, 1, 0], [], []>} : vector<32x8xf32>, vector<32x8xf32>, vector<32x32xf32> -> vector<32x32xf32>
    %cst_194 = arith.constant 0.353553385 : f32
    %502 = vector.broadcast %cst_194 : f32 to vector<32x32xf32>
    %503 = arith.mulf %501, %502 : vector<32x32xf32>
    %504 = arith.addf %503, %65 : vector<32x32xf32>
    %cst_195 = arith.constant dense<0xFF800000> : vector<32xf32>
    %505 = vector.multi_reduction <maximumf>, %504, %cst_195 [1] : vector<32x32xf32> to vector<32xf32>
    %506 = vector.shape_cast %505 : vector<32xf32> to vector<32x1xf32>
    %507 = vector.broadcast %506 : vector<32x1xf32> to vector<32x32xf32>
    %508 = arith.subf %504, %507 : vector<32x32xf32>
    %509 = math.exp %508 : vector<32x32xf32>
    %cst_196 = arith.constant dense<0.000000e+00> : vector<32xf32>
    %510 = vector.multi_reduction <add>, %509, %cst_196 [1] : vector<32x32xf32> to vector<32xf32>
    %511 = vector.shape_cast %510 : vector<32xf32> to vector<32x1xf32>
    %512 = vector.broadcast %511 : vector<32x1xf32> to vector<32x32xf32>
    %513 = arith.divf %509, %512 : vector<32x32xf32>
    %cst_197 = arith.constant dense<0.000000e+00> : vector<32x8xf32>
    %514 = tpu.matmul %513, %500, %cst_197 {dimension_numbers = #tpu.dot_dimension_numbers<[1], [0], [0], [1], [0, 0, 1, 1], [], []>} : vector<32x32xf32>, vector<32x8xf32>, vector<32x8xf32> -> vector<32x8xf32>
    %515 = vector.extract_strided_slice %463 {offsets = [0, 24], sizes = [32, 8], strides = [1, 1]} : vector<32x96xf32> to vector<32x8xf32>
    %516 = vector.extract_strided_slice %463 {offsets = [0, 56], sizes = [32, 8], strides = [1, 1]} : vector<32x96xf32> to vector<32x8xf32>
    %517 = vector.extract_strided_slice %463 {offsets = [0, 88], sizes = [32, 8], strides = [1, 1]} : vector<32x96xf32> to vector<32x8xf32>
    %cst_198 = arith.constant dense<0.000000e+00> : vector<32x32xf32>
    %518 = tpu.matmul %515, %516, %cst_198 {dimension_numbers = #tpu.dot_dimension_numbers<[1], [1], [0], [0], [0, 0, 1, 0], [], []>} : vector<32x8xf32>, vector<32x8xf32>, vector<32x32xf32> -> vector<32x32xf32>
    %cst_199 = arith.constant 0.353553385 : f32
    %519 = vector.broadcast %cst_199 : f32 to vector<32x32xf32>
    %520 = arith.mulf %518, %519 : vector<32x32xf32>
    %521 = arith.addf %520, %65 : vector<32x32xf32>
    %cst_200 = arith.constant dense<0xFF800000> : vector<32xf32>
    %522 = vector.multi_reduction <maximumf>, %521, %cst_200 [1] : vector<32x32xf32> to vector<32xf32>
    %523 = vector.shape_cast %522 : vector<32xf32> to vector<32x1xf32>
    %524 = vector.broadcast %523 : vector<32x1xf32> to vector<32x32xf32>
    %525 = arith.subf %521, %524 : vector<32x32xf32>
    %526 = math.exp %525 : vector<32x32xf32>
    %cst_201 = arith.constant dense<0.000000e+00> : vector<32xf32>
    %527 = vector.multi_reduction <add>, %526, %cst_201 [1] : vector<32x32xf32> to vector<32xf32>
    %528 = vector.shape_cast %527 : vector<32xf32> to vector<32x1xf32>
    %529 = vector.broadcast %528 : vector<32x1xf32> to vector<32x32xf32>
    %530 = arith.divf %526, %529 : vector<32x32xf32>
    %cst_202 = arith.constant dense<0.000000e+00> : vector<32x8xf32>
    %531 = tpu.matmul %530, %517, %cst_202 {dimension_numbers = #tpu.dot_dimension_numbers<[1], [0], [0], [1], [0, 0, 1, 1], [], []>} : vector<32x32xf32>, vector<32x8xf32>, vector<32x8xf32> -> vector<32x8xf32>
    %532 = tpu.concatenate %480, %497, %514, %531 in 1 : vector<32x8xf32>, vector<32x8xf32>, vector<32x8xf32>, vector<32x8xf32> -> vector<32x32xf32>
    %cst_203 = arith.constant dense<0.000000e+00> : vector<32x32xf32>
    %533 = tpu.matmul %532, %461, %cst_203 {dimension_numbers = #tpu.dot_dimension_numbers<[1], [0], [0], [1], [0, 0, 1, 1], [], []>} : vector<32x32xf32>, vector<32x32xf32>, vector<32x32xf32> -> vector<32x32xf32>
    %534 = vector.broadcast %462 : vector<1x32xf32> to vector<32x32xf32>
    %535 = arith.addf %533, %534 : vector<32x32xf32>
    %536 = arith.addf %378, %457 : vector<16x32xf32>
    %537 = arith.addf %379, %535 : vector<32x32xf32>
    %cst_204 = arith.constant dense<0.000000e+00> : vector<16xf32>
    %538 = vector.multi_reduction <add>, %536, %cst_204 [1] : vector<16x32xf32> to vector<16xf32>
    %539 = vector.shape_cast %538 : vector<16xf32> to vector<16x1xf32>
    %cst_205 = arith.constant 3.200000e+01 : f32
    %540 = vector.broadcast %cst_205 : f32 to vector<16x1xf32>
    %541 = arith.divf %539, %540 : vector<16x1xf32>
    %542 = vector.broadcast %541 : vector<16x1xf32> to vector<16x32xf32>
    %543 = arith.subf %536, %542 : vector<16x32xf32>
    %544 = vector.broadcast %541 : vector<16x1xf32> to vector<16x32xf32>
    %545 = arith.subf %536, %544 : vector<16x32xf32>
    %546 = arith.mulf %543, %545 : vector<16x32xf32>
    %cst_206 = arith.constant dense<0.000000e+00> : vector<16xf32>
    %547 = vector.multi_reduction <add>, %546, %cst_206 [1] : vector<16x32xf32> to vector<16xf32>
    %548 = vector.shape_cast %547 : vector<16xf32> to vector<16x1xf32>
    %cst_207 = arith.constant 3.200000e+01 : f32
    %549 = vector.broadcast %cst_207 : f32 to vector<16x1xf32>
    %550 = arith.divf %548, %549 : vector<16x1xf32>
    %551 = vector.broadcast %541 : vector<16x1xf32> to vector<16x32xf32>
    %552 = arith.subf %536, %551 : vector<16x32xf32>
    %cst_208 = arith.constant 9.99999974E-6 : f32
    %553 = vector.broadcast %cst_208 : f32 to vector<16x1xf32>
    %554 = arith.addf %550, %553 : vector<16x1xf32>
    %555 = math.rsqrt %554 : vector<16x1xf32>
    %556 = vector.broadcast %555 : vector<16x1xf32> to vector<16x32xf32>
    %557 = arith.mulf %552, %556 : vector<16x32xf32>
    %558 = vector.extract_strided_slice %0 {offsets = [5, 0], sizes = [1, 32], strides = [1, 1]} : vector<16x32xf32> to vector<1x32xf32>
    %559 = vector.broadcast %558 : vector<1x32xf32> to vector<16x32xf32>
    %560 = arith.mulf %557, %559 : vector<16x32xf32>
    %561 = vector.extract_strided_slice %0 {offsets = [6, 0], sizes = [1, 32], strides = [1, 1]} : vector<16x32xf32> to vector<1x32xf32>
    %562 = vector.broadcast %561 : vector<1x32xf32> to vector<16x32xf32>
    %563 = arith.addf %560, %562 : vector<16x32xf32>
    %c0_209 = arith.constant 0 : index
    %c0_210 = arith.constant 0 : index
    %c0_211 = arith.constant 0 : index
    %564 = vector.load %arg8[%c0_209, %c0_210, %c0_211] : memref<1x48x32xf32, #tpu.memory_space<vmem>>, vector<1x16x32xf32>
    %565 = vector.shape_cast %564 : vector<1x16x32xf32> to vector<16x32xf32>
    %566 = vector.shape_cast %563 : vector<16x32xf32> to vector<1x16x32xf32>
    tpu.vector_store %arg8[%c0_209, %c0_210, %c0_211], %566 {strides = array<i32>} : memref<1x48x32xf32, #tpu.memory_space<vmem>>, vector<1x16x32xf32>,
    %cst_212 = arith.constant dense<0.000000e+00> : vector<32xf32>
    %567 = vector.multi_reduction <add>, %537, %cst_212 [1] : vector<32x32xf32> to vector<32xf32>
    %568 = vector.shape_cast %567 : vector<32xf32> to vector<32x1xf32>
    %cst_213 = arith.constant 3.200000e+01 : f32
    %569 = vector.broadcast %cst_213 : f32 to vector<32x1xf32>
    %570 = arith.divf %568, %569 : vector<32x1xf32>
    %571 = vector.broadcast %570 : vector<32x1xf32> to vector<32x32xf32>
    %572 = arith.subf %537, %571 : vector<32x32xf32>
    %573 = vector.broadcast %570 : vector<32x1xf32> to vector<32x32xf32>
    %574 = arith.subf %537, %573 : vector<32x32xf32>
    %575 = arith.mulf %572, %574 : vector<32x32xf32>
    %cst_214 = arith.constant dense<0.000000e+00> : vector<32xf32>
    %576 = vector.multi_reduction <add>, %575, %cst_214 [1] : vector<32x32xf32> to vector<32xf32>
    %577 = vector.shape_cast %576 : vector<32xf32> to vector<32x1xf32>
    %cst_215 = arith.constant 3.200000e+01 : f32
    %578 = vector.broadcast %cst_215 : f32 to vector<32x1xf32>
    %579 = arith.divf %577, %578 : vector<32x1xf32>
    %580 = vector.broadcast %570 : vector<32x1xf32> to vector<32x32xf32>
    %581 = arith.subf %537, %580 : vector<32x32xf32>
    %cst_216 = arith.constant 9.99999974E-6 : f32
    %582 = vector.broadcast %cst_216 : f32 to vector<32x1xf32>
    %583 = arith.addf %579, %582 : vector<32x1xf32>
    %584 = math.rsqrt %583 : vector<32x1xf32>
    %585 = vector.broadcast %584 : vector<32x1xf32> to vector<32x32xf32>
    %586 = arith.mulf %581, %585 : vector<32x32xf32>
    %587 = vector.extract_strided_slice %0 {offsets = [5, 0], sizes = [1, 32], strides = [1, 1]} : vector<16x32xf32> to vector<1x32xf32>
    %588 = vector.broadcast %587 : vector<1x32xf32> to vector<32x32xf32>
    %589 = arith.mulf %586, %588 : vector<32x32xf32>
    %590 = vector.extract_strided_slice %0 {offsets = [6, 0], sizes = [1, 32], strides = [1, 1]} : vector<16x32xf32> to vector<1x32xf32>
    %591 = vector.broadcast %590 : vector<1x32xf32> to vector<32x32xf32>
    %592 = arith.addf %589, %591 : vector<32x32xf32>
    %c0_217 = arith.constant 0 : index
    %c16 = arith.constant 16 : index
    %c0_218 = arith.constant 0 : index
    %593 = vector.load %arg8[%c0_217, %c16, %c0_218] : memref<1x48x32xf32, #tpu.memory_space<vmem>>, vector<1x32x32xf32>
    %594 = vector.shape_cast %593 : vector<1x32x32xf32> to vector<32x32xf32>
    %595 = vector.shape_cast %592 : vector<32x32xf32> to vector<1x32x32xf32>
    tpu.vector_store %arg8[%c0_217, %c16, %c0_218], %595 {strides = array<i32>} : memref<1x48x32xf32, #tpu.memory_space<vmem>>, vector<1x32x32xf32>,
    return
  }
  func.func @transform_0(%arg0: i32) -> (i32, i32, i32) {
    %c0_i32 = arith.constant 0 : i32
    %c0_i32_0 = arith.constant 0 : i32
    %c0_i32_1 = arith.constant 0 : i32
    return %arg0, %c0_i32, %c0_i32_0 : i32, i32, i32
  }
  func.func @transform_1(%arg0: i32) -> (i32, i32, i32) {
    %c0_i32 = arith.constant 0 : i32
    %c0_i32_0 = arith.constant 0 : i32
    %c0_i32_1 = arith.constant 0 : i32
    return %arg0, %c0_i32, %c0_i32_0 : i32, i32, i32
  }
  func.func @transform_2(%arg0: i32) -> (i32, i32, i32) {
    %c0_i32 = arith.constant 0 : i32
    %c0_i32_0 = arith.constant 0 : i32
    %c0_i32_1 = arith.constant 0 : i32
    return %arg0, %c0_i32, %c0_i32_0 : i32, i32, i32
  }
  func.func @transform_3(%arg0: i32) -> (i32, i32, i32) {
    %c0_i32 = arith.constant 0 : i32
    %c0_i32_0 = arith.constant 0 : i32
    %c0_i32_1 = arith.constant 0 : i32
    return %arg0, %c0_i32, %c0_i32_0 : i32, i32, i32
  }
  func.func @transform_4(%arg0: i32) -> (i32, i32, i32, i32) {
    %c0_i32 = arith.constant 0 : i32
    %c0_i32_0 = arith.constant 0 : i32
    %c0_i32_1 = arith.constant 0 : i32
    %c0_i32_2 = arith.constant 0 : i32
    %c0_i32_3 = arith.constant 0 : i32
    return %c0_i32, %c0_i32_0, %c0_i32_1, %c0_i32_2 : i32, i32, i32, i32
  }
  func.func @transform_5(%arg0: i32) -> (i32, i32, i32, i32) {
    %c0_i32 = arith.constant 0 : i32
    %c0_i32_0 = arith.constant 0 : i32
    %c0_i32_1 = arith.constant 0 : i32
    %c0_i32_2 = arith.constant 0 : i32
    %c0_i32_3 = arith.constant 0 : i32
    return %c0_i32, %c0_i32_0, %c0_i32_1, %c0_i32_2 : i32, i32, i32, i32
  }
  func.func @transform_6(%arg0: i32) -> (i32, i32) {
    %c0_i32 = arith.constant 0 : i32
    %c0_i32_0 = arith.constant 0 : i32
    %c0_i32_1 = arith.constant 0 : i32
    return %c0_i32, %c0_i32_0 : i32, i32
  }
  func.func @transform_7(%arg0: i32) -> (i32, i32, i32) {
    %c0_i32 = arith.constant 0 : i32
    %c0_i32_0 = arith.constant 0 : i32
    %c0_i32_1 = arith.constant 0 : i32
    return %arg0, %c0_i32, %c0_i32_0 : i32, i32, i32
  }
}

</mosaic_0001>

<bundles_post_ra>
// kernel: graph_encoder_forward.1
= control target key start
LH: loop header
LB: loop body
LE: loop exit
PB: predicated region body
PF: predicated region fallthrough
CT: control target
= control target key end

     0   :  { %12 = vsyncpa [#allocation3], 0  ;;  %s8850_s0 = inlined_call_operand.vmem [shape: f32[2,16,2], index: 0, kind: input, shape index: {}]   ;;  %s8851_s1 = inlined_call_operand.vmem [shape: f32[2,32,1], index: 1, kind: input, shape index: {}]   ;;  %s8852_s2 = inlined_call_operand.vmem [shape: f32[2,16,16], index: 2, kind: input, shape index: {}]   ;;  %s8853_s3 = inlined_call_operand.vmem [shape: f32[2,32,32], index: 3, kind: input, shape index: {}]   ;;  %s8854_s4 = inlined_call_operand.hbm [shape: f32[3,2,32,96], index: 4, kind: input, shape index: {}]   ;;  %s8855_s5 = inlined_call_operand.hbm [shape: f32[3,2,32,32], index: 5, kind: input, shape index: {}]   ;;  %s8856_s6 = inlined_call_operand.hbm [shape: f32[16,32], index: 6, kind: input, shape index: {}]   ;;  %s8857_s7 = inlined_call_operand.vmem [shape: f32[2,48,32], index: 7, kind: output, shape index: {}]  }
   0x1   :  { %13 = vsyncpa [#allocation5], 0  ;;  %s6704_s24 = smov 0  }
   0x2 LB: > { %s6710_s25 = sadd.s32 4294967295, %s6639_s24   ;;  %p5691_p0 = scmp.ge.s32.totalorder %s6639_s24, 1  ;;  %s6639_s24 = sphi %s6704_s24, %s19_s24  }
   0x3   : > { %p217_p1 = scmp.lt.s32.totalorder %s6639_s24, 3  ;;  %p5994_p2 = scmp.eq.s32.totalorder %s6710_s25, 0 }
   0x4   : > { %s242_s28 = sshll.u32 %s8855_s5, 4  ;;  %s228_s9 = sshll.u32 %s8854_s4, 4  ;;  %s243_s28 = int_to_ptr.hbm [resolvable:$true] %s242_s28  ;;  %s229_s9 = int_to_ptr.hbm [resolvable:$true] %s228_s9 }
   0x5   : > { %p6718_p3 = pnand %p5691_p0, %p217_p1  ;;  %s6641_s10 = smov [#allocation4]  }
   0x6   : > { %s244_s11 = sshll.u32 %s6641_s10, 4  ;;  %s6642_s12 = smov [#allocation2]   ;;  %s245_s11 = int_to_ptr.vmem [resolvable:$true] %s244_s11 }
   0x7   : > { %p5984_p4 = pneg %p6718_p3  ;;  %s230_s13 = sshll.u32 %s6642_s12, 4  ;;  %s231_s13 = int_to_ptr.vmem [resolvable:$true] %s230_s13 }
   0x8   : > { %s256_s16 = sshll.u32 %s8856_s6, 4  ;;  %s6643_s17 = smov 128   ;;  %s257_s16 = int_to_ptr.hbm [resolvable:$true] %s256_s16 }
   0x9   : > { %p5985_p5 = pnand %p5994_p2, %p5984_p4  ;;  %s6644_s18 = smov 8  }
   0xa   : > { %s6645_s19 = smov [#allocation6]   ;;  %306 = sbr.rel (%p6718_p3) target bundleno = 5477 (0x1565), region = 48 }
   0xb   : > { %5990 = dma.hbm_to_vmem [thread:$0]  (!%p5985_p5), %s243_s28, 3072, %s245_s11, [#allocation5], %s6643_s17, %s6643_s17, %s6644_s18  }
   0xc   : > { %5987 = dma.hbm_to_vmem [thread:$0]  (!%p5985_p5), %s229_s9, 3072, %s231_s13, [#allocation3], %s6643_s17, %s6643_s17, %s6644_s18  }
   0xd   : > { %s258_s20 = sshll.u32 %s6645_s19, 4  ;;  %s259_s20 = int_to_ptr.vmem [resolvable:$true] %s258_s20 }
   0xe   : > { %5993 = dma.hbm_to_vmem [thread:$0]  (!%p5985_p5), %s257_s16, 256, %s259_s20, [#allocation5], %s6643_s17, %s6643_s17, %s6644_s18  }
   0xf   : > { %6630 = dma.done.wait (%p5994_p2), [#allocation3], 3072  }
  0x10   : > { %6632 = vsyncadd (%p5994_p2), [#allocation3], 4294964224 }
  0x11   : > { %6634 = dma.done.wait (%p5994_p2), [#allocation5], 3328  }
  0x12   : > { %6636 = vsyncadd (%p5994_p2), [#allocation5], 4294963968  ;;  %p364_p6 = scmp.lt.s32.totalorder %s6710_s25, 1  ;;  %v6646_v0 = vmov 0   ;;  %v6647_v3 = vmov 1   ;;  %v531_v4 = vld [vmem:[#allocation2 + $0x18] sm:$0xff] }
  0x13   : > { %6033 = vset.pattern.permute.xlu1 %v6646_v0  ;;  %6031 = vset.pattern.permute.xlu0 %v6646_v0  ;;  %v530_v5 = vld [vmem:[#allocation2 + $0x10] sm:$0xff]  ;;  %v529_v6 = vld [vmem:[#allocation2 + $0x8] sm:$0xff]  ;;  %v528_v7 = vld [vmem:[#allocation2] sm:$0xff]  ;;  %vm536_vm0 = vcmask 261120   ;;  %s6648_s27 = smov 80   ;;  %s6649_s28 = smov 120  }
  0x14   : > { %s8872_s25 = smov (!%p364_p6, %s6710_s25), 1  ;;  %6035 = vset.pattern.permute.xlu2 %v6646_v0  ;;  %555 = vmatpush.msra.mxu0 %v531_v4  ;;  %v6752_v10 = vld [vmem:[#allocation6] sm:$0xff]  ;;  %s6650_s29 = smov 88   ;;  %vm572_vm1 = vcmask 64512   ;;  %v6655_v59 = vmov -1e+30  }
  0x15   : > { %s5963_s21 = sshll.u32 %s8872_s25, 4  ;;  %v407_v11 = vperm.slane %v6752_v10, 0  ;;  %v418_v12 = vperm.slane %v6752_v10, 1  ;;  %v423_v16 = vperm.slane %v6752_v10, 3  ;;  %s6651_s30 = smov 112   ;;  %vm608_vm3 = vcmask 130048  }
  0x16   : > { %s368_s26 = scalar_lea.vmem %s8850_s0, %s5963_s21  ;;  %556 = vmatpush.msra.mxu0 %v530_v5  ;;  %s6652_s8 = smov 96  }
  0x17   : > { %v392_v1 = vld [vmem:[%s368_s26 + $0x8] sm:$0xff]  ;;  %v391_v2 = vld [vmem:[%s368_s26] sm:$0xff]  ;;  %s6653_s9 = smov 72   ;;  %s6654_s10 = smov 104  }
  0x18   : > { %404 = vperm.xlu1 %6033, %v392_v1   ;;  %399 = vperm.xlu0 %6031, %v391_v2   ;;  %s378_s13 = scalar_lea.vmem %s8852_s2, %s5963_s21  ;;  %s6656_s14 = smov 48  }
  0x19   : > { %557 = vmatpush.msra.mxu0 %v529_v6  ;;  %v510_v58 = vld [vmem:[%s378_s13] sm:$0xff]  ;;  %v511_v5 = vld [vmem:[%s378_s13 + $0x8] sm:$0xff]  ;;  %s5964_s15 = sshll.u32 %s8872_s25, 5  ;;  %s6657_s19 = smov 64  }
  0x1a   : > { %vm512_vm2 = vcmp.gt.f32.partialorder %v510_v58, 0.0  ;;  %vm513_vm4 = vcmp.gt.f32.partialorder %v511_v5, 0.0  ;;  %s6856_s18 = scalar_lea.vmem %s8851_s1, %s5964_s15  ;;  %s6658_s20 = smov 40  }
  0x1b   : > { %558 = vmatpush.msra.mxu0 %v528_v7  ;;  %v6819_v60 = vsel %vm512_vm2, 0.0, %v6655_v59  ;;  %s6659_s21 = smov 56   ;;  %s6660_s22 = smov 16  }
  0x1c   : > { %s6661_s23 = smov 8   ;;  %s6662_s26 = smov 24  }
  0x1d   : > { %s7116_s13 = scalar_lea.vmem %s8853_s3, %s5964_s15 }
  0x20   : > { %6034 = vset.pattern.permute.xlu1 %v6647_v3  ;;  %6032 = vset.pattern.permute.xlu0 %v6647_v3 }
  0x21   : > { %415 = vperm.xlu1 %6034, %v392_v1   ;;  %411 = vperm.xlu0 %6032, %v391_v2  }
  0x29   : > { %6042 = vset.pattern.permute.xlu1 %v6646_v0  ;;  %6041 = vset.pattern.permute.xlu0 %v6646_v0 }
  0x8a   : > { %v405_v8 = vpop.permute.xlu1 %404  ;;  %v400_v9 = vpop.permute.xlu0 %399 }
  0x8b   : > { %v409_v13 = vmul.f32 %v407_v11, %v405_v8  ;;  %v408_v18 = vmul.f32 %v407_v11, %v400_v9 }
  0x93   : > { %v416_v14 = vpop.permute.xlu1 %415  ;;  %v412_v17 = vpop.permute.xlu0 %411 }
  0x94   : > { %v420_v15 = vmul.f32 %v418_v12, %v416_v14  ;;  %v419_v19 = vmul.f32 %v418_v12, %v412_v17 }
  0x96   : > { %v422_v20 = vadd.f32 %v420_v15, %v409_v13  ;;  %v421_v21 = vadd.f32 %v419_v19, %v408_v18  ;;  %v6831_v13 = vsel %vm513_vm4, 0.0, %v6655_v59 }
  0x98   : > { %v425_v22 = vadd.f32 %v423_v16, %v422_v20  ;;  %v424_v23 = vadd.f32 %v423_v16, %v421_v21 }
  0x9a   : > { %v429_v24 = vmul.f32 0.044715, %v425_v22  ;;  %v428_v25 = vmul.f32 0.044715, %v424_v23  ;;  %v426_v35 = vmul.f32 0.5, %v424_v23  ;;  %v427_v40 = vmul.f32 0.5, %v425_v22 }
  0x9c   : > { %v431_v26 = vmul.f32 %v429_v24, %v425_v22  ;;  %v430_v27 = vmul.f32 %v428_v25, %v424_v23 }
  0x9e   : > { %v433_v28 = vmul.f32 %v431_v26, %v425_v22  ;;  %v432_v29 = vmul.f32 %v430_v27, %v424_v23 }
  0xa0   : > { %v434_v30 = vadd.f32 %v432_v29, %v424_v23  ;;  %v435_v31 = vadd.f32 %v433_v28, %v425_v22  ;;  %v395_v29 = vld [vmem:[%s6856_s18 + $0x10] sm:$0xff] }
  0xa2   : > { %v436_v32 = vmul.f32 0.7978846, %v434_v30  ;;  %v437_v33 = vmul.f32 0.7978846, %v435_v31  ;;  %v394_v30 = vld [vmem:[%s6856_s18 + $0x8] sm:$0xff]  ;;  %v393_v31 = vld [vmem:[%s6856_s18] sm:$0xff] }
  0xa4   : > { %6218 = vtanh.f32 %v436_v32 }
  0xa5   : > { %6220 = vtanh.f32 %v437_v33 }
  0xaa   : > { %v6219_v34 = vpop.eup %6218 }
  0xab   : > { %v440_v36 = vadd.f32 1.0, %v6219_v34  ;;  %v6221_v38 = vpop.eup %6220 }
  0xac   : > { %v441_v39 = vadd.f32 1.0, %v6221_v38 }
  0xad   : > { %v442_v37 = vmul.f32 %v440_v36, %v426_v35 }
  0xae   : > { %v443_v41 = vmul.f32 %v441_v39, %v427_v40 }
  0xaf   : > { %5709 = vmatmul.msk.f32.vlgmr.msra.gmra.mxu0 %vm536_vm0, %v442_v37 }
  0xb7   : > { %5710 = vmatmul.msk.f32.gmra.mxu0 %vm536_vm0, %v443_v41 }
 0x12c   : > { %v6759_v42 = vpop.f32.mrf.mxu0 }
 0x12d   : > { %822 = vrot.lane.b32.xlu0 %v6759_v42, %s6648_s27  ;;  %692 = vrot.lane.b32.xlu1 %v6759_v42, %s6649_s28 }
 0x12e   : > { %696 = vrot.lane.b32.xlu2 %v6759_v42, %s6650_s29 }
 0x134   : > { %v6767_v43 = vpop.f32.mrf.mxu0 }
 0x135   : > { %818 = vrot.lane.b32.xlu1 %v6759_v42, %s6651_s30  ;;  %570 = vrot.lane.b32.xlu0 %v6767_v43, %s6652_s8  ;;  %v6844_v26 = vpack.i.bf16 %v6759_v42, %v6767_v43 }
 0x136   : > { %698 = vrot.lane.b32.xlu2 %v6767_v43, %s6650_s29 }
 0x13d   : > { %568 = vrot.lane.b32.xlu1 %v6759_v42, %s6652_s8  ;;  %950 = vrot.lane.b32.xlu0 %v6767_v43, %s6653_s9 }
 0x13e   : > { %824 = vrot.lane.b32.xlu2 %v6767_v43, %s6648_s27 }
 0x145   : > { %948 = vrot.lane.b32.xlu1 %v6759_v42, %s6653_s9  ;;  %946 = vrot.lane.b32.xlu0 %v6767_v43, %s6654_s10 }
 0x146   : > { %820 = vrot.lane.b32.xlu2 %v6767_v43, %s6651_s30 }
 0x14e   : > { %694 = vrot.lane.b32.xlu2 %v6767_v43, %s6649_s28 }
 0x156   : > { %944 = vrot.lane.b32.xlu2 %v6759_v42, %s6654_s10 }
 0x188   : > { %v697_v44 = vpop.permute.xlu2 %696 }
 0x190   : > { %v699_v45 = vpop.permute.xlu2 %698 }
 0x191   : > { %5717 = vmatpush.xpose.msk.msrb.mxu0 %vm572_vm1, %v699_v45  ;;  %5969 = vmatpush.xpose.msk.msra.mxu3 %vm572_vm1, %v699_v45 }
 0x195   : > { %5718 = vmatpush.xpose.msk.msrb.mxu0 %vm572_vm1, %v697_v44  ;;  %5970 = vmatpush.xpose.msk.msra.mxu3 %vm572_vm1, %v697_v44 }
 0x198   : > { %v825_v46 = vpop.permute.xlu2 %824 }
 0x199   : > { %5723 = vmatpush.xpose.msk.msra.mxu0 %vm572_vm1, %v825_v46 }
 0x19f   : > { %v823_v47 = vpop.permute.xlu0 %822  ;;  %v693_v48 = vpop.permute.xlu1 %692 }
 0x1a0   : > { %v821_v49 = vpop.permute.xlu2 %820  ;;  %5719 = vmatmul.msk.f32.vlgmr.msrb.gmra.mxu0 %vm572_vm1, %v693_v48 }
 0x1a1   : > { %5724 = vmatpush.xpose.msk.msra.mxu0 %vm572_vm1, %v823_v47 }
 0x1a7   : > { %v819_v50 = vpop.permute.xlu1 %818  ;;  %v571_v51 = vpop.permute.xlu0 %570 }
 0x1a8   : > { %v695_v52 = vpop.permute.xlu2 %694  ;;  %5711 = vmatpush.xpose.msk.msra.mxu1 %vm572_vm1, %v571_v51  ;;  %5967 = vmatpush.xpose.msk.msra.mxu2 %vm572_vm1, %v571_v51 }
 0x1a9   : > { %5720 = vmatmul.msk.f32.vlgmr.msra.gmra.mxu3 %vm572_vm1, %v695_v52  ;;  %5725 = vmatmul.msk.f32.vlgmr.msra.gmra.mxu0 %vm572_vm1, %v819_v50 }
 0x1af   : > { %v569_v53 = vpop.permute.xlu1 %568  ;;  %v951_v54 = vpop.permute.xlu0 %950 }
 0x1b0   : > { %5712 = vmatpush.xpose.msk.msra.mxu1 %vm572_vm1, %v569_v53  ;;  %5968 = vmatpush.xpose.msk.msra.mxu2 %vm572_vm1, %v569_v53  ;;  %v945_v56 = vpop.permute.xlu2 %944 }
 0x1b1   : > { %5726 = vmatmul.msk.f32.gmra.mxu0 %vm572_vm1, %v821_v49  ;;  %5729 = vmatpush.xpose.msk.msrb.mxu3 %vm572_vm1, %v951_v54 }
 0x1b3   : > { %5713 = vmatmul.msk.f32.vlgmr.msra.gmra.mxu1 %vm572_vm1, %v6759_v42  ;;  %5714 = vmatmul.msk.f32.vlgmr.msra.gmra.mxu2 %vm572_vm1, %v6767_v43 }
 0x1b7   : > { %v949_v55 = vpop.permute.xlu1 %948  ;;  %v947_v57 = vpop.permute.xlu0 %946 }
 0x1b8   : > { %5730 = vmatpush.xpose.msk.msrb.mxu3 %vm572_vm1, %v949_v55 }
 0x1bb   : > { %5731 = vmatmul.msk.f32.vlgmr.msrb.gmra.mxu3 %vm572_vm1, %v945_v56 }
 0x1c3   : > { %5732 = vmatmul.msk.f32.gmra.mxu3 %vm572_vm1, %v947_v57 }
 0x21d   : > { %v725_v61 = vpop.f32.mrf.mxu0 }
 0x21e   : > { %v731_v62 = vmul.f32 0.35355338, %v725_v61 }
 0x220   : > { %v733_v63 = vadd.f32 %v731_v62, %v6819_v60 }
 0x222   : > { %v735_v0 = vsel %vm608_vm3, %v733_v63, -inf }
 0x223   : > { %736 = vmax.xlane.f32.xlu1 %v735_v0 }
 0x226   : > { %v851_v1 = vpop.f32.mrf.mxu0 }
 0x227   : > { %v857_v2 = vmul.f32 0.35355338, %v851_v1 }
 0x229   : > { %v859_v3 = vadd.f32 %v857_v2, %v6819_v60 }
 0x22b   : > { %v861_v4 = vsel %vm608_vm3, %v859_v3, -inf }
 0x22c   : > { %862 = vmax.xlane.f32.xlu1 %v861_v4  ;;  %v728_v8 = vpop.f32.mrf.mxu3  ;;  %v396_v4 = vld [vmem:[%s6856_s18 + $0x18] sm:$0xff] }
 0x22d   : > { %v732_v11 = vmul.f32 0.35355338, %v728_v8 }
 0x22e   : > { %v854_v16 = vpop.f32.mrf.mxu0 }
 0x22f   : > { %v6835_v18 = vadd.f32 %v732_v11, %v6831_v13  ;;  %v858_v19 = vmul.f32 0.35355338, %v854_v16 }
 0x230   : > { %v598_v6 = vpop.f32.mrf.mxu1 }
 0x231   : > { %v604_v7 = vmul.f32 0.35355338, %v598_v6  ;;  %v738_v21 = vsel %vm608_vm3, %v6835_v18, -inf  ;;  %v860_v24 = vadd.f32 %v858_v19, %v6831_v13 }
 0x233   : > { %v6826_v9 = vadd.f32 %v604_v7, %v6819_v60  ;;  %v864_v27 = vsel %vm608_vm3, %v860_v24, -inf }
 0x235   : > { %v609_v12 = vsel %vm608_vm3, %v6826_v9, -inf }
 0x236   : > { %v601_v14 = vpop.f32.mrf.mxu2  ;;  %610 = vmax.xlane.f32.xlu0 %v609_v12 }
 0x237   : > { %v605_v15 = vmul.f32 0.35355338, %v601_v14 }
 0x239   : > { %v607_v17 = vadd.f32 %v605_v15, %v6831_v13 }
 0x23b   : > { %v612_v20 = vsel %vm608_vm3, %v607_v17, -inf }
 0x23c   : > { %613 = vmax.xlane.f32.xlu2 %v612_v20 }
 0x23e   : > { %739 = vmax.xlane.f32.xlu0 %v738_v21  ;;  %v977_v22 = vpop.f32.mrf.mxu3  ;;  %v6905_v21 = vperm.slane %v6752_v10, 4 }
 0x23f   : > { %v983_v23 = vmul.f32 0.35355338, %v977_v22 }
 0x241   : > { %v985_v25 = vadd.f32 %v983_v23, %v6819_v60 }
 0x243   : > { %v987_v28 = vsel %vm608_vm3, %v985_v25, -inf }
 0x244   : > { %865 = vmax.xlane.f32.xlu2 %v864_v27 }
 0x245   : > { %6037 = vrot.lane.b32.xlu1 %v6844_v26, %s6656_s14 }
 0x246   : > { %988 = vmax.xlane.f32.xlu0 %v987_v28  ;;  %v980_v36 = vpop.f32.mrf.mxu3 }
 0x247   : > { %v984_v40 = vmul.f32 0.35355338, %v980_v36 }
 0x249   : > { %v6866_v44 = vadd.f32 %v984_v40, %v6831_v13 }
 0x24b   : > { %v990_v48 = vsel %vm608_vm3, %v6866_v44, -inf }
 0x24d   : > { %456 = vperm.xlu1 %6042, %v395_v29   ;;  %v1135_v29 = vld [vmem:[#allocation2 + $0x38] sm:$0xff] }
 0x25a   : > { %451 = vperm.xlu0 %6041, %v394_v30  }
 0x25c   : > { %446 = vperm.xlu2 %6035, %v393_v31  }
 0x296   : > { %v737_v32 = vpop.xlane.xlu1 %736 }
 0x297   : > { %v741_v39 = vsub.f32 %v733_v63, %v737_v32 }
 0x299   : > { %v743_v42 = vmul.f32 1.442695, %v741_v39 }
 0x29f   : > { %v863_v33 = vpop.xlane.xlu1 %862 }
 0x2a0   : > { %v867_v34 = vsub.f32 %v859_v3, %v863_v33  ;;  %v1134_v33 = vld [vmem:[#allocation2 + $0x30] sm:$0xff] }
 0x2a2   : > { %v869_v35 = vmul.f32 1.442695, %v867_v34 }
 0x2a4   : > { %6222 = vpow2.f32 %v869_v35 }
 0x2a5   : > { %6224 = vpow2.f32 %v743_v42 }
 0x2a9   : > { %v611_v37 = vpop.xlane.xlu0 %610 }
 0x2aa   : > { %v6861_v38 = vpop.eup %6222  ;;  %v615_v5 = vsub.f32 %v6826_v9, %v611_v37 }
 0x2ab   : > { %v873_v41 = vsel %vm608_vm3, %v6861_v38, 0.0  ;;  %v6870_v51 = vpop.eup %6224 }
 0x2ac   : > { %874 = vadd.xlane.f32.xlu2 %v873_v41  ;;  %v747_v61 = vsel %vm608_vm3, %v6870_v51, 0.0  ;;  %v617_v6 = vmul.f32 1.442695, %v615_v5  ;;  %v1133_v41 = vld [vmem:[#allocation2 + $0x28] sm:$0xff] }
 0x2af   : > { %v614_v43 = vpop.xlane.xlu2 %613 }
 0x2b0   : > { %v616_v45 = vsub.f32 %v607_v17, %v614_v43  ;;  %v6902_v17 = vperm.slane %v6752_v10, 2 }
 0x2b1   : > { %v740_v46 = vpop.xlane.xlu0 %739 }
 0x2b2   : > { %v619_v47 = vmul.f32 1.442695, %v616_v45  ;;  %v742_v7 = vsub.f32 %v6835_v18, %v740_v46  ;;  %v1132_v45 = vld [vmem:[#allocation2 + $0x20] sm:$0xff] }
 0x2b4   : > { %6226 = vpow2.f32 %v619_v47  ;;  %991 = vmax.xlane.f32.xlu2 %v990_v48  ;;  %v745_v8 = vmul.f32 1.442695, %v742_v7 }
 0x2b7   : > { %v6038_v49 = vpop.permute.xlu1 %6037  ;;  %v866_v50 = vpop.xlane.xlu2 %865 }
 0x2b8   : > { %v868_v52 = vsub.f32 %v860_v24, %v866_v50  ;;  %v6039_v53 = vunpack.i.l.bf16 %v6038_v49  ;;  %v6040_v58 = vunpack.i.h.bf16 %v6038_v49 }
 0x2b9   : > { %v989_v54 = vpop.xlane.xlu0 %988 }
 0x2ba   : > { %v6872_v55 = vpop.eup %6226  ;;  %v871_v56 = vmul.f32 1.442695, %v868_v52  ;;  %935 = vmatpush.msrb.mxu1 %v6039_v53  ;;  %v993_v57 = vsub.f32 %v985_v25, %v989_v54 }
 0x2bb   : > { %v624_v62 = vsel %vm608_vm3, %v6872_v55, 0.0 }
 0x2bc   : > { %6228 = vpow2.f32 %v871_v56  ;;  %v995_v63 = vmul.f32 1.442695, %v993_v57  ;;  %936 = vmatpush.msrb.mxu1 %v6040_v58  ;;  %748 = vadd.xlane.f32.xlu2 %v747_v61 }
 0x2bd   : > { %625 = vadd.xlane.f32.xlu0 %v624_v62 }
 0x2be   : > { %6230 = vpow2.f32 %v995_v63  ;;  %1165 = vmatpush.msra.mxu1 %v1135_v29 }
 0x2bf   : > { %6232 = vpow2.f32 %v617_v6  ;;  %v447_v16 = vpop.permute.xlu2 %446 }
 0x2c0   : > { %6234 = vpow2.f32 %v745_v8  ;;  %v465_v22 = vmul.f32 %v6902_v17, %v447_v16  ;;  %1166 = vmatpush.msra.mxu1 %v1134_v33 }
 0x2c2   : > { %v6878_v0 = vpop.eup %6228  ;;  %v6912_v30 = vadd.f32 %v6905_v21, %v465_v22  ;;  %1167 = vmatpush.msra.mxu1 %v1133_v41 }
 0x2c3   : > { %v876_v1 = vsel %vm608_vm3, %v6878_v0, 0.0 }
 0x2c4   : > { %v6882_v2 = vpop.eup %6230  ;;  %877 = vadd.xlane.f32.xlu1 %v876_v1  ;;  %v478_v39 = vmul.f32 0.044715, %v6912_v30  ;;  %1168 = vmatpush.msra.mxu1 %v1132_v45 }
 0x2c5   : > { %v999_v3 = vsel %vm608_vm3, %v6882_v2, 0.0  ;;  %v6893_v11 = vpop.eup %6232 }
 0x2c6   : > { %1000 = vadd.xlane.f32.xlu0 %v999_v3  ;;  %v621_v12 = vsel %vm608_vm3, %v6893_v11, 0.0  ;;  %v6897_v14 = vpop.eup %6234  ;;  %v482_v47 = vmul.f32 %v478_v39, %v6912_v30 }
 0x2c7   : > { %v750_v15 = vsel %vm608_vm3, %v6897_v14, 0.0 }
 0x2c8   : > { %v486_v52 = vmul.f32 %v482_v47, %v6912_v30 }
 0x2ca   : > { %v490_v57 = vadd.f32 %v486_v52, %v6912_v30 }
 0x2cc   : > { %v452_v31 = vpop.permute.xlu0 %451  ;;  %v494_v1 = vmul.f32 0.7978846, %v490_v57 }
 0x2cd   : > { %v466_v34 = vmul.f32 %v6902_v17, %v452_v31 }
 0x2cf   : > { %v471_v43 = vadd.f32 %v6905_v21, %v466_v34 }
 0x2d1   : > { %v479_v48 = vmul.f32 0.044715, %v471_v43  ;;  %v475_v34 = vmul.f32 0.5, %v471_v43 }
 0x2d3   : > { %v483_v56 = vmul.f32 %v479_v48, %v471_v43 }
 0x2d4   : > { %6044 = vrot.lane.b32.xlu2 %v6844_v26, %s6657_s19 }
 0x2d5   : > { %v487_v62 = vmul.f32 %v483_v56, %v471_v43 }
 0x2d7   : > { %v491_v6 = vadd.f32 %v487_v62, %v471_v43 }
 0x2da   : > { %6054 = vrot.lane.b32.xlu0 %v6844_v26, %s6658_s20 }
 0x2dd   : > { %461 = vperm.xlu1 %6042, %v396_v4  }
 0x307   : > { %622 = vadd.xlane.f32.xlu1 %v621_v12 }
 0x30f   : > { %751 = vadd.xlane.f32.xlu1 %v750_v15 }
 0x31f   : > { %v875_v9 = vpop.xlane.xlu2 %874 }
 0x320   : > { %6236 = vrcp.f32 %v875_v9  ;;  %v890_v28 = vand.u32 2147483648, %v875_v9  ;;  %v888_v10 = vand.u32 2147483647, %v875_v9  ;;  %vm884_vm6 = vweird.f32 %v875_v9 }
 0x322   : > { %v891_v35 = vor.u32 1.1754944e-38, %v890_v28  ;;  %vm889_vm8 = vcmp.eq.f32.partialorder %v888_v10, 8.507059e+37 }
 0x326   : > { %v6237_v18 = vpop.eup %6236 }
 0x327   : > { %v880_v19 = vmul.f32 %v6237_v18, %v875_v9  ;;  %v992_v20 = vpop.xlane.xlu2 %991  ;;  %vm885_vm5 = vweird.f32 %v6237_v18  ;;  %v495_v9 = vmul.f32 0.7978846, %v491_v6 }
 0x328   : > { %v994_v23 = vsub.f32 %v6866_v44, %v992_v20  ;;  %6049 = vrot.lane.b32.xlu1 %v6844_v26, %s6659_s21  ;;  %vm886_vm7 = vmor %vm884_vm6, %vm885_vm5  ;;  %v457_v26 = vpop.permute.xlu1 %456 }
 0x329   : > { %v881_v24 = vsub.f32 1.0, %v880_v19  ;;  %v467_v53 = vmul.f32 %v6902_v17, %v457_v26 }
 0x32a   : > { %v997_v25 = vmul.f32 1.442695, %v994_v23 }
 0x32b   : > { %v882_v27 = vmul.f32 %v6237_v18, %v881_v24  ;;  %v472_v58 = vadd.f32 %v6905_v21, %v467_v53 }
 0x32c   : > { %6238 = vpow2.f32 %v997_v25  ;;  %v474_v25 = vmul.f32 0.5, %v6912_v30 }
 0x32d   : > { %v883_v32 = vadd.f32 %v6237_v18, %v882_v27  ;;  %v480_v3 = vmul.f32 0.044715, %v472_v58 }
 0x32f   : > { %v6915_v36 = vpop.xlane.xlu2 %748  ;;  %v887_v37 = vsel %vm886_vm7, %v6237_v18, %v883_v32  ;;  %v484_v12 = vmul.f32 %v480_v3, %v472_v58 }
 0x330   : > { %v892_v40 = vsel %vm889_vm8, %v891_v35, %v887_v37  ;;  %v626_v48 = vpop.xlane.xlu0 %625 }
 0x331   : > { %v893_v44 = vmul.f32 %v6861_v38, %v892_v40  ;;  %v488_v20 = vmul.f32 %v484_v12, %v472_v58  ;;  %v653_v12 = vand.u32 2147483648, %v626_v48  ;;  %vm647_vm5 = vweird.f32 %v626_v48 }
 0x332   : > { %v6918_v42 = vpop.eup %6238 }
 0x333   : > { %v1002_v46 = vsel %vm608_vm3, %v6918_v42, 0.0  ;;  %5727 = vmatmul.msk.f32.vlgmr.msrb.gmra.mxu1 %vm608_vm3, %v893_v44  ;;  %v492_v24 = vadd.f32 %v488_v20, %v472_v58  ;;  %v476_v44 = vmul.f32 0.5, %v472_v58 }
 0x334   : > { %1003 = vadd.xlane.f32.xlu2 %v1002_v46 }
 0x335   : > { %v496_v31 = vmul.f32 0.7978846, %v492_v24 }
 0x337   : > { %v6045_v49 = vpop.permute.xlu2 %6044  ;;  %v878_v50 = vpop.xlane.xlu1 %877 }
 0x338   : > { %6240 = vrcp.f32 %v878_v50  ;;  %v6046_v38 = vunpack.i.l.bf16 %v6045_v49  ;;  %v6047_v54 = vunpack.i.h.bf16 %v6045_v49  ;;  %v905_v5 = vand.u32 2147483648, %v878_v50 }
 0x339   : > { %v903_v8 = vand.u32 2147483647, %v878_v50  ;;  %6242 = vtanh.f32 %v494_v1  ;;  %vm899_vm10 = vweird.f32 %v878_v50 }
 0x33a   : > { %683 = vmatpush.msrb.mxu2 %v6046_v38  ;;  %v906_v16 = vor.u32 1.1754944e-38, %v905_v5  ;;  %6244 = vtanh.f32 %v495_v9 }
 0x33b   : > { %vm904_vm12 = vcmp.eq.f32.partialorder %v903_v8, 8.507059e+37  ;;  %6246 = vtanh.f32 %v496_v31  ;;  %v762_v31 = vand.u32 2147483647, %v6915_v36 }
 0x33c   : > { %684 = vmatpush.msrb.mxu2 %v6047_v54 }
 0x33e   : > { %v6241_v61 = vpop.eup %6240 }
 0x33f   : > { %v895_v63 = vmul.f32 %v6241_v61, %v878_v50  ;;  %vm900_vm9 = vweird.f32 %v6241_v61  ;;  %v6243_v23 = vpop.eup %6242 }
 0x340   : > { %vm901_vm11 = vmor %vm899_vm10, %vm900_vm9  ;;  %v502_v27 = vadd.f32 1.0, %v6243_v23  ;;  %v6245_v29 = vpop.eup %6244  ;;  %vm758_vm9 = vweird.f32 %v6915_v36 }
 0x341   : > { %v896_v4 = vsub.f32 1.0, %v895_v63  ;;  %v6247_v40 = vpop.eup %6246 }
 0x342   : > { %v506_v32 = vmul.f32 %v502_v27, %v474_v25 }
 0x343   : > { %v897_v7 = vmul.f32 %v6241_v61, %v896_v4 }
 0x345   : > { %v898_v15 = vadd.f32 %v6241_v61, %v897_v7 }
 0x347   : > { %v902_v18 = vsel %vm901_vm11, %v6241_v61, %v898_v15  ;;  %vm763_vm11 = vcmp.eq.f32.partialorder %v762_v31, 8.507059e+37 }
 0x348   : > { %v907_v19 = vsel %vm904_vm12, %v906_v16, %v902_v18  ;;  %v6944_v16 = vpop.xlane.xlu0 %1000  ;;  %v651_v18 = vand.u32 2147483647, %v626_v48 }
 0x349   : > { %v908_v22 = vmul.f32 %v6878_v0, %v907_v19  ;;  %v503_v0 = vadd.f32 1.0, %v6245_v29 }
 0x34a   : > { %vm652_vm7 = vcmp.eq.f32.partialorder %v651_v18, 8.507059e+37 }
 0x34b   : > { %5728 = vmatmul.msk.f32.gmra.mxu1 %vm608_vm3, %v908_v22  ;;  %v507_v37 = vmul.f32 %v503_v0, %v475_v34  ;;  %v654_v22 = vor.u32 1.1754944e-38, %v653_v12 }
 0x34f   : > { %v462_v28 = vpop.permute.xlu1 %461 }
 0x350   : > { %v468_v10 = vmul.f32 %v6902_v17, %v462_v28  ;;  %v504_v17 = vadd.f32 1.0, %v6247_v40 }
 0x352   : > { %v473_v33 = vadd.f32 %v6905_v21, %v468_v10  ;;  %v508_v45 = vmul.f32 %v504_v17, %v476_v44  ;;  %v764_v10 = vand.u32 2147483648, %v6915_v36 }
 0x353   : > { %5737 = vmatmul.msk.f32.vlgmr.msra.gmra.mxu1 %vm536_vm0, %v506_v32 }
 0x354   : > { %v481_v26 = vmul.f32 0.044715, %v473_v33  ;;  %v477_v43 = vmul.f32 0.5, %v473_v33  ;;  %v765_v0 = vor.u32 1.1754944e-38, %v764_v10 }
 0x356   : > { %v485_v35 = vmul.f32 %v481_v26, %v473_v33 }
 0x358   : > { %v489_v39 = vmul.f32 %v485_v35, %v473_v33 }
 0x35a   : > { %v493_v30 = vadd.f32 %v489_v39, %v473_v33  ;;  %v6055_v39 = vpop.permute.xlu0 %6054 }
 0x35b   : > { %5738 = vmatmul.msk.f32.gmra.mxu1 %vm536_vm0, %v507_v37  ;;  %v6056_v17 = vunpack.i.l.bf16 %v6055_v39 }
 0x35c   : > { %v497_v41 = vmul.f32 0.7978846, %v493_v30 }
 0x35e   : > { %6248 = vtanh.f32 %v497_v41 }
 0x35f   : > { %6250 = vrcp.f32 %v626_v48 }
 0x363   : > { %5739 = vmatmul.msk.f32.gmra.mxu1 %vm536_vm0, %v508_v45 }
 0x364   : > { %v6249_v21 = vpop.eup %6248 }
 0x365   : > { %v505_v46 = vadd.f32 1.0, %v6249_v21  ;;  %v6251_v50 = vpop.eup %6250 }
 0x366   : > { %v643_v52 = vmul.f32 %v6251_v50, %v626_v48  ;;  %vm648_vm4 = vweird.f32 %v6251_v50 }
 0x367   : > { %v509_v47 = vmul.f32 %v505_v46, %v477_v43  ;;  %vm649_vm6 = vmor %vm647_vm5, %vm648_vm4  ;;  %v6057_v46 = vunpack.i.h.bf16 %v6055_v39  ;;  %vm1010_vm4 = vweird.f32 %v6944_v16  ;;  %v534_v39 = vld [vmem:[#allocation4 + $0x10] sm:$0xff] }
 0x368   : > { %v644_v38 = vsub.f32 1.0, %v643_v52 }
 0x36a   : > { %v645_v1 = vmul.f32 %v6251_v50, %v644_v38 }
 0x36b   : > { %5740 = vmatmul.msk.f32.gmra.mxu1 %vm536_vm0, %v509_v47 }
 0x36c   : > { %v646_v7 = vadd.f32 %v6251_v50, %v645_v1 }
 0x36e   : > { %v650_v20 = vsel %vm649_vm6, %v6251_v50, %v646_v7 }
 0x36f   : > { %v655_v25 = vsel %vm652_vm7, %v654_v22, %v650_v20 }
 0x37a   : > { %v623_v49 = vpop.xlane.xlu1 %622 }
 0x37b   : > { %6252 = vrcp.f32 %v623_v49  ;;  %v638_v61 = vand.u32 2147483648, %v623_v49  ;;  %v636_v63 = vand.u32 2147483647, %v623_v49  ;;  %vm632_vm14 = vweird.f32 %v623_v49 }
 0x37c   : > { %6254 = vrcp.f32 %v6915_v36 }
 0x37d   : > { %v639_v5 = vor.u32 1.1754944e-38, %v638_v61  ;;  %vm637_vm2 = vcmp.eq.f32.partialorder %v636_v63, 8.507059e+37 }
 0x381   : > { %v6253_v53 = vpop.eup %6252 }
 0x382   : > { %v628_v54 = vmul.f32 %v6253_v53, %v623_v49  ;;  %v6940_v57 = vpop.xlane.xlu1 %751  ;;  %v6255_v58 = vpop.eup %6254  ;;  %vm633_vm13 = vweird.f32 %v6253_v53  ;;  %v1014_v49 = vand.u32 2147483647, %v6944_v16 }
 0x383   : > { %6256 = vrcp.f32 %v6940_v57  ;;  %v754_v3 = vmul.f32 %v6255_v58, %v6915_v36  ;;  %vm634_vm15 = vmor %vm632_vm14, %vm633_vm13  ;;  %vm759_vm8 = vweird.f32 %v6255_v58  ;;  %v779_v36 = vand.u32 2147483648, %v6940_v57 }
 0x384   : > { %v629_v56 = vsub.f32 1.0, %v628_v54  ;;  %6258 = vrcp.f32 %v6944_v16  ;;  %vm760_vm10 = vmor %vm758_vm9, %vm759_vm8  ;;  %vm773_vm13 = vweird.f32 %v6940_v57  ;;  %v777_v44 = vand.u32 2147483647, %v6940_v57 }
 0x385   : > { %v755_v15 = vsub.f32 1.0, %v754_v3  ;;  %v780_v43 = vor.u32 1.1754944e-38, %v779_v36  ;;  %vm1015_vm6 = vcmp.eq.f32.partialorder %v1014_v49, 8.507059e+37  ;;  %v532_v36 = vld [vmem:[#allocation4] sm:$0xff] }
 0x386   : > { %v630_v62 = vmul.f32 %v6253_v53, %v629_v56 }
 0x387   : > { %v756_v23 = vmul.f32 %v6255_v58, %v755_v15 }
 0x388   : > { %v631_v4 = vadd.f32 %v6253_v53, %v630_v62 }
 0x389   : > { %v6257_v19 = vpop.eup %6256  ;;  %v757_v27 = vadd.f32 %v6255_v58, %v756_v23 }
 0x38a   : > { %v635_v6 = vsel %vm634_vm15, %v6253_v53, %v631_v4  ;;  %v769_v24 = vmul.f32 %v6257_v19, %v6940_v57  ;;  %v6259_v29 = vpop.eup %6258  ;;  %vm774_vm12 = vweird.f32 %v6257_v19  ;;  %vm778_vm15 = vcmp.eq.f32.partialorder %v777_v44, 8.507059e+37 }
 0x38b   : > { %v640_v8 = vsel %vm637_vm2, %v639_v5, %v635_v6  ;;  %v761_v32 = vsel %vm760_vm10, %v6255_v58, %v757_v27  ;;  %v1006_v33 = vmul.f32 %v6259_v29, %v6944_v16  ;;  %vm775_vm14 = vmor %vm773_vm13, %vm774_vm12  ;;  %vm1011_vm2 = vweird.f32 %v6259_v29 }
 0x38c   : > { %v641_v9 = vmul.f32 %v6893_v11, %v640_v8  ;;  %v770_v28 = vsub.f32 1.0, %v769_v24  ;;  %v656_v11 = vmul.f32 %v6872_v55, %v655_v25  ;;  %v766_v37 = vsel %vm763_vm11, %v765_v0, %v761_v32  ;;  %vm1012_vm5 = vmor %vm1010_vm4, %vm1011_vm2 }
 0x38d   : > { %v1007_v55 = vsub.f32 1.0, %v1006_v33  ;;  %v767_v41 = vmul.f32 %v6870_v51, %v766_v37  ;;  %v1016_v51 = vand.u32 2147483648, %v6944_v16  ;;  %vm1098_vm11 = vcmask 195584  }
 0x38e   : > { %5715 = vmatmul.msk.f32.vlgmr.msrb.gmra.mxu2 %vm608_vm3, %v641_v9  ;;  %v771_v34 = vmul.f32 %v6257_v19, %v770_v28 }
 0x38f   : > { %v1008_v45 = vmul.f32 %v6259_v29, %v1007_v55  ;;  %v1017_v38 = vor.u32 1.1754944e-38, %v1016_v51  ;;  %v535_v55 = vld [vmem:[#allocation4 + $0x18] sm:$0xff] }
 0x390   : > { %v772_v40 = vadd.f32 %v6257_v19, %v771_v34  ;;  %1120 = vmatpush.msrb.mxu0 %v535_v55 }
 0x391   : > { %v1009_v48 = vadd.f32 %v6259_v29, %v1008_v45 }
 0x392   : > { %v776_v21 = vsel %vm775_vm14, %v6257_v19, %v772_v40  ;;  %v533_v40 = vld [vmem:[#allocation4 + $0x8] sm:$0xff]  ;;  %1121 = vmatpush.msrb.mxu0 %v534_v39 }
 0x393   : > { %v781_v47 = vsel %vm778_vm15, %v780_v43, %v776_v21  ;;  %v1013_v53 = vsel %vm1012_vm5, %v6259_v29, %v1009_v48 }
 0x394   : > { %v782_v50 = vmul.f32 %v6897_v14, %v781_v47  ;;  %v1018_v54 = vsel %vm1015_vm6, %v1017_v38, %v1013_v53  ;;  %1122 = vmatpush.msrb.mxu0 %v533_v40  ;;  %v518_v40 = vld [vmem:[%s7116_s13 + $0x10] sm:$0xff] }
 0x395   : > { %v1019_v57 = vmul.f32 %v6882_v2, %v1018_v54  ;;  %vm522_vm15 = vcmp.gt.f32.partialorder %v518_v40, 0.0 }
 0x396   : > { %5716 = vmatmul.msk.f32.gmra.mxu2 %vm608_vm3, %v656_v11  ;;  %1123 = vmatpush.msrb.mxu0 %v532_v36 }
 0x39a   : > { %v6050_v26 = vpop.permute.xlu1 %6049 }
 0x39b   : > { %v6051_v35 = vunpack.i.l.bf16 %v6050_v26  ;;  %v6052_v30 = vunpack.i.h.bf16 %v6050_v26 }
 0x39d   : > { %809 = vmatpush.msra.mxu2 %v6051_v35 }
 0x39f   : > { %810 = vmatpush.msra.mxu2 %v6052_v30 }
 0x3a0   : > { %5721 = vmatmul.msk.f32.vlgmr.msra.gmra.mxu2 %vm608_vm3, %v767_v41 }
 0x3a1   : > { %1061 = vmatpush.msrb.mxu2 %v6056_v17 }
 0x3a3   : > { %1062 = vmatpush.msrb.mxu2 %v6057_v46 }
 0x3a7   : > { %v1004_v52 = vpop.xlane.xlu2 %1003 }
 0x3a8   : > { %6260 = vrcp.f32 %v1004_v52  ;;  %5722 = vmatmul.msk.f32.gmra.mxu2 %vm608_vm3, %v782_v50  ;;  %v1031_v14 = vand.u32 2147483648, %v1004_v52  ;;  %v1029_v1 = vand.u32 2147483647, %v1004_v52  ;;  %vm1025_vm8 = vweird.f32 %v1004_v52 }
 0x3aa   : > { %v1032_v4 = vor.u32 1.1754944e-38, %v1031_v14  ;;  %vm1030_vm10 = vcmp.eq.f32.partialorder %v1029_v1, 8.507059e+37 }
 0x3ae   : > { %v6261_v56 = vpop.eup %6260 }
 0x3af   : > { %v1021_v58 = vmul.f32 %v6261_v56, %v1004_v52  ;;  %vm1026_vm7 = vweird.f32 %v6261_v56 }
 0x3b0   : > { %5733 = vmatmul.msk.f32.vlgmr.msrb.gmra.mxu2 %vm608_vm3, %v1019_v57  ;;  %v938_v62 = vpop.f32.mrf.mxu1  ;;  %vm1027_vm9 = vmor %vm1025_vm8, %vm1026_vm7 }
 0x3b1   : > { %v1022_v61 = vsub.f32 1.0, %v1021_v58  ;;  %1080 = vrot.lane.b32.xlu2 %v938_v62, %s6660_s22 }
 0x3b3   : > { %v1023_v63 = vmul.f32 %v6261_v56, %v1022_v61 }
 0x3b5   : > { %v1024_v3 = vadd.f32 %v6261_v56, %v1023_v63 }
 0x3b7   : > { %v1028_v5 = vsel %vm1027_vm9, %v6261_v56, %v1024_v3 }
 0x3b8   : > { %v1033_v6 = vsel %vm1030_vm10, %v1032_v4, %v1028_v5  ;;  %v516_v5 = vld [vmem:[%s7116_s13] sm:$0xff] }
 0x3b9   : > { %v1034_v2 = vmul.f32 %v6918_v42, %v1033_v6  ;;  %vm520_vm12 = vcmp.gt.f32.partialorder %v516_v5, 0.0 }
 0x3ba   : > { %v7122_v6 = vsel %vm520_vm12, 0.0, %v6655_v59 }
 0x3bb   : > { %5734 = vmatmul.msk.f32.gmra.mxu2 %vm608_vm3, %v1034_v2 }
 0x3c8   : > { %v941_v7 = vpop.f32.mrf.mxu1 }
 0x3c9   : > { %1082 = vrot.lane.b32.xlu2 %v941_v7, %s6660_s22 }
 0x3d0   : > { %v6972_v8 = vpop.f32.mrf.mxu1 }
 0x3d1   : > { %1186 = vrot.lane.b32.xlu0 %v6972_v8, %s6652_s8  ;;  %1622 = vrot.lane.b32.xlu2 %v6972_v8, %s6648_s27 }
 0x3d8   : > { %v6978_v12 = vpop.f32.mrf.mxu1 }
 0x3d9   : > { %1396 = vrot.lane.b32.xlu2 %v6972_v8, %s6649_s28  ;;  %1188 = vrot.lane.b32.xlu1 %v6978_v12, %s6652_s8  ;;  %v7067_v30 = vpack.i.bf16 %v6972_v8, %v6978_v12 }
 0x3e0   : > { %v1176_v42 = vpop.f32.mrf.mxu1 }
 0x3e1   : > { %1190 = vrot.lane.b32.xlu0 %v1176_v42, %s6652_s8  ;;  %1618 = vrot.lane.b32.xlu2 %v1176_v42, %s6651_s30 }
 0x3e8   : > { %v6986_v15 = vpop.f32.mrf.mxu1 }
 0x3e9   : > { %1192 = vrot.lane.b32.xlu1 %v6986_v15, %s6652_s8  ;;  %1620 = vrot.lane.b32.xlu2 %v6986_v15, %s6651_s30  ;;  %v6997_v16 = vpack.i.bf16 %v1176_v42, %v6986_v15 }
 0x3f1   : > { %1842 = vrot.lane.b32.xlu2 %v6978_v12, %s6653_s9 }
 0x3f9   : > { %1834 = vrot.lane.b32.xlu2 %v6978_v12, %s6654_s10 }
 0x401   : > { %6064 = vrot.lane.b32.xlu2 %v6997_v16, %s6657_s19 }
 0x40b   : > { %v7003_v18 = vpop.permute.xlu2 %1080 }
 0x411   : > { %v7001_v9 = vpop.f32.mrf.mxu2 }
 0x419   : > { %v7005_v19 = vpop.f32.mrf.mxu2 }
 0x423   : > { %v7007_v20 = vpop.permute.xlu2 %1082  ;;  %v812_v22 = vpop.f32.mrf.mxu2 }
 0x424   : > { %1072 = vrot.lane.b32.xlu1 %v812_v22, %s6661_s23 }
 0x42b   : > { %v7010_v23 = vpop.permute.xlu2 %1622  ;;  %v815_v24 = vpop.f32.mrf.mxu2 }
 0x42c   : > { %1074 = vrot.lane.b32.xlu0 %v815_v24, %s6661_s23 }
 0x433   : > { %v7013_v25 = vpop.permute.xlu2 %1396  ;;  %v1064_v27 = vpop.f32.mrf.mxu2 }
 0x434   : > { %1624 = vrot.lane.b32.xlu0 %v6978_v12, %s6648_s27  ;;  %1088 = vrot.lane.b32.xlu1 %v1064_v27, %s6662_s26 }
 0x43b   : > { %v7018_v28 = vpop.permute.xlu2 %1618 }
 0x43c   : > { %1628 = vrot.lane.b32.xlu0 %v6986_v15, %s6648_s27  ;;  %1626 = vrot.lane.b32.xlu1 %v1176_v42, %s6648_s27 }
 0x43e   : > { %v1067_v29 = vpop.f32.mrf.mxu2 }
 0x443   : > { %v7023_v11 = vpop.permute.xlu2 %1620  ;;  %v1187_v33 = vpop.permute.xlu0 %1186 }
 0x444   : > { %1410 = vrot.lane.b32.xlu0 %v6986_v15, %s6650_s29  ;;  %1408 = vrot.lane.b32.xlu1 %v1176_v42, %s6650_s29 }
 0x44b   : > { %v7028_v10 = vpop.permute.xlu2 %1842  ;;  %v1189_v31 = vpop.permute.xlu1 %1188 }
 0x44c   : > { %1406 = vrot.lane.b32.xlu0 %v6978_v12, %s6650_s29  ;;  %1090 = vrot.lane.b32.xlu1 %v1067_v29, %s6662_s26 }
 0x453   : > { %v7033_v32 = vpop.permute.xlu2 %1834  ;;  %v1191_v37 = vpop.permute.xlu0 %1190 }
 0x454   : > { %1404 = vrot.lane.b32.xlu0 %v6972_v8, %s6650_s29  ;;  %1614 = vrot.lane.b32.xlu1 %v6972_v8, %s6651_s30 }
 0x45b   : > { %v1193_v34 = vpop.permute.xlu1 %1192  ;;  %v6065_v0 = vpop.permute.xlu2 %6064 }
 0x45c   : > { %v6066_v26 = vunpack.i.l.bf16 %v6065_v0  ;;  %5741 = vmatpush.xpose.msk.msra.mxu3 %vm572_vm1, %v1193_v34  ;;  %1398 = vrot.lane.b32.xlu0 %v6978_v12, %s6649_s28  ;;  %v6067_v35 = vunpack.i.h.bf16 %v6065_v0  ;;  %v519_v0 = vld [vmem:[%s7116_s13 + $0x18] sm:$0xff] }
 0x45d   : > { %1616 = vrot.lane.b32.xlu1 %v6978_v12, %s6651_s30  ;;  %vm523_vm14 = vcmp.gt.f32.partialorder %v519_v0, 0.0 }
 0x45e   : > { %1379 = vmatpush.msra.mxu2 %v6066_v26 }
 0x460   : > { %5742 = vmatpush.xpose.msk.msra.mxu3 %vm572_vm1, %v1191_v37  ;;  %1380 = vmatpush.msra.mxu2 %v6067_v35 }
 0x464   : > { %5743 = vmatpush.xpose.msk.msra.mxu3 %vm572_vm1, %v1189_v31  ;;  %1846 = vrot.lane.b32.xlu0 %v6986_v15, %s6653_s9 }
 0x465   : > { %1400 = vrot.lane.b32.xlu1 %v1176_v42, %s6649_s28 }
 0x468   : > { %5744 = vmatpush.xpose.msk.msra.mxu3 %vm572_vm1, %v1187_v33 }
 0x46b   : > { %5745 = vmatmul.msk.f32.vlgmr.msra.gmra.mxu3 %vm572_vm1, %v6972_v8 }
 0x46c   : > { %1402 = vrot.lane.b32.xlu0 %v6986_v15, %s6649_s28 }
 0x46d   : > { %1844 = vrot.lane.b32.xlu1 %v1176_v42, %s6653_s9 }
 0x473   : > { %5746 = vmatmul.msk.f32.gmra.mxu3 %vm572_vm1, %v6978_v12 }
 0x474   : > { %1832 = vrot.lane.b32.xlu0 %v6972_v8, %s6654_s10 }
 0x475   : > { %1840 = vrot.lane.b32.xlu1 %v6972_v8, %s6653_s9 }
 0x47b   : > { %5747 = vmatmul.msk.f32.gmra.mxu3 %vm572_vm1, %v1176_v42 }
 0x47c   : > { %1838 = vrot.lane.b32.xlu0 %v6986_v15, %s6654_s10 }
 0x47d   : > { %1836 = vrot.lane.b32.xlu1 %v1176_v42, %s6654_s10 }
 0x483   : > { %5748 = vmatmul.msk.f32.gmra.mxu3 %vm572_vm1, %v6986_v15 }
 0x484   : > { %6059 = vrot.lane.b32.xlu0 %v7067_v30, %s6657_s19 }
 0x485   : > { %6069 = vrot.lane.b32.xlu1 %v6997_v16, %s6659_s21 }
 0x496   : > { %v1073_v41 = vpop.permute.xlu1 %1072 }
 0x497   : > { %v1094_v17 = vsel %vm572_vm1, %v7001_v9, %v1073_v41 }
 0x498   : > { %v1096_v21 = vsel %vm608_vm3, %v1094_v17, %v7003_v18  ;;  %v7161_v17 = vsel %vm523_vm14, 0.0, %v6655_v59 }
 0x49e   : > { %v1075_v44 = vpop.permute.xlu0 %1074 }
 0x49f   : > { %v1095_v50 = vsel %vm572_vm1, %v7005_v19, %v1075_v44 }
 0x4a0   : > { %v1097_v38 = vsel %vm608_vm3, %v1095_v50, %v7007_v20 }
 0x4a6   : > { %v1625_v45 = vpop.permute.xlu0 %1624  ;;  %v1089_v46 = vpop.permute.xlu1 %1088 }
 0x4a7   : > { %v1099_v43 = vsel %vm1098_vm11, %v1096_v21, %v1089_v46 }
 0x4a8   : > { %5735 = vmatmul.msk.f32.vlgmr.msrb.gmra.mxu0 %vm536_vm0, %v1099_v43  ;;  %v7167_v43 = vsel %vm522_vm15, 0.0, %v6655_v59 }
 0x4ae   : > { %v1629_v47 = vpop.permute.xlu0 %1628  ;;  %v1627_v48 = vpop.permute.xlu1 %1626 }
 0x4af   : > { %5765 = vmatpush.xpose.msk.msrb.mxu3 %vm572_vm1, %v1629_v47 }
 0x4b3   : > { %5766 = vmatpush.xpose.msk.msrb.mxu3 %vm572_vm1, %v1627_v48 }
 0x4b6   : > { %v1411_v51 = vpop.permute.xlu0 %1410  ;;  %v1409_v49 = vpop.permute.xlu1 %1408 }
 0x4b7   : > { %5753 = vmatpush.xpose.msk.msra.mxu0 %vm572_vm1, %v1411_v51  ;;  %5767 = vmatpush.xpose.msk.msrb.mxu3 %vm572_vm1, %v1625_v45 }
 0x4bb   : > { %5754 = vmatpush.xpose.msk.msra.mxu0 %vm572_vm1, %v1409_v49  ;;  %5768 = vmatpush.xpose.msk.msrb.mxu3 %vm572_vm1, %v7010_v23 }
 0x4be   : > { %v1407_v52 = vpop.permute.xlu0 %1406  ;;  %v1091_v53 = vpop.permute.xlu1 %1090 }
 0x4bf   : > { %5755 = vmatpush.xpose.msk.msra.mxu0 %vm572_vm1, %v1407_v52  ;;  %v1100_v54 = vsel %vm1098_vm11, %v1097_v38, %v1091_v53 }
 0x4c0   : > { %5736 = vmatmul.msk.f32.gmra.mxu0 %vm536_vm0, %v1100_v54 }
 0x4c6   : > { %v1405_v56 = vpop.permute.xlu0 %1404  ;;  %v1615_v57 = vpop.permute.xlu1 %1614 }
 0x4c7   : > { %5756 = vmatpush.xpose.msk.msra.mxu0 %vm572_vm1, %v1405_v56  ;;  %5769 = vmatmul.msk.f32.vlgmr.msrb.gmra.mxu3 %vm572_vm1, %v1615_v57 }
 0x4ca   : > { %5757 = vmatmul.msk.f32.vlgmr.msra.gmra.mxu0 %vm572_vm1, %v7013_v25 }
 0x4ce   : > { %v1399_v58 = vpop.permute.xlu0 %1398 }
 0x4cf   : > { %v1617_v61 = vpop.permute.xlu1 %1616 }
 0x4d0   : > { %5770 = vmatmul.msk.f32.gmra.mxu3 %vm572_vm1, %v1617_v61 }
 0x4d2   : > { %5758 = vmatmul.msk.f32.gmra.mxu0 %vm572_vm1, %v1399_v58 }
 0x4d6   : > { %v1847_v62 = vpop.permute.xlu0 %1846 }
 0x4d7   : > { %v1401_v14 = vpop.permute.xlu1 %1400  ;;  %5777 = vmatpush.xpose.msk.msrb.mxu0 %vm572_vm1, %v1847_v62 }
 0x4d8   : > { %5771 = vmatmul.msk.f32.gmra.mxu3 %vm572_vm1, %v7018_v28  ;;  %v517_v28 = vld [vmem:[%s7116_s13 + $0x8] sm:$0xff] }
 0x4d9   : > { %vm521_vm13 = vcmp.gt.f32.partialorder %v517_v28, 0.0 }
 0x4da   : > { %5759 = vmatmul.msk.f32.gmra.mxu0 %vm572_vm1, %v1401_v14  ;;  %v7146_v34 = vsel %vm521_vm13, 0.0, %v6655_v59 }
 0x4de   : > { %v1403_v63 = vpop.permute.xlu0 %1402 }
 0x4df   : > { %v1845_v1 = vpop.permute.xlu1 %1844 }
 0x4e0   : > { %5772 = vmatmul.msk.f32.gmra.mxu3 %vm572_vm1, %v7023_v11  ;;  %5778 = vmatpush.xpose.msk.msrb.mxu0 %vm572_vm1, %v1845_v1 }
 0x4e2   : > { %5760 = vmatmul.msk.f32.gmra.mxu0 %vm572_vm1, %v1403_v63 }
 0x4e4   : > { %5779 = vmatpush.xpose.msk.msrb.mxu0 %vm572_vm1, %v7028_v10 }
 0x4e6   : > { %v1833_v3 = vpop.permute.xlu0 %1832 }
 0x4e7   : > { %v1841_v4 = vpop.permute.xlu1 %1840 }
 0x4e8   : > { %5780 = vmatpush.xpose.msk.msrb.mxu0 %vm572_vm1, %v1841_v4 }
 0x4eb   : > { %5781 = vmatmul.msk.f32.vlgmr.msrb.gmra.mxu0 %vm572_vm1, %v1833_v3 }
 0x4ee   : > { %v1227_v2 = vpop.f32.mrf.mxu3  ;;  %v1839_v7 = vpop.permute.xlu0 %1838 }
 0x4ef   : > { %v1239_v8 = vmul.f32 0.35355338, %v1227_v2  ;;  %v1837_v12 = vpop.permute.xlu1 %1836 }
 0x4f1   : > { %v7125_v42 = vadd.f32 %v1239_v8, %v7122_v6 }
 0x4f3   : > { %5782 = vmatmul.msk.f32.gmra.mxu0 %vm572_vm1, %v7033_v32  ;;  %v1247_v15 = vsel %vm536_vm0, %v7125_v42, -inf }
 0x4f4   : > { %1248 = vmax.xlane.f32.xlu2 %v1247_v15 }
 0x4f6   : > { %v6060_v9 = vpop.permute.xlu0 %6059  ;;  %v1230_v25 = vpop.f32.mrf.mxu3 }
 0x4f7   : > { %v6061_v18 = vunpack.i.l.bf16 %v6060_v9  ;;  %v6070_v19 = vpop.permute.xlu1 %6069  ;;  %v6062_v22 = vunpack.i.h.bf16 %v6060_v9  ;;  %v1240_v32 = vmul.f32 0.35355338, %v1230_v25 }
 0x4f8   : > { %v6071_v20 = vunpack.i.l.bf16 %v6070_v19  ;;  %v6072_v23 = vunpack.i.h.bf16 %v6070_v19 }
 0x4f9   : > { %1381 = vmatpush.msra.mxu2 %v6061_v18  ;;  %v7150_v37 = vadd.f32 %v1240_v32, %v7146_v34 }
 0x4fa   : > { %1597 = vmatpush.msrb.mxu1 %v6071_v20 }
 0x4fb   : > { %5783 = vmatmul.msk.f32.gmra.mxu0 %vm572_vm1, %v1837_v12  ;;  %1382 = vmatpush.msra.mxu2 %v6062_v22  ;;  %v1250_v41 = vsel %vm536_vm0, %v7150_v37, -inf }
 0x4fc   : > { %1598 = vmatpush.msrb.mxu1 %v6072_v23 }
 0x4fe   : > { %v1233_v11 = vpop.f32.mrf.mxu3 }
 0x4ff   : > { %v1241_v48 = vmul.f32 0.35355338, %v1233_v11 }
 0x501   : > { %v7177_v52 = vadd.f32 %v1241_v48, %v7167_v43 }
 0x503   : > { %5784 = vmatmul.msk.f32.gmra.mxu0 %vm572_vm1, %v1839_v7  ;;  %v1253_v59 = vsel %vm536_vm0, %v7177_v52, -inf }
 0x506   : > { %v1236_v55 = vpop.f32.mrf.mxu3 }
 0x507   : > { %v1242_v36 = vmul.f32 0.35355338, %v1236_v55 }
 0x509   : > { %v7164_v46 = vadd.f32 %v1242_v36, %v7161_v17 }
 0x50b   : > { %v1256_v51 = vsel %vm536_vm0, %v7164_v46, -inf }
 0x50c   : > { %6074 = vrot.lane.b32.xlu2 %v6997_v16, %s6656_s14 }
 0x525   : > { %v7135_v24 = vpop.f32.mrf.mxu0 }
 0x53d   : > { %v7137_v27 = vpop.f32.mrf.mxu0 }
 0x547   : > { %v1445_v29 = vpop.f32.mrf.mxu0 }
 0x548   : > { %v1457_v10 = vmul.f32 0.35355338, %v1445_v29 }
 0x54a   : > { %v7141_v31 = vadd.f32 %v1457_v10, %v7122_v6  ;;  %v1663_v53 = vpop.f32.mrf.mxu3 }
 0x54b   : > { %v1675_v7 = vmul.f32 0.35355338, %v1663_v53 }
 0x54c   : > { %v1465_v33 = vsel %vm536_vm0, %v7141_v31, -inf }
 0x54d   : > { %1466 = vmax.xlane.f32.xlu1 %v1465_v33  ;;  %v7197_v19 = vadd.f32 %v1675_v7, %v7122_v6 }
 0x54f   : > { %v1448_v26 = vpop.f32.mrf.mxu0  ;;  %v1683_v28 = vsel %vm536_vm0, %v7197_v19, -inf }
 0x550   : > { %v1458_v35 = vmul.f32 0.35355338, %v1448_v26 }
 0x552   : > { %v7153_v39 = vadd.f32 %v1458_v35, %v7146_v34 }
 0x553   : > { %v1666_v62 = vpop.f32.mrf.mxu3 }
 0x554   : > { %v1468_v44 = vsel %vm536_vm0, %v7153_v39, -inf  ;;  %v1676_v12 = vmul.f32 0.35355338, %v1666_v62 }
 0x555   : > { %1251 = vmax.xlane.f32.xlu1 %v1250_v41  ;;  %1469 = vmax.xlane.f32.xlu2 %v1468_v44 }
 0x556   : > { %v7200_v22 = vadd.f32 %v1676_v12, %v7146_v34 }
 0x557   : > { %v1451_v45 = vpop.f32.mrf.mxu0 }
 0x558   : > { %v1459_v21 = vmul.f32 0.35355338, %v1451_v45  ;;  %v1686_v29 = vsel %vm536_vm0, %v7200_v22, -inf }
 0x55a   : > { %v7170_v47 = vadd.f32 %v1459_v21, %v7167_v43 }
 0x55b   : > { %v1669_v9 = vpop.f32.mrf.mxu3 }
 0x55c   : > { %v1471_v49 = vsel %vm536_vm0, %v7170_v47, -inf  ;;  %v1677_v11 = vmul.f32 0.35355338, %v1669_v9 }
 0x55d   : > { %1257 = vmax.xlane.f32.xlu2 %v1256_v51  ;;  %1472 = vmax.xlane.f32.xlu0 %v1471_v49 }
 0x55e   : > { %v7213_v26 = vadd.f32 %v1677_v11, %v7167_v43 }
 0x55f   : > { %v1454_v50 = vpop.f32.mrf.mxu0 }
 0x560   : > { %v1460_v38 = vmul.f32 0.35355338, %v1454_v50  ;;  %v1689_v40 = vsel %vm536_vm0, %v7213_v26, -inf }
 0x562   : > { %v7182_v57 = vadd.f32 %v1460_v38, %v7161_v17 }
 0x564   : > { %v1474_v61 = vsel %vm536_vm0, %v7182_v57, -inf }
 0x565   : > { %1254 = vmax.xlane.f32.xlu0 %v1253_v59 }
 0x567   : > { %v1249_v54 = vpop.xlane.xlu2 %1248 }
 0x568   : > { %v1881_v56 = vpop.f32.mrf.mxu0  ;;  %v1259_v25 = vsub.f32 %v7125_v42, %v1249_v54  ;;  %v1672_v42 = vpop.f32.mrf.mxu3 }
 0x569   : > { %v1893_v58 = vmul.f32 0.35355338, %v1881_v56  ;;  %v1678_v55 = vmul.f32 0.35355338, %v1672_v42 }
 0x56a   : > { %v1263_v32 = vmul.f32 1.442695, %v1259_v25 }
 0x56b   : > { %v7187_v3 = vadd.f32 %v1893_v58, %v7122_v6  ;;  %v7223_v41 = vadd.f32 %v1678_v55, %v7161_v17 }
 0x56c   : > { %6262 = vpow2.f32 %v1263_v32 }
 0x56d   : > { %1475 = vmax.xlane.f32.xlu0 %v1474_v61  ;;  %v1901_v8 = vsel %vm536_vm0, %v7187_v3, -inf  ;;  %v1692_v45 = vsel %vm536_vm0, %v7223_v41, -inf }
 0x56f   : > { %v6075_v14 = vpop.permute.xlu2 %6074 }
 0x570   : > { %v6076_v63 = vunpack.i.l.bf16 %v6075_v14  ;;  %v1884_v1 = vpop.f32.mrf.mxu0  ;;  %v6077_v5 = vunpack.i.h.bf16 %v6075_v14 }
 0x571   : > { %v1894_v4 = vmul.f32 0.35355338, %v1884_v1 }
 0x572   : > { %1815 = vmatpush.msrb.mxu2 %v6076_v63  ;;  %v7225_v44 = vpop.eup %6262 }
 0x573   : > { %v7190_v2 = vadd.f32 %v1894_v4, %v7146_v34  ;;  %v1271_v21 = vsel %vm536_vm0, %v7225_v44, 0.0 }
 0x574   : > { %1816 = vmatpush.msrb.mxu2 %v6077_v5 }
 0x575   : > { %1902 = vmax.xlane.f32.xlu0 %v1901_v8  ;;  %v1904_v15 = vsel %vm536_vm0, %v7190_v2, -inf }
 0x576   : > { %1905 = vmax.xlane.f32.xlu1 %v1904_v15 }
 0x578   : > { %v1887_v18 = vpop.f32.mrf.mxu0 }
 0x579   : > { %v1895_v20 = vmul.f32 0.35355338, %v1887_v18 }
 0x57b   : > { %v7203_v23 = vadd.f32 %v1895_v20, %v7167_v43 }
 0x57d   : > { %1684 = vmax.xlane.f32.xlu0 %v1683_v28  ;;  %v1907_v10 = vsel %vm536_vm0, %v7203_v23, -inf }
 0x57e   : > { %1687 = vmax.xlane.f32.xlu1 %v1686_v29  ;;  %1908 = vmax.xlane.f32.xlu2 %v1907_v10 }
 0x580   : > { %v1890_v33 = vpop.f32.mrf.mxu0 }
 0x581   : > { %v1896_v0 = vmul.f32 0.35355338, %v1890_v33 }
 0x583   : > { %v7216_v35 = vadd.f32 %v1896_v0, %v7161_v17 }
 0x585   : > { %v1910_v36 = vsel %vm536_vm0, %v7216_v35, -inf }
 0x586   : > { %1690 = vmax.xlane.f32.xlu2 %v1689_v40  ;;  %1911 = vmax.xlane.f32.xlu1 %v1910_v36 }
 0x58e   : > { %1693 = vmax.xlane.f32.xlu2 %v1692_v45  ;;  %1272 = vadd.xlane.f32.xlu1 %v1271_v21 }
 0x591   : > { %6079 = vrot.lane.b32.xlu0 %v7067_v30, %s6659_s21 }
 0x5a6   : > { %6084 = vrot.lane.b32.xlu2 %v7067_v30, %s6656_s14 }
 0x5c0   : > { %v1467_v48 = vpop.xlane.xlu1 %1466 }
 0x5c1   : > { %v1477_v51 = vsub.f32 %v7141_v31, %v1467_v48 }
 0x5c3   : > { %v1481_v49 = vmul.f32 1.442695, %v1477_v51 }
 0x5c5   : > { %6264 = vpow2.f32 %v1481_v49 }
 0x5c8   : > { %v1470_v50 = vpop.xlane.xlu2 %1469  ;;  %v1252_v53 = vpop.xlane.xlu1 %1251 }
 0x5c9   : > { %v1478_v38 = vsub.f32 %v7153_v39, %v1470_v50  ;;  %v1260_v56 = vsub.f32 %v7150_v37, %v1252_v53 }
 0x5cb   : > { %v7237_v59 = vpop.eup %6264  ;;  %v1483_v54 = vmul.f32 1.442695, %v1478_v38  ;;  %v1265_v61 = vmul.f32 1.442695, %v1260_v56 }
 0x5cc   : > { %v1489_v58 = vsel %vm536_vm0, %v7237_v59, 0.0 }
 0x5cd   : > { %6266 = vpow2.f32 %v1483_v54  ;;  %1490 = vadd.xlane.f32.xlu0 %v1489_v58 }
 0x5ce   : > { %6268 = vpow2.f32 %v1265_v61 }
 0x5d0   : > { %v1473_v62 = vpop.xlane.xlu0 %1472  ;;  %v1258_v1 = vpop.xlane.xlu2 %1257 }
 0x5d1   : > { %v1479_v31 = vsub.f32 %v7170_v47, %v1473_v62  ;;  %v1262_v7 = vsub.f32 %v7164_v46, %v1258_v1 }
 0x5d3   : > { %v7243_v14 = vpop.eup %6266  ;;  %v1485_v63 = vmul.f32 1.442695, %v1479_v31  ;;  %v1269_v9 = vmul.f32 1.442695, %v1262_v7 }
 0x5d4   : > { %v1492_v39 = vsel %vm536_vm0, %v7243_v14, 0.0  ;;  %v7247_v4 = vpop.eup %6268 }
 0x5d5   : > { %1493 = vadd.xlane.f32.xlu1 %v1492_v39  ;;  %6270 = vpow2.f32 %v1485_v63  ;;  %v1274_v47 = vsel %vm536_vm0, %v7247_v4, 0.0 }
 0x5d8   : > { %v1255_v37 = vpop.xlane.xlu0 %1254 }
 0x5d9   : > { %v1261_v5 = vsub.f32 %v7177_v52, %v1255_v37 }
 0x5db   : > { %v1267_v8 = vmul.f32 1.442695, %v1261_v5  ;;  %v7251_v12 = vpop.eup %6270 }
 0x5dc   : > { %v1495_v15 = vsel %vm536_vm0, %v7251_v12, 0.0 }
 0x5dd   : > { %6272 = vpow2.f32 %v1267_v8  ;;  %1275 = vadd.xlane.f32.xlu1 %v1274_v47  ;;  %1496 = vadd.xlane.f32.xlu0 %v1495_v15 }
 0x5de   : > { %6274 = vpow2.f32 %v1269_v9 }
 0x5e0   : > { %v1476_v18 = vpop.xlane.xlu0 %1475 }
 0x5e1   : > { %v1480_v20 = vsub.f32 %v7182_v57, %v1476_v18 }
 0x5e3   : > { %v7258_v25 = vpop.eup %6272  ;;  %v1487_v46 = vmul.f32 1.442695, %v1480_v20 }
 0x5e4   : > { %v1277_v52 = vsel %vm536_vm0, %v7258_v25, 0.0  ;;  %v7262_v11 = vpop.eup %6274 }
 0x5e5   : > { %6276 = vpow2.f32 %v1487_v46  ;;  %1278 = vadd.xlane.f32.xlu1 %v1277_v52  ;;  %v1280_v57 = vsel %vm536_vm0, %v7262_v11, 0.0 }
 0x5e8   : > { %v1903_v28 = vpop.xlane.xlu0 %1902 }
 0x5e9   : > { %v7264_v29 = vpop.xlane.xlu1 %1905 }
 0x5ea   : > { %v1914_v5 = vsub.f32 %v7190_v2, %v7264_v29 }
 0x5eb   : > { %v7266_v10 = vpop.eup %6276 }
 0x5ec   : > { %v1498_v32 = vsel %vm536_vm0, %v7266_v10, 0.0  ;;  %v1919_v2 = vmul.f32 1.442695, %v1914_v5 }
 0x5ed   : > { %1499 = vadd.xlane.f32.xlu0 %v1498_v32  ;;  %1281 = vadd.xlane.f32.xlu1 %v1280_v57 }
 0x5f0   : > { %v1685_v33 = vpop.xlane.xlu0 %1684 }
 0x5f1   : > { %v1695_v0 = vsub.f32 %v7197_v19, %v1685_v33  ;;  %v1909_v42 = vpop.xlane.xlu2 %1908  ;;  %v1688_v55 = vpop.xlane.xlu1 %1687 }
 0x5f2   : > { %v1696_v36 = vsub.f32 %v7200_v22, %v1688_v55  ;;  %v1913_v22 = vsub.f32 %v7187_v3, %v1903_v28  ;;  %v1915_v58 = vsub.f32 %v7203_v23, %v1909_v42 }
 0x5f3   : > { %v1699_v40 = vmul.f32 1.442695, %v1695_v0 }
 0x5f4   : > { %v1701_v45 = vmul.f32 1.442695, %v1696_v36  ;;  %v1917_v63 = vmul.f32 1.442695, %v1913_v22 }
 0x5f5   : > { %6278 = vpow2.f32 %v1699_v40 }
 0x5f6   : > { %6280 = vpow2.f32 %v1701_v45 }
 0x5f9   : > { %v1691_v21 = vpop.xlane.xlu2 %1690  ;;  %v1912_v48 = vpop.xlane.xlu1 %1911 }
 0x5fa   : > { %v1697_v49 = vsub.f32 %v7213_v26, %v1691_v21  ;;  %v1916_v47 = vsub.f32 %v7216_v35, %v1912_v48 }
 0x5fb   : > { %v7274_v51 = vpop.eup %6278 }
 0x5fc   : > { %v1707_v50 = vsel %vm536_vm0, %v7274_v51, 0.0  ;;  %v1703_v53 = vmul.f32 1.442695, %v1697_v49  ;;  %v7279_v19 = vpop.eup %6280  ;;  %v1923_v35 = vmul.f32 1.442695, %v1916_v47 }
 0x5fd   : > { %1708 = vadd.xlane.f32.xlu1 %v1707_v50  ;;  %v1710_v31 = vsel %vm536_vm0, %v7279_v19, 0.0 }
 0x601   : > { %v1694_v38 = vpop.xlane.xlu2 %1693  ;;  %v1273_v54 = vpop.xlane.xlu1 %1272  ;;  %6089 = vrot.lane.b32.xlu0 %v6997_v16, %s6658_s20  ;;  %v1921_v16 = vmul.f32 1.442695, %v1915_v58 }
 0x602   : > { %v1698_v56 = vsub.f32 %v7223_v41, %v1694_v38  ;;  %6282 = vrcp.f32 %v1273_v54  ;;  %v1294_v15 = vand.u32 2147483648, %v1273_v54  ;;  %v1292_v46 = vand.u32 2147483647, %v1273_v54 }
 0x603   : > { %6284 = vpow2.f32 %v1703_v53  ;;  %v6080_v26 = vpop.permute.xlu0 %6079  ;;  %vm1288_vm4 = vweird.f32 %v1273_v54 }
 0x604   : > { %v1705_v61 = vmul.f32 1.442695, %v1698_v56  ;;  %v6081_v62 = vunpack.i.l.bf16 %v6080_v26  ;;  %v6082_v39 = vunpack.i.h.bf16 %v6080_v26  ;;  %v1295_v32 = vor.u32 1.1754944e-38, %v1294_v15 }
 0x605   : > { %1711 = vadd.xlane.f32.xlu1 %v1710_v31  ;;  %vm1293_vm6 = vcmp.eq.f32.partialorder %v1292_v46, 8.507059e+37 }
 0x606   : > { %6286 = vpow2.f32 %v1705_v61  ;;  %1599 = vmatpush.msrb.mxu1 %v6081_v62 }
 0x607   : > { %6288 = vpow2.f32 %v1917_v63 }
 0x608   : > { %v6283_v1 = vpop.eup %6282  ;;  %1600 = vmatpush.msrb.mxu1 %v6082_v39  ;;  %6290 = vpow2.f32 %v1921_v16 }
 0x609   : > { %v7288_v3 = vpop.eup %6284  ;;  %v1284_v41 = vmul.f32 %v6283_v1, %v1273_v54  ;;  %v6085_v37 = vpop.permute.xlu2 %6084  ;;  %vm1289_vm2 = vweird.f32 %v6283_v1  ;;  %6292 = vpow2.f32 %v1919_v2 }
 0x60a   : > { %v6086_v23 = vunpack.i.l.bf16 %v6085_v37  ;;  %v6087_v9 = vunpack.i.h.bf16 %v6085_v37  ;;  %v1713_v18 = vsel %vm536_vm0, %v7288_v3, 0.0  ;;  %vm1290_vm5 = vmor %vm1288_vm4, %vm1289_vm2  ;;  %6294 = vpow2.f32 %v1923_v35 }
 0x60b   : > { %v1285_v7 = vsub.f32 1.0, %v1284_v41 }
 0x60c   : > { %v7292_v8 = vpop.eup %6286  ;;  %1817 = vmatpush.msrb.mxu2 %v6086_v23 }
 0x60d   : > { %v1286_v20 = vmul.f32 %v6283_v1, %v1285_v7  ;;  %v1716_v52 = vsel %vm536_vm0, %v7292_v8, 0.0  ;;  %1714 = vadd.xlane.f32.xlu1 %v1713_v18  ;;  %v7299_v29 = vpop.eup %6288 }
 0x60e   : > { %1717 = vadd.xlane.f32.xlu2 %v1716_v52  ;;  %1818 = vmatpush.msrb.mxu2 %v6087_v9  ;;  %v7301_v57 = vpop.eup %6290  ;;  %v1925_v55 = vsel %vm536_vm0, %v7299_v29, 0.0 }
 0x60f   : > { %v1287_v28 = vadd.f32 %v6283_v1, %v1286_v20  ;;  %v1931_v40 = vsel %vm536_vm0, %v7301_v57, 0.0  ;;  %v7309_v36 = vpop.eup %6292 }
 0x610   : > { %v7311_v45 = vpop.eup %6294  ;;  %v1928_v21 = vsel %vm536_vm0, %v7309_v36, 0.0 }
 0x611   : > { %v1291_v33 = vsel %vm1290_vm5, %v6283_v1, %v1287_v28 }
 0x612   : > { %v1296_v0 = vsel %vm1293_vm6, %v1295_v32, %v1291_v33 }
 0x613   : > { %v1297_v42 = vmul.f32 %v7225_v44, %v1296_v0  ;;  %v1934_v44 = vsel %vm536_vm0, %v7311_v45, 0.0 }
 0x615   : > { %5749 = vmatmul.msk.f32.vlgmr.msra.gmra.mxu2 %vm536_vm0, %v1297_v42  ;;  %1926 = vadd.xlane.f32.xlu1 %v1925_v55 }
 0x616   : > { %1932 = vadd.xlane.f32.xlu2 %v1931_v40 }
 0x61d   : > { %1929 = vadd.xlane.f32.xlu1 %v1928_v21 }
 0x61e   : > { %1935 = vadd.xlane.f32.xlu2 %v1934_v44 }
 0x636   : > { %6094 = vrot.lane.b32.xlu1 %v7067_v30, %s6658_s20 }
 0x640   : > { %v1491_v48 = vpop.xlane.xlu0 %1490 }
 0x641   : > { %6296 = vrcp.f32 %v1491_v48  ;;  %v1512_v54 = vand.u32 2147483648, %v1491_v48  ;;  %v1510_v56 = vand.u32 2147483647, %v1491_v48  ;;  %vm1506_vm8 = vweird.f32 %v1491_v48 }
 0x643   : > { %v1513_v61 = vor.u32 1.1754944e-38, %v1512_v54  ;;  %vm1511_vm10 = vcmp.eq.f32.partialorder %v1510_v56, 8.507059e+37 }
 0x647   : > { %v6297_v49 = vpop.eup %6296 }
 0x648   : > { %v1502_v50 = vmul.f32 %v6297_v49, %v1491_v48  ;;  %v1494_v53 = vpop.xlane.xlu1 %1493  ;;  %vm1507_vm7 = vweird.f32 %v6297_v49 }
 0x649   : > { %6298 = vrcp.f32 %v1494_v53  ;;  %vm1508_vm9 = vmor %vm1506_vm8, %vm1507_vm7  ;;  %v1527_v41 = vand.u32 2147483648, %v1494_v53  ;;  %v1525_v23 = vand.u32 2147483647, %v1494_v53  ;;  %vm1521_vm13 = vweird.f32 %v1494_v53 }
 0x64a   : > { %v1503_v38 = vsub.f32 1.0, %v1502_v50 }
 0x64b   : > { %v1528_v47 = vor.u32 1.1754944e-38, %v1527_v41  ;;  %vm1526_vm15 = vcmp.eq.f32.partialorder %v1525_v23, 8.507059e+37 }
 0x64c   : > { %v1504_v22 = vmul.f32 %v6297_v49, %v1503_v38 }
 0x64e   : > { %v1505_v58 = vadd.f32 %v6297_v49, %v1504_v22 }
 0x64f   : > { %v6299_v26 = vpop.eup %6298 }
 0x650   : > { %v1509_v62 = vsel %vm1508_vm9, %v6297_v49, %v1505_v58  ;;  %v1517_v31 = vmul.f32 %v6299_v26, %v1494_v53  ;;  %v1276_v30 = vpop.xlane.xlu1 %1275  ;;  %v1497_v63 = vpop.xlane.xlu0 %1496  ;;  %vm1522_vm12 = vweird.f32 %v6299_v26 }
 0x651   : > { %6300 = vrcp.f32 %v1276_v30  ;;  %v1514_v39 = vsel %vm1511_vm10, %v1513_v61, %v1509_v62  ;;  %vm1523_vm14 = vmor %vm1521_vm13, %vm1522_vm12  ;;  %v1309_v35 = vand.u32 2147483648, %v1276_v30  ;;  %v1307_v33 = vand.u32 2147483647, %v1276_v30 }
 0x652   : > { %v1518_v16 = vsub.f32 1.0, %v1517_v31  ;;  %6302 = vrcp.f32 %v1497_v63  ;;  %v1515_v1 = vmul.f32 %v7237_v59, %v1514_v39  ;;  %v1542_v0 = vand.u32 2147483648, %v1497_v63 }
 0x653   : > { %v1540_v55 = vand.u32 2147483647, %v1497_v63  ;;  %vm1303_vm5 = vweird.f32 %v1276_v30  ;;  %v1310_v44 = vor.u32 1.1754944e-38, %v1309_v35  ;;  %vm1536_vm7 = vweird.f32 %v1497_v63 }
 0x654   : > { %5761 = vmatmul.msk.f32.vlgmr.msrb.gmra.mxu1 %vm536_vm0, %v1515_v1  ;;  %v1519_v37 = vmul.f32 %v6299_v26, %v1518_v16  ;;  %vm1308_vm8 = vcmp.eq.f32.partialorder %v1307_v33, 8.507059e+37  ;;  %v1543_v38 = vor.u32 1.1754944e-38, %v1542_v0 }
 0x655   : > { %vm1541_vm10 = vcmp.eq.f32.partialorder %v1540_v55, 8.507059e+37 }
 0x656   : > { %v1520_v5 = vadd.f32 %v6299_v26, %v1519_v37 }
 0x657   : > { %v6301_v7 = vpop.eup %6300 }
 0x658   : > { %v6303_v15 = vpop.eup %6302  ;;  %v1299_v9 = vmul.f32 %v6301_v7, %v1276_v30  ;;  %v1279_v18 = vpop.xlane.xlu1 %1278  ;;  %v1524_v20 = vsel %vm1523_vm14, %v6299_v26, %v1520_v5  ;;  %vm1304_vm2 = vweird.f32 %v6301_v7 }
 0x659   : > { %v1532_v46 = vmul.f32 %v6303_v15, %v1497_v63  ;;  %6304 = vrcp.f32 %v1279_v18  ;;  %v1529_v52 = vsel %vm1526_vm15, %v1528_v47, %v1524_v20  ;;  %vm1537_vm4 = vweird.f32 %v6303_v15  ;;  %vm1305_vm6 = vmor %vm1303_vm5, %vm1304_vm2 }
 0x65a   : > { %v1300_v59 = vsub.f32 1.0, %v1299_v9  ;;  %v1530_v2 = vmul.f32 %v7243_v14, %v1529_v52  ;;  %vm1538_vm9 = vmor %vm1536_vm7, %vm1537_vm4  ;;  %v1324_v62 = vand.u32 2147483648, %v1279_v18  ;;  %v1322_v30 = vand.u32 2147483647, %v1279_v18 }
 0x65b   : > { %v1533_v28 = vsub.f32 1.0, %v1532_v46  ;;  %vm1318_vm13 = vweird.f32 %v1279_v18 }
 0x65c   : > { %5762 = vmatmul.msk.f32.gmra.mxu1 %vm536_vm0, %v1530_v2  ;;  %v1301_v32 = vmul.f32 %v6301_v7, %v1300_v59  ;;  %v1325_v16 = vor.u32 1.1754944e-38, %v1324_v62  ;;  %vm1323_vm15 = vcmp.eq.f32.partialorder %v1322_v30, 8.507059e+37 }
 0x65d   : > { %v1534_v42 = vmul.f32 %v6303_v15, %v1533_v28 }
 0x65e   : > { %v1302_v40 = vadd.f32 %v6301_v7, %v1301_v32 }
 0x65f   : > { %v6305_v21 = vpop.eup %6304  ;;  %v1535_v48 = vadd.f32 %v6303_v15, %v1534_v42 }
 0x660   : > { %v1314_v49 = vmul.f32 %v6305_v21, %v1279_v18  ;;  %v1500_v14 = vpop.xlane.xlu0 %1499  ;;  %v1282_v50 = vpop.xlane.xlu1 %1281  ;;  %v1306_v53 = vsel %vm1305_vm6, %v6301_v7, %v1302_v40  ;;  %vm1319_vm12 = vweird.f32 %v6305_v21 }
 0x661   : > { %6306 = vrcp.f32 %v1500_v14  ;;  %v1311_v54 = vsel %vm1308_vm8, %v1310_v44, %v1306_v53  ;;  %v1539_v22 = vsel %vm1538_vm9, %v6303_v15, %v1535_v48  ;;  %vm1320_vm14 = vmor %vm1318_vm13, %vm1319_vm12  ;;  %v1557_v15 = vand.u32 2147483648, %v1500_v14 }
 0x662   : > { %v1315_v56 = vsub.f32 1.0, %v1314_v49  ;;  %6308 = vrcp.f32 %v1282_v50  ;;  %v1312_v58 = vmul.f32 %v7247_v4, %v1311_v54  ;;  %v1544_v26 = vsel %vm1541_vm10, %v1543_v38, %v1539_v22  ;;  %v2155_v22 = vld [vmem:[#allocation2 + $0x50] sm:$0xff] }
 0x663   : > { %v1545_v61 = vmul.f32 %v7251_v12, %v1544_v26  ;;  %v1339_v18 = vand.u32 2147483648, %v1282_v50  ;;  %v1555_v20 = vand.u32 2147483647, %v1500_v14  ;;  %v1337_v46 = vand.u32 2147483647, %v1282_v50  ;;  %v2154_v26 = vld [vmem:[#allocation2 + $0x48] sm:$0xff] }
 0x664   : > { %5750 = vmatmul.msk.f32.gmra.mxu2 %vm536_vm0, %v1312_v58  ;;  %v1316_v31 = vmul.f32 %v6305_v21, %v1315_v56  ;;  %vm1551_vm5 = vweird.f32 %v1500_v14  ;;  %vm1333_vm7 = vweird.f32 %v1282_v50  ;;  %v1558_v35 = vor.u32 1.1754944e-38, %v1557_v15 }
 0x665   : > { %5763 = vmatmul.msk.f32.gmra.mxu1 %vm536_vm0, %v1545_v61  ;;  %vm1556_vm9 = vcmp.eq.f32.partialorder %v1555_v20, 8.507059e+37  ;;  %vm1338_vm10 = vcmp.eq.f32.partialorder %v1337_v46, 8.507059e+37 }
 0x666   : > { %v1317_v63 = vadd.f32 %v6305_v21, %v1316_v31 }
 0x667   : > { %v6307_v39 = vpop.eup %6306 }
 0x668   : > { %v6309_v1 = vpop.eup %6308  ;;  %v1547_v41 = vmul.f32 %v6307_v39, %v1500_v14  ;;  %v1321_v37 = vsel %vm1320_vm14, %v6305_v21, %v1317_v63  ;;  %vm1552_vm2 = vweird.f32 %v6307_v39 }
 0x669   : > { %v1329_v4 = vmul.f32 %v6309_v1, %v1282_v50  ;;  %v1326_v23 = vsel %vm1323_vm15, %v1325_v16, %v1321_v37  ;;  %vm1334_vm4 = vweird.f32 %v6309_v1  ;;  %vm1553_vm6 = vmor %vm1551_vm5, %vm1552_vm2 }
 0x66a   : > { %v1548_v12 = vsub.f32 1.0, %v1547_v41  ;;  %v1327_v5 = vmul.f32 %v7258_v25, %v1326_v23  ;;  %vm1335_vm8 = vmor %vm1333_vm7, %vm1334_vm4  ;;  %v1340_v25 = vor.u32 1.1754944e-38, %v1339_v18 }
 0x66b   : > { %v1330_v7 = vsub.f32 1.0, %v1329_v4 }
 0x66c   : > { %5751 = vmatmul.msk.f32.gmra.mxu2 %vm536_vm0, %v1327_v5  ;;  %v1549_v47 = vmul.f32 %v6307_v39, %v1548_v12 }
 0x66d   : > { %v1331_v9 = vmul.f32 %v6309_v1, %v1330_v7 }
 0x66e   : > { %v1550_v52 = vadd.f32 %v6307_v39, %v1549_v47 }
 0x66f   : > { %v1332_v59 = vadd.f32 %v6309_v1, %v1331_v9 }
 0x670   : > { %v1709_v2 = vpop.xlane.xlu1 %1708  ;;  %v1554_v28 = vsel %vm1553_vm6, %v6307_v39, %v1550_v52 }
 0x671   : > { %6310 = vrcp.f32 %v1709_v2  ;;  %v1336_v32 = vsel %vm1335_vm8, %v6309_v1, %v1332_v59  ;;  %v1559_v33 = vsel %vm1556_vm9, %v1558_v35, %v1554_v28  ;;  %v1730_v53 = vand.u32 2147483648, %v1709_v2  ;;  %v2153_v1 = vld [vmem:[#allocation2 + $0x40] sm:$0xff] }
 0x672   : > { %v1341_v42 = vsel %vm1338_vm10, %v1340_v25, %v1336_v32  ;;  %v1560_v55 = vmul.f32 %v7266_v10, %v1559_v33  ;;  %v1728_v54 = vand.u32 2147483647, %v1709_v2  ;;  %v2156_v10 = vld [vmem:[#allocation2 + $0x58] sm:$0xff]  ;;  %vm1724_vm13 = vweird.f32 %v1709_v2 }
 0x673   : > { %v6090_v0 = vpop.permute.xlu0 %6089  ;;  %v1342_v21 = vmul.f32 %v7262_v11, %v1341_v42  ;;  %2180 = vmatpush.msra.mxu2 %v2156_v10  ;;  %v1731_v58 = vor.u32 1.1754944e-38, %v1730_v53  ;;  %v7349_v10 = vld [vmem:[#allocation6 + $0x8] sm:$0xff] }
 0x674   : > { %v6091_v40 = vunpack.i.l.bf16 %v6090_v0  ;;  %5764 = vmatmul.msk.f32.gmra.mxu1 %vm536_vm0, %v1560_v55  ;;  %v6092_v44 = vunpack.i.h.bf16 %v6090_v0  ;;  %vm1729_vm15 = vcmp.eq.f32.partialorder %v1728_v54, 8.507059e+37 }
 0x675   : > { %5752 = vmatmul.msk.f32.gmra.mxu2 %vm536_vm0, %v1342_v21 }
 0x676   : > { %2033 = vmatpush.msra.mxu1 %v6091_v40  ;;  %2181 = vmatpush.msra.mxu2 %v2155_v22 }
 0x677   : > { %v6311_v48 = vpop.eup %6310 }
 0x678   : > { %v1720_v49 = vmul.f32 %v6311_v48, %v1709_v2  ;;  %v1712_v14 = vpop.xlane.xlu1 %1711  ;;  %2034 = vmatpush.msra.mxu1 %v6092_v44  ;;  %vm1725_vm12 = vweird.f32 %v6311_v48  ;;  %2182 = vmatpush.msra.mxu2 %v2154_v26 }
 0x679   : > { %6312 = vrcp.f32 %v1712_v14  ;;  %vm1726_vm14 = vmor %vm1724_vm13, %vm1725_vm12  ;;  %v1745_v37 = vand.u32 2147483648, %v1712_v14  ;;  %v1743_v4 = vand.u32 2147483647, %v1712_v14  ;;  %vm1739_vm4 = vweird.f32 %v1712_v14 }
 0x67a   : > { %v1721_v50 = vsub.f32 1.0, %v1720_v49  ;;  %2183 = vmatpush.msra.mxu2 %v2153_v1 }
 0x67b   : > { %v1746_v9 = vor.u32 1.1754944e-38, %v1745_v37  ;;  %vm1744_vm6 = vcmp.eq.f32.partialorder %v1743_v4, 8.507059e+37 }
 0x67c   : > { %v1722_v38 = vmul.f32 %v6311_v48, %v1721_v50 }
 0x67e   : > { %v1723_v56 = vadd.f32 %v6311_v48, %v1722_v38 }
 0x67f   : > { %v6313_v11 = vpop.eup %6312 }
 0x680   : > { %v1727_v61 = vsel %vm1726_vm14, %v6311_v48, %v1723_v56  ;;  %v1735_v62 = vmul.f32 %v6313_v11, %v1712_v14  ;;  %v1715_v31 = vpop.xlane.xlu1 %1714  ;;  %vm1740_vm2 = vweird.f32 %v6313_v11 }
 0x681   : > { %v1718_v30 = vpop.xlane.xlu2 %1717  ;;  %6314 = vrcp.f32 %v1715_v31  ;;  %v1732_v63 = vsel %vm1729_vm15, %v1731_v58, %v1727_v61  ;;  %vm1741_vm5 = vmor %vm1739_vm4, %vm1740_vm2  ;;  %v1760_v59 = vand.u32 2147483648, %v1715_v31  ;;  %v1758_v28 = vand.u32 2147483647, %v1715_v31 }
 0x682   : > { %v1736_v39 = vsub.f32 1.0, %v1735_v62  ;;  %6316 = vrcp.f32 %v1718_v30  ;;  %v1733_v16 = vmul.f32 %v7274_v51, %v1732_v63  ;;  %vm1754_vm8 = vweird.f32 %v1715_v31 }
 0x683   : > { %v1761_v32 = vor.u32 1.1754944e-38, %v1760_v59  ;;  %vm1759_vm10 = vcmp.eq.f32.partialorder %v1758_v28, 8.507059e+37  ;;  %v1775_v40 = vand.u32 2147483648, %v1718_v30  ;;  %vm1769_vm13 = vweird.f32 %v1718_v30 }
 0x684   : > { %5773 = vmatmul.msk.f32.vlgmr.msrb.gmra.mxu2 %vm536_vm0, %v1733_v16  ;;  %v1737_v41 = vmul.f32 %v6313_v11, %v1736_v39  ;;  %v1773_v44 = vand.u32 2147483647, %v1718_v30 }
 0x685   : > { %v1776_v14 = vor.u32 1.1754944e-38, %v1775_v40 }
 0x686   : > { %v1738_v23 = vadd.f32 %v6313_v11, %v1737_v41  ;;  %vm1774_vm15 = vcmp.eq.f32.partialorder %v1773_v44, 8.507059e+37 }
 0x687   : > { %v6315_v12 = vpop.eup %6314 }
 0x688   : > { %v6317_v5 = vpop.eup %6316  ;;  %v1750_v7 = vmul.f32 %v6315_v12, %v1715_v31  ;;  %v7335_v47 = vpop.xlane.xlu1 %1926  ;;  %v1742_v15 = vsel %vm1741_vm5, %v6313_v11, %v1738_v23  ;;  %vm1755_vm7 = vweird.f32 %v6315_v12  ;;  %v1101_v11 = vperm.slane %v7349_v10, 0 }
 0x689   : > { %v1765_v51 = vmul.f32 %v6317_v5, %v1718_v30  ;;  %v1747_v20 = vsel %vm1744_vm6, %v1746_v9, %v1742_v15  ;;  %6318 = vrcp.f32 %v7335_v47  ;;  %vm1756_vm9 = vmor %vm1754_vm8, %vm1755_vm7  ;;  %vm1770_vm12 = vweird.f32 %v6317_v5  ;;  %v7346_v50 = vpop.xlane.xlu2 %1932 }
 0x68a   : > { %v1751_v18 = vsub.f32 1.0, %v1750_v7  ;;  %v1748_v52 = vmul.f32 %v7279_v19, %v1747_v20  ;;  %vm1771_vm14 = vmor %vm1769_vm13, %vm1770_vm12  ;;  %v7358_v31 = vadd.f32 %v7135_v24, %v1101_v11  ;;  %vm1942_vm4 = vweird.f32 %v7335_v47 }
 0x68b   : > { %v1766_v46 = vsub.f32 1.0, %v1765_v51  ;;  %v1946_v30 = vand.u32 2147483647, %v7335_v47  ;;  %v1978_v59 = vand.u32 2147483648, %v7346_v50  ;;  %vm1972_vm13 = vweird.f32 %v7346_v50 }
 0x68c   : > { %v1752_v2 = vmul.f32 %v6315_v12, %v1751_v18  ;;  %5774 = vmatmul.msk.f32.gmra.mxu2 %vm536_vm0, %v1748_v52  ;;  %v1976_v28 = vand.u32 2147483647, %v7346_v50 }
 0x68d   : > { %v1767_v35 = vmul.f32 %v6317_v5, %v1766_v46  ;;  %vm1947_vm6 = vcmp.eq.f32.partialorder %v1946_v30, 8.507059e+37 }
 0x68e   : > { %v1753_v25 = vadd.f32 %v6315_v12, %v1752_v2 }
 0x68f   : > { %v1768_v42 = vadd.f32 %v6317_v5, %v1767_v35  ;;  %v6319_v21 = vpop.eup %6318 }
 0x690   : > { %v1757_v33 = vsel %vm1756_vm9, %v6315_v12, %v1753_v25  ;;  %v7340_v55 = vpop.xlane.xlu1 %1929  ;;  %v1938_v49 = vmul.f32 %v6319_v21, %v7335_v47  ;;  %vm1943_vm2 = vweird.f32 %v6319_v21 }
 0x691   : > { %v1762_v0 = vsel %vm1759_vm10, %v1761_v32, %v1757_v33  ;;  %6320 = vrcp.f32 %v7340_v55  ;;  %v1772_v48 = vsel %vm1771_vm14, %v6317_v5, %v1768_v42  ;;  %v7355_v26 = vpop.xlane.xlu2 %1935  ;;  %vm1944_vm5 = vmor %vm1942_vm4, %vm1943_vm2  ;;  %v7368_v5 = vadd.f32 %v7137_v27, %v1101_v11 }
 0x692   : > { %v1763_v19 = vmul.f32 %v7288_v3, %v1762_v0  ;;  %v1777_v53 = vsel %vm1774_vm15, %v1776_v14, %v1772_v48  ;;  %v1939_v38 = vsub.f32 1.0, %v1938_v49  ;;  %6322 = vrcp.f32 %v7346_v50 }
 0x693   : > { %v1778_v3 = vmul.f32 %v7292_v8, %v1777_v53  ;;  %v1948_v8 = vand.u32 2147483648, %v7335_v47  ;;  %6324 = vrcp.f32 %v7355_v26  ;;  %v1963_v47 = vand.u32 2147483648, %v7340_v55 }
 0x694   : > { %5775 = vmatmul.msk.f32.gmra.mxu2 %vm536_vm0, %v1763_v19  ;;  %v1940_v22 = vmul.f32 %v6319_v21, %v1939_v38  ;;  %vm1957_vm8 = vweird.f32 %v7340_v55  ;;  %v1961_v9 = vand.u32 2147483647, %v7340_v55  ;;  %v1979_v32 = vor.u32 1.1754944e-38, %v1978_v59 }
 0x695   : > { %v1949_v1 = vor.u32 1.1754944e-38, %v1948_v8  ;;  %v1964_v20 = vor.u32 1.1754944e-38, %v1963_v47  ;;  %vm1977_vm15 = vcmp.eq.f32.partialorder %v1976_v28, 8.507059e+37  ;;  %v1993_v42 = vand.u32 2147483648, %v7355_v26 }
 0x696   : > { %v1941_v58 = vadd.f32 %v6319_v21, %v1940_v22  ;;  %vm1962_vm10 = vcmp.eq.f32.partialorder %v1961_v9, 8.507059e+37  ;;  %vm1987_vm4 = vweird.f32 %v7355_v26 }
 0x697   : > { %v6321_v54 = vpop.eup %6320  ;;  %v1994_v40 = vor.u32 1.1754944e-38, %v1993_v42 }
 0x698   : > { %v1953_v56 = vmul.f32 %v6321_v54, %v7340_v55  ;;  %v6323_v62 = vpop.eup %6322  ;;  %v1945_v39 = vsel %vm1944_vm5, %v6319_v21, %v1941_v58  ;;  %vm1958_vm7 = vweird.f32 %v6321_v54  ;;  %v1384_v14 = vpop.f32.mrf.mxu2 }
 0x699   : > { %v1968_v63 = vmul.f32 %v6323_v62, %v7346_v50  ;;  %v1950_v37 = vsel %vm1947_vm6, %v1949_v1, %v1945_v39  ;;  %v6325_v12 = vpop.eup %6324  ;;  %vm1959_vm9 = vmor %vm1957_vm8, %vm1958_vm7  ;;  %vm1973_vm12 = vweird.f32 %v6323_v62  ;;  %v1138_v1 = vld [vmem:[#allocation4 + $0x28] sm:$0xff] }
 0x69a   : > { %v1954_v61 = vsub.f32 1.0, %v1953_v56  ;;  %v1951_v15 = vmul.f32 %v7299_v29, %v1950_v37  ;;  %v1983_v51 = vmul.f32 %v6325_v12, %v7355_v26  ;;  %vm1974_vm14 = vmor %vm1972_vm13, %vm1973_vm12  ;;  %vm1988_vm2 = vweird.f32 %v6325_v12 }
 0x69b   : > { %v1969_v4 = vsub.f32 1.0, %v1968_v63  ;;  %vm1989_vm5 = vmor %vm1987_vm4, %vm1988_vm2  ;;  %v1140_v63 = vld [vmem:[#allocation4 + $0x38] sm:$0xff] }
 0x69c   : > { %5776 = vmatmul.msk.f32.gmra.mxu2 %vm536_vm0, %v1778_v3  ;;  %v1955_v16 = vmul.f32 %v6321_v54, %v1954_v61  ;;  %v1984_v52 = vsub.f32 1.0, %v1983_v51  ;;  %2135 = vmatpush.msra.mxu3 %v1140_v63 }
 0x69d   : > { %v1970_v18 = vmul.f32 %v6323_v62, %v1969_v4 }
 0x69e   : > { %v1956_v23 = vadd.f32 %v6321_v54, %v1955_v16  ;;  %v1985_v25 = vmul.f32 %v6325_v12, %v1984_v52  ;;  %v1139_v16 = vld [vmem:[#allocation4 + $0x30] sm:$0xff] }
 0x69f   : > { %v1971_v29 = vadd.f32 %v6323_v62, %v1970_v18  ;;  %2136 = vmatpush.msra.mxu3 %v1139_v16 }
 0x6a0   : > { %v1960_v27 = vsel %vm1959_vm9, %v6321_v54, %v1956_v23  ;;  %v1986_v0 = vadd.f32 %v6325_v12, %v1985_v25 }
 0x6a1   : > { %v1965_v46 = vsel %vm1962_vm10, %v1964_v20, %v1960_v27  ;;  %v1975_v35 = vsel %vm1974_vm14, %v6323_v62, %v1971_v29  ;;  %2137 = vmatpush.msra.mxu3 %v1138_v1 }
 0x6a2   : > { %v1966_v2 = vmul.f32 %v7309_v36, %v1965_v46  ;;  %v1980_v33 = vsel %vm1977_vm15, %v1979_v32, %v1975_v35  ;;  %v1991_v36 = vand.u32 2147483647, %v7355_v26  ;;  %v1990_v19 = vsel %vm1989_vm5, %v6325_v12, %v1986_v0 }
 0x6a3   : > { %v1981_v55 = vmul.f32 %v7301_v57, %v1980_v33 }
 0x6a4   : > { %5793 = vmatmul.msk.f32.vlgmr.msra.gmra.mxu2 %vm536_vm0, %v7358_v31  ;;  %vm1992_vm6 = vcmp.eq.f32.partialorder %v1991_v36, 8.507059e+37 }
 0x6a5   : > { %v1995_v21 = vsel %vm1992_vm6, %v1994_v40, %v1990_v19 }
 0x6a6   : > { %v1996_v44 = vmul.f32 %v7311_v45, %v1995_v21 }
 0x6a8   : > { %v6095_v24 = vpop.permute.xlu1 %6094 }
 0x6a9   : > { %v6096_v41 = vunpack.i.l.bf16 %v6095_v24  ;;  %v6097_v7 = vunpack.i.h.bf16 %v6095_v24  ;;  %v1137_v24 = vld [vmem:[#allocation4 + $0x20] sm:$0xff] }
 0x6aa   : > { %2138 = vmatpush.msra.mxu3 %v1137_v24 }
 0x6ab   : > { %2035 = vmatpush.msra.mxu1 %v6096_v41 }
 0x6ac   : > { %5794 = vmatmul.msk.f32.gmra.mxu2 %vm536_vm0, %v7368_v5 }
 0x6ad   : > { %2036 = vmatpush.msra.mxu1 %v6097_v7 }
 0x6ae   : > { %5785 = vmatmul.msk.f32.vlgmr.msra.gmra.mxu1 %vm536_vm0, %v1951_v15 }
 0x6b6   : > { %5786 = vmatmul.msk.f32.gmra.mxu1 %vm536_vm0, %v1966_v2 }
 0x6be   : > { %5787 = vmatmul.msk.f32.gmra.mxu1 %vm536_vm0, %v1981_v55 }
 0x6c6   : > { %5788 = vmatmul.msk.f32.gmra.mxu1 %vm536_vm0, %v1996_v44 }
 0x6d1   : > { %v1602_v48 = vpop.f32.mrf.mxu1 }
 0x6d2   : > { %2054 = vrot.lane.b32.xlu2 %v1602_v48, %s6661_s23 }
 0x6d9   : > { %v1605_v49 = vpop.f32.mrf.mxu1 }
 0x6da   : > { %2056 = vrot.lane.b32.xlu1 %v1605_v49, %s6661_s23 }
 0x6e2   : > { %v1608_v57 = vpop.f32.mrf.mxu1 }
 0x6e3   : > { %2058 = vrot.lane.b32.xlu2 %v1608_v57, %s6661_s23 }
 0x6e7   : > { %v1387_v50 = vpop.f32.mrf.mxu2 }
 0x6ef   : > { %v7393_v53 = vpop.f32.mrf.mxu2 }
 0x6f1   : > { %v1611_v56 = vpop.f32.mrf.mxu1 }
 0x6f8   : > { %v7395_v38 = vpop.f32.mrf.mxu2 }
 0x707   : > { %v1820_v54 = vpop.f32.mrf.mxu2 }
 0x70f   : > { %v1823_v3 = vpop.f32.mrf.mxu2 }
 0x717   : > { %v1826_v45 = vpop.f32.mrf.mxu2 }
 0x71f   : > { %v1829_v22 = vpop.f32.mrf.mxu2 }
 0x727   : > { %v7397_v11 = vpop.f32.mrf.mxu2 }
 0x72b   : > { %v2038_v58 = vpop.f32.mrf.mxu1 }
 0x72c   : > { %2086 = vrot.lane.b32.xlu0 %v2038_v58, %s6662_s26  ;;  %v2055_v30 = vpop.permute.xlu2 %2054 }
 0x72d   : > { %v2098_v23 = vsel %vm572_vm1, %v1384_v14, %v2055_v30 }
 0x72f   : > { %v7400_v26 = vpop.f32.mrf.mxu2 }
 0x730   : > { %2195 = vrot.lane.b32.xlu2 %v7400_v26, %s6652_s8 }
 0x733   : > { %v2041_v61 = vpop.f32.mrf.mxu1 }
 0x734   : > { %2070 = vrot.lane.b32.xlu0 %v1820_v54, %s6660_s22  ;;  %2088 = vrot.lane.b32.xlu1 %v2041_v61, %s6662_s26 }
 0x738   : > { %2076 = vrot.lane.b32.xlu2 %v1829_v22, %s6660_s22 }
 0x73b   : > { %v2044_v62 = vpop.f32.mrf.mxu1 }
 0x73c   : > { %2072 = vrot.lane.b32.xlu0 %v1823_v3, %s6660_s22  ;;  %2090 = vrot.lane.b32.xlu1 %v2044_v62, %s6662_s26 }
 0x73d   : > { %v2059_v39 = vpop.permute.xlu2 %2058 }
 0x73e   : > { %v2100_v29 = vsel %vm572_vm1, %v7393_v53, %v2059_v39 }
 0x740   : > { %2445 = vrot.lane.b32.xlu2 %v7397_v11, %s6648_s27 }
 0x743   : > { %v2047_v8 = vpop.f32.mrf.mxu1 }
 0x744   : > { %2074 = vrot.lane.b32.xlu0 %v1826_v45, %s6660_s22  ;;  %2060 = vrot.lane.b32.xlu1 %v1611_v56, %s6661_s23 }
 0x748   : > { %2321 = vrot.lane.b32.xlu2 %v7400_v26, %s6650_s29 }
 0x74c   : > { %2193 = vrot.lane.b32.xlu0 %v7397_v11, %s6652_s8  ;;  %2447 = vrot.lane.b32.xlu1 %v7400_v26, %s6648_s27  ;;  %v2057_v37 = vpop.permute.xlu1 %2056 }
 0x74d   : > { %v2099_v51 = vsel %vm572_vm1, %v1387_v50, %v2057_v37 }
 0x750   : > { %2317 = vrot.lane.b32.xlu2 %v7400_v26, %s6649_s28 }
 0x754   : > { %2443 = vrot.lane.b32.xlu1 %v7400_v26, %s6651_s30  ;;  %2092 = vrot.lane.b32.xlu0 %v2047_v8, %s6662_s26 }
 0x758   : > { %2567 = vrot.lane.b32.xlu2 %v7397_v11, %s6654_s10 }
 0x75c   : > { %2315 = vrot.lane.b32.xlu1 %v7397_v11, %s6649_s28  ;;  %2441 = vrot.lane.b32.xlu0 %v7397_v11, %s6651_s30 }
 0x764   : > { %2571 = vrot.lane.b32.xlu1 %v7397_v11, %s6653_s9  ;;  %2319 = vrot.lane.b32.xlu0 %v7397_v11, %s6650_s29 }
 0x76c   : > { %2573 = vrot.lane.b32.xlu0 %v7400_v26, %s6653_s9 }
 0x774   : > { %2569 = vrot.lane.b32.xlu0 %v7400_v26, %s6654_s10 }
 0x78a   : > { %v2196_v41 = vpop.permute.xlu2 %2195 }
 0x78b   : > { %5795 = vmatpush.xpose.msk.msra.mxu0 %vm572_vm1, %v2196_v41 }
 0x792   : > { %v2077_v9 = vpop.permute.xlu2 %2076 }
 0x79a   : > { %v2446_v52 = vpop.permute.xlu2 %2445 }
 0x79e   : > { %v2087_v4 = vpop.permute.xlu0 %2086 }
 0x7a2   : > { %v2322_v33 = vpop.permute.xlu2 %2321 }
 0x7a6   : > { %v2071_v12 = vpop.permute.xlu0 %2070  ;;  %v2089_v7 = vpop.permute.xlu1 %2088 }
 0x7a7   : > { %v2102_v47 = vsel %vm608_vm3, %v2098_v23, %v2071_v12 }
 0x7a8   : > { %v2106_v15 = vsel %vm1098_vm11, %v2102_v47, %v2087_v4 }
 0x7a9   : > { %5789 = vmatmul.msk.f32.vlgmr.msra.gmra.mxu3 %vm536_vm0, %v2106_v15 }
 0x7aa   : > { %v2318_v49 = vpop.permute.xlu2 %2317 }
 0x7ae   : > { %v2073_v27 = vpop.permute.xlu0 %2072  ;;  %v2091_v18 = vpop.permute.xlu1 %2090 }
 0x7af   : > { %v2103_v20 = vsel %vm608_vm3, %v2099_v51, %v2073_v27 }
 0x7b0   : > { %v2107_v46 = vsel %vm1098_vm11, %v2103_v20, %v2089_v7 }
 0x7b1   : > { %5790 = vmatmul.msk.f32.gmra.mxu3 %vm536_vm0, %v2107_v46 }
 0x7b2   : > { %v2568_v14 = vpop.permute.xlu2 %2567 }
 0x7b6   : > { %v2075_v59 = vpop.permute.xlu0 %2074  ;;  %v2061_v2 = vpop.permute.xlu1 %2060 }
 0x7b7   : > { %v2104_v28 = vsel %vm608_vm3, %v2100_v29, %v2075_v59  ;;  %v2101_v0 = vsel %vm572_vm1, %v7395_v38, %v2061_v2 }
 0x7b8   : > { %v2108_v35 = vsel %vm1098_vm11, %v2104_v28, %v2091_v18  ;;  %v2105_v55 = vsel %vm608_vm3, %v2101_v0, %v2077_v9 }
 0x7b9   : > { %5791 = vmatmul.msk.f32.gmra.mxu3 %vm536_vm0, %v2108_v35 }
 0x7be   : > { %v2194_v25 = vpop.permute.xlu0 %2193  ;;  %v2448_v32 = vpop.permute.xlu1 %2447 }
 0x7bf   : > { %5796 = vmatpush.xpose.msk.msra.mxu0 %vm572_vm1, %v2194_v25  ;;  %5807 = vmatpush.xpose.msk.msrb.mxu3 %vm572_vm1, %v2448_v32 }
 0x7c2   : > { %5797 = vmatmul.msk.f32.vlgmr.msra.gmra.mxu0 %vm572_vm1, %v7397_v11 }
 0x7c3   : > { %5801 = vmatpush.xpose.msk.msrb.mxu0 %vm572_vm1, %v2322_v33  ;;  %5808 = vmatpush.xpose.msk.msrb.mxu3 %vm572_vm1, %v2446_v52 }
 0x7c6   : > { %v2093_v42 = vpop.permute.xlu0 %2092  ;;  %v2444_v19 = vpop.permute.xlu1 %2443 }
 0x7c7   : > { %v2109_v36 = vsel %vm1098_vm11, %v2105_v55, %v2093_v42 }
 0x7c8   : > { %5792 = vmatmul.msk.f32.gmra.mxu3 %vm536_vm0, %v2109_v36 }
 0x7ca   : > { %5798 = vmatmul.msk.f32.gmra.mxu0 %vm572_vm1, %v7400_v26 }
 0x7ce   : > { %v2442_v40 = vpop.permute.xlu0 %2441  ;;  %v2316_v44 = vpop.permute.xlu1 %2315 }
 0x7d0   : > { %5809 = vmatmul.msk.f32.vlgmr.msrb.gmra.mxu3 %vm572_vm1, %v2442_v40 }
 0x7d6   : > { %v2320_v21 = vpop.permute.xlu0 %2319  ;;  %v2572_v57 = vpop.permute.xlu1 %2571 }
 0x7d7   : > { %5802 = vmatpush.xpose.msk.msrb.mxu0 %vm572_vm1, %v2320_v21 }
 0x7d8   : > { %5810 = vmatmul.msk.f32.gmra.mxu3 %vm572_vm1, %v2444_v19 }
 0x7da   : > { %5803 = vmatmul.msk.f32.vlgmr.msrb.gmra.mxu0 %vm572_vm1, %v2316_v44 }
 0x7de   : > { %v2574_v48 = vpop.permute.xlu0 %2573 }
 0x7df   : > { %5813 = vmatpush.xpose.msk.msra.mxu0 %vm572_vm1, %v2574_v48 }
 0x7e2   : > { %5804 = vmatmul.msk.f32.gmra.mxu0 %vm572_vm1, %v2318_v49 }
 0x7e3   : > { %5814 = vmatpush.xpose.msk.msra.mxu0 %vm572_vm1, %v2572_v57 }
 0x7e6   : > { %v2570_v50 = vpop.permute.xlu0 %2569 }
 0x7ea   : > { %5815 = vmatmul.msk.f32.vlgmr.msra.gmra.mxu0 %vm572_vm1, %v2568_v14 }
 0x7f2   : > { %5816 = vmatmul.msk.f32.gmra.mxu0 %vm572_vm1, %v2570_v50 }
 0x82c   : > { %v7474_v53 = vpop.f32.mrf.mxu3 }
 0x834   : > { %v7476_v38 = vpop.f32.mrf.mxu3 }
 0x83c   : > { %v7479_v22 = vpop.f32.mrf.mxu3 }
 0x83f   : > { %v2222_v54 = vpop.f32.mrf.mxu0 }
 0x840   : > { %v2228_v3 = vmul.f32 0.35355338, %v2222_v54 }
 0x842   : > { %v2230_v45 = vadd.f32 %v2228_v3, %v6819_v60 }
 0x844   : > { %v2232_v56 = vsel %vm608_vm3, %v2230_v45, -inf }
 0x845   : > { %2233 = vmax.xlane.f32.xlu1 %v2232_v56  ;;  %v6098_v56 = vpack.i.bf16 %v7397_v11, %v7400_v26 }
 0x847   : > { %v2225_v58 = vpop.f32.mrf.mxu0 }
 0x848   : > { %v2229_v61 = vmul.f32 0.35355338, %v2225_v58 }
 0x84a   : > { %v2231_v62 = vadd.f32 %v2229_v61, %v6831_v13 }
 0x84b   : > { %v7483_v8 = vpop.f32.mrf.mxu3 }
 0x84c   : > { %v2235_v30 = vsel %vm608_vm3, %v2231_v62, -inf }
 0x84d   : > { %2236 = vmax.xlane.f32.xlu2 %v2235_v30 }
 0x853   : > { %v2474_v63 = vpop.f32.mrf.mxu3 }
 0x854   : > { %v2480_v39 = vmul.f32 0.35355338, %v2474_v63 }
 0x856   : > { %v2482_v16 = vadd.f32 %v2480_v39, %v6819_v60 }
 0x857   : > { %v2348_v1 = vpop.f32.mrf.mxu0 }
 0x858   : > { %v2484_v24 = vsel %vm608_vm3, %v2482_v16, -inf  ;;  %v2354_v23 = vmul.f32 0.35355338, %v2348_v1 }
 0x859   : > { %2485 = vmax.xlane.f32.xlu0 %v2484_v24 }
 0x85a   : > { %v7491_v47 = vadd.f32 %v2354_v23, %v6819_v60 }
 0x85b   : > { %v2477_v41 = vpop.f32.mrf.mxu3 }
 0x85c   : > { %v2481_v37 = vmul.f32 0.35355338, %v2477_v41  ;;  %v2358_v9 = vsel %vm608_vm3, %v7491_v47, -inf }
 0x85e   : > { %v2483_v4 = vadd.f32 %v2481_v37, %v6831_v13 }
 0x85f   : > { %v2351_v7 = vpop.f32.mrf.mxu0 }
 0x860   : > { %v2487_v12 = vsel %vm608_vm3, %v2483_v4, -inf  ;;  %v2355_v15 = vmul.f32 0.35355338, %v2351_v7 }
 0x861   : > { %2488 = vmax.xlane.f32.xlu1 %v2487_v12 }
 0x862   : > { %v2357_v27 = vadd.f32 %v2355_v15, %v6831_v13 }
 0x864   : > { %v2361_v20 = vsel %vm608_vm3, %v2357_v27, -inf }
 0x867   : > { %v2600_v51 = vpop.f32.mrf.mxu0 }
 0x868   : > { %v2606_v18 = vmul.f32 0.35355338, %v2600_v51 }
 0x869   : > { %2359 = vmax.xlane.f32.xlu1 %v2358_v9 }
 0x86a   : > { %v2608_v46 = vadd.f32 %v2606_v18, %v6819_v60 }
 0x86c   : > { %v2610_v59 = vsel %vm608_vm3, %v2608_v46, -inf }
 0x86f   : > { %v2603_v52 = vpop.f32.mrf.mxu0 }
 0x870   : > { %v2607_v29 = vmul.f32 0.35355338, %v2603_v52 }
 0x871   : > { %2362 = vmax.xlane.f32.xlu1 %v2361_v20 }
 0x872   : > { %v2609_v2 = vadd.f32 %v2607_v29, %v6831_v13 }
 0x874   : > { %v2613_v28 = vsel %vm608_vm3, %v2609_v2, -inf }
 0x879   : > { %2611 = vmax.xlane.f32.xlu1 %v2610_v59 }
 0x881   : > { %2614 = vmax.xlane.f32.xlu1 %v2613_v28 }
 0x8b8   : > { %v2234_v35 = vpop.xlane.xlu1 %2233 }
 0x8b9   : > { %v2238_v25 = vsub.f32 %v2230_v45, %v2234_v35 }
 0x8bb   : > { %v2240_v32 = vmul.f32 1.442695, %v2238_v25 }
 0x8bd   : > { %6326 = vpow2.f32 %v2240_v32 }
 0x8c0   : > { %v2237_v33 = vpop.xlane.xlu2 %2236 }
 0x8c1   : > { %v2239_v0 = vsub.f32 %v2231_v62, %v2237_v33 }
 0x8c3   : > { %v7501_v42 = vpop.eup %6326  ;;  %v2242_v55 = vmul.f32 1.442695, %v2239_v0 }
 0x8c4   : > { %v2244_v36 = vsel %vm608_vm3, %v7501_v42, 0.0 }
 0x8c5   : > { %6328 = vpow2.f32 %v2242_v55  ;;  %2245 = vadd.xlane.f32.xlu2 %v2244_v36 }
 0x8cb   : > { %v7505_v19 = vpop.eup %6328 }
 0x8cc   : > { %v2486_v40 = vpop.xlane.xlu0 %2485  ;;  %v2247_v21 = vsel %vm608_vm3, %v7505_v19, 0.0 }
 0x8cd   : > { %v2490_v44 = vsub.f32 %v2482_v16, %v2486_v40  ;;  %2248 = vadd.xlane.f32.xlu0 %v2247_v21 }
 0x8cf   : > { %v2492_v48 = vmul.f32 1.442695, %v2490_v44 }
 0x8d1   : > { %6330 = vpow2.f32 %v2492_v48 }
 0x8d4   : > { %v2489_v49 = vpop.xlane.xlu1 %2488 }
 0x8d5   : > { %v2491_v57 = vsub.f32 %v2483_v4, %v2489_v49 }
 0x8d7   : > { %v7509_v14 = vpop.eup %6330  ;;  %v2494_v50 = vmul.f32 1.442695, %v2491_v57 }
 0x8d8   : > { %v2496_v54 = vsel %vm608_vm3, %v7509_v14, 0.0 }
 0x8d9   : > { %6332 = vpow2.f32 %v2494_v50  ;;  %2497 = vadd.xlane.f32.xlu2 %v2496_v54 }
 0x8dc   : > { %v2360_v3 = vpop.xlane.xlu1 %2359 }
 0x8dd   : > { %v2364_v23 = vsub.f32 %v7491_v47, %v2360_v3 }
 0x8df   : > { %v7513_v45 = vpop.eup %6332  ;;  %v2366_v12 = vmul.f32 1.442695, %v2364_v23 }
 0x8e0   : > { %v2499_v58 = vsel %vm608_vm3, %v7513_v45, 0.0 }
 0x8e1   : > { %6099 = vrot.lane.b32.xlu0 %v6098_v56, %s6657_s19  ;;  %2500 = vadd.xlane.f32.xlu2 %v2499_v58 }
 0x8e4   : > { %v2363_v61 = vpop.xlane.xlu1 %2362 }
 0x8e5   : > { %v2365_v62 = vsub.f32 %v2357_v27, %v2363_v61 }
 0x8e7   : > { %v2368_v30 = vmul.f32 1.442695, %v2365_v62 }
 0x8e9   : > { %6334 = vpow2.f32 %v2368_v30 }
 0x8ec   : > { %v2612_v63 = vpop.xlane.xlu1 %2611 }
 0x8ed   : > { %v2616_v39 = vsub.f32 %v2608_v46, %v2612_v63 }
 0x8ef   : > { %v7520_v16 = vpop.eup %6334  ;;  %v2618_v1 = vmul.f32 1.442695, %v2616_v39 }
 0x8f0   : > { %v2373_v24 = vsel %vm608_vm3, %v7520_v16, 0.0 }
 0x8f1   : > { %6336 = vpow2.f32 %v2618_v1  ;;  %2374 = vadd.xlane.f32.xlu1 %v2373_v24 }
 0x8f4   : > { %v2615_v11 = vpop.xlane.xlu1 %2614 }
 0x8f5   : > { %v2617_v26 = vsub.f32 %v2609_v2, %v2615_v11 }
 0x8f7   : > { %v7524_v41 = vpop.eup %6336  ;;  %v2620_v37 = vmul.f32 1.442695, %v2617_v26 }
 0x8f8   : > { %v2622_v4 = vsel %vm608_vm3, %v7524_v41, 0.0 }
 0x8f9   : > { %6338 = vpow2.f32 %v2620_v37  ;;  %2623 = vadd.xlane.f32.xlu1 %v2622_v4  ;;  %6104 = vrot.lane.b32.xlu2 %v6098_v56, %s6656_s14 }
 0x8fa   : > { %6340 = vpow2.f32 %v2366_v12 }
 0x8ff   : > { %v7530_v7 = vpop.eup %6338 }
 0x900   : > { %v2625_v15 = vsel %vm608_vm3, %v7530_v7, 0.0  ;;  %v7535_v9 = vpop.eup %6340 }
 0x901   : > { %2626 = vadd.xlane.f32.xlu1 %v2625_v15  ;;  %6109 = vrot.lane.b32.xlu2 %v6098_v56, %s6659_s21  ;;  %v2370_v47 = vsel %vm608_vm3, %v7535_v9, 0.0  ;;  %v2757_v15 = vld [vmem:[#allocation2 + $0x78] sm:$0xff] }
 0x909   : > { %6114 = vrot.lane.b32.xlu2 %v6098_v56, %s6658_s20 }
 0x90b   : > { %2371 = vadd.xlane.f32.xlu0 %v2370_v47 }
 0x938   : > { %v2246_v51 = vpop.xlane.xlu2 %2245 }
 0x939   : > { %6342 = vrcp.f32 %v2246_v51  ;;  %v2261_v25 = vand.u32 2147483648, %v2246_v51  ;;  %vm2255_vm8 = vweird.f32 %v2246_v51  ;;  %v2259_v32 = vand.u32 2147483647, %v2246_v51 }
 0x93b   : > { %v2262_v55 = vor.u32 1.1754944e-38, %v2261_v25  ;;  %vm2260_vm10 = vcmp.eq.f32.partialorder %v2259_v32, 8.507059e+37  ;;  %v2754_v25 = vld [vmem:[#allocation2 + $0x60] sm:$0xff] }
 0x93f   : > { %v6343_v27 = vpop.eup %6342 }
 0x940   : > { %v2249_v18 = vpop.xlane.xlu0 %2248  ;;  %v2251_v20 = vmul.f32 %v6343_v27, %v2246_v51  ;;  %vm2256_vm7 = vweird.f32 %v6343_v27 }
 0x941   : > { %6344 = vrcp.f32 %v2249_v18  ;;  %vm2257_vm9 = vmor %vm2255_vm8, %vm2256_vm7  ;;  %v2276_v3 = vand.u32 2147483648, %v2249_v18  ;;  %vm2270_vm13 = vweird.f32 %v2249_v18  ;;  %v2274_v58 = vand.u32 2147483647, %v2249_v18 }
 0x942   : > { %v2252_v46 = vsub.f32 1.0, %v2251_v20 }
 0x943   : > { %v2277_v30 = vor.u32 1.1754944e-38, %v2276_v3  ;;  %vm2275_vm15 = vcmp.eq.f32.partialorder %v2274_v58, 8.507059e+37 }
 0x944   : > { %v2253_v29 = vmul.f32 %v6343_v27, %v2252_v46 }
 0x946   : > { %v2254_v28 = vadd.f32 %v6343_v27, %v2253_v29 }
 0x947   : > { %v6345_v52 = vpop.eup %6344 }
 0x948   : > { %v2266_v59 = vmul.f32 %v6345_v52, %v2249_v18  ;;  %v2258_v33 = vsel %vm2257_vm9, %v6343_v27, %v2254_v28  ;;  %vm2271_vm12 = vweird.f32 %v6345_v52  ;;  %v2756_v18 = vld [vmem:[#allocation2 + $0x70] sm:$0xff] }
 0x949   : > { %v2263_v49 = vsel %vm2260_vm10, %v2262_v55, %v2258_v33  ;;  %vm2272_vm14 = vmor %vm2270_vm13, %vm2271_vm12 }
 0x94a   : > { %v2267_v35 = vsub.f32 1.0, %v2266_v59  ;;  %v2264_v56 = vmul.f32 %v7501_v42, %v2263_v49 }
 0x94c   : > { %v2498_v2 = vpop.xlane.xlu2 %2497  ;;  %v2268_v0 = vmul.f32 %v6345_v52, %v2267_v35 }
 0x94d   : > { %6346 = vrcp.f32 %v2498_v2  ;;  %v2513_v37 = vand.u32 2147483648, %v2498_v2  ;;  %vm2507_vm4 = vweird.f32 %v2498_v2  ;;  %v2511_v4 = vand.u32 2147483647, %v2498_v2 }
 0x94e   : > { %v2269_v57 = vadd.f32 %v6345_v52, %v2268_v0 }
 0x94f   : > { %v2514_v27 = vor.u32 1.1754944e-38, %v2513_v37  ;;  %vm2512_vm6 = vcmp.eq.f32.partialorder %v2511_v4, 8.507059e+37 }
 0x950   : > { %v2273_v62 = vsel %vm2272_vm14, %v6345_v52, %v2269_v57  ;;  %v2755_v52 = vld [vmem:[#allocation2 + $0x68] sm:$0xff] }
 0x951   : > { %v2278_v24 = vsel %vm2275_vm15, %v2277_v30, %v2273_v62 }
 0x952   : > { %v2279_v23 = vmul.f32 %v7505_v19, %v2278_v24 }
 0x953   : > { %v6347_v36 = vpop.eup %6346  ;;  %v6100_v40 = vpop.permute.xlu0 %6099 }
 0x954   : > { %v2503_v21 = vmul.f32 %v6347_v36, %v2498_v2  ;;  %v6101_v44 = vunpack.i.l.bf16 %v6100_v40  ;;  %v7540_v48 = vpop.xlane.xlu2 %2500  ;;  %v6102_v54 = vunpack.i.h.bf16 %v6100_v40  ;;  %vm2508_vm2 = vweird.f32 %v6347_v36 }
 0x955   : > { %6348 = vrcp.f32 %v7540_v48  ;;  %vm2509_vm5 = vmor %vm2507_vm4, %vm2508_vm2  ;;  %v2528_v19 = vand.u32 2147483648, %v7540_v48  ;;  %vm2522_vm8 = vweird.f32 %v7540_v48  ;;  %v2526_v35 = vand.u32 2147483647, %v7540_v48 }
 0x956   : > { %v2504_v50 = vsub.f32 1.0, %v2503_v21  ;;  %2306 = vmatpush.msrb.mxu2 %v6101_v44  ;;  %v2110_v44 = vperm.slane %v7349_v10, 3 }
 0x957   : > { %v2529_v33 = vor.u32 1.1754944e-38, %v2528_v19  ;;  %vm2527_vm10 = vcmp.eq.f32.partialorder %v2526_v35, 8.507059e+37 }
 0x958   : > { %2307 = vmatpush.msrb.mxu2 %v6102_v54  ;;  %v2505_v61 = vmul.f32 %v6347_v36, %v2504_v50  ;;  %v7572_v4 = vadd.f32 %v7483_v8, %v2110_v44 }
 0x959   : > { %5799 = vmatmul.msk.f32.vlgmr.msrb.gmra.mxu2 %vm608_vm3, %v2264_v56 }
 0x95a   : > { %v2506_v11 = vadd.f32 %v6347_v36, %v2505_v61  ;;  %v7567_v61 = vadd.f32 %v7479_v22, %v2110_v44 }
 0x95b   : > { %v6349_v63 = vpop.eup %6348 }
 0x95c   : > { %v2518_v39 = vmul.f32 %v6349_v63, %v7540_v48  ;;  %v6105_v1 = vpop.permute.xlu2 %6104  ;;  %v2510_v47 = vsel %vm2509_vm5, %v6347_v36, %v2506_v11  ;;  %vm2523_vm7 = vweird.f32 %v6349_v63  ;;  %v7557_v48 = vadd.f32 %v7474_v53, %v2110_v44 }
 0x95d   : > { %v6106_v26 = vunpack.i.l.bf16 %v6105_v1  ;;  %v6107_v12 = vunpack.i.h.bf16 %v6105_v1  ;;  %v2515_v46 = vsel %vm2512_vm6, %v2514_v27, %v2510_v47  ;;  %vm2524_vm9 = vmor %vm2522_vm8, %vm2523_vm7 }
 0x95e   : > { %v2519_v42 = vsub.f32 1.0, %v2518_v39  ;;  %v2516_v28 = vmul.f32 %v7509_v14, %v2515_v46 }
 0x95f   : > { %2558 = vmatpush.msra.mxu2 %v6106_v26 }
 0x960   : > { %v2520_v51 = vmul.f32 %v6349_v63, %v2519_v42 }
 0x961   : > { %5800 = vmatmul.msk.f32.gmra.mxu2 %vm608_vm3, %v2279_v23 }
 0x962   : > { %2559 = vmatpush.msra.mxu2 %v6107_v12  ;;  %v2521_v59 = vadd.f32 %v6349_v63, %v2520_v51 }
 0x964   : > { %2787 = vmatpush.msrb.mxu2 %v2757_v15  ;;  %v6110_v20 = vpop.permute.xlu2 %6109  ;;  %v2525_v32 = vsel %vm2524_vm9, %v6349_v63, %v2521_v59  ;;  %v2375_v21 = vpop.xlane.xlu1 %2374 }
 0x965   : > { %v6111_v29 = vunpack.i.l.bf16 %v6110_v20  ;;  %v6112_v2 = vunpack.i.h.bf16 %v6110_v20  ;;  %v2530_v55 = vsel %vm2527_vm10, %v2529_v33, %v2525_v32  ;;  %6350 = vrcp.f32 %v2375_v21 }
 0x966   : > { %2788 = vmatpush.msrb.mxu2 %v2756_v18  ;;  %v2531_v40 = vmul.f32 %v7513_v45, %v2530_v55  ;;  %v7562_v45 = vadd.f32 %v7476_v38, %v2110_v44  ;;  %v2402_v12 = vand.u32 2147483648, %v2375_v21  ;;  %vm2396_vm4 = vweird.f32 %v2375_v21 }
 0x967   : > { %2432 = vmatpush.msrb.mxu1 %v6111_v29  ;;  %v2400_v47 = vand.u32 2147483647, %v2375_v21 }
 0x968   : > { %2789 = vmatpush.msrb.mxu2 %v2755_v52  ;;  %v2403_v20 = vor.u32 1.1754944e-38, %v2402_v12 }
 0x969   : > { %2433 = vmatpush.msrb.mxu1 %v6112_v2  ;;  %5811 = vmatmul.msk.f32.vlgmr.msra.gmra.mxu2 %vm608_vm3, %v2516_v28  ;;  %vm2401_vm6 = vcmp.eq.f32.partialorder %v2400_v47, 8.507059e+37 }
 0x96a   : > { %2790 = vmatpush.msrb.mxu2 %v2754_v25 }
 0x96b   : > { %v6351_v57 = vpop.eup %6350 }
 0x96c   : > { %v6115_v0 = vpop.permute.xlu2 %6114  ;;  %v2624_v49 = vpop.xlane.xlu1 %2623  ;;  %v2392_v54 = vmul.f32 %v6351_v57, %v2375_v21  ;;  %vm2397_vm15 = vweird.f32 %v6351_v57 }
 0x96d   : > { %v6116_v36 = vunpack.i.l.bf16 %v6115_v0  ;;  %v6117_v14 = vunpack.i.h.bf16 %v6115_v0  ;;  %vm2398_vm5 = vmor %vm2396_vm4, %vm2397_vm15  ;;  %v2639_v29 = vand.u32 2147483648, %v2624_v49  ;;  %vm2633_vm8 = vweird.f32 %v2624_v49 }
 0x96e   : > { %v2393_v3 = vsub.f32 1.0, %v2392_v54 }
 0x96f   : > { %2684 = vmatpush.msra.mxu1 %v6116_v36  ;;  %v2640_v28 = vor.u32 1.1754944e-38, %v2639_v29 }
 0x970   : > { %v2394_v38 = vmul.f32 %v6351_v57, %v2393_v3 }
 0x971   : > { %5812 = vmatmul.msk.f32.gmra.mxu2 %vm608_vm3, %v2531_v40  ;;  %2685 = vmatpush.msra.mxu1 %v6117_v14 }
 0x972   : > { %v2395_v22 = vadd.f32 %v6351_v57, %v2394_v38  ;;  %v2158_v38 = vld [vmem:[#allocation4 + $0x40] sm:$0xff] }
 0x974   : > { %v2627_v53 = vpop.xlane.xlu1 %2626  ;;  %v2399_v18 = vsel %vm2398_vm5, %v6351_v57, %v2395_v22 }
 0x975   : > { %v2404_v46 = vsel %vm2401_vm6, %v2403_v20, %v2399_v18  ;;  %v2654_v32 = vand.u32 2147483648, %v2627_v53  ;;  %v2652_v0 = vand.u32 2147483647, %v2627_v53 }
 0x976   : > { %v2405_v59 = vmul.f32 %v7520_v16, %v2404_v46 }
 0x977   : > { %v2655_v16 = vor.u32 1.1754944e-38, %v2654_v32  ;;  %vm2653_vm15 = vcmp.eq.f32.partialorder %v2652_v0, 8.507059e+37 }
 0x979   : > { %5821 = vmatmul.msk.f32.vlgmr.msrb.gmra.mxu2 %vm536_vm0, %v7557_v48 }
 0x97e   : > { %v2372_v50 = vpop.xlane.xlu0 %2371 }
 0x97f   : > { %6352 = vrcp.f32 %v2372_v50  ;;  %v2387_v30 = vand.u32 2147483648, %v2372_v50  ;;  %v2385_v1 = vand.u32 2147483647, %v2372_v50  ;;  %vm2381_vm13 = vweird.f32 %v2372_v50 }
 0x980   : > { %6354 = vrcp.f32 %v2624_v49 }
 0x981   : > { %5822 = vmatmul.msk.f32.gmra.mxu2 %vm536_vm0, %v7562_v45  ;;  %6356 = vrcp.f32 %v2627_v53  ;;  %v2388_v11 = vor.u32 1.1754944e-38, %v2387_v30  ;;  %vm2386_vm2 = vcmp.eq.f32.partialorder %v2385_v1, 8.507059e+37  ;;  %v2159_v30 = vld [vmem:[#allocation4 + $0x48] sm:$0xff] }
 0x985   : > { %v6353_v10 = vpop.eup %6352 }
 0x986   : > { %v2377_v56 = vmul.f32 %v6353_v10, %v2372_v50  ;;  %v6355_v58 = vpop.eup %6354  ;;  %vm2382_vm12 = vweird.f32 %v6353_v10 }
 0x987   : > { %v2629_v63 = vmul.f32 %v6355_v58, %v2624_v49  ;;  %vm2383_vm14 = vmor %vm2381_vm13, %vm2382_vm12  ;;  %v6357_v42 = vpop.eup %6356  ;;  %vm2634_vm7 = vweird.f32 %v6355_v58  ;;  %vm2648_vm13 = vweird.f32 %v2627_v53 }
 0x988   : > { %v2378_v62 = vsub.f32 1.0, %v2377_v56  ;;  %v2644_v27 = vmul.f32 %v6357_v42, %v2627_v53  ;;  %vm2635_vm9 = vmor %vm2633_vm8, %vm2634_vm7  ;;  %vm2649_vm12 = vweird.f32 %v6357_v42 }
 0x989   : > { %5823 = vmatmul.msk.f32.gmra.mxu2 %vm536_vm0, %v7567_v61  ;;  %v2630_v26 = vsub.f32 1.0, %v2629_v63 }
 0x98a   : > { %v2379_v39 = vmul.f32 %v6353_v10, %v2378_v62  ;;  %v2645_v52 = vsub.f32 1.0, %v2644_v27  ;;  %v2160_v62 = vld [vmem:[#allocation4 + $0x50] sm:$0xff] }
 0x98b   : > { %v2631_v51 = vmul.f32 %v6355_v58, %v2630_v26 }
 0x98c   : > { %v2380_v24 = vadd.f32 %v6353_v10, %v2379_v39  ;;  %v2646_v2 = vmul.f32 %v6357_v42, %v2645_v52 }
 0x98d   : > { %v2632_v8 = vadd.f32 %v6355_v58, %v2631_v51 }
 0x98e   : > { %v2384_v37 = vsel %vm2383_vm14, %v6353_v10, %v2380_v24  ;;  %v2647_v25 = vadd.f32 %v6357_v42, %v2646_v2  ;;  %vm2650_vm14 = vmor %vm2648_vm13, %vm2649_vm12 }
 0x98f   : > { %v2389_v23 = vsel %vm2386_vm2, %v2388_v11, %v2384_v37  ;;  %v2636_v19 = vsel %vm2635_vm9, %v6355_v58, %v2632_v8  ;;  %v2161_v58 = vld [vmem:[#allocation4 + $0x58] sm:$0xff] }
 0x990   : > { %v2390_v15 = vmul.f32 %v7535_v9, %v2389_v23  ;;  %v2637_v9 = vand.u32 2147483647, %v2624_v49  ;;  %v2651_v55 = vsel %vm2650_vm14, %v6357_v42, %v2647_v25  ;;  %2742 = vmatpush.msra.mxu3 %v2161_v58 }
 0x991   : > { %5824 = vmatmul.msk.f32.gmra.mxu2 %vm536_vm0, %v7572_v4  ;;  %v2656_v36 = vsel %vm2653_vm15, %v2655_v16, %v2651_v55 }
 0x992   : > { %5805 = vmatmul.msk.f32.vlgmr.msrb.gmra.mxu1 %vm608_vm3, %v2390_v15  ;;  %vm2638_vm10 = vcmp.eq.f32.partialorder %v2637_v9, 8.507059e+37  ;;  %v2657_v40 = vmul.f32 %v7530_v7, %v2656_v36  ;;  %2743 = vmatpush.msra.mxu3 %v2160_v62 }
 0x993   : > { %v2641_v35 = vsel %vm2638_vm10, %v2640_v28, %v2636_v19 }
 0x994   : > { %v2642_v33 = vmul.f32 %v7524_v41, %v2641_v35  ;;  %2744 = vmatpush.msra.mxu3 %v2159_v30 }
 0x996   : > { %2745 = vmatpush.msra.mxu3 %v2158_v38 }
 0x99a   : > { %5806 = vmatmul.msk.f32.gmra.mxu1 %vm608_vm3, %v2405_v59 }
 0x9a2   : > { %5817 = vmatmul.msk.f32.vlgmr.msra.gmra.mxu1 %vm608_vm3, %v2642_v33 }
 0x9aa   : > { %5818 = vmatmul.msk.f32.gmra.mxu1 %vm608_vm3, %v2657_v40 }
 0x9dc   : > { %v7584_v14 = vpop.f32.mrf.mxu2 }
 0x9e4   : > { %v7586_v21 = vpop.f32.mrf.mxu2 }
 0x9ec   : > { %v2561_v44 = vpop.f32.mrf.mxu2 }
 0x9f4   : > { %v2564_v49 = vpop.f32.mrf.mxu2 }
 0x9fc   : > { %v7588_v41 = vpop.f32.mrf.mxu2 }
 0x9fd   : > { %2808 = vrot.lane.b32.xlu0 %v7588_v41, %s6652_s8 }
 0xa04   : > { %v7592_v57 = vpop.f32.mrf.mxu2 }
 0xa05   : > { %2705 = vrot.lane.b32.xlu0 %v2564_v49, %s6660_s22  ;;  %v7664_v39 = vpack.i.bf16 %v7588_v41, %v7592_v57 }
 0xa0c   : > { %v7595_v50 = vpop.f32.mrf.mxu2 }
 0xa0f   : > { %v2435_v7 = vpop.f32.mrf.mxu1 }
 0xa10   : > { %2695 = vrot.lane.b32.xlu2 %v2435_v7, %s6661_s23 }
 0xa14   : > { %v7598_v54 = vpop.f32.mrf.mxu2 }
 0xa15   : > { %3032 = vrot.lane.b32.xlu0 %v7598_v54, %s6650_s29  ;;  %2814 = vrot.lane.b32.xlu1 %v7598_v54, %s6652_s8  ;;  %v7646_v56 = vpack.i.bf16 %v7595_v50, %v7598_v54 }
 0xa17   : > { %v2438_v10 = vpop.f32.mrf.mxu1 }
 0xa18   : > { %2810 = vrot.lane.b32.xlu2 %v7592_v57, %s6652_s8 }
 0xa1d   : > { %3250 = vrot.lane.b32.xlu0 %v7598_v54, %s6648_s27  ;;  %2703 = vrot.lane.b32.xlu1 %v2561_v44, %s6660_s22 }
 0xa1f   : > { %v2687_v3 = vpop.f32.mrf.mxu1 }
 0xa20   : > { %2812 = vrot.lane.b32.xlu2 %v7595_v50, %s6652_s8 }
 0xa25   : > { %3018 = vrot.lane.b32.xlu0 %v7588_v41, %s6649_s28  ;;  %2697 = vrot.lane.b32.xlu1 %v2438_v10, %s6661_s23 }
 0xa27   : > { %v2690_v53 = vpop.f32.mrf.mxu1 }
 0xa28   : > { %2711 = vrot.lane.b32.xlu2 %v2687_v3, %s6662_s26 }
 0xa2d   : > { %3020 = vrot.lane.b32.xlu0 %v7592_v57, %s6649_s28  ;;  %2713 = vrot.lane.b32.xlu1 %v2690_v53, %s6662_s26 }
 0xa30   : > { %3030 = vrot.lane.b32.xlu2 %v7595_v50, %s6650_s29 }
 0xa35   : > { %3238 = vrot.lane.b32.xlu0 %v7592_v57, %s6651_s30  ;;  %3026 = vrot.lane.b32.xlu1 %v7588_v41, %s6650_s29 }
 0xa38   : > { %3028 = vrot.lane.b32.xlu2 %v7592_v57, %s6650_s29 }
 0xa3d   : > { %3024 = vrot.lane.b32.xlu0 %v7598_v54, %s6649_s28  ;;  %3246 = vrot.lane.b32.xlu1 %v7592_v57, %s6648_s27 }
 0xa40   : > { %3248 = vrot.lane.b32.xlu2 %v7595_v50, %s6648_s27 }
 0xa45   : > { %3462 = vrot.lane.b32.xlu0 %v7588_v41, %s6653_s9  ;;  %3236 = vrot.lane.b32.xlu1 %v7588_v41, %s6651_s30 }
 0xa48   : > { %3244 = vrot.lane.b32.xlu2 %v7588_v41, %s6648_s27 }
 0xa4d   : > { %3456 = vrot.lane.b32.xlu0 %v7592_v57, %s6654_s10  ;;  %3468 = vrot.lane.b32.xlu1 %v7598_v54, %s6653_s9 }
 0xa50   : > { %3022 = vrot.lane.b32.xlu2 %v7595_v50, %s6649_s28 }
 0xa55   : > { %6124 = vrot.lane.b32.xlu0 %v7646_v56, %s6657_s19  ;;  %3240 = vrot.lane.b32.xlu1 %v7595_v50, %s6651_s30 }
 0xa58   : > { %3466 = vrot.lane.b32.xlu2 %v7595_v50, %s6653_s9 }
 0xa5d   : > { %3242 = vrot.lane.b32.xlu1 %v7598_v54, %s6651_s30 }
 0xa60   : > { %3464 = vrot.lane.b32.xlu2 %v7592_v57, %s6653_s9 }
 0xa65   : > { %3458 = vrot.lane.b32.xlu1 %v7595_v50, %s6654_s10 }
 0xa68   : > { %3454 = vrot.lane.b32.xlu2 %v7588_v41, %s6654_s10 }
 0xa6a   : > { %v2696_v63 = vpop.permute.xlu2 %2695 }
 0xa6b   : > { %v2717_v12 = vsel %vm572_vm1, %v7584_v14, %v2696_v63 }
 0xa6d   : > { %6119 = vrot.lane.b32.xlu1 %v7664_v39, %s6657_s19 }
 0xa6f   : > { %v2809_v24 = vpop.permute.xlu0 %2808 }
 0xa70   : > { %3460 = vrot.lane.b32.xlu2 %v7598_v54, %s6654_s10 }
 0xa72   : > { %v2811_v1 = vpop.permute.xlu2 %2810 }
 0xa77   : > { %v2706_v26 = vpop.permute.xlu0 %2705 }
 0xa7a   : > { %v2813_v11 = vpop.permute.xlu2 %2812 }
 0xa82   : > { %v2712_v37 = vpop.permute.xlu2 %2711 }
 0xa87   : > { %v3033_v22 = vpop.permute.xlu0 %3032  ;;  %v2815_v42 = vpop.permute.xlu1 %2814 }
 0xa88   : > { %5825 = vmatpush.xpose.msk.msrb.mxu0 %vm572_vm1, %v2815_v42  ;;  %5837 = vmatpush.xpose.msk.msrb.mxu3 %vm572_vm1, %v3033_v22 }
 0xa8a   : > { %v3031_v23 = vpop.permute.xlu2 %3030 }
 0xa8c   : > { %5826 = vmatpush.xpose.msk.msrb.mxu0 %vm572_vm1, %v2813_v11  ;;  %5838 = vmatpush.xpose.msk.msrb.mxu3 %vm572_vm1, %v3031_v23 }
 0xa8f   : > { %v3251_v15 = vpop.permute.xlu0 %3250  ;;  %v2704_v47 = vpop.permute.xlu1 %2703 }
 0xa90   : > { %v2719_v51 = vsel %vm608_vm3, %v2717_v12, %v2704_v47  ;;  %5827 = vmatpush.xpose.msk.msrb.mxu0 %vm572_vm1, %v2811_v1 }
 0xa91   : > { %v2721_v27 = vsel %vm1098_vm11, %v2719_v51, %v2712_v37 }
 0xa92   : > { %v3029_v18 = vpop.permute.xlu2 %3028  ;;  %5819 = vmatmul.msk.f32.vlgmr.msra.gmra.mxu3 %vm536_vm0, %v2721_v27 }
 0xa93   : > { %5839 = vmatpush.xpose.msk.msrb.mxu3 %vm572_vm1, %v3029_v18 }
 0xa94   : > { %5828 = vmatpush.xpose.msk.msrb.mxu0 %vm572_vm1, %v2809_v24 }
 0xa97   : > { %v3019_v20 = vpop.permute.xlu0 %3018  ;;  %5829 = vmatmul.msk.f32.vlgmr.msrb.gmra.mxu0 %vm572_vm1, %v7588_v41  ;;  %v2698_v46 = vpop.permute.xlu1 %2697 }
 0xa98   : > { %5849 = vmatpush.xpose.msk.msra.mxu0 %vm572_vm1, %v3251_v15  ;;  %v2718_v52 = vsel %vm572_vm1, %v7586_v21, %v2698_v46 }
 0xa99   : > { %v2720_v59 = vsel %vm608_vm3, %v2718_v52, %v2706_v26 }
 0xa9a   : > { %v3249_v8 = vpop.permute.xlu2 %3248 }
 0xa9c   : > { %5850 = vmatpush.xpose.msk.msra.mxu0 %vm572_vm1, %v3249_v8 }
 0xa9f   : > { %v3021_v29 = vpop.permute.xlu0 %3020  ;;  %5830 = vmatmul.msk.f32.gmra.mxu0 %vm572_vm1, %v7592_v57  ;;  %v2714_v9 = vpop.permute.xlu1 %2713 }
 0xaa0   : > { %v2722_v19 = vsel %vm1098_vm11, %v2720_v59, %v2714_v9 }
 0xaa1   : > { %5820 = vmatmul.msk.f32.gmra.mxu3 %vm536_vm0, %v2722_v19 }
 0xaa2   : > { %v3245_v2 = vpop.permute.xlu2 %3244 }
 0xaa7   : > { %v3239_v28 = vpop.permute.xlu0 %3238  ;;  %5831 = vmatmul.msk.f32.gmra.mxu0 %vm572_vm1, %v7595_v50  ;;  %v3027_v35 = vpop.permute.xlu1 %3026 }
 0xaa8   : > { %5840 = vmatpush.xpose.msk.msrb.mxu3 %vm572_vm1, %v3027_v35 }
 0xaaa   : > { %v3023_v33 = vpop.permute.xlu2 %3022 }
 0xaab   : > { %5841 = vmatmul.msk.f32.vlgmr.msrb.gmra.mxu3 %vm572_vm1, %v3019_v20 }
 0xaaf   : > { %v3025_v25 = vpop.permute.xlu0 %3024  ;;  %5832 = vmatmul.msk.f32.gmra.mxu0 %vm572_vm1, %v7598_v54  ;;  %v3247_v32 = vpop.permute.xlu1 %3246 }
 0xab0   : > { %5851 = vmatpush.xpose.msk.msra.mxu0 %vm572_vm1, %v3247_v32 }
 0xab2   : > { %v3467_v16 = vpop.permute.xlu2 %3466 }
 0xab3   : > { %5842 = vmatmul.msk.f32.gmra.mxu3 %vm572_vm1, %v3021_v29 }
 0xab4   : > { %5852 = vmatpush.xpose.msk.msra.mxu0 %vm572_vm1, %v3245_v2 }
 0xab7   : > { %v3463_v0 = vpop.permute.xlu0 %3462  ;;  %v3237_v55 = vpop.permute.xlu1 %3236 }
 0xab8   : > { %5853 = vmatmul.msk.f32.vlgmr.msra.gmra.mxu0 %vm572_vm1, %v3237_v55 }
 0xaba   : > { %v3465_v14 = vpop.permute.xlu2 %3464 }
 0xabb   : > { %5843 = vmatmul.msk.f32.gmra.mxu3 %vm572_vm1, %v3023_v33 }
 0xabf   : > { %v3457_v36 = vpop.permute.xlu0 %3456  ;;  %v3469_v40 = vpop.permute.xlu1 %3468 }
 0xac0   : > { %5854 = vmatmul.msk.f32.gmra.mxu0 %vm572_vm1, %v3239_v28  ;;  %5861 = vmatpush.xpose.msk.msra.mxu3 %vm572_vm1, %v3469_v40 }
 0xac2   : > { %v3455_v57 = vpop.permute.xlu2 %3454 }
 0xac3   : > { %5844 = vmatmul.msk.f32.gmra.mxu3 %vm572_vm1, %v3025_v25 }
 0xac4   : > { %5862 = vmatpush.xpose.msk.msra.mxu3 %vm572_vm1, %v3467_v16 }
 0xac7   : > { %v6125_v21 = vpop.permute.xlu0 %6124  ;;  %v3241_v44 = vpop.permute.xlu1 %3240 }
 0xac8   : > { %v6126_v49 = vunpack.i.l.bf16 %v6125_v21  ;;  %5855 = vmatmul.msk.f32.gmra.mxu0 %vm572_vm1, %v3241_v44  ;;  %5863 = vmatpush.xpose.msk.msra.mxu3 %vm572_vm1, %v3465_v14  ;;  %v6127_v41 = vunpack.i.h.bf16 %v6125_v21 }
 0xaca   : > { %3001 = vmatpush.msrb.mxu1 %v6126_v49  ;;  %v3461_v53 = vpop.permute.xlu2 %3460 }
 0xacc   : > { %3002 = vmatpush.msrb.mxu1 %v6127_v41  ;;  %5864 = vmatpush.xpose.msk.msra.mxu3 %vm572_vm1, %v3463_v0 }
 0xacf   : > { %5865 = vmatmul.msk.f32.vlgmr.msra.gmra.mxu3 %vm572_vm1, %v3455_v57  ;;  %v3243_v50 = vpop.permute.xlu1 %3242 }
 0xad0   : > { %5856 = vmatmul.msk.f32.gmra.mxu0 %vm572_vm1, %v3243_v50 }
 0xad7   : > { %5866 = vmatmul.msk.f32.gmra.mxu3 %vm572_vm1, %v3457_v36  ;;  %v3459_v7 = vpop.permute.xlu1 %3458 }
 0xadf   : > { %5867 = vmatmul.msk.f32.gmra.mxu3 %vm572_vm1, %v3459_v7  ;;  %v6120_v54 = vpop.permute.xlu1 %6119 }
 0xae0   : > { %v6121_v10 = vunpack.i.l.bf16 %v6120_v54  ;;  %v6122_v3 = vunpack.i.h.bf16 %v6120_v54 }
 0xae2   : > { %3003 = vmatpush.msrb.mxu1 %v6121_v10 }
 0xae4   : > { %3004 = vmatpush.msrb.mxu1 %v6122_v3 }
 0xae7   : > { %5868 = vmatmul.msk.f32.gmra.mxu3 %vm572_vm1, %v3461_v53 }
 0xb14   : > { %v2849_v58 = vpop.f32.mrf.mxu0 }
 0xb15   : > { %v2861_v62 = vmul.f32 0.35355338, %v2849_v58  ;;  %v7721_v24 = vpop.f32.mrf.mxu3 }
 0xb17   : > { %v7717_v30 = vadd.f32 %v2861_v62, %v7122_v6 }
 0xb19   : > { %v2869_v38 = vsel %vm536_vm0, %v7717_v30, -inf }
 0xb1a   : > { %2870 = vmax.xlane.f32.xlu0 %v2869_v38 }
 0xb1c   : > { %v2852_v63 = vpop.f32.mrf.mxu0 }
 0xb1d   : > { %v2862_v1 = vmul.f32 0.35355338, %v2852_v63 }
 0xb1f   : > { %v7724_v11 = vadd.f32 %v2862_v1, %v7146_v34 }
 0xb21   : > { %v2872_v26 = vsel %vm536_vm0, %v7724_v11, -inf }
 0xb22   : > { %2873 = vmax.xlane.f32.xlu1 %v2872_v26 }
 0xb24   : > { %v2855_v37 = vpop.f32.mrf.mxu0  ;;  %v7728_v22 = vpop.f32.mrf.mxu3 }
 0xb25   : > { %v2863_v47 = vmul.f32 0.35355338, %v2855_v37 }
 0xb27   : > { %v7736_v20 = vadd.f32 %v2863_v47, %v7167_v43 }
 0xb29   : > { %v2875_v29 = vsel %vm536_vm0, %v7736_v20, -inf }
 0xb2c   : > { %v2858_v42 = vpop.f32.mrf.mxu0 }
 0xb2d   : > { %v2864_v52 = vmul.f32 0.35355338, %v2858_v42 }
 0xb2e   : > { %v3067_v23 = vpop.f32.mrf.mxu3 }
 0xb2f   : > { %v3079_v12 = vmul.f32 0.35355338, %v3067_v23  ;;  %v7746_v28 = vadd.f32 %v2864_v52, %v7161_v17 }
 0xb31   : > { %v7731_v15 = vadd.f32 %v3079_v12, %v7122_v6  ;;  %v2878_v0 = vsel %vm536_vm0, %v7746_v28, -inf }
 0xb33   : > { %v3087_v51 = vsel %vm536_vm0, %v7731_v15, -inf }
 0xb34   : > { %3088 = vmax.xlane.f32.xlu2 %v3087_v51 }
 0xb35   : > { %v3285_v27 = vpop.f32.mrf.mxu0 }
 0xb36   : > { %v3070_v18 = vpop.f32.mrf.mxu3  ;;  %v3297_v41 = vmul.f32 0.35355338, %v3285_v27 }
 0xb37   : > { %v3080_v46 = vmul.f32 0.35355338, %v3070_v18 }
 0xb38   : > { %v7771_v50 = vadd.f32 %v3297_v41, %v7122_v6 }
 0xb39   : > { %v7739_v8 = vadd.f32 %v3080_v46, %v7146_v34 }
 0xb3a   : > { %v3305_v10 = vsel %vm536_vm0, %v7771_v50, -inf }
 0xb3b   : > { %v3090_v9 = vsel %vm536_vm0, %v7739_v8, -inf }
 0xb3c   : > { %2876 = vmax.xlane.f32.xlu2 %v2875_v29  ;;  %3091 = vmax.xlane.f32.xlu0 %v3090_v9 }
 0xb3d   : > { %v3288_v59 = vpop.f32.mrf.mxu0 }
 0xb3e   : > { %v3298_v19 = vmul.f32 0.35355338, %v3288_v59  ;;  %v3073_v2 = vpop.f32.mrf.mxu3 }
 0xb3f   : > { %v3081_v35 = vmul.f32 0.35355338, %v3073_v2 }
 0xb40   : > { %v7749_v25 = vadd.f32 %v3298_v19, %v7146_v34 }
 0xb41   : > { %v7752_v32 = vadd.f32 %v3081_v35, %v7167_v43 }
 0xb42   : > { %v3308_v33 = vsel %vm536_vm0, %v7749_v25, -inf }
 0xb43   : > { %v3093_v55 = vsel %vm536_vm0, %v7752_v32, -inf }
 0xb44   : > { %2879 = vmax.xlane.f32.xlu0 %v2878_v0  ;;  %3094 = vmax.xlane.f32.xlu1 %v3093_v55 }
 0xb45   : > { %3309 = vmax.xlane.f32.xlu2 %v3308_v33  ;;  %v3291_v16 = vpop.f32.mrf.mxu0 }
 0xb46   : > { %v3299_v36 = vmul.f32 0.35355338, %v3291_v16  ;;  %v3076_v40 = vpop.f32.mrf.mxu3 }
 0xb47   : > { %v3082_v14 = vmul.f32 0.35355338, %v3076_v40 }
 0xb48   : > { %v7761_v21 = vadd.f32 %v3299_v36, %v7167_v43 }
 0xb49   : > { %v7764_v44 = vadd.f32 %v3082_v14, %v7161_v17 }
 0xb4a   : > { %v3311_v49 = vsel %vm536_vm0, %v7761_v21, -inf }
 0xb4b   : > { %v3096_v57 = vsel %vm536_vm0, %v7764_v44, -inf }
 0xb4c   : > { %3097 = vmax.xlane.f32.xlu1 %v3096_v57  ;;  %3312 = vmax.xlane.f32.xlu0 %v3311_v49 }
 0xb4d   : > { %v3294_v37 = vpop.f32.mrf.mxu0 }
 0xb4e   : > { %v3300_v23 = vmul.f32 0.35355338, %v3294_v37 }
 0xb50   : > { %v7791_v51 = vadd.f32 %v3300_v23, %v7161_v17 }
 0xb52   : > { %v3503_v7 = vpop.f32.mrf.mxu3  ;;  %v3314_v46 = vsel %vm536_vm0, %v7791_v51, -inf }
 0xb53   : > { %v3515_v54 = vmul.f32 0.35355338, %v3503_v7 }
 0xb54   : > { %3306 = vmax.xlane.f32.xlu1 %v3305_v10 }
 0xb55   : > { %v7776_v3 = vadd.f32 %v3515_v54, %v7122_v6 }
 0xb57   : > { %v3523_v62 = vsel %vm536_vm0, %v7776_v3, -inf }
 0xb5a   : > { %v3506_v53 = vpop.f32.mrf.mxu3 }
 0xb5b   : > { %v3516_v58 = vmul.f32 0.35355338, %v3506_v53 }
 0xb5c   : > { %3524 = vmax.xlane.f32.xlu1 %v3523_v62 }
 0xb5d   : > { %v7781_v38 = vadd.f32 %v3516_v58, %v7146_v34 }
 0xb5f   : > { %v3526_v63 = vsel %vm536_vm0, %v7781_v38, -inf }
 0xb60   : > { %3527 = vmax.xlane.f32.xlu2 %v3526_v63 }
 0xb62   : > { %v3509_v1 = vpop.f32.mrf.mxu3 }
 0xb63   : > { %v3517_v26 = vmul.f32 0.35355338, %v3509_v1 }
 0xb65   : > { %v7786_v42 = vadd.f32 %v3517_v26, %v7167_v43 }
 0xb67   : > { %v3529_v12 = vsel %vm536_vm0, %v7786_v42, -inf }
 0xb68   : > { %3530 = vmax.xlane.f32.xlu0 %v3529_v12 }
 0xb6a   : > { %v3512_v47 = vpop.f32.mrf.mxu3 }
 0xb6b   : > { %v3518_v27 = vmul.f32 0.35355338, %v3512_v47 }
 0xb6d   : > { %v7794_v18 = vadd.f32 %v3518_v27, %v7161_v17 }
 0xb6f   : > { %v3532_v52 = vsel %vm536_vm0, %v7794_v18, -inf }
 0xb70   : > { %3315 = vmax.xlane.f32.xlu0 %v3314_v46  ;;  %3533 = vmax.xlane.f32.xlu2 %v3532_v52 }
 0xb84   : > { %6134 = vrot.lane.b32.xlu0 %v7646_v56, %s6656_s14 }
 0xb8c   : > { %6144 = vrot.lane.b32.xlu0 %v7664_v39, %s6656_s14 }
 0xb8d   : > { %v2871_v29 = vpop.xlane.xlu0 %2870 }
 0xb8e   : > { %v2881_v9 = vsub.f32 %v7717_v30, %v2871_v29 }
 0xb90   : > { %v2885_v59 = vmul.f32 1.442695, %v2881_v9 }
 0xb92   : > { %6358 = vpow2.f32 %v2885_v59 }
 0xb95   : > { %v2874_v35 = vpop.xlane.xlu1 %2873 }
 0xb96   : > { %v2882_v55 = vsub.f32 %v7724_v11, %v2874_v35 }
 0xb98   : > { %v7805_v19 = vpop.eup %6358  ;;  %v2887_v36 = vmul.f32 1.442695, %v2882_v55 }
 0xb99   : > { %v2893_v2 = vsel %vm536_vm0, %v7805_v19, 0.0 }
 0xb9a   : > { %2894 = vadd.xlane.f32.xlu2 %v2893_v2 }
 0xba7   : > { %v3089_v33 = vpop.xlane.xlu2 %3088 }
 0xba8   : > { %v3099_v0 = vsub.f32 %v7731_v15, %v3089_v33 }
 0xbaa   : > { %v3103_v16 = vmul.f32 1.442695, %v3099_v0 }
 0xbac   : > { %6360 = vpow2.f32 %v3103_v16 }
 0xbad   : > { %6362 = vpow2.f32 %v2887_v36 }
 0xbaf   : > { %v3092_v40 = vpop.xlane.xlu0 %3091  ;;  %v2877_v57 = vpop.xlane.xlu2 %2876 }
 0xbb0   : > { %v3100_v30 = vsub.f32 %v7739_v8, %v3092_v40  ;;  %v2883_v15 = vsub.f32 %v7736_v20, %v2877_v57 }
 0xbb2   : > { %v7811_v14 = vpop.eup %6360  ;;  %v3105_v41 = vmul.f32 1.442695, %v3100_v30  ;;  %v2889_v8 = vmul.f32 1.442695, %v2883_v15 }
 0xbb3   : > { %v3111_v49 = vsel %vm536_vm0, %v7811_v14, 0.0  ;;  %v7816_v54 = vpop.eup %6362 }
 0xbb4   : > { %3112 = vadd.xlane.f32.xlu2 %v3111_v49  ;;  %6364 = vpow2.f32 %v3105_v41  ;;  %v2896_v53 = vsel %vm536_vm0, %v7816_v54, 0.0 }
 0xbb7   : > { %v3095_v7 = vpop.xlane.xlu1 %3094  ;;  %v2880_v58 = vpop.xlane.xlu0 %2879 }
 0xbb8   : > { %v3101_v11 = vsub.f32 %v7752_v32, %v3095_v7  ;;  %v2884_v26 = vsub.f32 %v7746_v28, %v2880_v58  ;;  %v3310_v35 = vpop.xlane.xlu2 %3309 }
 0xbba   : > { %v3107_v10 = vmul.f32 1.442695, %v3101_v11  ;;  %v7822_v63 = vpop.eup %6364  ;;  %v2891_v12 = vmul.f32 1.442695, %v2884_v26 }
 0xbbb   : > { %v3114_v20 = vsel %vm536_vm0, %v7822_v63, 0.0 }
 0xbbc   : > { %2897 = vadd.xlane.f32.xlu2 %v2896_v53  ;;  %6366 = vpow2.f32 %v3107_v10 }
 0xbbd   : > { %6368 = vpow2.f32 %v2889_v8 }
 0xbbf   : > { %v3098_v62 = vpop.xlane.xlu1 %3097  ;;  %v3313_v29 = vpop.xlane.xlu0 %3312 }
 0xbc0   : > { %v3102_v1 = vsub.f32 %v7764_v44, %v3098_v62  ;;  %v3319_v53 = vsub.f32 %v7761_v21, %v3313_v29 }
 0xbc2   : > { %v3109_v32 = vmul.f32 1.442695, %v3102_v1  ;;  %v7828_v37 = vpop.eup %6366  ;;  %v3325_v58 = vmul.f32 1.442695, %v3319_v53 }
 0xbc3   : > { %v3117_v23 = vsel %vm536_vm0, %v7828_v37, 0.0  ;;  %v7832_v47 = vpop.eup %6368 }
 0xbc4   : > { %3115 = vadd.xlane.f32.xlu2 %v3114_v20  ;;  %6370 = vpow2.f32 %v3109_v32  ;;  %3118 = vadd.xlane.f32.xlu1 %v3117_v23  ;;  %v2899_v28 = vsel %vm536_vm0, %v7832_v47, 0.0 }
 0xbc5   : > { %6372 = vpow2.f32 %v2891_v12 }
 0xbc7   : > { %v3307_v2 = vpop.xlane.xlu1 %3306 }
 0xbc8   : > { %v3317_v0 = vsub.f32 %v7771_v50, %v3307_v2 }
 0xbca   : > { %v7834_v44 = vpop.eup %6370  ;;  %v3321_v36 = vmul.f32 1.442695, %v3317_v0 }
 0xbcb   : > { %v3120_v27 = vsel %vm536_vm0, %v7834_v44, 0.0  ;;  %v7840_v46 = vpop.eup %6372 }
 0xbcc   : > { %2900 = vadd.xlane.f32.xlu2 %v2899_v28  ;;  %3121 = vadd.xlane.f32.xlu0 %v3120_v27  ;;  %v2902_v52 = vsel %vm536_vm0, %v7840_v46, 0.0  ;;  %6374 = vpow2.f32 %v3321_v36 }
 0xbd2   : > { %v7855_v11 = vpop.eup %6374 }
 0xbd3   : > { %v3528_v40 = vpop.xlane.xlu2 %3527  ;;  %v3329_v10 = vsel %vm536_vm0, %v7855_v11, 0.0 }
 0xbd4   : > { %2903 = vadd.xlane.f32.xlu2 %v2902_v52 }
 0xbdb   : > { %v7848_v9 = vpop.xlane.xlu0 %3530 }
 0xbdd   : > { %6139 = vrot.lane.b32.xlu1 %v7664_v39, %s6659_s21 }
 0xbe0   : > { %6149 = vrot.lane.b32.xlu0 %v7646_v56, %s6658_s20 }
 0xbe3   : > { %v3316_v59 = vpop.xlane.xlu0 %3315  ;;  %v3534_v50 = vpop.xlane.xlu2 %3533 }
 0xbe4   : > { %v3320_v49 = vsub.f32 %v7791_v51, %v3316_v59  ;;  %v3536_v59 = vsub.f32 %v7781_v38, %v3528_v40  ;;  %v3537_v38 = vsub.f32 %v7786_v42, %v7848_v9 }
 0xbe6   : > { %v3327_v7 = vmul.f32 1.442695, %v3320_v49 }
 0xbe8   : > { %6376 = vpow2.f32 %v3327_v7 }
 0xbec   : > { %6129 = vrot.lane.b32.xlu2 %v7646_v56, %s6659_s21  ;;  %v3318_v56 = vsub.f32 %v7749_v25, %v3310_v35  ;;  %v3525_v25 = vpop.xlane.xlu1 %3524 }
 0xbed   : > { %v3535_v26 = vsub.f32 %v7776_v3, %v3525_v25 }
 0xbee   : > { %v3323_v15 = vmul.f32 1.442695, %v3318_v56  ;;  %v7860_v51 = vpop.eup %6376 }
 0xbef   : > { %v3338_v62 = vsel %vm536_vm0, %v7860_v51, 0.0  ;;  %v3539_v23 = vmul.f32 1.442695, %v3535_v26 }
 0xbf0   : > { %6378 = vpow2.f32 %v3323_v15 }
 0xbf6   : > { %v6135_v33 = vpop.permute.xlu0 %6134  ;;  %v7864_v1 = vpop.eup %6378 }
 0xbf7   : > { %v6136_v55 = vunpack.i.l.bf16 %v6135_v33  ;;  %v6137_v16 = vunpack.i.h.bf16 %v6135_v33  ;;  %v3332_v20 = vsel %vm536_vm0, %v7864_v1, 0.0 }
 0xbf9   : > { %3437 = vmatpush.msra.mxu1 %v6136_v55  ;;  %v3541_v55 = vmul.f32 1.442695, %v3536_v59 }
 0xbfb   : > { %3438 = vmatpush.msra.mxu1 %v6137_v16 }
 0xbfe   : > { %v6145_v30 = vpop.permute.xlu0 %6144 }
 0xbff   : > { %v6146_v41 = vunpack.i.l.bf16 %v6145_v30  ;;  %v6147_v57 = vunpack.i.h.bf16 %v6145_v30  ;;  %v3543_v30 = vmul.f32 1.442695, %v3537_v38 }
 0xc01   : > { %3439 = vmatpush.msra.mxu1 %v6146_v41 }
 0xc03   : > { %3440 = vmatpush.msra.mxu1 %v6147_v57 }
 0xc07   : > { %3330 = vadd.xlane.f32.xlu1 %v3329_v10 }
 0xc0d   : > { %v2895_v8 = vpop.xlane.xlu2 %2894 }
 0xc0e   : > { %6380 = vrcp.f32 %v2895_v8  ;;  %v2916_v28 = vand.u32 2147483648, %v2895_v8  ;;  %v2914_v29 = vand.u32 2147483647, %v2895_v8  ;;  %vm2910_vm4 = vweird.f32 %v2895_v8 }
 0xc0f   : > { %3339 = vadd.xlane.f32.xlu1 %v3338_v62  ;;  %6382 = vpow2.f32 %v3325_v58 }
 0xc10   : > { %6384 = vpow2.f32 %v3539_v23  ;;  %v2917_v3 = vor.u32 1.1754944e-38, %v2916_v28  ;;  %vm2915_vm6 = vcmp.eq.f32.partialorder %v2914_v29, 8.507059e+37 }
 0xc11   : > { %6386 = vpow2.f32 %v3541_v55 }
 0xc12   : > { %6388 = vpow2.f32 %v3543_v30 }
 0xc14   : > { %v6381_v32 = vpop.eup %6380 }
 0xc15   : > { %v2906_v21 = vmul.f32 %v6381_v32, %v2895_v8  ;;  %3333 = vadd.xlane.f32.xlu2 %v3332_v20  ;;  %v7869_v27 = vpop.eup %6382  ;;  %vm2911_vm2 = vweird.f32 %v6381_v32 }
 0xc16   : > { %vm2912_vm5 = vmor %vm2910_vm4, %vm2911_vm2  ;;  %v3335_v35 = vsel %vm536_vm0, %v7869_v27, 0.0  ;;  %v7875_v36 = vpop.eup %6384 }
 0xc17   : > { %v2907_v12 = vsub.f32 1.0, %v2906_v21  ;;  %v3547_v40 = vsel %vm536_vm0, %v7875_v36, 0.0  ;;  %v7884_v41 = vpop.eup %6386 }
 0xc18   : > { %v3550_v57 = vsel %vm536_vm0, %v7884_v41, 0.0  ;;  %v7891_v56 = vpop.eup %6388 }
 0xc19   : > { %v2908_v52 = vmul.f32 %v6381_v32, %v2907_v12  ;;  %v3553_v7 = vsel %vm536_vm0, %v7891_v56, 0.0 }
 0xc1b   : > { %v2909_v2 = vadd.f32 %v6381_v32, %v2908_v52 }
 0xc1d   : > { %v2913_v33 = vsel %vm2912_vm5, %v6381_v32, %v2909_v2  ;;  %3336 = vadd.xlane.f32.xlu2 %v3335_v35 }
 0xc1e   : > { %v2918_v0 = vsel %vm2915_vm6, %v2917_v3, %v2913_v33 }
 0xc1f   : > { %v2919_v16 = vmul.f32 %v7805_v19, %v2918_v0  ;;  %v3538_v19 = vsub.f32 %v7794_v18, %v3534_v50 }
 0xc21   : > { %5833 = vmatmul.msk.f32.vlgmr.msrb.gmra.mxu1 %vm536_vm0, %v2919_v16  ;;  %v3545_v42 = vmul.f32 1.442695, %v3538_v19 }
 0xc25   : > { %3548 = vadd.xlane.f32.xlu2 %v3547_v40 }
 0xc27   : > { %v7882_v49 = vpop.xlane.xlu2 %3112 }
 0xc28   : > { %6154 = vrot.lane.b32.xlu1 %v7664_v39, %s6658_s20  ;;  %vm3128_vm15 = vweird.f32 %v7882_v49 }
 0xc2d   : > { %3551 = vadd.xlane.f32.xlu2 %v3550_v57 }
 0xc2f   : > { %v2898_v9 = vpop.xlane.xlu2 %2897 }
 0xc30   : > { %6390 = vrcp.f32 %v2898_v9  ;;  %v2931_v53 = vand.u32 2147483648, %v2898_v9  ;;  %v2929_v58 = vand.u32 2147483647, %v2898_v9  ;;  %vm2925_vm8 = vweird.f32 %v2898_v9 }
 0xc31   : > { %6392 = vpow2.f32 %v3545_v42 }
 0xc32   : > { %6394 = vrcp.f32 %v7882_v49  ;;  %v2932_v32 = vor.u32 1.1754944e-38, %v2931_v53  ;;  %vm2930_vm10 = vcmp.eq.f32.partialorder %v2929_v58, 8.507059e+37 }
 0xc35   : > { %3554 = vadd.xlane.f32.xlu2 %v3553_v7  ;;  %v3134_v7 = vand.u32 2147483648, %v7882_v49 }
 0xc36   : > { %v6391_v15 = vpop.eup %6390 }
 0xc37   : > { %v2921_v39 = vmul.f32 %v6391_v15, %v2898_v9  ;;  %v7896_v10 = vpop.xlane.xlu2 %3115  ;;  %v7898_v18 = vpop.eup %6392  ;;  %vm2926_vm7 = vweird.f32 %v6391_v15 }
 0xc38   : > { %v3556_v25 = vsel %vm536_vm0, %v7898_v18, 0.0  ;;  %v7902_v62 = vpop.eup %6394  ;;  %vm2927_vm9 = vmor %vm2925_vm8, %vm2926_vm7  ;;  %6396 = vrcp.f32 %v7896_v10  ;;  %v7908_v29 = vpop.xlane.xlu1 %3118 }
 0xc39   : > { %v2922_v50 = vsub.f32 1.0, %v2921_v39  ;;  %v3124_v23 = vmul.f32 %v7902_v62, %v7882_v49  ;;  %vm3129_vm13 = vweird.f32 %v7902_v62  ;;  %v3147_v39 = vand.u32 2147483647, %v7896_v10 }
 0xc3a   : > { %vm7928_vm4 = vmor %vm3128_vm15, %vm3129_vm13 }
 0xc3b   : > { %v2923_v8 = vmul.f32 %v6391_v15, %v2922_v50  ;;  %v3125_v52 = vsub.f32 1.0, %v3124_v23  ;;  %v3132_v50 = vand.u32 2147483647, %v7882_v49  ;;  %vm3148_vm15 = vcmp.eq.f32.partialorder %v3147_v39, 8.507059e+37 }
 0xc3d   : > { %3557 = vadd.xlane.f32.xlu2 %v3556_v25  ;;  %v2924_v26 = vadd.f32 %v6391_v15, %v2923_v8  ;;  %v3126_v33 = vmul.f32 %v7902_v62, %v3125_v52  ;;  %vm3133_vm6 = vcmp.eq.f32.partialorder %v3132_v50, 8.507059e+37 }
 0xc3e   : > { %v7911_v59 = vpop.eup %6396 }
 0xc3f   : > { %v2901_v20 = vpop.xlane.xlu2 %2900  ;;  %v2928_v21 = vsel %vm2927_vm9, %v6391_v15, %v2924_v26  ;;  %v3127_v40 = vadd.f32 %v7902_v62, %v3126_v33  ;;  %v7924_v57 = vpop.xlane.xlu0 %3121  ;;  %vm3144_vm8 = vweird.f32 %v7911_v59 }
 0xc40   : > { %6398 = vrcp.f32 %v2901_v20  ;;  %v2933_v12 = vsel %vm2930_vm10, %v2932_v32, %v2928_v21  ;;  %v2946_v55 = vand.u32 2147483648, %v2901_v20  ;;  %v2944_v38 = vand.u32 2147483647, %v2901_v20 }
 0xc41   : > { %v2934_v28 = vmul.f32 %v7816_v54, %v2933_v12  ;;  %6400 = vrcp.f32 %v7908_v29  ;;  %v3139_v54 = vmul.f32 %v7911_v59, %v7896_v10  ;;  %vm2940_vm14 = vweird.f32 %v2901_v20 }
 0xc42   : > { %v2947_v15 = vor.u32 1.1754944e-38, %v2946_v55  ;;  %vm2945_vm5 = vcmp.eq.f32.partialorder %v2944_v38, 8.507059e+37  ;;  %v3131_v25 = vsel %vm7928_vm4, %v7902_v62, %v3127_v40  ;;  %vm3143_vm10 = vweird.f32 %v7896_v10 }
 0xc43   : > { %5834 = vmatmul.msk.f32.gmra.mxu1 %vm536_vm0, %v2934_v28  ;;  %v3140_v19 = vsub.f32 1.0, %v3139_v54  ;;  %v3135_v28 = vor.u32 1.1754944e-38, %v3134_v7  ;;  %v3149_v40 = vand.u32 2147483648, %v7896_v10  ;;  %vm3158_vm4 = vweird.f32 %v7908_v29 }
 0xc45   : > { %v3136_v33 = vsel %vm3133_vm6, %v3135_v28, %v3131_v25 }
 0xc46   : > { %v6399_v2 = vpop.eup %6398  ;;  %v3137_v7 = vmul.f32 %v7811_v14, %v3136_v33 }
 0xc47   : > { %v2936_v3 = vmul.f32 %v6399_v2, %v2901_v20  ;;  %v7914_v35 = vpop.xlane.xlu2 %2903  ;;  %vm2941_vm12 = vweird.f32 %v6399_v2  ;;  %v7922_v30 = vpop.eup %6400  ;;  %v3141_v20 = vmul.f32 %v7911_v59, %v3140_v19 }
 0xc48   : > { %6402 = vrcp.f32 %v7914_v35  ;;  %vm2942_vm2 = vmor %vm2940_vm14, %vm2941_vm12  ;;  %v3154_v21 = vmul.f32 %v7922_v30, %v7908_v29  ;;  %vm2955_vm9 = vweird.f32 %v7914_v35 }
 0xc49   : > { %v2937_v0 = vsub.f32 1.0, %v2936_v3  ;;  %6404 = vrcp.f32 %v7924_v57  ;;  %v2959_v3 = vand.u32 2147483647, %v7914_v35  ;;  %vm7955_vm14 = vmor %vm3143_vm10, %vm3144_vm8  ;;  %vm3173_vm8 = vweird.f32 %v7924_v57 }
 0xc4b   : > { %v2938_v16 = vmul.f32 %v6399_v2, %v2937_v0  ;;  %v3155_v0 = vsub.f32 1.0, %v3154_v21  ;;  %vm2960_vm13 = vcmp.eq.f32.partialorder %v2959_v3, 8.507059e+37  ;;  %v3164_v21 = vand.u32 2147483648, %v7908_v29 }
 0xc4d   : > { %v2939_v42 = vadd.f32 %v6399_v2, %v2938_v16  ;;  %v3142_v16 = vadd.f32 %v7911_v59, %v3141_v20 }
 0xc4e   : > { %v6403_v9 = vpop.eup %6402 }
 0xc4f   : > { %v2951_v53 = vmul.f32 %v6403_v9, %v7914_v35  ;;  %v6130_v8 = vpop.permute.xlu2 %6129  ;;  %v2943_v58 = vsel %vm2942_vm2, %v6399_v2, %v2939_v42  ;;  %v6140_v49 = vpop.permute.xlu1 %6139  ;;  %v2961_v2 = vand.u32 2147483648, %v7914_v35  ;;  %vm2956_vm7 = vweird.f32 %v6403_v9 }
 0xc50   : > { %v6131_v26 = vunpack.i.l.bf16 %v6130_v8  ;;  %v2948_v32 = vsel %vm2945_vm5, %v2947_v15, %v2943_v58  ;;  %v6132_v52 = vunpack.i.h.bf16 %v6130_v8  ;;  %v6141_v54 = vunpack.i.l.bf16 %v6140_v49  ;;  %v6405_v38 = vpop.eup %6404  ;;  %vm2957_vm12 = vmor %vm2955_vm9, %vm2956_vm7 }
 0xc51   : > { %v2952_v23 = vsub.f32 1.0, %v2951_v53  ;;  %v2949_v12 = vmul.f32 %v7832_v47, %v2948_v32  ;;  %v6142_v19 = vunpack.i.h.bf16 %v6140_v49  ;;  %v2962_v42 = vor.u32 1.1754944e-38, %v2961_v2 }
 0xc52   : > { %3219 = vmatpush.msra.mxu2 %v6131_v26  ;;  %v6150_v55 = vpop.permute.xlu0 %6149  ;;  %v3156_v8 = vmul.f32 %v7922_v30, %v3155_v0  ;;  %v3169_v58 = vmul.f32 %v6405_v38, %v7924_v57  ;;  %v3146_v10 = vsel %vm7955_vm14, %v7911_v59, %v3142_v16  ;;  %vm3159_vm2 = vweird.f32 %v7922_v30 }
 0xc53   : > { %5835 = vmatmul.msk.f32.gmra.mxu1 %vm536_vm0, %v2949_v12  ;;  %v2953_v62 = vmul.f32 %v6403_v9, %v2952_v23  ;;  %v6151_v50 = vunpack.i.l.bf16 %v6150_v55  ;;  %v6152_v25 = vunpack.i.h.bf16 %v6150_v55  ;;  %vm3160_vm5 = vmor %vm3158_vm4, %vm3159_vm2  ;;  %v3165_v12 = vor.u32 1.1754944e-38, %v3164_v21  ;;  %v3781_v21 = vld [vmem:[#allocation2 + $0x80] sm:$0xff] }
 0xc54   : > { %3220 = vmatpush.msra.mxu2 %v6132_v52  ;;  %v3157_v32 = vadd.f32 %v7922_v30, %v3156_v8  ;;  %v3170_v20 = vsub.f32 1.0, %v3169_v58  ;;  %vm3174_vm7 = vweird.f32 %v6405_v38  ;;  %v3179_v2 = vand.u32 2147483648, %v7924_v57 }
 0xc55   : > { %v2954_v47 = vadd.f32 %v6403_v9, %v2953_v62  ;;  %vm3175_vm9 = vmor %vm3173_vm8, %vm3174_vm7 }
 0xc56   : > { %3221 = vmatpush.msra.mxu2 %v6141_v54  ;;  %v3171_v23 = vmul.f32 %v6405_v38, %v3170_v20  ;;  %v3161_v49 = vsel %vm3160_vm5, %v7922_v30, %v3157_v32  ;;  %v3180_v3 = vor.u32 1.1754944e-38, %v3179_v2 }
 0xc57   : > { %v2958_v15 = vsel %vm2957_vm12, %v6403_v9, %v2954_v47  ;;  %v3150_v9 = vor.u32 1.1754944e-38, %v3149_v40 }
 0xc58   : > { %3222 = vmatpush.msra.mxu2 %v6142_v19  ;;  %v2963_v53 = vsel %vm2960_vm13, %v2962_v42, %v2958_v15  ;;  %v3172_v52 = vadd.f32 %v6405_v38, %v3171_v23 }
 0xc59   : > { %5845 = vmatmul.msk.f32.vlgmr.msra.gmra.mxu2 %vm536_vm0, %v3137_v7  ;;  %v2964_v14 = vmul.f32 %v7840_v46, %v2963_v53  ;;  %v3151_v26 = vsel %vm3148_vm15, %v3150_v9, %v3146_v10  ;;  %v3162_v46 = vand.u32 2147483647, %v7908_v29  ;;  %v3177_v29 = vand.u32 2147483647, %v7924_v57  ;;  %v3784_v53 = vld [vmem:[#allocation2 + $0x98] sm:$0xff] }
 0xc5a   : > { %3655 = vmatpush.msrb.mxu2 %v6151_v50  ;;  %v3152_v59 = vmul.f32 %v7822_v63, %v3151_v26  ;;  %v3176_v63 = vsel %vm3175_vm9, %v6405_v38, %v3172_v52  ;;  %3808 = vmatpush.msrb.mxu1 %v3784_v53  ;;  %v3782_v26 = vld [vmem:[#allocation2 + $0x88] sm:$0xff] }
 0xc5b   : > { %5836 = vmatmul.msk.f32.gmra.mxu1 %vm536_vm0, %v2964_v14  ;;  %vm3163_vm6 = vcmp.eq.f32.partialorder %v3162_v46, 8.507059e+37  ;;  %vm3178_vm10 = vcmp.eq.f32.partialorder %v3177_v29, 8.507059e+37  ;;  %v3783_v14 = vld [vmem:[#allocation2 + $0x90] sm:$0xff] }
 0xc5c   : > { %3656 = vmatpush.msrb.mxu2 %v6152_v25  ;;  %v3166_v28 = vsel %vm3163_vm6, %v3165_v12, %v3161_v49  ;;  %v3181_v30 = vsel %vm3178_vm10, %v3180_v3, %v3176_v63  ;;  %3809 = vmatpush.msrb.mxu1 %v3783_v14 }
 0xc5d   : > { %v3167_v62 = vmul.f32 %v7828_v37, %v3166_v28  ;;  %v3182_v33 = vmul.f32 %v7834_v44, %v3181_v30 }
 0xc5e   : > { %3810 = vmatpush.msrb.mxu1 %v3782_v26 }
 0xc60   : > { %3811 = vmatpush.msrb.mxu1 %v3781_v21  ;;  %v8009_v21 = vld [vmem:[#allocation6 + $0x8] sm:$0xff] }
 0xc61   : > { %5846 = vmatmul.msk.f32.gmra.mxu2 %vm536_vm0, %v3152_v59 }
 0xc69   : > { %5847 = vmatmul.msk.f32.gmra.mxu2 %vm536_vm0, %v3167_v62 }
 0xc71   : > { %5848 = vmatmul.msk.f32.gmra.mxu2 %vm536_vm0, %v3182_v33 }
 0xc7a   : > { %v3331_v54 = vpop.xlane.xlu1 %3330 }
 0xc7b   : > { %6406 = vrcp.f32 %v3331_v54  ;;  %v3352_v16 = vand.u32 2147483648, %v3331_v54  ;;  %v3350_v57 = vand.u32 2147483647, %v3331_v54  ;;  %vm3346_vm13 = vweird.f32 %v3331_v54 }
 0xc7d   : > { %v3353_v42 = vor.u32 1.1754944e-38, %v3352_v16  ;;  %vm3351_vm15 = vcmp.eq.f32.partialorder %v3350_v57, 8.507059e+37 }
 0xc81   : > { %v6407_v0 = vpop.eup %6406 }
 0xc82   : > { %v3342_v55 = vmul.f32 %v6407_v0, %v3331_v54  ;;  %vm3347_vm12 = vweird.f32 %v6407_v0  ;;  %v7982_v19 = vpop.xlane.xlu1 %3339 }
 0xc83   : > { %vm3348_vm14 = vmor %vm3346_vm13, %vm3347_vm12  ;;  %vm3391_vm13 = vweird.f32 %v7982_v19 }
 0xc84   : > { %v3343_v47 = vsub.f32 1.0, %v3342_v55 }
 0xc86   : > { %v3344_v37 = vmul.f32 %v6407_v0, %v3343_v47 }
 0xc88   : > { %v3334_v40 = vpop.xlane.xlu2 %3333  ;;  %v3345_v38 = vadd.f32 %v6407_v0, %v3344_v37 }
 0xc89   : > { %6408 = vrcp.f32 %v3334_v40  ;;  %v3367_v9 = vand.u32 2147483648, %v3334_v40  ;;  %vm3361_vm4 = vweird.f32 %v3334_v40 }
 0xc8a   : > { %v3349_v44 = vsel %vm3348_vm14, %v6407_v0, %v3345_v38  ;;  %6410 = vrcp.f32 %v7982_v19 }
 0xc8b   : > { %v3354_v7 = vsel %vm3351_vm15, %v3353_v42, %v3349_v44  ;;  %v3368_v46 = vor.u32 1.1754944e-38, %v3367_v9  ;;  %v3395_v44 = vand.u32 2147483647, %v7982_v19 }
 0xc8c   : > { %v3355_v15 = vmul.f32 %v7855_v11, %v3354_v7  ;;  %v3365_v11 = vand.u32 2147483647, %v3334_v40 }
 0xc8e   : > { %5857 = vmatmul.msk.f32.vlgmr.msra.gmra.mxu1 %vm536_vm0, %v3355_v15  ;;  %vm3366_vm6 = vcmp.eq.f32.partialorder %v3365_v11, 8.507059e+37 }
 0xc8f   : > { %v6409_v39 = vpop.eup %6408 }
 0xc90   : > { %v3357_v35 = vmul.f32 %v6409_v39, %v3334_v40  ;;  %v3337_v50 = vpop.xlane.xlu2 %3336  ;;  %v7987_v8 = vpop.eup %6410  ;;  %vm3362_vm2 = vweird.f32 %v6409_v39  ;;  %v3397_v40 = vand.u32 2147483648, %v7982_v19 }
 0xc91   : > { %6412 = vrcp.f32 %v3337_v50  ;;  %v3387_v25 = vmul.f32 %v7987_v8, %v7982_v19  ;;  %vm3363_vm5 = vmor %vm3361_vm4, %vm3362_vm2  ;;  %v3382_v29 = vand.u32 2147483648, %v3337_v50  ;;  %v3380_v33 = vand.u32 2147483647, %v3337_v50 }
 0xc92   : > { %v3358_v58 = vsub.f32 1.0, %v3357_v35  ;;  %vm3376_vm8 = vweird.f32 %v3337_v50  ;;  %vm3392_vm10 = vweird.f32 %v7987_v8  ;;  %vm3396_vm4 = vcmp.eq.f32.partialorder %v3395_v44, 8.507059e+37 }
 0xc93   : > { %v3388_v12 = vsub.f32 1.0, %v3387_v25  ;;  %v3383_v47 = vor.u32 1.1754944e-38, %v3382_v29  ;;  %vm3381_vm12 = vcmp.eq.f32.partialorder %v3380_v33, 8.507059e+37  ;;  %vm8000_vm14 = vmor %vm3391_vm13, %vm3392_vm10 }
 0xc94   : > { %v3359_v10 = vmul.f32 %v6409_v39, %v3358_v58  ;;  %v3398_v58 = vor.u32 1.1754944e-38, %v3397_v40 }
 0xc95   : > { %v3389_v3 = vmul.f32 %v7987_v8, %v3388_v12 }
 0xc96   : > { %v3360_v32 = vadd.f32 %v6409_v39, %v3359_v10 }
 0xc97   : > { %v6413_v20 = vpop.eup %6412  ;;  %v3390_v57 = vadd.f32 %v7987_v8, %v3389_v3 }
 0xc98   : > { %v3372_v59 = vmul.f32 %v6413_v20, %v3337_v50  ;;  %v3549_v23 = vpop.xlane.xlu2 %3548  ;;  %v3364_v49 = vsel %vm3363_vm5, %v6409_v39, %v3360_v32  ;;  %vm3377_vm7 = vweird.f32 %v6413_v20 }
 0xc99   : > { %6414 = vrcp.f32 %v3549_v23  ;;  %v3369_v52 = vsel %vm3366_vm6, %v3368_v46, %v3364_v49  ;;  %vm3378_vm9 = vmor %vm3376_vm8, %vm3377_vm7  ;;  %v3570_v7 = vand.u32 2147483648, %v3549_v23  ;;  %v3568_v50 = vand.u32 2147483647, %v3549_v23 }
 0xc9a   : > { %v3373_v28 = vsub.f32 1.0, %v3372_v59  ;;  %v3370_v2 = vmul.f32 %v7864_v1, %v3369_v52  ;;  %v6155_v63 = vpop.permute.xlu1 %6154  ;;  %v3394_v53 = vsel %vm8000_vm14, %v7987_v8, %v3390_v57  ;;  %vm3564_vm2 = vweird.f32 %v3549_v23 }
 0xc9b   : > { %v6156_v30 = vunpack.i.l.bf16 %v6155_v63  ;;  %v6157_v55 = vunpack.i.h.bf16 %v6155_v63  ;;  %vm3569_vm6 = vcmp.eq.f32.partialorder %v3568_v50, 8.507059e+37  ;;  %v3399_v11 = vsel %vm3396_vm4, %v3398_v58, %v3394_v53 }
 0xc9c   : > { %v3374_v62 = vmul.f32 %v6413_v20, %v3373_v28  ;;  %5858 = vmatmul.msk.f32.gmra.mxu1 %vm536_vm0, %v3370_v2  ;;  %v2723_v8 = vperm.slane %v8009_v21, 1  ;;  %v3400_v46 = vmul.f32 %v7860_v51, %v3399_v11 }
 0xc9d   : > { %3657 = vmatpush.msrb.mxu2 %v6156_v30 }
 0xc9e   : > { %v3375_v54 = vadd.f32 %v6413_v20, %v3374_v62  ;;  %v3006_v50 = vpop.f32.mrf.mxu1 }
 0xc9f   : > { %v6415_v0 = vpop.eup %6414  ;;  %3658 = vmatpush.msrb.mxu2 %v6157_v55 }
 0xca0   : > { %v3560_v16 = vmul.f32 %v6415_v0, %v3549_v23  ;;  %v3552_v37 = vpop.xlane.xlu2 %3551  ;;  %v3379_v1 = vsel %vm3378_vm9, %v6413_v20, %v3375_v54  ;;  %vm3565_vm15 = vweird.f32 %v6415_v0 }
 0xca1   : > { %6416 = vrcp.f32 %v3552_v37  ;;  %v3384_v42 = vsel %vm3381_vm12, %v3383_v47, %v3379_v1  ;;  %vm3566_vm5 = vmor %vm3564_vm2, %vm3565_vm15  ;;  %v3585_v23 = vand.u32 2147483648, %v3552_v37  ;;  %v3583_v49 = vand.u32 2147483647, %v3552_v37 }
 0xca2   : > { %v3561_v38 = vsub.f32 1.0, %v3560_v16  ;;  %v3385_v15 = vmul.f32 %v7869_v27, %v3384_v42  ;;  %v3571_v27 = vor.u32 1.1754944e-38, %v3570_v7  ;;  %vm3579_vm8 = vweird.f32 %v3552_v37 }
 0xca3   : > { %v3586_v52 = vor.u32 1.1754944e-38, %v3585_v23  ;;  %vm3584_vm10 = vcmp.eq.f32.partialorder %v3583_v49, 8.507059e+37  ;;  %v2751_v47 = vadd.f32 %v7728_v22, %v2723_v8  ;;  %v2761_v23 = vld [vmem:[#allocation4 + $0x70] sm:$0xff]  ;;  %v2760_v49 = vld [vmem:[#allocation4 + $0x68] sm:$0xff] }
 0xca4   : > { %v3562_v35 = vmul.f32 %v6415_v0, %v3561_v38  ;;  %5859 = vmatmul.msk.f32.gmra.mxu1 %vm536_vm0, %v3385_v15 }
 0xca5   : > { %v8026_v40 = vadd.f32 %v2751_v47, %v7368_v5 }
 0xca6   : > { %v3563_v14 = vadd.f32 %v6415_v0, %v3562_v35 }
 0xca7   : > { %v6417_v19 = vpop.eup %6416 }
 0xca8   : > { %v3567_v10 = vsel %vm3566_vm5, %v6415_v0, %v3563_v14  ;;  %v3575_v9 = vmul.f32 %v6417_v19, %v3552_v37  ;;  %v3555_v25 = vpop.xlane.xlu2 %3554  ;;  %vm3580_vm7 = vweird.f32 %v6417_v19 }
 0xca9   : > { %v3572_v26 = vsel %vm3569_vm6, %v3571_v27, %v3567_v10  ;;  %6418 = vrcp.f32 %v3555_v25  ;;  %vm3581_vm9 = vmor %vm3579_vm8, %vm3580_vm7  ;;  %v3600_v30 = vand.u32 2147483648, %v3555_v25  ;;  %v3598_v0 = vand.u32 2147483647, %v3555_v25 }
 0xcaa   : > { %v3573_v32 = vmul.f32 %v7875_v36, %v3572_v26  ;;  %v3576_v20 = vsub.f32 1.0, %v3575_v9  ;;  %v2748_v36 = vadd.f32 %v7721_v24, %v2723_v8  ;;  %vm3594_vm13 = vweird.f32 %v3555_v25 }
 0xcab   : > { %v3601_v16 = vor.u32 1.1754944e-38, %v3600_v30  ;;  %vm3599_vm15 = vcmp.eq.f32.partialorder %v3598_v0, 8.507059e+37 }
 0xcac   : > { %v3577_v59 = vmul.f32 %v6417_v19, %v3576_v20  ;;  %5869 = vmatmul.msk.f32.vlgmr.msrb.gmra.mxu2 %vm536_vm0, %v3573_v32  ;;  %5860 = vmatmul.msk.f32.gmra.mxu1 %vm536_vm0, %v3400_v46  ;;  %v8017_v3 = vadd.f32 %v2748_v36, %v7358_v31 }
 0xcae   : > { %v3578_v12 = vadd.f32 %v6417_v19, %v3577_v59  ;;  %v2762_v59 = vld [vmem:[#allocation4 + $0x78] sm:$0xff] }
 0xcaf   : > { %v6419_v28 = vpop.eup %6418  ;;  %3757 = vmatpush.msrb.mxu0 %v2762_v59 }
 0xcb0   : > { %v3590_v2 = vmul.f32 %v6419_v28, %v3555_v25  ;;  %v3558_v62 = vpop.xlane.xlu2 %3557  ;;  %v3582_v29 = vsel %vm3581_vm9, %v6417_v19, %v3578_v12  ;;  %vm3595_vm12 = vweird.f32 %v6419_v28  ;;  %v2759_v12 = vld [vmem:[#allocation4 + $0x60] sm:$0xff] }
 0xcb1   : > { %6420 = vrcp.f32 %v3558_v62  ;;  %v3587_v63 = vsel %vm3584_vm10, %v3586_v52, %v3582_v29  ;;  %vm3596_vm14 = vmor %vm3594_vm13, %vm3595_vm12  ;;  %v3615_v38 = vand.u32 2147483648, %v3558_v62  ;;  %v3613_v44 = vand.u32 2147483647, %v3558_v62  ;;  %3758 = vmatpush.msrb.mxu0 %v2761_v23 }
 0xcb2   : > { %v3591_v51 = vsub.f32 1.0, %v3590_v2  ;;  %v3588_v33 = vmul.f32 %v7884_v41, %v3587_v63  ;;  %vm3609_vm4 = vweird.f32 %v3558_v62 }
 0xcb3   : > { %v3616_v7 = vor.u32 1.1754944e-38, %v3615_v38  ;;  %vm3614_vm6 = vcmp.eq.f32.partialorder %v3613_v44, 8.507059e+37  ;;  %3759 = vmatpush.msrb.mxu0 %v2760_v49 }
 0xcb4   : > { %v3592_v54 = vmul.f32 %v6419_v28, %v3591_v51  ;;  %5870 = vmatmul.msk.f32.gmra.mxu2 %vm536_vm0, %v3588_v33  ;;  %5877 = vmatmul.msk.f32.vlgmr.msrb.gmra.mxu1 %vm536_vm0, %v8017_v3 }
 0xcb5   : > { %3760 = vmatpush.msrb.mxu0 %v2759_v12 }
 0xcb6   : > { %v3593_v24 = vadd.f32 %v6419_v28, %v3592_v54 }
 0xcb7   : > { %v6421_v55 = vpop.eup %6420 }
 0xcb8   : > { %v3605_v31 = vmul.f32 %v6421_v55, %v3558_v62  ;;  %v3597_v37 = vsel %vm3596_vm14, %v6419_v28, %v3593_v24  ;;  %vm3610_vm2 = vweird.f32 %v6421_v55 }
 0xcb9   : > { %v3602_v1 = vsel %vm3599_vm15, %v3601_v16, %v3597_v37  ;;  %vm3611_vm5 = vmor %vm3609_vm4, %vm3610_vm2 }
 0xcba   : > { %v3606_v41 = vsub.f32 1.0, %v3605_v31  ;;  %v3603_v57 = vmul.f32 %v7891_v56, %v3602_v1 }
 0xcbc   : > { %v3607_v42 = vmul.f32 %v6421_v55, %v3606_v41  ;;  %5871 = vmatmul.msk.f32.gmra.mxu2 %vm536_vm0, %v3603_v57  ;;  %5878 = vmatmul.msk.f32.gmra.mxu1 %vm536_vm0, %v8026_v40 }
 0xcbe   : > { %v3608_v22 = vadd.f32 %v6421_v55, %v3607_v42 }
 0xcc0   : > { %v3612_v15 = vsel %vm3611_vm5, %v6421_v55, %v3608_v22  ;;  %v3009_v53 = vpop.f32.mrf.mxu1 }
 0xcc1   : > { %v3617_v39 = vsel %vm3614_vm6, %v3616_v7, %v3612_v15 }
 0xcc2   : > { %v3618_v56 = vmul.f32 %v7898_v18, %v3617_v39 }
 0xcc4   : > { %5872 = vmatmul.msk.f32.gmra.mxu2 %vm536_vm0, %v3618_v56 }
 0xcd0   : > { %v8035_v58 = vpop.f32.mrf.mxu1 }
 0xcd8   : > { %v8037_v14 = vpop.f32.mrf.mxu1 }
 0xcdc   : > { %v3224_v5 = vpop.f32.mrf.mxu2 }
 0xcdd   : > { %3676 = vrot.lane.b32.xlu0 %v3224_v5, %s6661_s23 }
 0xce4   : > { %v3227_v35 = vpop.f32.mrf.mxu2 }
 0xce5   : > { %3678 = vrot.lane.b32.xlu1 %v3227_v35, %s6661_s23 }
 0xcec   : > { %v3230_v18 = vpop.f32.mrf.mxu2 }
 0xcf4   : > { %v3233_v9 = vpop.f32.mrf.mxu2 }
 0xd0b   : > { %v3442_v19 = vpop.f32.mrf.mxu1 }
 0xd0c   : > { %3692 = vrot.lane.b32.xlu2 %v3442_v19, %s6660_s22 }
 0xd19   : > { %v3445_v27 = vpop.f32.mrf.mxu1 }
 0xd1a   : > { %3694 = vrot.lane.b32.xlu0 %v3445_v27, %s6660_s22 }
 0xd21   : > { %v3448_v10 = vpop.f32.mrf.mxu1 }
 0xd29   : > { %v3451_v25 = vpop.f32.mrf.mxu1 }
 0xd2f   : > { %v3660_v11 = vpop.f32.mrf.mxu2 }
 0xd30   : > { %3708 = vrot.lane.b32.xlu0 %v3660_v11, %s6662_s26 }
 0xd31   : > { %v8042_v26 = vpop.f32.mrf.mxu1 }
 0xd32   : > { %3821 = vrot.lane.b32.xlu2 %v8042_v26, %s6652_s8 }
 0xd37   : > { %v3663_v32 = vpop.f32.mrf.mxu2 }
 0xd38   : > { %3710 = vrot.lane.b32.xlu1 %v3663_v32, %s6662_s26 }
 0xd39   : > { %v8047_v20 = vpop.f32.mrf.mxu1 }
 0xd3a   : > { %3823 = vrot.lane.b32.xlu0 %v8047_v20, %s6652_s8 }
 0xd3f   : > { %v3666_v8 = vpop.f32.mrf.mxu2 }
 0xd40   : > { %3696 = vrot.lane.b32.xlu1 %v3448_v10, %s6660_s22  ;;  %3712 = vrot.lane.b32.xlu2 %v3666_v8, %s6662_s26 }
 0xd42   : > { %3680 = vrot.lane.b32.xlu0 %v3230_v18, %s6661_s23 }
 0xd47   : > { %v3669_v46 = vpop.f32.mrf.mxu2 }
 0xd48   : > { %3698 = vrot.lane.b32.xlu1 %v3451_v25, %s6660_s22  ;;  %3714 = vrot.lane.b32.xlu2 %v3669_v46, %s6662_s26 }
 0xd4a   : > { %3682 = vrot.lane.b32.xlu0 %v3233_v9, %s6661_s23 }
 0xd4f   : > { %v3677_v28 = vpop.permute.xlu0 %3676 }
 0xd50   : > { %4073 = vrot.lane.b32.xlu1 %v8042_v26, %s6648_s27  ;;  %4069 = vrot.lane.b32.xlu2 %v8042_v26, %s6651_s30  ;;  %v3720_v62 = vsel %vm572_vm1, %v3006_v50, %v3677_v28 }
 0xd52   : > { %4075 = vrot.lane.b32.xlu0 %v8047_v20, %s6648_s27 }
 0xd57   : > { %v3679_v63 = vpop.permute.xlu1 %3678 }
 0xd58   : > { %3947 = vrot.lane.b32.xlu2 %v8042_v26, %s6650_s29  ;;  %3949 = vrot.lane.b32.xlu1 %v8047_v20, %s6650_s29  ;;  %v3721_v54 = vsel %vm572_vm1, %v3009_v53, %v3679_v63 }
 0xd5a   : > { %4071 = vrot.lane.b32.xlu0 %v8047_v20, %s6651_s30 }
 0xd60   : > { %4201 = vrot.lane.b32.xlu2 %v8047_v20, %s6653_s9  ;;  %3945 = vrot.lane.b32.xlu1 %v8047_v20, %s6649_s28 }
 0xd62   : > { %3943 = vrot.lane.b32.xlu0 %v8042_v26, %s6649_s28 }
 0xd66   : > { %v3693_v36 = vpop.permute.xlu2 %3692 }
 0xd67   : > { %v3724_v29 = vsel %vm608_vm3, %v3720_v62, %v3693_v36 }
 0xd68   : > { %4197 = vrot.lane.b32.xlu2 %v8047_v20, %s6654_s10  ;;  %4195 = vrot.lane.b32.xlu1 %v8042_v26, %s6654_s10 }
 0xd6a   : > { %4199 = vrot.lane.b32.xlu0 %v8042_v26, %s6653_s9 }
 0xd8c   : > { %v3695_v52 = vpop.permute.xlu0 %3694  ;;  %v3822_v2 = vpop.permute.xlu2 %3821 }
 0xd8d   : > { %v3725_v0 = vsel %vm608_vm3, %v3721_v54, %v3695_v52 }
 0xd9a   : > { %v3713_v33 = vpop.permute.xlu2 %3712 }
 0xda2   : > { %v3709_v51 = vpop.permute.xlu0 %3708  ;;  %v3715_v16 = vpop.permute.xlu2 %3714 }
 0xda3   : > { %v3728_v30 = vsel %vm1098_vm11, %v3724_v29, %v3709_v51 }
 0xda4   : > { %5873 = vmatmul.msk.f32.vlgmr.msrb.gmra.mxu0 %vm536_vm0, %v3728_v30 }
 0xdaa   : > { %v3711_v24 = vpop.permute.xlu1 %3710  ;;  %v4070_v42 = vpop.permute.xlu2 %4069 }
 0xdab   : > { %v3729_v55 = vsel %vm1098_vm11, %v3725_v0, %v3711_v24 }
 0xdac   : > { %5874 = vmatmul.msk.f32.gmra.mxu0 %vm536_vm0, %v3729_v55  ;;  %v3824_v47 = vpop.permute.xlu0 %3823 }
 0xdad   : > { %5879 = vmatpush.xpose.msk.msrb.mxu3 %vm572_vm1, %v3824_v47 }
 0xdb1   : > { %5880 = vmatpush.xpose.msk.msrb.mxu3 %vm572_vm1, %v3822_v2 }
 0xdb2   : > { %v3697_v31 = vpop.permute.xlu1 %3696  ;;  %v3948_v5 = vpop.permute.xlu2 %3947 }
 0xdb4   : > { %5881 = vmatmul.msk.f32.vlgmr.msrb.gmra.mxu3 %vm572_vm1, %v8042_v26  ;;  %v3681_v37 = vpop.permute.xlu0 %3680 }
 0xdb5   : > { %v3722_v1 = vsel %vm572_vm1, %v8035_v58, %v3681_v37 }
 0xdb6   : > { %v3726_v41 = vsel %vm608_vm3, %v3722_v1, %v3697_v31 }
 0xdb7   : > { %v3730_v57 = vsel %vm1098_vm11, %v3726_v41, %v3713_v33 }
 0xdb8   : > { %5875 = vmatmul.msk.f32.gmra.mxu0 %vm536_vm0, %v3730_v57 }
 0xdba   : > { %v3699_v38 = vpop.permute.xlu1 %3698  ;;  %v4202_v53 = vpop.permute.xlu2 %4201 }
 0xdbc   : > { %5882 = vmatmul.msk.f32.gmra.mxu3 %vm572_vm1, %v8047_v20  ;;  %v3683_v44 = vpop.permute.xlu0 %3682 }
 0xdbd   : > { %v3723_v22 = vsel %vm572_vm1, %v8037_v14, %v3683_v44 }
 0xdbe   : > { %v3727_v7 = vsel %vm608_vm3, %v3723_v22, %v3699_v38 }
 0xdbf   : > { %v3731_v15 = vsel %vm1098_vm11, %v3727_v7, %v3715_v16 }
 0xdc0   : > { %5876 = vmatmul.msk.f32.gmra.mxu0 %vm536_vm0, %v3731_v15 }
 0xdc2   : > { %v4074_v39 = vpop.permute.xlu1 %4073  ;;  %v4198_v18 = vpop.permute.xlu2 %4197 }
 0xdc4   : > { %v4076_v56 = vpop.permute.xlu0 %4075 }
 0xdc5   : > { %5891 = vmatpush.xpose.msk.msra.mxu0 %vm572_vm1, %v4076_v56 }
 0xdc9   : > { %5892 = vmatpush.xpose.msk.msra.mxu0 %vm572_vm1, %v4074_v39 }
 0xdca   : > { %v3950_v35 = vpop.permute.xlu1 %3949 }
 0xdcb   : > { %5885 = vmatpush.xpose.msk.msra.mxu3 %vm572_vm1, %v3950_v35 }
 0xdcc   : > { %5893 = vmatmul.msk.f32.vlgmr.msra.gmra.mxu0 %vm572_vm1, %v4070_v42  ;;  %v4072_v50 = vpop.permute.xlu0 %4071 }
 0xdcf   : > { %5886 = vmatpush.xpose.msk.msra.mxu3 %vm572_vm1, %v3948_v5 }
 0xdd2   : > { %v3946_v14 = vpop.permute.xlu1 %3945 }
 0xdd3   : > { %5897 = vmatpush.xpose.msk.msrb.mxu3 %vm572_vm1, %v4202_v53 }
 0xdd4   : > { %5894 = vmatmul.msk.f32.gmra.mxu0 %vm572_vm1, %v4072_v50  ;;  %v3944_v58 = vpop.permute.xlu0 %3943 }
 0xdd5   : > { %5887 = vmatmul.msk.f32.vlgmr.msra.gmra.mxu3 %vm572_vm1, %v3944_v58 }
 0xdda   : > { %v4196_v27 = vpop.permute.xlu1 %4195 }
 0xddc   : > { %v4200_v19 = vpop.permute.xlu0 %4199 }
 0xddd   : > { %5888 = vmatmul.msk.f32.gmra.mxu3 %vm572_vm1, %v3946_v14 }
 0xdde   : > { %5898 = vmatpush.xpose.msk.msrb.mxu3 %vm572_vm1, %v4200_v19 }
 0xde5   : > { %5899 = vmatmul.msk.f32.vlgmr.msrb.gmra.mxu3 %vm572_vm1, %v4196_v27 }
 0xded   : > { %5900 = vmatmul.msk.f32.gmra.mxu3 %vm572_vm1, %v4198_v18 }
 0xe21   : > { %v8117_v10 = vpop.f32.mrf.mxu0 }
 0xe29   : > { %v8119_v9 = vpop.f32.mrf.mxu0 }
 0xe35   : > { %v8121_v25 = vpop.f32.mrf.mxu0 }
 0xe37   : > { %v3850_v11 = vpop.f32.mrf.mxu3 }
 0xe38   : > { %v3856_v32 = vmul.f32 0.35355338, %v3850_v11 }
 0xe3a   : > { %v3858_v8 = vadd.f32 %v3856_v32, %v6819_v60 }
 0xe3c   : > { %v3860_v46 = vsel %vm608_vm3, %v3858_v8, -inf }
 0xe3d   : > { %3861 = vmax.xlane.f32.xlu0 %v3860_v46  ;;  %v8125_v49 = vpop.f32.mrf.mxu0 }
 0xe3f   : > { %v3853_v59 = vpop.f32.mrf.mxu3 }
 0xe40   : > { %v3857_v23 = vmul.f32 0.35355338, %v3853_v59 }
 0xe42   : > { %v3859_v12 = vadd.f32 %v3857_v23, %v6831_v13 }
 0xe44   : > { %v3863_v28 = vsel %vm608_vm3, %v3859_v12, -inf }
 0xe45   : > { %3864 = vmax.xlane.f32.xlu1 %v3863_v28 }
 0xe49   : > { %v4102_v36 = vpop.f32.mrf.mxu0 }
 0xe4a   : > { %v4108_v52 = vmul.f32 0.35355338, %v4102_v36 }
 0xe4c   : > { %v4110_v2 = vadd.f32 %v4108_v52, %v6819_v60 }
 0xe4e   : > { %v4112_v62 = vsel %vm608_vm3, %v4110_v2, -inf }
 0xe4f   : > { %4113 = vmax.xlane.f32.xlu2 %v4112_v62 }
 0xe51   : > { %v4105_v29 = vpop.f32.mrf.mxu0 }
 0xe52   : > { %v4109_v51 = vmul.f32 0.35355338, %v4105_v29 }
 0xe54   : > { %v4111_v63 = vadd.f32 %v4109_v51, %v6831_v13 }
 0xe56   : > { %v4115_v30 = vsel %vm608_vm3, %v4111_v63, -inf }
 0xe57   : > { %4116 = vmax.xlane.f32.xlu0 %v4115_v30 }
 0xe58   : > { %v3976_v33 = vpop.f32.mrf.mxu3 }
 0xe59   : > { %v3982_v54 = vmul.f32 0.35355338, %v3976_v33 }
 0xe5b   : > { %v3984_v0 = vadd.f32 %v3982_v54, %v6819_v60 }
 0xe5d   : > { %v3986_v24 = vsel %vm608_vm3, %v3984_v0, -inf }
 0xe5e   : > { %3987 = vmax.xlane.f32.xlu1 %v3986_v24 }
 0xe60   : > { %v3979_v55 = vpop.f32.mrf.mxu3 }
 0xe61   : > { %v3983_v47 = vmul.f32 0.35355338, %v3979_v55 }
 0xe63   : > { %v3985_v16 = vadd.f32 %v3983_v47, %v6831_v13 }
 0xe65   : > { %v3989_v31 = vsel %vm608_vm3, %v3985_v16, -inf }
 0xe66   : > { %3990 = vmax.xlane.f32.xlu0 %v3989_v31 }
 0xe68   : > { %v4228_v37 = vpop.f32.mrf.mxu3 }
 0xe69   : > { %v4234_v1 = vmul.f32 0.35355338, %v4228_v37 }
 0xe6b   : > { %v4236_v41 = vadd.f32 %v4234_v1, %v6819_v60 }
 0xe6d   : > { %v4238_v57 = vsel %vm608_vm3, %v4236_v41, -inf }
 0xe6e   : > { %4239 = vmax.xlane.f32.xlu2 %v4238_v57 }
 0xe70   : > { %v4231_v7 = vpop.f32.mrf.mxu3 }
 0xe71   : > { %v4235_v5 = vmul.f32 0.35355338, %v4231_v7 }
 0xe73   : > { %v4237_v60 = vadd.f32 %v4235_v5, %v6831_v13 }
 0xe75   : > { %v4241_v19 = vsel %vm608_vm3, %v4237_v60, -inf }
 0xeb0   : > { %v3862_v38 = vpop.xlane.xlu0 %3861 }
 0xeb1   : > { %v3866_v42 = vsub.f32 %v3858_v8, %v3862_v38 }
 0xeb3   : > { %v3868_v44 = vmul.f32 1.442695, %v3866_v42 }
 0xeb5   : > { %6422 = vpow2.f32 %v3868_v44 }
 0xeb8   : > { %v3865_v22 = vpop.xlane.xlu1 %3864 }
 0xeb9   : > { %v3867_v15 = vsub.f32 %v3859_v12, %v3865_v22 }
 0xebb   : > { %v8139_v39 = vpop.eup %6422  ;;  %v3870_v56 = vmul.f32 1.442695, %v3867_v15 }
 0xebc   : > { %v3872_v35 = vsel %vm608_vm3, %v8139_v39, 0.0 }
 0xebd   : > { %6424 = vpow2.f32 %v3870_v56  ;;  %3873 = vadd.xlane.f32.xlu2 %v3872_v35 }
 0xec2   : > { %v4114_v50 = vpop.xlane.xlu2 %4113 }
 0xec3   : > { %v8144_v53 = vpop.eup %6424  ;;  %v4118_v58 = vsub.f32 %v4110_v2, %v4114_v50  ;;  %v6163_v2 = vpack.i.bf16 %v8042_v26, %v8047_v20 }
 0xec4   : > { %v3875_v14 = vsel %vm608_vm3, %v8144_v53, 0.0 }
 0xec5   : > { %v4120_v27 = vmul.f32 1.442695, %v4118_v58  ;;  %3876 = vadd.xlane.f32.xlu1 %v3875_v14  ;;  %4242 = vmax.xlane.f32.xlu2 %v4241_v19 }
 0xec7   : > { %6426 = vpow2.f32 %v4120_v27 }
 0xeca   : > { %v4117_v18 = vpop.xlane.xlu0 %4116 }
 0xecb   : > { %v4119_v11 = vsub.f32 %v4111_v63, %v4117_v18 }
 0xecd   : > { %v8149_v32 = vpop.eup %6426  ;;  %v4122_v8 = vmul.f32 1.442695, %v4119_v11 }
 0xece   : > { %v4124_v13 = vsel %vm608_vm3, %v8149_v32, 0.0 }
 0xecf   : > { %6428 = vpow2.f32 %v4122_v8  ;;  %4125 = vadd.xlane.f32.xlu0 %v4124_v13 }
 0xed1   : > { %v3988_v46 = vpop.xlane.xlu1 %3987 }
 0xed2   : > { %v3992_v59 = vsub.f32 %v3984_v0, %v3988_v46 }
 0xed4   : > { %v3994_v23 = vmul.f32 1.442695, %v3992_v59 }
 0xed5   : > { %v8153_v12 = vpop.eup %6428 }
 0xed6   : > { %6430 = vpow2.f32 %v3994_v23  ;;  %v4127_v28 = vsel %vm608_vm3, %v8153_v12, 0.0 }
 0xed7   : > { %4128 = vadd.xlane.f32.xlu0 %v4127_v28 }
 0xed9   : > { %v3991_v36 = vpop.xlane.xlu0 %3990 }
 0xeda   : > { %v3993_v52 = vsub.f32 %v3985_v16, %v3991_v36 }
 0xedc   : > { %v8159_v62 = vpop.eup %6430  ;;  %v3996_v29 = vmul.f32 1.442695, %v3993_v52 }
 0xedd   : > { %6164 = vrot.lane.b32.xlu2 %v6163_v2, %s6656_s14  ;;  %v3998_v51 = vsel %vm608_vm3, %v8159_v62, 0.0 }
 0xede   : > { %6432 = vpow2.f32 %v3996_v29  ;;  %6159 = vrot.lane.b32.xlu1 %v6163_v2, %s6657_s19 }
 0xedf   : > { %3999 = vadd.xlane.f32.xlu0 %v3998_v51 }
 0xee1   : > { %v4240_v33 = vpop.xlane.xlu2 %4239 }
 0xee2   : > { %v4244_v26 = vsub.f32 %v4236_v41, %v4240_v33 }
 0xee4   : > { %v8165_v63 = vpop.eup %6432  ;;  %v4246_v20 = vmul.f32 1.442695, %v4244_v26 }
 0xee5   : > { %v4001_v30 = vsel %vm608_vm3, %v8165_v63, 0.0 }
 0xee6   : > { %6434 = vpow2.f32 %v4246_v20 }
 0xee7   : > { %4002 = vadd.xlane.f32.xlu0 %v4001_v30 }
 0xeec   : > { %v8171_v54 = vpop.eup %6434 }
 0xeed   : > { %v4250_v0 = vsel %vm608_vm3, %v8171_v54, 0.0 }
 0xefb   : > { %6169 = vrot.lane.b32.xlu0 %v6163_v2, %s6659_s21 }
 0xf03   : > { %6174 = vrot.lane.b32.xlu0 %v6163_v2, %s6658_s20 }
 0xf08   : > { %4251 = vadd.xlane.f32.xlu1 %v4250_v0 }
 0xf30   : > { %v3874_v24 = vpop.xlane.xlu2 %3873 }
 0xf31   : > { %6436 = vrcp.f32 %v3874_v24  ;;  %vm3883_vm8 = vweird.f32 %v3874_v24  ;;  %v3887_v50 = vand.u32 2147483647, %v3874_v24 }
 0xf33   : > { %vm3888_vm10 = vcmp.eq.f32.partialorder %v3887_v50, 8.507059e+37 }
 0xf37   : > { %v6437_v31 = vpop.eup %6436 }
 0xf38   : > { %v4243_v55 = vpop.xlane.xlu2 %4242  ;;  %v3877_v47 = vpop.xlane.xlu1 %3876  ;;  %v3879_v1 = vmul.f32 %v6437_v31, %v3874_v24  ;;  %vm3884_vm7 = vweird.f32 %v6437_v31 }
 0xf39   : > { %v4245_v16 = vsub.f32 %v4237_v60, %v4243_v55  ;;  %6438 = vrcp.f32 %v3877_v47  ;;  %v3889_v60 = vand.u32 2147483648, %v3874_v24  ;;  %vm3885_vm9 = vmor %vm3883_vm8, %vm3884_vm7  ;;  %v3904_v36 = vand.u32 2147483648, %v3877_v47  ;;  %v4385_v24 = vld [vmem:[#allocation2 + $0xb8] sm:$0xff] }
 0xf3a   : > { %v3880_v41 = vsub.f32 1.0, %v3879_v1  ;;  %vm3898_vm13 = vweird.f32 %v3877_v47  ;;  %v3902_v29 = vand.u32 2147483647, %v3877_v47 }
 0xf3b   : > { %v4248_v37 = vmul.f32 1.442695, %v4245_v16  ;;  %v3890_v27 = vor.u32 1.1754944e-38, %v3889_v60  ;;  %v3905_v20 = vor.u32 1.1754944e-38, %v3904_v36 }
 0xf3c   : > { %v3881_v22 = vmul.f32 %v6437_v31, %v3880_v41  ;;  %vm3903_vm15 = vcmp.eq.f32.partialorder %v3902_v29, 8.507059e+37 }
 0xf3d   : > { %6440 = vpow2.f32 %v4248_v37 }
 0xf3e   : > { %v3882_v15 = vadd.f32 %v6437_v31, %v3881_v22  ;;  %v4383_v22 = vld [vmem:[#allocation2 + $0xa8] sm:$0xff] }
 0xf3f   : > { %v6439_v38 = vpop.eup %6438 }
 0xf40   : > { %v3894_v7 = vmul.f32 %v6439_v38, %v3877_v47  ;;  %v3886_v58 = vsel %vm3885_vm9, %v6437_v31, %v3882_v15  ;;  %vm3899_vm12 = vweird.f32 %v6439_v38  ;;  %v6165_v46 = vpop.permute.xlu2 %6164  ;;  %v4384_v47 = vld [vmem:[#allocation2 + $0xb0] sm:$0xff] }
 0xf41   : > { %v3891_v11 = vsel %vm3888_vm10, %v3890_v27, %v3886_v58  ;;  %vm3900_vm14 = vmor %vm3898_vm13, %vm3899_vm12  ;;  %v6166_v51 = vunpack.i.l.bf16 %v6165_v46  ;;  %v6167_v0 = vunpack.i.h.bf16 %v6165_v46 }
 0xf42   : > { %v8175_v57 = vpop.xlane.xlu0 %4125  ;;  %v3895_v56 = vsub.f32 1.0, %v3894_v7  ;;  %v3892_v2 = vmul.f32 %v8139_v39, %v3891_v11 }
 0xf43   : > { %v8177_v42 = vpop.eup %6440  ;;  %6442 = vrcp.f32 %v8175_v57  ;;  %v4141_v1 = vand.u32 2147483648, %v8175_v57  ;;  %vm4135_vm4 = vweird.f32 %v8175_v57 }
 0xf44   : > { %v4253_v44 = vsel %vm608_vm3, %v8177_v42, 0.0  ;;  %v3896_v14 = vmul.f32 %v6439_v38, %v3895_v56  ;;  %v4382_v56 = vld [vmem:[#allocation2 + $0xa0] sm:$0xff] }
 0xf45   : > { %4254 = vadd.xlane.f32.xlu2 %v4253_v44  ;;  %v4142_v60 = vor.u32 1.1754944e-38, %v4141_v1 }
 0xf46   : > { %v3897_v13 = vadd.f32 %v6439_v38, %v3896_v14 }
 0xf48   : > { %v3901_v26 = vsel %vm3900_vm14, %v6439_v38, %v3897_v13  ;;  %v4139_v38 = vand.u32 2147483647, %v8175_v57 }
 0xf49   : > { %v8184_v35 = vpop.eup %6442  ;;  %v3906_v39 = vsel %vm3903_vm15, %v3905_v20, %v3901_v26 }
 0xf4a   : > { %v8182_v5 = vpop.xlane.xlu0 %4128  ;;  %v4131_v19 = vmul.f32 %v8184_v35, %v8175_v57  ;;  %vm4136_vm2 = vweird.f32 %v8184_v35  ;;  %v3907_v44 = vmul.f32 %v8144_v53, %v3906_v39  ;;  %vm4140_vm6 = vcmp.eq.f32.partialorder %v4139_v38, 8.507059e+37 }
 0xf4b   : > { %6444 = vrcp.f32 %v8182_v5  ;;  %vm4137_vm5 = vmor %vm4135_vm4, %vm4136_vm2  ;;  %v4156_v53 = vand.u32 2147483648, %v8182_v5  ;;  %vm4150_vm8 = vweird.f32 %v8182_v5 }
 0xf4c   : > { %v4132_v59 = vsub.f32 1.0, %v4131_v19 }
 0xf4e   : > { %v4133_v30 = vmul.f32 %v8184_v35, %v4132_v59 }
 0xf50   : > { %v6160_v18 = vpop.permute.xlu1 %6159  ;;  %v4134_v16 = vadd.f32 %v8184_v35, %v4133_v30 }
 0xf51   : > { %v6161_v8 = vunpack.i.l.bf16 %v6160_v18  ;;  %v8191_v28 = vpop.eup %6444  ;;  %v6162_v52 = vunpack.i.h.bf16 %v6160_v18  ;;  %v4154_v18 = vand.u32 2147483647, %v8182_v5 }
 0xf52   : > { %v8189_v23 = vpop.xlane.xlu0 %3999  ;;  %v4146_v33 = vmul.f32 %v8191_v28, %v8182_v5  ;;  %v4138_v7 = vsel %vm4137_vm5, %v8184_v35, %v4134_v16  ;;  %vm4151_vm7 = vweird.f32 %v8191_v28 }
 0xf53   : > { %6446 = vrcp.f32 %v8189_v23  ;;  %3934 = vmatpush.msra.mxu1 %v6161_v8  ;;  %v4143_v14 = vsel %vm4140_vm6, %v4142_v60, %v4138_v7  ;;  %vm4152_vm9 = vmor %vm4150_vm8, %vm4151_vm7  ;;  %v4157_v8 = vor.u32 1.1754944e-38, %v4156_v53  ;;  %vm4155_vm12 = vcmp.eq.f32.partialorder %v4154_v18, 8.507059e+37 }
 0xf54   : > { %v4147_v31 = vsub.f32 1.0, %v4146_v33  ;;  %v4144_v27 = vmul.f32 %v8149_v32, %v4143_v14  ;;  %v4015_v59 = vand.u32 2147483648, %v8189_v23  ;;  %vm4009_vm13 = vweird.f32 %v8189_v23 }
 0xf55   : > { %3935 = vmatpush.msra.mxu1 %v6162_v52  ;;  %v4013_v32 = vand.u32 2147483647, %v8189_v23 }
 0xf56   : > { %5883 = vmatmul.msk.f32.vlgmr.msra.gmra.mxu1 %vm608_vm3, %v3892_v2  ;;  %v4148_v15 = vmul.f32 %v8191_v28, %v4147_v31  ;;  %v3732_v2 = vperm.slane %v8009_v21, 4  ;;  %v4016_v29 = vor.u32 1.1754944e-38, %v4015_v59 }
 0xf57   : > { %4186 = vmatpush.msrb.mxu1 %v6166_v51  ;;  %vm4014_vm15 = vcmp.eq.f32.partialorder %v4013_v32, 8.507059e+37 }
 0xf58   : > { %v4149_v57 = vadd.f32 %v8191_v28, %v4148_v15  ;;  %v3763_v20 = vadd.f32 %v8117_v10, %v3732_v2  ;;  %v3766_v16 = vadd.f32 %v8119_v9, %v3732_v2  ;;  %v3772_v15 = vadd.f32 %v8125_v49, %v3732_v2 }
 0xf59   : > { %v6447_v55 = vpop.eup %6446  ;;  %4187 = vmatpush.msrb.mxu1 %v6167_v0 }
 0xf5a   : > { %v8201_v37 = vpop.xlane.xlu0 %4002  ;;  %v4005_v41 = vmul.f32 %v6447_v55, %v8189_v23  ;;  %v4153_v11 = vsel %vm4152_vm9, %v8191_v28, %v4149_v57  ;;  %vm4010_vm10 = vweird.f32 %v6447_v55 }
 0xf5b   : > { %4415 = vmatpush.msra.mxu1 %v4385_v24  ;;  %6448 = vrcp.f32 %v8201_v37  ;;  %v4158_v36 = vsel %vm4155_vm12, %v4157_v8, %v4153_v11  ;;  %vm4011_vm14 = vmor %vm4009_vm13, %vm4010_vm10  ;;  %v4030_v23 = vand.u32 2147483648, %v8201_v37  ;;  %vm4024_vm4 = vweird.f32 %v8201_v37 }
 0xf5c   : > { %v4006_v50 = vsub.f32 1.0, %v4005_v41  ;;  %v4159_v28 = vmul.f32 %v8153_v12, %v4158_v36  ;;  %v4028_v21 = vand.u32 2147483647, %v8201_v37  ;;  %v3769_v41 = vadd.f32 %v8121_v25, %v3732_v2 }
 0xf5d   : > { %4416 = vmatpush.msra.mxu1 %v4384_v47  ;;  %v4031_v39 = vor.u32 1.1754944e-38, %v4030_v23  ;;  %v3787_v23 = vld [vmem:[#allocation4 + $0x88] sm:$0xff] }
 0xf5e   : > { %5884 = vmatmul.msk.f32.gmra.mxu1 %vm608_vm3, %v3907_v44  ;;  %v4007_v19 = vmul.f32 %v6447_v55, %v4006_v50  ;;  %vm4029_vm6 = vcmp.eq.f32.partialorder %v4028_v21, 8.507059e+37  ;;  %v8248_v9 = vadd.f32 %v3769_v41, %v7567_v61  ;;  %v8254_v50 = vadd.f32 %v3772_v15, %v7572_v4 }
 0xf5f   : > { %4417 = vmatpush.msra.mxu1 %v4383_v22 }
 0xf60   : > { %v4008_v13 = vadd.f32 %v6447_v55, %v4007_v19 }
 0xf61   : > { %v6449_v58 = vpop.eup %6448  ;;  %4418 = vmatpush.msra.mxu1 %v4382_v56 }
 0xf62   : > { %v4020_v35 = vmul.f32 %v6449_v58, %v8201_v37  ;;  %v4012_v52 = vsel %vm4011_vm14, %v6447_v55, %v4008_v13  ;;  %vm4025_vm2 = vweird.f32 %v6449_v58  ;;  %v8234_v55 = vadd.f32 %v3763_v20, %v7557_v48  ;;  %v3788_v20 = vld [vmem:[#allocation4 + $0x90] sm:$0xff] }
 0xf63   : > { %v4017_v30 = vsel %vm4014_vm15, %v4016_v29, %v4012_v52  ;;  %vm4026_vm5 = vmor %vm4024_vm4, %vm4025_vm2  ;;  %v8242_v48 = vadd.f32 %v3766_v16, %v7562_v45 }
 0xf64   : > { %v4021_v46 = vsub.f32 1.0, %v4020_v35  ;;  %v4018_v24 = vmul.f32 %v8159_v62, %v4017_v30 }
 0xf66   : > { %5895 = vmatmul.msk.f32.vlgmr.msrb.gmra.mxu1 %vm608_vm3, %v4144_v27  ;;  %v4022_v5 = vmul.f32 %v6449_v58, %v4021_v46 }
 0xf68   : > { %v4023_v26 = vadd.f32 %v6449_v58, %v4022_v5 }
 0xf6a   : > { %v4027_v12 = vsel %vm4026_vm5, %v6449_v58, %v4023_v26  ;;  %v3789_v26 = vld [vmem:[#allocation4 + $0x98] sm:$0xff] }
 0xf6b   : > { %v4032_v62 = vsel %vm4029_vm6, %v4031_v39, %v4027_v12  ;;  %4370 = vmatpush.msrb.mxu0 %v3789_v26 }
 0xf6c   : > { %v4033_v37 = vmul.f32 %v8165_v63, %v4032_v62 }
 0xf6d   : > { %v6170_v51 = vpop.permute.xlu0 %6169  ;;  %4371 = vmatpush.msrb.mxu0 %v3788_v20 }
 0xf6e   : > { %v6171_v33 = vunpack.i.l.bf16 %v6170_v51  ;;  %5896 = vmatmul.msk.f32.gmra.mxu1 %vm608_vm3, %v4159_v28  ;;  %v6172_v0 = vunpack.i.h.bf16 %v6170_v51 }
 0xf6f   : > { %4372 = vmatpush.msrb.mxu0 %v3787_v23 }
 0xf70   : > { %4060 = vmatpush.msra.mxu2 %v6171_v33 }
 0xf72   : > { %4061 = vmatpush.msra.mxu2 %v6172_v0  ;;  %v3786_v0 = vld [vmem:[#allocation4 + $0x80] sm:$0xff] }
 0xf73   : > { %5889 = vmatmul.msk.f32.vlgmr.msra.gmra.mxu2 %vm608_vm3, %v4018_v24  ;;  %4373 = vmatpush.msrb.mxu0 %v3786_v0 }
 0xf75   : > { %v6175_v10 = vpop.permute.xlu0 %6174 }
 0xf76   : > { %v6176_v47 = vunpack.i.l.bf16 %v6175_v10  ;;  %5905 = vmatmul.msk.f32.vlgmr.msra.gmra.mxu1 %vm536_vm0, %v8234_v55  ;;  %v6177_v31 = vunpack.i.h.bf16 %v6175_v10 }
 0xf78   : > { %4312 = vmatpush.msrb.mxu2 %v6176_v47 }
 0xf7a   : > { %4313 = vmatpush.msrb.mxu2 %v6177_v31 }
 0xf7b   : > { %v4252_v1 = vpop.xlane.xlu1 %4251  ;;  %5890 = vmatmul.msk.f32.gmra.mxu2 %vm608_vm3, %v4033_v37 }
 0xf7c   : > { %6450 = vrcp.f32 %v4252_v1  ;;  %v4267_v63 = vand.u32 2147483648, %v4252_v1  ;;  %v4265_v45 = vand.u32 2147483647, %v4252_v1  ;;  %vm4261_vm8 = vweird.f32 %v4252_v1 }
 0xf7e   : > { %5906 = vmatmul.msk.f32.gmra.mxu1 %vm536_vm0, %v8242_v48  ;;  %v4268_v60 = vor.u32 1.1754944e-38, %v4267_v63  ;;  %vm4266_vm10 = vcmp.eq.f32.partialorder %v4265_v45, 8.507059e+37 }
 0xf82   : > { %v6451_v38 = vpop.eup %6450 }
 0xf83   : > { %v4257_v44 = vmul.f32 %v6451_v38, %v4252_v1  ;;  %vm4262_vm7 = vweird.f32 %v6451_v38 }
 0xf84   : > { %vm4263_vm9 = vmor %vm4261_vm8, %vm4262_vm7 }
 0xf85   : > { %v4258_v22 = vsub.f32 1.0, %v4257_v44 }
 0xf86   : > { %5907 = vmatmul.msk.f32.gmra.mxu1 %vm536_vm0, %v8248_v9 }
 0xf87   : > { %v4259_v7 = vmul.f32 %v6451_v38, %v4258_v22 }
 0xf89   : > { %v4260_v56 = vadd.f32 %v6451_v38, %v4259_v7 }
 0xf8b   : > { %v4264_v25 = vsel %vm4263_vm9, %v6451_v38, %v4260_v56 }
 0xf8c   : > { %v4269_v61 = vsel %vm4266_vm10, %v4268_v60, %v4264_v25 }
 0xf8d   : > { %v4270_v58 = vmul.f32 %v8171_v54, %v4269_v61 }
 0xf8e   : > { %5908 = vmatmul.msk.f32.gmra.mxu1 %vm536_vm0, %v8254_v50 }
 0xf8f   : > { %5901 = vmatmul.msk.f32.vlgmr.msrb.gmra.mxu2 %vm608_vm3, %v4270_v58 }
 0xfb8   : > { %v4255_v14 = vpop.xlane.xlu2 %4254 }
 0xfb9   : > { %6452 = vrcp.f32 %v4255_v14  ;;  %v4282_v19 = vand.u32 2147483648, %v4255_v14  ;;  %v4280_v27 = vand.u32 2147483647, %v4255_v14  ;;  %vm4276_vm13 = vweird.f32 %v4255_v14 }
 0xfbb   : > { %v4283_v4 = vor.u32 1.1754944e-38, %v4282_v19  ;;  %vm4281_vm15 = vcmp.eq.f32.partialorder %v4280_v27, 8.507059e+37 }
 0xfbf   : > { %v6453_v49 = vpop.eup %6452 }
 0xfc0   : > { %v4272_v57 = vmul.f32 %v6453_v49, %v4255_v14  ;;  %vm4277_vm12 = vweird.f32 %v6453_v49 }
 0xfc1   : > { %vm4278_vm14 = vmor %vm4276_vm13, %vm4277_vm12 }
 0xfc2   : > { %v4273_v53 = vsub.f32 1.0, %v4272_v57 }
 0xfc4   : > { %v4274_v35 = vmul.f32 %v6453_v49, %v4273_v53 }
 0xfc6   : > { %v4275_v18 = vadd.f32 %v6453_v49, %v4274_v35 }
 0xfc8   : > { %v4279_v54 = vsel %vm4278_vm14, %v6453_v49, %v4275_v18 }
 0xfc9   : > { %v4284_v11 = vsel %vm4281_vm15, %v4283_v4, %v4279_v54 }
 0xfca   : > { %v4285_v8 = vmul.f32 %v8177_v42, %v4284_v11 }
 0xfcc   : > { %5902 = vmatmul.msk.f32.gmra.mxu2 %vm608_vm3, %v4285_v8 }
 0xfd3   : > { %v8262_v13 = vpop.f32.mrf.mxu1 }
 0xfdb   : > { %v8264_v46 = vpop.f32.mrf.mxu1 }
 0xfe3   : > { %v4189_v59 = vpop.f32.mrf.mxu1 }
 0xfe4   : > { %4331 = vrot.lane.b32.xlu0 %v4189_v59, %s6660_s22 }
 0xfeb   : > { %v4192_v32 = vpop.f32.mrf.mxu1 }
 0xff3   : > { %v8267_v36 = vpop.f32.mrf.mxu1 }
 0xff6   : > { %v4063_v52 = vpop.f32.mrf.mxu2 }
 0xff7   : > { %4323 = vrot.lane.b32.xlu2 %v4063_v52, %s6661_s23 }
 0xffb   : > { %v8270_v5 = vpop.f32.mrf.mxu1 }
 0xffc   : > { %v8314_v30 = vpack.i.bf16 %v8267_v36, %v8270_v5 }
 0xffe   : > { %v4066_v2 = vpop.f32.mrf.mxu2 }
 0xfff   : > { %4325 = vrot.lane.b32.xlu2 %v4066_v2, %s6661_s23 }
0x1003   : > { %v8273_v42 = vpop.f32.mrf.mxu1 }
0x1004   : > { %4440 = vrot.lane.b32.xlu1 %v8273_v42, %s6652_s8 }
0x100b   : > { %v8278_v28 = vpop.f32.mrf.mxu1 }
0x100c   : > { %4333 = vrot.lane.b32.xlu1 %v4192_v32, %s6660_s22  ;;  %v8324_v33 = vpack.i.bf16 %v8273_v42, %v8278_v28 }
0x1012   : > { %v4315_v29 = vpop.f32.mrf.mxu2 }
0x1013   : > { %4339 = vrot.lane.b32.xlu0 %v4315_v29, %s6662_s26 }
0x1014   : > { %4660 = vrot.lane.b32.xlu1 %v8278_v28, %s6650_s29 }
0x101b   : > { %4438 = vrot.lane.b32.xlu0 %v8270_v5, %s6652_s8 }
0x101c   : > { %4654 = vrot.lane.b32.xlu1 %v8267_v36, %s6650_s29 }
0x1023   : > { %4442 = vrot.lane.b32.xlu0 %v8278_v28, %s6652_s8 }
0x1024   : > { %4648 = vrot.lane.b32.xlu1 %v8270_v5, %s6649_s28 }
0x102b   : > { %4436 = vrot.lane.b32.xlu0 %v8267_v36, %s6652_s8 }
0x102c   : > { %4650 = vrot.lane.b32.xlu1 %v8273_v42, %s6649_s28 }
0x1033   : > { %4658 = vrot.lane.b32.xlu0 %v8273_v42, %s6650_s29 }
0x1034   : > { %4864 = vrot.lane.b32.xlu1 %v8267_v36, %s6651_s30 }
0x103b   : > { %4656 = vrot.lane.b32.xlu0 %v8270_v5, %s6650_s29 }
0x103c   : > { %5092 = vrot.lane.b32.xlu1 %v8270_v5, %s6653_s9 }
0x1043   : > { %4878 = vrot.lane.b32.xlu0 %v8278_v28, %s6648_s27 }
0x1044   : > { %5082 = vrot.lane.b32.xlu1 %v8267_v36, %s6654_s10 }
0x104b   : > { %4874 = vrot.lane.b32.xlu0 %v8270_v5, %s6648_s27 }
0x104c   : > { %4870 = vrot.lane.b32.xlu1 %v8278_v28, %s6651_s30 }
0x104f   : > { %v4318_v51 = vpop.f32.mrf.mxu2 }
0x1050   : > { %4341 = vrot.lane.b32.xlu2 %v4318_v51, %s6662_s26 }
0x1051   : > { %v4324_v39 = vpop.permute.xlu2 %4323 }
0x1052   : > { %v4345_v10 = vsel %vm572_vm1, %v8262_v13, %v4324_v39 }
0x1053   : > { %5096 = vrot.lane.b32.xlu0 %v8278_v28, %s6653_s9 }
0x1054   : > { %6184 = vrot.lane.b32.xlu1 %v8314_v30, %s6659_s21 }
0x1056   : > { %v4332_v21 = vpop.permute.xlu0 %4331 }
0x1057   : > { %v4347_v47 = vsel %vm608_vm3, %v4345_v10, %v4332_v21 }
0x1058   : > { %4646 = vrot.lane.b32.xlu2 %v8267_v36, %s6649_s28 }
0x1059   : > { %v4326_v63 = vpop.permute.xlu2 %4325 }
0x105a   : > { %v4346_v15 = vsel %vm572_vm1, %v8264_v46, %v4326_v63 }
0x105b   : > { %4652 = vrot.lane.b32.xlu0 %v8278_v28, %s6649_s28 }
0x105c   : > { %6194 = vrot.lane.b32.xlu1 %v8324_v33, %s6659_s21 }
0x1060   : > { %4876 = vrot.lane.b32.xlu2 %v8273_v42, %s6648_s27 }
0x1063   : > { %5090 = vrot.lane.b32.xlu0 %v8267_v36, %s6653_s9 }
0x1068   : > { %4872 = vrot.lane.b32.xlu2 %v8267_v36, %s6648_s27  ;;  %s5971_s27 = smul.u32 48, %s8872_s25 }
0x106b   : > { %5084 = vrot.lane.b32.xlu0 %v8270_v5, %s6654_s10 }
0x1070   : > { %5094 = vrot.lane.b32.xlu2 %v8273_v42, %s6653_s9 }
0x1073   : > { %5088 = vrot.lane.b32.xlu0 %v8278_v28, %s6654_s10 }
0x1076   : > { %v4441_v24 = vpop.permute.xlu1 %4440 }
0x1078   : > { %4866 = vrot.lane.b32.xlu2 %v8270_v5, %s6651_s30 }
0x107b   : > { %6179 = vrot.lane.b32.xlu0 %v8314_v30, %s6657_s19 }
0x107e   : > { %v4334_v12 = vpop.permute.xlu1 %4333 }
0x107f   : > { %v4348_v56 = vsel %vm608_vm3, %v4346_v15, %v4334_v12 }
0x1080   : > { %4868 = vrot.lane.b32.xlu2 %v8273_v42, %s6651_s30  ;;  %s8806_s30 = scalar_lea.vmem %s8857_s7, %s5971_s27 }
0x1085   : > { %v4340_v62 = vpop.permute.xlu0 %4339 }
0x1086   : > { %v4349_v16 = vsel %vm1098_vm11, %v4347_v47, %v4340_v62  ;;  %v4661_v31 = vpop.permute.xlu1 %4660 }
0x1087   : > { %5903 = vmatmul.msk.f32.vlgmr.msrb.gmra.mxu0 %vm536_vm0, %v4349_v16 }
0x1088   : > { %5921 = vmatpush.xpose.msk.msra.mxu0 %vm572_vm1, %v4661_v31  ;;  %5086 = vrot.lane.b32.xlu2 %v8273_v42, %s6654_s10 }
0x108d   : > { %v4439_v37 = vpop.permute.xlu0 %4438 }
0x108e   : > { %v4655_v1 = vpop.permute.xlu1 %4654 }
0x1090   : > { %6189 = vrot.lane.b32.xlu2 %v8324_v33, %s6657_s19 }
0x1095   : > { %v4443_v41 = vpop.permute.xlu0 %4442 }
0x1096   : > { %v4649_v38 = vpop.permute.xlu1 %4648  ;;  %5909 = vmatpush.xpose.msk.msra.mxu3 %vm572_vm1, %v4443_v41 }
0x109a   : > { %5910 = vmatpush.xpose.msk.msra.mxu3 %vm572_vm1, %v4441_v24 }
0x109d   : > { %v4437_v44 = vpop.permute.xlu0 %4436 }
0x109e   : > { %v4651_v22 = vpop.permute.xlu1 %4650  ;;  %5911 = vmatpush.xpose.msk.msra.mxu3 %vm572_vm1, %v4439_v37 }
0x10a2   : > { %5912 = vmatpush.xpose.msk.msra.mxu3 %vm572_vm1, %v4437_v44 }
0x10a5   : > { %5913 = vmatmul.msk.f32.vlgmr.msra.gmra.mxu3 %vm572_vm1, %v8267_v36  ;;  %v4659_v7 = vpop.permute.xlu0 %4658 }
0x10a6   : > { %v4865_v45 = vpop.permute.xlu1 %4864  ;;  %5922 = vmatpush.xpose.msk.msra.mxu0 %vm572_vm1, %v4659_v7 }
0x10aa   : > { %v4342_v60 = vpop.permute.xlu2 %4341 }
0x10ab   : > { %v4350_v25 = vsel %vm1098_vm11, %v4348_v56, %v4342_v60 }
0x10ac   : > { %5904 = vmatmul.msk.f32.gmra.mxu0 %vm536_vm0, %v4350_v25 }
0x10ad   : > { %5914 = vmatmul.msk.f32.gmra.mxu3 %vm572_vm1, %v8270_v5  ;;  %v4657_v61 = vpop.permute.xlu0 %4656 }
0x10ae   : > { %v5093_v58 = vpop.permute.xlu1 %5092  ;;  %5923 = vmatpush.xpose.msk.msra.mxu0 %vm572_vm1, %v4657_v61 }
0x10b2   : > { %5924 = vmatpush.xpose.msk.msra.mxu0 %vm572_vm1, %v4655_v1  ;;  %v4647_v14 = vpop.permute.xlu2 %4646 }
0x10b5   : > { %5915 = vmatmul.msk.f32.gmra.mxu3 %vm572_vm1, %v8273_v42  ;;  %v4879_v49 = vpop.permute.xlu0 %4878  ;;  %5925 = vmatmul.msk.f32.vlgmr.msra.gmra.mxu0 %vm572_vm1, %v4647_v14 }
0x10b6   : > { %v5083_v57 = vpop.permute.xlu1 %5082  ;;  %5933 = vmatpush.xpose.msk.msrb.mxu3 %vm572_vm1, %v4879_v49 }
0x10ba   : > { %v4877_v53 = vpop.permute.xlu2 %4876 }
0x10bb   : > { %5934 = vmatpush.xpose.msk.msrb.mxu3 %vm572_vm1, %v4877_v53 }
0x10bd   : > { %5916 = vmatmul.msk.f32.gmra.mxu3 %vm572_vm1, %v8278_v28  ;;  %v4875_v19 = vpop.permute.xlu0 %4874  ;;  %5926 = vmatmul.msk.f32.gmra.mxu0 %vm572_vm1, %v4649_v38 }
0x10be   : > { %v4871_v35 = vpop.permute.xlu1 %4870 }
0x10bf   : > { %5935 = vmatpush.xpose.msk.msrb.mxu3 %vm572_vm1, %v4875_v19 }
0x10c2   : > { %v4873_v27 = vpop.permute.xlu2 %4872 }
0x10c3   : > { %5936 = vmatpush.xpose.msk.msrb.mxu3 %vm572_vm1, %v4873_v27 }
0x10c5   : > { %v5097_v18 = vpop.permute.xlu0 %5096  ;;  %5927 = vmatmul.msk.f32.gmra.mxu0 %vm572_vm1, %v4651_v22 }
0x10c6   : > { %v6185_v4 = vpop.permute.xlu1 %6184  ;;  %5945 = vmatpush.xpose.msk.msrb.mxu0 %vm572_vm1, %v5097_v18  ;;  %5937 = vmatmul.msk.f32.vlgmr.msrb.gmra.mxu3 %vm572_vm1, %v4865_v45 }
0x10c7   : > { %v6186_v59 = vunpack.i.l.bf16 %v6185_v4  ;;  %v6187_v36 = vunpack.i.h.bf16 %v6185_v4 }
0x10ca   : > { %v5095_v54 = vpop.permute.xlu2 %5094 }
0x10cb   : > { %5946 = vmatpush.xpose.msk.msrb.mxu0 %vm572_vm1, %v5095_v54 }
0x10cd   : > { %v4653_v11 = vpop.permute.xlu0 %4652 }
0x10ce   : > { %v6195_v8 = vpop.permute.xlu1 %6194  ;;  %5928 = vmatmul.msk.f32.gmra.mxu0 %vm572_vm1, %v4653_v11 }
0x10cf   : > { %v6196_v13 = vunpack.i.l.bf16 %v6195_v8  ;;  %5947 = vmatpush.xpose.msk.msrb.mxu0 %vm572_vm1, %v5093_v58  ;;  %v6197_v46 = vunpack.i.h.bf16 %v6195_v8 }
0x10d1   : > { %4847 = vmatpush.msrb.mxu1 %v6196_v13 }
0x10d2   : > { %v4867_v32 = vpop.permute.xlu2 %4866 }
0x10d3   : > { %4848 = vmatpush.msrb.mxu1 %v6197_v46  ;;  %5938 = vmatmul.msk.f32.gmra.mxu3 %vm572_vm1, %v4867_v32 }
0x10d5   : > { %4849 = vmatpush.msrb.mxu1 %v6186_v59  ;;  %v5091_v52 = vpop.permute.xlu0 %5090 }
0x10d6   : > { %5948 = vmatpush.xpose.msk.msrb.mxu0 %vm572_vm1, %v5091_v52 }
0x10d7   : > { %4850 = vmatpush.msrb.mxu1 %v6187_v36 }
0x10d9   : > { %5949 = vmatmul.msk.f32.vlgmr.msrb.gmra.mxu0 %vm572_vm1, %v5083_v57 }
0x10da   : > { %v4869_v5 = vpop.permute.xlu2 %4868 }
0x10db   : > { %5939 = vmatmul.msk.f32.gmra.mxu3 %vm572_vm1, %v4869_v5 }
0x10dd   : > { %v5085_v2 = vpop.permute.xlu0 %5084 }
0x10e1   : > { %5950 = vmatmul.msk.f32.gmra.mxu0 %vm572_vm1, %v5085_v2 }
0x10e2   : > { %v5087_v42 = vpop.permute.xlu2 %5086 }
0x10e3   : > { %5940 = vmatmul.msk.f32.gmra.mxu3 %vm572_vm1, %v4871_v35 }
0x10e5   : > { %v5089_v29 = vpop.permute.xlu0 %5088 }
0x10e9   : > { %5951 = vmatmul.msk.f32.gmra.mxu0 %vm572_vm1, %v5087_v42 }
0x10ea   : > { %v6190_v28 = vpop.permute.xlu2 %6189 }
0x10eb   : > { %v6191_v51 = vunpack.i.l.bf16 %v6190_v28  ;;  %v6192_v20 = vunpack.i.h.bf16 %v6190_v28 }
0x10ed   : > { %v6180_v26 = vpop.permute.xlu0 %6179  ;;  %4629 = vmatpush.msra.mxu2 %v6191_v51 }
0x10ee   : > { %v6181_v23 = vunpack.i.l.bf16 %v6180_v26  ;;  %v6182_v0 = vunpack.i.h.bf16 %v6180_v26 }
0x10ef   : > { %4630 = vmatpush.msra.mxu2 %v6192_v20 }
0x10f1   : > { %5952 = vmatmul.msk.f32.gmra.mxu0 %vm572_vm1, %v5089_v29  ;;  %4631 = vmatpush.msra.mxu2 %v6181_v23 }
0x10f3   : > { %4632 = vmatpush.msra.mxu2 %v6182_v0 }
0x1104   : > { %v8398_v24 = vpop.f32.mrf.mxu0 }
0x1128   : > { %v4477_v21 = vpop.f32.mrf.mxu3 }
0x1129   : > { %v4489_v12 = vmul.f32 0.35355338, %v4477_v21  ;;  %v8400_v39 = vpop.f32.mrf.mxu0 }
0x112b   : > { %v8403_v10 = vadd.f32 %v4489_v12, %v7122_v6 }
0x112d   : > { %v4497_v47 = vsel %vm536_vm0, %v8403_v10, -inf }
0x112e   : > { %4498 = vmax.xlane.f32.xlu1 %v4497_v47 }
0x1130   : > { %v4480_v62 = vpop.f32.mrf.mxu3 }
0x1131   : > { %v4490_v16 = vmul.f32 0.35355338, %v4480_v62 }
0x1132   : > { %v4695_v31 = vpop.f32.mrf.mxu0 }
0x1133   : > { %v8408_v37 = vadd.f32 %v4490_v16, %v7146_v34  ;;  %v4707_v1 = vmul.f32 0.35355338, %v4695_v31 }
0x1135   : > { %v8411_v41 = vadd.f32 %v4707_v1, %v7122_v6  ;;  %v4500_v38 = vsel %vm536_vm0, %v8408_v37, -inf }
0x1136   : > { %4501 = vmax.xlane.f32.xlu0 %v4500_v38 }
0x1137   : > { %v4715_v44 = vsel %vm536_vm0, %v8411_v41, -inf }
0x1138   : > { %v4483_v22 = vpop.f32.mrf.mxu3  ;;  %4716 = vmax.xlane.f32.xlu2 %v4715_v44 }
0x1139   : > { %v4491_v63 = vmul.f32 0.35355338, %v4483_v22 }
0x113a   : > { %v4698_v7 = vpop.f32.mrf.mxu0 }
0x113b   : > { %v8418_v45 = vadd.f32 %v4491_v63, %v7167_v43  ;;  %v4708_v15 = vmul.f32 0.35355338, %v4698_v7 }
0x113d   : > { %v8421_v56 = vadd.f32 %v4708_v15, %v7146_v34  ;;  %v4503_v60 = vsel %vm536_vm0, %v8418_v45, -inf }
0x113f   : > { %v4718_v25 = vsel %vm536_vm0, %v8421_v56, -inf }
0x1140   : > { %v4486_v61 = vpop.f32.mrf.mxu3  ;;  %4504 = vmax.xlane.f32.xlu2 %v4503_v60  ;;  %4719 = vmax.xlane.f32.xlu1 %v4718_v25 }
0x1141   : > { %v4492_v58 = vmul.f32 0.35355338, %v4486_v61 }
0x1142   : > { %v4701_v14 = vpop.f32.mrf.mxu0 }
0x1143   : > { %v8428_v49 = vadd.f32 %v4492_v58, %v7161_v17  ;;  %v4709_v57 = vmul.f32 0.35355338, %v4701_v14 }
0x1145   : > { %v8431_v53 = vadd.f32 %v4709_v57, %v7167_v43  ;;  %v4506_v19 = vsel %vm536_vm0, %v8428_v49, -inf }
0x1147   : > { %v4721_v35 = vsel %vm536_vm0, %v8431_v53, -inf }
0x1148   : > { %4507 = vmax.xlane.f32.xlu1 %v4506_v19  ;;  %4722 = vmax.xlane.f32.xlu0 %v4721_v35 }
0x1149   : > { %v4913_v27 = vpop.f32.mrf.mxu3 }
0x114a   : > { %v4925_v18 = vmul.f32 0.35355338, %v4913_v27 }
0x114b   : > { %v4704_v4 = vpop.f32.mrf.mxu0 }
0x114c   : > { %v4710_v54 = vmul.f32 0.35355338, %v4704_v4  ;;  %v8438_v11 = vadd.f32 %v4925_v18, %v7122_v6 }
0x114e   : > { %v8441_v8 = vadd.f32 %v4710_v54, %v7161_v17  ;;  %v4933_v13 = vsel %vm536_vm0, %v8438_v11, -inf }
0x1150   : > { %4934 = vmax.xlane.f32.xlu0 %v4933_v13  ;;  %v4724_v46 = vsel %vm536_vm0, %v8441_v8, -inf }
0x1151   : > { %4725 = vmax.xlane.f32.xlu2 %v4724_v46 }
0x1156   : > { %v5131_v59 = vpop.f32.mrf.mxu0  ;;  %v4916_v32 = vpop.f32.mrf.mxu3 }
0x1157   : > { %v5143_v36 = vmul.f32 0.35355338, %v5131_v59  ;;  %v4926_v52 = vmul.f32 0.35355338, %v4916_v32 }
0x1159   : > { %v8448_v5 = vadd.f32 %v5143_v36, %v7122_v6  ;;  %v8451_v2 = vadd.f32 %v4926_v52, %v7146_v34 }
0x115b   : > { %v5151_v42 = vsel %vm536_vm0, %v8448_v5, -inf  ;;  %v4936_v29 = vsel %vm536_vm0, %v8451_v2, -inf }
0x115c   : > { %5152 = vmax.xlane.f32.xlu1 %v5151_v42  ;;  %4937 = vmax.xlane.f32.xlu2 %v4936_v29 }
0x115e   : > { %v5134_v28 = vpop.f32.mrf.mxu0  ;;  %v4919_v51 = vpop.f32.mrf.mxu3 }
0x115f   : > { %v5144_v26 = vmul.f32 0.35355338, %v5134_v28  ;;  %v4927_v20 = vmul.f32 0.35355338, %v4919_v51 }
0x1161   : > { %v8458_v23 = vadd.f32 %v5144_v26, %v7146_v34  ;;  %v8461_v6 = vadd.f32 %v4927_v20, %v7167_v43 }
0x1163   : > { %v5154_v0 = vsel %vm536_vm0, %v8458_v23, -inf  ;;  %v4939_v21 = vsel %vm536_vm0, %v8461_v6, -inf }
0x1164   : > { %5155 = vmax.xlane.f32.xlu0 %v5154_v0  ;;  %4940 = vmax.xlane.f32.xlu1 %v4939_v21 }
0x1166   : > { %v5137_v12 = vpop.f32.mrf.mxu0  ;;  %v4922_v1 = vpop.f32.mrf.mxu3 }
0x1167   : > { %v5145_v47 = vmul.f32 0.35355338, %v5137_v12  ;;  %v4928_v44 = vmul.f32 0.35355338, %v4922_v1 }
0x1169   : > { %v8468_v62 = vadd.f32 %v5145_v47, %v7167_v43  ;;  %v8478_v63 = vadd.f32 %v4928_v44, %v7161_v17 }
0x116b   : > { %v5157_v34 = vsel %vm536_vm0, %v8468_v62, -inf  ;;  %v4942_v43 = vsel %vm536_vm0, %v8478_v63, -inf }
0x116c   : > { %5158 = vmax.xlane.f32.xlu0 %v5157_v34 }
0x116e   : > { %v5140_v16 = vpop.f32.mrf.mxu0 }
0x116f   : > { %v5146_v31 = vmul.f32 0.35355338, %v5140_v16 }
0x1171   : > { %v8473_v38 = vadd.f32 %v5146_v31, %v7161_v17 }
0x1173   : > { %v5160_v22 = vsel %vm536_vm0, %v8473_v38, -inf }
0x1174   : > { %5161 = vmax.xlane.f32.xlu1 %v5160_v22 }
0x117c   : > { %4943 = vmax.xlane.f32.xlu1 %v4942_v43 }
0x11a1   : > { %v4499_v7 = vpop.xlane.xlu1 %4498 }
0x11a2   : > { %v4509_v25 = vsub.f32 %v8403_v10, %v4499_v7 }
0x11a4   : > { %v4513_v58 = vmul.f32 1.442695, %v4509_v25 }
0x11a9   : > { %v4502_v14 = vpop.xlane.xlu0 %4501 }
0x11aa   : > { %v4510_v18 = vsub.f32 %v8408_v37, %v4502_v14 }
0x11ab   : > { %v4717_v15 = vpop.xlane.xlu2 %4716 }
0x11ac   : > { %v4727_v60 = vsub.f32 %v8411_v41, %v4717_v15  ;;  %v4515_v41 = vmul.f32 1.442695, %v4510_v18 }
0x11ae   : > { %v4731_v61 = vmul.f32 1.442695, %v4727_v60 }
0x11b0   : > { %6454 = vpow2.f32 %v4731_v61 }
0x11b1   : > { %6456 = vpow2.f32 %v4513_v58 }
0x11b3   : > { %v4720_v57 = vpop.xlane.xlu1 %4719  ;;  %v4505_v19 = vpop.xlane.xlu2 %4504 }
0x11b4   : > { %v4728_v35 = vsub.f32 %v8421_v56, %v4720_v57  ;;  %v4511_v17 = vsub.f32 %v8418_v45, %v4505_v19 }
0x11b6   : > { %v8486_v27 = vpop.eup %6454  ;;  %v4733_v4 = vmul.f32 1.442695, %v4728_v35  ;;  %v4517_v54 = vmul.f32 1.442695, %v4511_v17 }
0x11b7   : > { %v4739_v10 = vsel %vm536_vm0, %v8486_v27, 0.0  ;;  %v8491_v59 = vpop.eup %6456 }
0x11b8   : > { %6458 = vpow2.f32 %v4733_v4  ;;  %4740 = vadd.xlane.f32.xlu2 %v4739_v10  ;;  %v4521_v42 = vsel %vm536_vm0, %v8491_v59, 0.0 }
0x11b9   : > { %6460 = vpow2.f32 %v4517_v54 }
0x11ba   : > { %6462 = vpow2.f32 %v4515_v41 }
0x11bb   : > { %v4508_v13 = vpop.xlane.xlu1 %4507  ;;  %v4723_v46 = vpop.xlane.xlu0 %4722 }
0x11bc   : > { %v4729_v45 = vsub.f32 %v8431_v53, %v4723_v46  ;;  %v4512_v37 = vsub.f32 %v8428_v49, %v4508_v13 }
0x11be   : > { %v8494_v56 = vpop.eup %6458  ;;  %v4735_v32 = vmul.f32 1.442695, %v4729_v45  ;;  %v4519_v53 = vmul.f32 1.442695, %v4512_v37 }
0x11bf   : > { %v8497_v36 = vpop.eup %6460  ;;  %v4742_v52 = vsel %vm536_vm0, %v8494_v56, 0.0 }
0x11c0   : > { %4743 = vadd.xlane.f32.xlu0 %v4742_v52  ;;  %4522 = vadd.xlane.f32.xlu2 %v4521_v42  ;;  %v4527_v29 = vsel %vm536_vm0, %v8497_v36, 0.0  ;;  %6464 = vpow2.f32 %v4735_v32  ;;  %v8505_v28 = vpop.eup %6462 }
0x11c1   : > { %4528 = vadd.xlane.f32.xlu1 %v4527_v29  ;;  %6466 = vpow2.f32 %v4519_v53  ;;  %v4524_v0 = vsel %vm536_vm0, %v8505_v28, 0.0 }
0x11c3   : > { %v4935_v34 = vpop.xlane.xlu0 %4934 }
0x11c4   : > { %v4726_v49 = vpop.xlane.xlu2 %4725  ;;  %v4945_v44 = vsub.f32 %v8438_v11, %v4935_v34 }
0x11c5   : > { %v4730_v51 = vsub.f32 %v8441_v8, %v4726_v49 }
0x11c6   : > { %v8508_v26 = vpop.eup %6464  ;;  %v4949_v43 = vmul.f32 1.442695, %v4945_v44 }
0x11c7   : > { %v4737_v20 = vmul.f32 1.442695, %v4730_v51  ;;  %v4745_v21 = vsel %vm536_vm0, %v8508_v26, 0.0  ;;  %v8514_v12 = vpop.eup %6466 }
0x11c8   : > { %4525 = vadd.xlane.f32.xlu0 %v4524_v0  ;;  %4746 = vadd.xlane.f32.xlu2 %v4745_v21  ;;  %v4530_v8 = vsel %vm536_vm0, %v8514_v12, 0.0 }
0x11c9   : > { %6468 = vpow2.f32 %v4737_v20 }
0x11cf   : > { %v8516_v47 = vpop.eup %6468  ;;  %v5153_v16 = vpop.xlane.xlu1 %5152 }
0x11d0   : > { %v5163_v31 = vsub.f32 %v8448_v5, %v5153_v16  ;;  %4531 = vadd.xlane.f32.xlu0 %v4530_v8  ;;  %v4748_v1 = vsel %vm536_vm0, %v8516_v47, 0.0  ;;  %v4938_v7 = vpop.xlane.xlu2 %4937 }
0x11d1   : > { %4749 = vadd.xlane.f32.xlu1 %v4748_v1  ;;  %v4946_v61 = vsub.f32 %v8451_v2, %v4938_v7 }
0x11d2   : > { %v5167_v22 = vmul.f32 1.442695, %v5163_v31 }
0x11d3   : > { %v4951_v14 = vmul.f32 1.442695, %v4946_v61 }
0x11d4   : > { %6470 = vpow2.f32 %v5167_v22 }
0x11d5   : > { %6472 = vpow2.f32 %v4949_v43 }
0x11d7   : > { %v5156_v15 = vpop.xlane.xlu0 %5155  ;;  %v4941_v17 = vpop.xlane.xlu1 %4940 }
0x11d8   : > { %v5164_v60 = vsub.f32 %v8458_v23, %v5156_v15  ;;  %v4947_v18 = vsub.f32 %v8461_v6, %v4941_v17 }
0x11da   : > { %v8525_v25 = vpop.eup %6470  ;;  %v5169_v5 = vmul.f32 1.442695, %v5164_v60  ;;  %v4953_v4 = vmul.f32 1.442695, %v4947_v18 }
0x11db   : > { %v5175_v58 = vsel %vm536_vm0, %v8525_v25, 0.0  ;;  %v8530_v11 = vpop.eup %6472 }
0x11dc   : > { %6474 = vpow2.f32 %v5169_v5  ;;  %5176 = vadd.xlane.f32.xlu2 %v5175_v58  ;;  %v4957_v19 = vsel %vm536_vm0, %v8530_v11, 0.0 }
0x11dd   : > { %6476 = vpow2.f32 %v4951_v14 }
0x11de   : > { %6478 = vpow2.f32 %v4953_v4 }
0x11df   : > { %v5159_v41 = vpop.xlane.xlu0 %5158 }
0x11e0   : > { %v5165_v13 = vsub.f32 %v8468_v62, %v5159_v41 }
0x11e2   : > { %v8532_v57 = vpop.eup %6474 }
0x11e3   : > { %v5178_v23 = vsel %vm536_vm0, %v8532_v57, 0.0  ;;  %v8538_v2 = vpop.eup %6476 }
0x11e4   : > { %5179 = vadd.xlane.f32.xlu0 %v5178_v23  ;;  %4958 = vadd.xlane.f32.xlu2 %v4957_v19  ;;  %v4960_v35 = vsel %vm536_vm0, %v8538_v2, 0.0  ;;  %v8549_v10 = vpop.eup %6478 }
0x11e5   : > { %v4963_v46 = vsel %vm536_vm0, %v8549_v10, 0.0 }
0x11e7   : > { %v5162_v54 = vpop.xlane.xlu1 %5161 }
0x11e8   : > { %v5166_v8 = vsub.f32 %v8473_v38, %v5162_v54 }
0x11ea   : > { %6209 = vrot.lane.b32.xlu1 %v8324_v33, %s6658_s20  ;;  %v5173_v61 = vmul.f32 1.442695, %v5166_v8 }
0x11ec   : > { %4961 = vadd.xlane.f32.xlu0 %v4960_v35 }
0x11ef   : > { %v4944_v45 = vpop.xlane.xlu1 %4943 }
0x11f0   : > { %v4948_v37 = vsub.f32 %v8478_v63, %v4944_v45 }
0x11f2   : > { %v4955_v32 = vmul.f32 1.442695, %v4948_v37 }
0x11fc   : > { %6199 = vrot.lane.b32.xlu2 %v8324_v33, %s6656_s14  ;;  %v5171_v33 = vmul.f32 1.442695, %v5165_v13 }
0x11fe   : > { %6480 = vpow2.f32 %v5171_v33 }
0x11ff   : > { %6482 = vpow2.f32 %v4955_v32 }
0x1200   : > { %6204 = vrot.lane.b32.xlu0 %v8314_v30, %s6656_s14 }
0x1204   : > { %v8555_v6 = vpop.eup %6480 }
0x1205   : > { %v5181_v52 = vsel %vm536_vm0, %v8555_v6, 0.0  ;;  %v8559_v42 = vpop.eup %6482 }
0x1206   : > { %v4966_v62 = vsel %vm536_vm0, %v8559_v42, 0.0 }
0x1214   : > { %4964 = vadd.xlane.f32.xlu1 %v4963_v46 }
0x1225   : > { %5182 = vadd.xlane.f32.xlu2 %v5181_v52 }
0x122a   : > { %4967 = vadd.xlane.f32.xlu0 %v4966_v62 }
0x122b   : > { %v4741_v29 = vpop.xlane.xlu2 %4740 }
0x122c   : > { %6484 = vrcp.f32 %v4741_v29  ;;  %v4762_v21 = vand.u32 2147483648, %v4741_v29  ;;  %v4760_v16 = vand.u32 2147483647, %v4741_v29  ;;  %vm4756_vm4 = vweird.f32 %v4741_v29 }
0x122d   : > { %6214 = vrot.lane.b32.xlu1 %v8314_v30, %s6658_s20 }
0x122e   : > { %v4763_v1 = vor.u32 1.1754944e-38, %v4762_v21  ;;  %vm4761_vm6 = vcmp.eq.f32.partialorder %v4760_v16, 8.507059e+37 }
0x1232   : > { %v6485_v63 = vpop.eup %6484 }
0x1233   : > { %v4752_v53 = vmul.f32 %v6485_v63, %v4741_v29  ;;  %v8565_v49 = vpop.xlane.xlu0 %4743  ;;  %v4523_v51 = vpop.xlane.xlu2 %4522  ;;  %vm4757_vm2 = vweird.f32 %v6485_v63 }
0x1234   : > { %6486 = vrcp.f32 %v8565_v49  ;;  %v8568_v20 = vpop.xlane.xlu1 %4528  ;;  %vm4758_vm5 = vmor %vm4756_vm4, %vm4757_vm2  ;;  %v4542_v19 = vand.u32 2147483647, %v4523_v51  ;;  %v4544_v35 = vand.u32 2147483648, %v4523_v51  ;;  %vm4771_vm8 = vweird.f32 %v8565_v49 }
0x1235   : > { %v4753_v0 = vsub.f32 1.0, %v4752_v53  ;;  %6488 = vrcp.f32 %v4523_v51  ;;  %v4777_v41 = vand.u32 2147483648, %v8565_v49  ;;  %vm4538_vm9 = vweird.f32 %v4523_v51 }
0x1236   : > { %6490 = vrcp.f32 %v8568_v20  ;;  %vm8592_vm10 = vcmp.eq.f32.partialorder %v4542_v19, 8.507059e+37  ;;  %v4545_v45 = vor.u32 1.1754944e-38, %v4544_v35  ;;  %v4574_v46 = vand.u32 2147483648, %v8568_v20 }
0x1237   : > { %v4754_v34 = vmul.f32 %v6485_v63, %v4753_v0  ;;  %v4778_v21 = vor.u32 1.1754944e-38, %v4777_v41 }
0x1238   : > { %v4575_v0 = vor.u32 1.1754944e-38, %v4574_v46 }
0x1239   : > { %v4755_v30 = vadd.f32 %v6485_v63, %v4754_v34 }
0x123a   : > { %v8572_v31 = vpop.eup %6486 }
0x123b   : > { %v4759_v44 = vsel %vm4758_vm5, %v6485_v63, %v4755_v30  ;;  %v4767_v22 = vmul.f32 %v8572_v31, %v8565_v49  ;;  %v8576_v43 = vpop.xlane.xlu0 %4525  ;;  %v6489_v7 = vpop.eup %6488  ;;  %vm4772_vm12 = vweird.f32 %v8572_v31 }
0x123c   : > { %v4764_v15 = vsel %vm4761_vm6, %v4763_v1, %v4759_v44  ;;  %6492 = vrcp.f32 %v8576_v43  ;;  %v8579_v60 = vpop.xlane.xlu2 %4746  ;;  %v8581_v38 = vpop.eup %6490  ;;  %v4534_v14 = vmul.f32 %v6489_v7, %v4523_v51  ;;  %vm4539_vm7 = vweird.f32 %v6489_v7  ;;  %vm4773_vm15 = vmor %vm4771_vm8, %vm4772_vm12 }
0x123d   : > { %v4765_v5 = vmul.f32 %v8486_v27, %v4764_v15  ;;  %v4768_v58 = vsub.f32 1.0, %v4767_v22  ;;  %6494 = vrcp.f32 %v8579_v60  ;;  %v4564_v18 = vmul.f32 %v8581_v38, %v8568_v20  ;;  %vm4540_vm13 = vmor %vm4538_vm9, %vm4539_vm7 }
0x123e   : > { %v4535_v23 = vsub.f32 1.0, %v4534_v14  ;;  %6496 = vpow2.f32 %v5173_v61  ;;  %v4775_v27 = vand.u32 2147483647, %v8565_v49  ;;  %v4559_v51 = vand.u32 2147483648, %v8576_v43 }
0x123f   : > { %5929 = vmatmul.msk.f32.vlgmr.msrb.gmra.mxu1 %vm536_vm0, %v4765_v5  ;;  %v4769_v17 = vmul.f32 %v8572_v31, %v4768_v58  ;;  %v4565_v52 = vsub.f32 1.0, %v4564_v18  ;;  %v4557_v44 = vand.u32 2147483647, %v8576_v43  ;;  %vm4553_vm4 = vweird.f32 %v8576_v43 }
0x1240   : > { %v4536_v4 = vmul.f32 %v6489_v7, %v4535_v23  ;;  %vm8606_vm14 = vcmp.eq.f32.partialorder %v4775_v27, 8.507059e+37  ;;  %v4560_v5 = vor.u32 1.1754944e-38, %v4559_v51  ;;  %v4792_v58 = vand.u32 2147483648, %v8579_v60 }
0x1241   : > { %v4770_v32 = vadd.f32 %v8572_v31, %v4769_v17  ;;  %v4566_v22 = vmul.f32 %v8581_v38, %v4565_v52  ;;  %v4790_v23 = vand.u32 2147483647, %v8579_v60  ;;  %vm4569_vm7 = vweird.f32 %v8581_v38 }
0x1242   : > { %v6493_v54 = vpop.eup %6492  ;;  %v4537_v13 = vadd.f32 %v6489_v7, %v4536_v4  ;;  %vm4558_vm8 = vcmp.eq.f32.partialorder %v4557_v44, 8.507059e+37  ;;  %vm4786_vm9 = vweird.f32 %v8579_v60 }
0x1243   : > { %v4549_v33 = vmul.f32 %v6493_v54, %v8576_v43  ;;  %v8597_v37 = vpop.xlane.xlu0 %4531  ;;  %v6495_v29 = vpop.eup %6494  ;;  %vm4554_vm2 = vweird.f32 %v6493_v54  ;;  %v4774_v15 = vsel %vm4773_vm15, %v8572_v31, %v4770_v32  ;;  %v4567_v27 = vadd.f32 %v8581_v38, %v4566_v22 }
0x1244   : > { %6498 = vrcp.f32 %v8597_v37  ;;  %v8602_v62 = vpop.xlane.xlu1 %4749  ;;  %v4541_v63 = vsel %vm4540_vm13, %v6489_v7, %v4537_v13  ;;  %v4782_v16 = vmul.f32 %v6495_v29, %v8579_v60  ;;  %v8613_v8 = vpop.eup %6496  ;;  %vm4555_vm5 = vmor %vm4553_vm4, %vm4554_vm2  ;;  %vm4787_vm6 = vweird.f32 %v6495_v29 }
0x1245   : > { %v4550_v53 = vsub.f32 1.0, %v4549_v33  ;;  %6500 = vrcp.f32 %v8602_v62  ;;  %v4546_v34 = vsel %vm8592_vm10, %v4545_v45, %v4541_v63  ;;  %vm4788_vm10 = vmor %vm4786_vm9, %vm4787_vm6  ;;  %vm4791_vm12 = vcmp.eq.f32.partialorder %v4790_v23, 8.507059e+37 }
0x1246   : > { %v4547_v30 = vmul.f32 %v8491_v59, %v4546_v34  ;;  %v4783_v7 = vsub.f32 1.0, %v4782_v16  ;;  %v4779_v59 = vsel %vm8606_vm14, %v4778_v21, %v4774_v15  ;;  %vm4568_vm13 = vweird.f32 %v8568_v20 }
0x1247   : > { %v4551_v1 = vmul.f32 %v6493_v54, %v4550_v53  ;;  %v4780_v43 = vmul.f32 %v8494_v56, %v4779_v59  ;;  %v4793_v56 = vor.u32 1.1754944e-38, %v4792_v58  ;;  %v4572_v60 = vand.u32 2147483647, %v8568_v20  ;;  %vm8648_vm14 = vmor %vm4568_vm13, %vm4569_vm7 }
0x1248   : > { %5917 = vmatmul.msk.f32.vlgmr.msra.gmra.mxu2 %vm536_vm0, %v4547_v30  ;;  %v4784_v14 = vmul.f32 %v6495_v29, %v4783_v7  ;;  %v4807_v33 = vand.u32 2147483648, %v8602_v62  ;;  %v4805_v53 = vand.u32 2147483647, %v8602_v62  ;;  %v4571_v20 = vsel %vm8648_vm14, %v8581_v38, %v4567_v27 }
0x1249   : > { %v4552_v61 = vadd.f32 %v6493_v54, %v4551_v1  ;;  %5930 = vmatmul.msk.f32.gmra.mxu1 %vm536_vm0, %v4780_v43  ;;  %vm4801_vm2 = vweird.f32 %v8602_v62  ;;  %vm4573_vm4 = vcmp.eq.f32.partialorder %v4572_v60, 8.507059e+37  ;;  %v4589_v44 = vand.u32 2147483648, %v8597_v37 }
0x124a   : > { %v8628_v49 = vpop.eup %6498  ;;  %v4785_v17 = vadd.f32 %v6495_v29, %v4784_v14  ;;  %v4808_v34 = vor.u32 1.1754944e-38, %v4807_v33  ;;  %vm4806_vm6 = vcmp.eq.f32.partialorder %v4805_v53, 8.507059e+37  ;;  %v4576_v16 = vsel %vm4573_vm4, %v4575_v0, %v4571_v20 }
0x124b   : > { %v6501_v19 = vpop.eup %6500  ;;  %v4579_v31 = vmul.f32 %v8628_v49, %v8597_v37  ;;  %v4556_v35 = vsel %vm4555_vm5, %v6493_v54, %v4552_v61  ;;  %vm4584_vm7 = vweird.f32 %v8628_v49  ;;  %v5184_v38 = vsel %vm536_vm0, %v8613_v8, 0.0 }
0x124c   : > { %v4797_v18 = vmul.f32 %v6501_v19, %v8602_v62  ;;  %v4561_v4 = vsel %vm4558_vm8, %v4560_v5, %v4556_v35  ;;  %v4789_v54 = vsel %vm4788_vm10, %v6495_v29, %v4785_v17  ;;  %vm4802_vm15 = vweird.f32 %v6501_v19 }
0x124d   : > { %v4580_v41 = vsub.f32 1.0, %v4579_v31  ;;  %v4562_v13 = vmul.f32 %v8505_v28, %v4561_v4  ;;  %v4794_v32 = vsel %vm4791_vm12, %v4793_v56, %v4789_v54  ;;  %vm4803_vm5 = vmor %vm4801_vm2, %vm4802_vm15  ;;  %vm4583_vm8 = vweird.f32 %v8597_v37 }
0x124e   : > { %v4798_v45 = vsub.f32 1.0, %v4797_v18  ;;  %v4795_v29 = vmul.f32 %v8508_v26, %v4794_v32  ;;  %v4587_v62 = vand.u32 2147483647, %v8597_v37  ;;  %v4577_v15 = vmul.f32 %v8497_v36, %v4576_v16  ;;  %vm4585_vm9 = vmor %vm4583_vm8, %vm4584_vm7 }
0x124f   : > { %v8644_v52 = vpop.xlane.xlu2 %5176  ;;  %v4581_v51 = vmul.f32 %v8628_v49, %v4580_v41  ;;  %v4590_v58 = vor.u32 1.1754944e-38, %v4589_v44 }
0x1250   : > { %v4799_v28 = vmul.f32 %v6501_v19, %v4798_v45  ;;  %5918 = vmatmul.msk.f32.gmra.mxu2 %vm536_vm0, %v4562_v13  ;;  %vm4588_vm10 = vcmp.eq.f32.partialorder %v4587_v62, 8.507059e+37 }
0x1251   : > { %5931 = vmatmul.msk.f32.gmra.mxu1 %vm536_vm0, %v4795_v29  ;;  %v4582_v30 = vadd.f32 %v8628_v49, %v4581_v51 }
0x1252   : > { %v4800_v21 = vadd.f32 %v6501_v19, %v4799_v28 }
0x1253   : > { %v4586_v5 = vsel %vm4585_vm9, %v8628_v49, %v4582_v30 }
0x1254   : > { %v4804_v26 = vsel %vm4803_vm5, %v6501_v19, %v4800_v21  ;;  %v4591_v37 = vsel %vm4588_vm10, %v4590_v58, %v4586_v5 }
0x1255   : > { %v4809_v1 = vsel %vm4806_vm6, %v4808_v34, %v4804_v26  ;;  %v4592_v31 = vmul.f32 %v8514_v12, %v4591_v37 }
0x1256   : > { %v4810_v61 = vmul.f32 %v8516_v47, %v4809_v1 }
0x1257   : > { %v8668_v22 = vpop.xlane.xlu0 %5179  ;;  %5185 = vadd.xlane.f32.xlu1 %v5184_v38  ;;  %v4959_v7 = vpop.xlane.xlu2 %4958 }
0x1258   : > { %6502 = vrcp.f32 %v4959_v7  ;;  %5919 = vmatmul.msk.f32.gmra.mxu2 %vm536_vm0, %v4577_v15  ;;  %v4980_v13 = vand.u32 2147483648, %v4959_v7  ;;  %vm4974_vm13 = vweird.f32 %v4959_v7  ;;  %v4978_v46 = vand.u32 2147483647, %v4959_v7 }
0x1259   : > { %5932 = vmatmul.msk.f32.gmra.mxu1 %vm536_vm0, %v4810_v61 }
0x125a   : > { %v4981_v54 = vor.u32 1.1754944e-38, %v4980_v13  ;;  %vm4979_vm15 = vcmp.eq.f32.partialorder %v4978_v46, 8.507059e+37 }
0x125c   : > { %v6210_v59 = vpop.permute.xlu1 %6209 }
0x125d   : > { %v6211_v14 = vunpack.i.l.bf16 %v6210_v59  ;;  %v6212_v43 = vunpack.i.h.bf16 %v6210_v59 }
0x125e   : > { %v6503_v23 = vpop.eup %6502 }
0x125f   : > { %5283 = vmatpush.msra.mxu1 %v6211_v14  ;;  %v4962_v19 = vpop.xlane.xlu0 %4961  ;;  %v6200_v36 = vpop.permute.xlu2 %6199  ;;  %v4970_v47 = vmul.f32 %v6503_v23, %v4959_v7  ;;  %vm4975_vm12 = vweird.f32 %v6503_v23 }
0x1260   : > { %6504 = vrcp.f32 %v4962_v19  ;;  %5920 = vmatmul.msk.f32.gmra.mxu2 %vm536_vm0, %v4592_v31  ;;  %v6201_v49 = vunpack.i.l.bf16 %v6200_v36  ;;  %v6202_v17 = vunpack.i.h.bf16 %v6200_v36  ;;  %vm4976_vm14 = vmor %vm4974_vm13, %vm4975_vm12  ;;  %v4995_v28 = vand.u32 2147483648, %v4962_v19 }
0x1261   : > { %5284 = vmatpush.msra.mxu1 %v6212_v43  ;;  %v4971_v35 = vsub.f32 1.0, %v4970_v47  ;;  %vm4989_vm4 = vweird.f32 %v4962_v19  ;;  %v4993_v51 = vand.u32 2147483647, %v4962_v19  ;;  %6506 = vrcp.f32 %v8644_v52 }
0x1262   : > { %5065 = vmatpush.msrb.mxu2 %v6201_v49  ;;  %v4996_v0 = vor.u32 1.1754944e-38, %v4995_v28  ;;  %v5198_v31 = vand.u32 2147483648, %v8644_v52  ;;  %vm5192_vm13 = vweird.f32 %v8644_v52  ;;  %v5196_v47 = vand.u32 2147483647, %v8644_v52 }
0x1263   : > { %v4972_v4 = vmul.f32 %v6503_v23, %v4971_v35  ;;  %vm4994_vm6 = vcmp.eq.f32.partialorder %v4993_v51, 8.507059e+37 }
0x1264   : > { %5066 = vmatpush.msrb.mxu2 %v6202_v17 }
0x1265   : > { %v4973_v56 = vadd.f32 %v6503_v23, %v4972_v4  ;;  %v5199_v4 = vor.u32 1.1754944e-38, %v5198_v31 }
0x1266   : > { %v6505_v18 = vpop.eup %6504 }
0x1267   : > { %v4985_v27 = vmul.f32 %v6505_v18, %v4962_v19  ;;  %v4977_v12 = vsel %vm4976_vm14, %v6503_v23, %v4973_v56  ;;  %vm4990_vm2 = vweird.f32 %v6505_v18  ;;  %v6507_v26 = vpop.eup %6506 }
0x1268   : > { %v4982_v33 = vsel %vm4979_vm15, %v4981_v54, %v4977_v12  ;;  %vm4991_vm5 = vmor %vm4989_vm4, %vm4990_vm2  ;;  %v5188_v30 = vmul.f32 %v6507_v26, %v8644_v52  ;;  %vm5193_vm12 = vweird.f32 %v6507_v26  ;;  %vm5197_vm15 = vcmp.eq.f32.partialorder %v5196_v47, 8.507059e+37 }
0x1269   : > { %v4986_v41 = vsub.f32 1.0, %v4985_v27  ;;  %v4983_v29 = vmul.f32 %v8530_v11, %v4982_v33  ;;  %vm5194_vm14 = vmor %vm5192_vm13, %vm5193_vm12  ;;  %v5213_v52 = vand.u32 2147483648, %v8668_v22  ;;  %vm5207_vm4 = vweird.f32 %v8668_v22 }
0x126a   : > { %v5189_v38 = vsub.f32 1.0, %v5188_v30 }
0x126b   : > { %v4987_v45 = vmul.f32 %v6505_v18, %v4986_v41  ;;  %v5214_v28 = vor.u32 1.1754944e-38, %v5213_v52 }
0x126c   : > { %v5190_v5 = vmul.f32 %v6507_v26, %v5189_v38 }
0x126d   : > { %v4988_v63 = vadd.f32 %v6505_v18, %v4987_v45 }
0x126e   : > { %v5191_v43 = vadd.f32 %v6507_v26, %v5190_v5 }
0x126f   : > { %v4992_v20 = vsel %vm4991_vm5, %v6505_v18, %v4988_v63 }
0x1270   : > { %v4997_v21 = vsel %vm4994_vm6, %v4996_v0, %v4992_v20  ;;  %v5195_v35 = vsel %vm5194_vm14, %v6507_v26, %v5191_v43 }
0x1271   : > { %v4998_v34 = vmul.f32 %v8538_v2, %v4997_v21 }
0x1272   : > { %v6205_v60 = vpop.permute.xlu0 %6204 }
0x1273   : > { %v6206_v32 = vunpack.i.l.bf16 %v6205_v60  ;;  %v6207_v53 = vunpack.i.h.bf16 %v6205_v60  ;;  %v5211_v60 = vand.u32 2147483647, %v8668_v22 }
0x1275   : > { %5067 = vmatpush.msrb.mxu2 %v6206_v32  ;;  %vm5212_vm6 = vcmp.eq.f32.partialorder %v5211_v60, 8.507059e+37 }
0x1277   : > { %5068 = vmatpush.msrb.mxu2 %v6207_v53 }
0x1278   : > { %5941 = vmatmul.msk.f32.vlgmr.msrb.gmra.mxu2 %vm536_vm0, %v4983_v29 }
0x1280   : > { %5942 = vmatmul.msk.f32.gmra.mxu2 %vm536_vm0, %v4998_v34 }
0x1287   : > { %v4965_v16 = vpop.xlane.xlu1 %4964 }
0x1288   : > { %6508 = vrcp.f32 %v4965_v16  ;;  %v5010_v62 = vand.u32 2147483648, %v4965_v16  ;;  %v5008_v2 = vand.u32 2147483647, %v4965_v16  ;;  %vm5004_vm8 = vweird.f32 %v4965_v16 }
0x1289   : > { %6510 = vrcp.f32 %v8668_v22 }
0x128a   : > { %v5011_v59 = vor.u32 1.1754944e-38, %v5010_v62  ;;  %vm5009_vm10 = vcmp.eq.f32.partialorder %v5008_v2, 8.507059e+37 }
0x128e   : > { %v6509_v11 = vpop.eup %6508 }
0x128f   : > { %v5000_v1 = vmul.f32 %v6509_v11, %v4965_v16  ;;  %v6511_v7 = vpop.eup %6510  ;;  %vm5005_vm7 = vweird.f32 %v6509_v11 }
0x1290   : > { %v5203_v58 = vmul.f32 %v6511_v7, %v8668_v22  ;;  %vm5006_vm9 = vmor %vm5004_vm8, %vm5005_vm7  ;;  %vm5208_vm2 = vweird.f32 %v6511_v7 }
0x1291   : > { %v5001_v44 = vsub.f32 1.0, %v5000_v1  ;;  %vm5209_vm5 = vmor %vm5207_vm4, %vm5208_vm2 }
0x1292   : > { %v5204_v19 = vsub.f32 1.0, %v5203_v58 }
0x1293   : > { %v5002_v15 = vmul.f32 %v6509_v11, %v5001_v44 }
0x1294   : > { %v5205_v17 = vmul.f32 %v6511_v7, %v5204_v19 }
0x1295   : > { %v5003_v61 = vadd.f32 %v6509_v11, %v5002_v15 }
0x1296   : > { %v5206_v13 = vadd.f32 %v6511_v7, %v5205_v17 }
0x1297   : > { %v5007_v37 = vsel %vm5006_vm9, %v6509_v11, %v5003_v61 }
0x1298   : > { %v8685_v14 = vpop.xlane.xlu2 %5182  ;;  %v5012_v23 = vsel %vm5009_vm10, %v5011_v59, %v5007_v37  ;;  %v5210_v63 = vsel %vm5209_vm5, %v6511_v7, %v5206_v13  ;;  %v6533_v13 = vld [vmem:[#allocation6 + $0x8] sm:$0xff] }
0x1299   : > { %6512 = vrcp.f32 %v8685_v14  ;;  %v5013_v36 = vmul.f32 %v8549_v10, %v5012_v23  ;;  %v5200_v10 = vsel %vm5197_vm15, %v5199_v4, %v5195_v35  ;;  %v5215_v0 = vsel %vm5212_vm6, %v5214_v28, %v5210_v63  ;;  %v4390_v63 = vld [vmem:[#allocation4 + $0xb8] sm:$0xff]  ;;  %v4389_v28 = vld [vmem:[#allocation4 + $0xb0] sm:$0xff] }
0x129a   : > { %v5201_v54 = vmul.f32 %v8525_v25, %v5200_v10  ;;  %v5228_v21 = vand.u32 2147483648, %v8685_v14  ;;  %vm5222_vm10 = vweird.f32 %v8685_v14  ;;  %v5226_v34 = vand.u32 2147483647, %v8685_v14  ;;  %5385 = vmatpush.msra.mxu3 %v4390_v63 }
0x129b   : > { %5943 = vmatmul.msk.f32.gmra.mxu2 %vm536_vm0, %v5013_v36  ;;  %v5216_v26 = vmul.f32 %v8532_v57, %v5215_v0 }
0x129c   : > { %v5229_v44 = vor.u32 1.1754944e-38, %v5228_v21  ;;  %vm5227_vm15 = vcmp.eq.f32.partialorder %v5226_v34, 8.507059e+37  ;;  %5386 = vmatpush.msra.mxu3 %v4389_v28 }
0x129d   : > { %v4968_v49 = vpop.xlane.xlu0 %4967 }
0x129e   : > { %6514 = vrcp.f32 %v4968_v49  ;;  %v5025_v29 = vand.u32 2147483648, %v4968_v49  ;;  %v5023_v20 = vand.u32 2147483647, %v4968_v49  ;;  %vm5019_vm9 = vweird.f32 %v4968_v49 }
0x129f   : > { %v6513_v18 = vpop.eup %6512  ;;  %v6215_v27 = vpop.permute.xlu1 %6214 }
0x12a0   : > { %v5218_v56 = vmul.f32 %v6513_v18, %v8685_v14  ;;  %v6216_v41 = vunpack.i.l.bf16 %v6215_v27  ;;  %v6217_v12 = vunpack.i.h.bf16 %v6215_v27  ;;  %vm5223_vm8 = vweird.f32 %v6513_v18 }
0x12a1   : > { %v5026_v16 = vor.u32 1.1754944e-38, %v5025_v29  ;;  %vm5224_vm13 = vmor %vm5222_vm10, %vm5223_vm8  ;;  %vm5024_vm14 = vcmp.eq.f32.partialorder %v5023_v20, 8.507059e+37 }
0x12a2   : > { %v5219_v46 = vsub.f32 1.0, %v5218_v56  ;;  %5285 = vmatpush.msra.mxu1 %v6216_v41 }
0x12a4   : > { %v6515_v45 = vpop.eup %6514  ;;  %5286 = vmatpush.msra.mxu1 %v6217_v12  ;;  %v5220_v32 = vmul.f32 %v6513_v18, %v5219_v46  ;;  %v4351_v46 = vperm.slane %v6533_v13, 2 }
0x12a5   : > { %v5015_v33 = vmul.f32 %v6515_v45, %v4968_v49  ;;  %5953 = vmatmul.msk.f32.vlgmr.msra.gmra.mxu1 %vm536_vm0, %v5201_v54  ;;  %vm5020_vm7 = vweird.f32 %v6515_v45 }
0x12a6   : > { %v5221_v25 = vadd.f32 %v6513_v18, %v5220_v32  ;;  %vm5021_vm12 = vmor %vm5019_vm9, %vm5020_vm7  ;;  %v4379_v52 = vadd.f32 %v8400_v39, %v4351_v46  ;;  %v4376_v54 = vadd.f32 %v8398_v24, %v4351_v46  ;;  %v4388_v39 = vld [vmem:[#allocation4 + $0xa8] sm:$0xff] }
0x12a7   : > { %v5016_v53 = vsub.f32 1.0, %v5015_v33  ;;  %5387 = vmatpush.msra.mxu3 %v4388_v39 }
0x12a8   : > { %v5225_v1 = vsel %vm5224_vm13, %v6513_v18, %v5221_v25  ;;  %v8725_v12 = vadd.f32 %v4379_v52, %v8026_v40  ;;  %v5402_v33 = vadd.f32 %v4376_v54, %v8017_v3  ;;  %v4387_v40 = vld [vmem:[#allocation4 + $0xa0] sm:$0xff] }
0x12a9   : > { %v5017_v51 = vmul.f32 %v6515_v45, %v5016_v53  ;;  %v5230_v62 = vsel %vm5227_vm15, %v5229_v44, %v5225_v1  ;;  %5388 = vmatpush.msra.mxu3 %v4387_v40 }
0x12aa   : > { %v5231_v7 = vmul.f32 %v8555_v6, %v5230_v62  ;;  %v5411_v60 = vsel %vm536_vm0, %v8725_v12, 0.0  ;;  %v5408_v32 = vsel %vm536_vm0, %v5402_v33, 0.0 }
0x12ab   : > { %v5018_v22 = vadd.f32 %v6515_v45, %v5017_v51 }
0x12ad   : > { %v5022_v11 = vsel %vm5021_vm12, %v6515_v45, %v5018_v22  ;;  %5954 = vmatmul.msk.f32.gmra.mxu1 %vm536_vm0, %v5216_v26 }
0x12ae   : > { %v5027_v30 = vsel %vm5024_vm14, %v5026_v16, %v5022_v11 }
0x12af   : > { %v5028_v38 = vmul.f32 %v8559_v42, %v5027_v30 }
0x12b1   : > { %5944 = vmatmul.msk.f32.gmra.mxu2 %vm536_vm0, %v5028_v38 }
0x12b5   : > { %5955 = vmatmul.msk.f32.gmra.mxu1 %vm536_vm0, %v5231_v7 }
0x12bc   : > { %v4852_v15 = vpop.f32.mrf.mxu1 }
0x12bd   : > { %5304 = vrot.lane.b32.xlu2 %v4852_v15, %s6661_s23 }
0x12c6   : > { %v4855_v57 = vpop.f32.mrf.mxu1 }
0x12c7   : > { %5306 = vrot.lane.b32.xlu2 %v4855_v57, %s6661_s23 }
0x12ca   : > { %v5186_v2 = vpop.xlane.xlu1 %5185 }
0x12cb   : > { %6516 = vrcp.f32 %v5186_v2  ;;  %v5243_v42 = vand.u32 2147483648, %v5186_v2  ;;  %v4634_v59 = vpop.f32.mrf.mxu2  ;;  %v5241_v14 = vand.u32 2147483647, %v5186_v2  ;;  %vm5237_vm4 = vweird.f32 %v5186_v2 }
0x12cd   : > { %v5244_v6 = vor.u32 1.1754944e-38, %v5243_v42  ;;  %vm5242_vm6 = vcmp.eq.f32.partialorder %v5241_v14, 8.507059e+37 }
0x12ce   : > { %v4858_v18 = vpop.f32.mrf.mxu1 }
0x12d1   : > { %v6517_v61 = vpop.eup %6516 }
0x12d2   : > { %v5233_v5 = vmul.f32 %v6517_v61, %v5186_v2  ;;  %vm5238_vm2 = vweird.f32 %v6517_v61 }
0x12d3   : > { %vm5239_vm5 = vmor %vm5237_vm4, %vm5238_vm2  ;;  %v4637_v31 = vpop.f32.mrf.mxu2 }
0x12d4   : > { %v5234_v58 = vsub.f32 1.0, %v5233_v5  ;;  %v6663_v5 = vmov 32.0  }
0x12d5   : > { %6518 = vrcp.f32 %v6663_v5 }
0x12d6   : > { %v5235_v37 = vmul.f32 %v6517_v61, %v5234_v58  ;;  %v4861_v4 = vpop.f32.mrf.mxu1 }
0x12d8   : > { %v5236_v23 = vadd.f32 %v6517_v61, %v5235_v37  ;;  %v5360_v37 = vperm.slane %v6533_v13, 5 }
0x12da   : > { %v5240_v43 = vsel %vm5239_vm5, %v6517_v61, %v5236_v23 }
0x12db   : > { %v5245_v19 = vsel %vm5242_vm6, %v5244_v6, %v5240_v43  ;;  %v4640_v47 = vpop.f32.mrf.mxu2  ;;  %v6519_v58 = vpop.eup %6518 }
0x12dc   : > { %v5246_v36 = vmul.f32 %v8613_v8, %v5245_v19  ;;  %v5415_v42 = vmul.f32 32.0, %v6519_v58 }
0x12de   : > { %5956 = vmatmul.msk.f32.gmra.mxu1 %vm536_vm0, %v5246_v36 }
0x12e3   : > { %v8712_v49 = vpop.f32.mrf.mxu2 }
0x12fb   : > { %v5070_v35 = vpop.f32.mrf.mxu2 }
0x12fc   : > { %5320 = vrot.lane.b32.xlu0 %v5070_v35, %s6660_s22 }
0x1303   : > { %v5073_v17 = vpop.f32.mrf.mxu2 }
0x1304   : > { %5322 = vrot.lane.b32.xlu0 %v5073_v17, %s6660_s22 }
0x130c   : > { %5308 = vrot.lane.b32.xlu0 %v4858_v18, %s6661_s23 }
0x1317   : > { %v5305_v24 = vpop.permute.xlu2 %5304 }
0x1318   : > { %v5348_v20 = vsel %vm572_vm1, %v4634_v59, %v5305_v24  ;;  %v5416_v59 = vsub.f32 1.0, %v5415_v42 }
0x131a   : > { %v5417_v14 = vmul.f32 %v6519_v58, %v5416_v59 }
0x131c   : > { %v5418_v19 = vadd.f32 %v6519_v58, %v5417_v14 }
0x131e   : > { %v5076_v56 = vpop.f32.mrf.mxu2 }
0x1321   : > { %v5307_v29 = vpop.permute.xlu2 %5306 }
0x1322   : > { %v5288_v27 = vpop.f32.mrf.mxu1  ;;  %v5349_v22 = vsel %vm572_vm1, %v4637_v31, %v5307_v29 }
0x1323   : > { %5336 = vrot.lane.b32.xlu1 %v5288_v27, %s6662_s26 }
0x132a   : > { %v5291_v8 = vpop.f32.mrf.mxu1 }
0x132b   : > { %5338 = vrot.lane.b32.xlu2 %v5291_v8, %s6662_s26 }
0x1332   : > { %v5294_v10 = vpop.f32.mrf.mxu1 }
0x1333   : > { %5340 = vrot.lane.b32.xlu0 %v5294_v10, %s6662_s26  ;;  %5324 = vrot.lane.b32.xlu2 %v5076_v56, %s6660_s22 }
0x1334   : > { %v5079_v41 = vpop.f32.mrf.mxu2 }
0x1335   : > { %5326 = vrot.lane.b32.xlu1 %v5079_v41, %s6660_s22 }
0x133b   : > { %5310 = vrot.lane.b32.xlu2 %v4861_v4, %s6661_s23 }
0x135b   : > { %v5297_v45 = vpop.f32.mrf.mxu1 }
0x135c   : > { %5342 = vrot.lane.b32.xlu0 %v5297_v45, %s6662_s26 }
0x135f   : > { %5412 = vadd.xlane.f32.xlu1 %v5411_v60 }
0x1364   : > { %5409 = vadd.xlane.f32.xlu2 %v5408_v32 }
0x136e   : > { %v5321_v53 = vpop.permute.xlu0 %5320 }
0x136f   : > { %v5352_v0 = vsel %vm608_vm3, %v5348_v20, %v5321_v53 }
0x1376   : > { %v5323_v51 = vpop.permute.xlu0 %5322 }
0x1377   : > { %v5353_v34 = vsel %vm608_vm3, %v5349_v22, %v5323_v51 }
0x137e   : > { %v5309_v16 = vpop.permute.xlu0 %5308 }
0x137f   : > { %v5350_v30 = vsel %vm572_vm1, %v4640_v47, %v5309_v16 }
0x1385   : > { %v5339_v21 = vpop.permute.xlu2 %5338 }
0x1386   : > { %v5357_v26 = vsel %vm1098_vm11, %v5353_v34, %v5339_v21 }
0x138d   : > { %v5325_v11 = vpop.permute.xlu2 %5324 }
0x138e   : > { %v5354_v1 = vsel %vm608_vm3, %v5350_v30, %v5325_v11 }
0x1395   : > { %v5337_v3 = vpop.permute.xlu1 %5336  ;;  %v5311_v62 = vpop.permute.xlu2 %5310 }
0x1396   : > { %v5356_v25 = vsel %vm1098_vm11, %v5352_v0, %v5337_v3  ;;  %v5351_v15 = vsel %vm572_vm1, %v8712_v49, %v5311_v62  ;;  %vm5419_vm1 = vweird.f32 %v6519_v58 }
0x1397   : > { %5957 = vmatmul.msk.f32.vlgmr.msra.gmra.mxu3 %vm536_vm0, %v5356_v25  ;;  %v8752_v47 = vsel %vm5419_vm1, %v6519_v58, %v5418_v19 }
0x139f   : > { %5958 = vmatmul.msk.f32.gmra.mxu3 %vm536_vm0, %v5357_v26 }
0x13a5   : > { %v5341_v44 = vpop.permute.xlu0 %5340 }
0x13a6   : > { %v5358_v38 = vsel %vm1098_vm11, %v5354_v1, %v5341_v44 }
0x13a7   : > { %5959 = vmatmul.msk.f32.gmra.mxu3 %vm536_vm0, %v5358_v38  ;;  %v5327_v7 = vpop.permute.xlu1 %5326 }
0x13a8   : > { %v5355_v57 = vsel %vm608_vm3, %v5351_v15, %v5327_v7 }
0x13ce   : > { %v5343_v2 = vpop.permute.xlu0 %5342 }
0x13cf   : > { %v5359_v61 = vsel %vm1098_vm11, %v5355_v57, %v5343_v2 }
0x13d0   : > { %5960 = vmatmul.msk.f32.gmra.mxu3 %vm536_vm0, %v5359_v61  ;;  %v6534_v61 = vld [vmem:[#allocation6] sm:$0xff] }
0x13d1   : > { %v8796_v5 = vperm.slane %v6534_v61, 5  ;;  %v8799_v59 = vperm.slane %v6534_v61, 6 }
0x13d2   : > { %v5413_v8 = vpop.xlane.xlu1 %5412 }
0x13d3   : > { %v5422_v56 = vmul.f32 %v8752_v47, %v5413_v8 }
0x13d5   : > { %v8764_v46 = vsub.f32 %v8725_v12, %v5422_v56 }
0x13d7   : > { %v5410_v31 = vpop.xlane.xlu2 %5409  ;;  %v5426_v45 = vmul.f32 %v8764_v46, %v8764_v46 }
0x13d8   : > { %v5421_v35 = vmul.f32 %v8752_v47, %v5410_v31 }
0x13d9   : > { %v5430_v54 = vsel %vm536_vm0, %v5426_v45, 0.0 }
0x13da   : > { %v8756_v4 = vsub.f32 %v5402_v33, %v5421_v35 }
0x13dc   : > { %v5425_v41 = vmul.f32 %v8756_v4, %v8756_v4 }
0x141a   : > { %v5390_v23 = vpop.f32.mrf.mxu3 }
0x141b   : > { %v5391_v6 = vadd.f32 %v5390_v23, %v5360_v37 }
0x141d   : > { %v5404_v43 = vadd.f32 %v5391_v6, %v8234_v55 }
0x141f   : > { %v5467_v36 = vsel %vm536_vm0, %v5404_v43, 0.0 }
0x1420   : > { %5468 = vadd.xlane.f32.xlu0 %v5467_v36 }
0x1422   : > { %v5393_v49 = vpop.f32.mrf.mxu3 }
0x1423   : > { %v5394_v17 = vadd.f32 %v5393_v49, %v5360_v37 }
0x1425   : > { %v5405_v18 = vadd.f32 %v5394_v17, %v8242_v48  ;;  %v5427_v48 = vsel %vm536_vm0, %v5425_v41, 0.0 }
0x1427   : > { %v5470_v27 = vsel %vm536_vm0, %v5405_v18, 0.0 }
0x1428   : > { %5471 = vadd.xlane.f32.xlu2 %v5470_v27 }
0x142a   : > { %v5396_v55 = vpop.f32.mrf.mxu3 }
0x142b   : > { %v5397_v10 = vadd.f32 %v5396_v55, %v5360_v37 }
0x142d   : > { %v5406_v13 = vadd.f32 %v5397_v10, %v8248_v9 }
0x142f   : > { %v5473_v52 = vsel %vm536_vm0, %v5406_v13, 0.0 }
0x1430   : > { %5428 = vadd.xlane.f32.xlu2 %v5427_v48  ;;  %5474 = vadd.xlane.f32.xlu1 %v5473_v52 }
0x1438   : > { %5431 = vadd.xlane.f32.xlu1 %v5430_v54 }
0x1453   : > { %v5399_v60 = vpop.f32.mrf.mxu3 }
0x1454   : > { %v5400_v33 = vadd.f32 %v5399_v60, %v5360_v37 }
0x1456   : > { %v8772_v32 = vadd.f32 %v5400_v33, %v8254_v50 }
0x1458   : > { %v5476_v9 = vsel %vm536_vm0, %v8772_v32, 0.0 }
0x1459   : > { %5477 = vadd.xlane.f32.xlu0 %v5476_v9 }
0x1493   : > { %v5469_v12 = vpop.xlane.xlu0 %5468 }
0x1494   : > { %v5479_v63 = vmul.f32 %v5469_v12, %v8752_v47 }
0x1496   : > { %v8777_v28 = vsub.f32 %v5404_v43, %v5479_v63 }
0x1498   : > { %v5487_v39 = vmul.f32 %v8777_v28, %v8777_v28 }
0x149a   : > { %v5491_v40 = vsel %vm536_vm0, %v5487_v39, 0.0 }
0x149b   : > { %v5472_v24 = vpop.xlane.xlu2 %5471  ;;  %5492 = vadd.xlane.f32.xlu0 %v5491_v40 }
0x149c   : > { %v5480_v53 = vmul.f32 %v5472_v24, %v8752_v47 }
0x149e   : > { %v8783_v50 = vsub.f32 %v5405_v18, %v5480_v53 }
0x14a0   : > { %v5488_v29 = vmul.f32 %v8783_v50, %v8783_v50 }
0x14a2   : > { %v5494_v51 = vsel %vm536_vm0, %v5488_v29, 0.0 }
0x14a3   : > { %5495 = vadd.xlane.f32.xlu2 %v5494_v51  ;;  %v5429_v20 = vpop.xlane.xlu2 %5428  ;;  %v5475_v0 = vpop.xlane.xlu1 %5474 }
0x14a4   : > { %v5433_v3 = vmul.f32 %v5429_v20, %v8752_v47  ;;  %v5481_v25 = vmul.f32 %v5475_v0, %v8752_v47 }
0x14a6   : > { %v5435_v21 = vadd.f32 1e-05, %v5433_v3  ;;  %v8790_v22 = vsub.f32 %v5406_v13, %v5481_v25 }
0x14a8   : > { %6520 = vrsqrt.f32 %v5435_v21  ;;  %v5489_v34 = vmul.f32 %v8790_v22, %v8790_v22  ;;  %vm5443_vm11 = vweird.f32 %v5435_v21 }
0x14aa   : > { %v5497_v16 = vsel %vm536_vm0, %v5489_v34, 0.0 }
0x14ab   : > { %5498 = vadd.xlane.f32.xlu1 %v5497_v16  ;;  %v5432_v26 = vpop.xlane.xlu1 %5431 }
0x14ac   : > { %v5434_v11 = vmul.f32 %v5432_v26, %v8752_v47 }
0x14ae   : > { %v6521_v30 = vpop.eup %6520  ;;  %v5436_v1 = vadd.f32 1e-05, %v5434_v11 }
0x14af   : > { %v5438_v44 = vmul.f32 %v6521_v30, %v5435_v21  ;;  %vm5444_vm3 = vweird.f32 %v6521_v30 }
0x14b0   : > { %6522 = vrsqrt.f32 %v5436_v1  ;;  %vm5445_vm7 = vmor %vm5443_vm11, %vm5444_vm3  ;;  %vm5453_vm9 = vweird.f32 %v5436_v1 }
0x14b1   : > { %v5439_v38 = vmul.f32 %v6521_v30, %v5438_v44 }
0x14b3   : > { %v5440_v62 = vmul.f32 0.5, %v5439_v38 }
0x14b5   : > { %v5441_v7 = vsub.f32 1.5, %v5440_v62 }
0x14b6   : > { %v6523_v15 = vpop.eup %6522 }
0x14b7   : > { %v5442_v57 = vmul.f32 %v6521_v30, %v5441_v7  ;;  %v5448_v2 = vmul.f32 %v6523_v15, %v5436_v1  ;;  %vm5454_vm8 = vweird.f32 %v6523_v15 }
0x14b8   : > { %vm5455_vm10 = vmor %vm5453_vm9, %vm5454_vm8 }
0x14b9   : > { %v5446_v58 = vsel %vm5445_vm7, %v6521_v30, %v5442_v57  ;;  %v5449_v42 = vmul.f32 %v6523_v15, %v5448_v2 }
0x14ba   : > { %v5457_v37 = vmul.f32 %v5446_v58, %v8756_v4 }
0x14bb   : > { %v5450_v14 = vmul.f32 0.5, %v5449_v42 }
0x14bc   : > { %v5460_v23 = vmul.f32 %v8796_v5, %v5457_v37 }
0x14bd   : > { %v5451_v6 = vsub.f32 1.5, %v5450_v14 }
0x14be   : > { %v5463_v43 = vadd.f32 %v8799_v59, %v5460_v23 }
0x14bf   : > { %v5452_v19 = vmul.f32 %v6523_v15, %v5451_v6 }
0x14c0   : > { %5465 = vst.msk [vmem:[%s8806_s30] sm:$0xff] %vm536_vm0, %v5463_v43 }
0x14c1   : > { %v5456_v36 = vsel %vm5455_vm10, %v6523_v15, %v5452_v19 }
0x14c2   : > { %v5458_v31 = vmul.f32 %v5456_v36, %v8764_v46 }
0x14c4   : > { %v5461_v49 = vmul.f32 %v8796_v5, %v5458_v31 }
0x14c6   : > { %v5464_v35 = vadd.f32 %v8799_v59, %v5461_v49 }
0x14c8   : > { %5466 = vst.msk [vmem:[%s8806_s30 + $0x8] sm:$0xff] %vm536_vm0, %v5464_v35 }
0x14cc   : > { %v5478_v17 = vpop.xlane.xlu0 %5477 }
0x14cd   : > { %v5482_v18 = vmul.f32 %v5478_v17, %v8752_v47 }
0x14cf   : > { %v8818_v4 = vsub.f32 %v8772_v32, %v5482_v18 }
0x14d1   : > { %v5490_v27 = vmul.f32 %v8818_v4, %v8818_v4 }
0x14d3   : > { %v5500_v8 = vsel %vm536_vm0, %v5490_v27, 0.0 }
0x14d4   : > { %5501 = vadd.xlane.f32.xlu0 %v5500_v8 }
0x150e   : > { %v5493_v55 = vpop.xlane.xlu0 %5492 }
0x150f   : > { %v5503_v56 = vmul.f32 %v5493_v55, %v8752_v47 }
0x1511   : > { %v5507_v10 = vadd.f32 1e-05, %v5503_v56 }
0x1513   : > { %6524 = vrsqrt.f32 %v5507_v10  ;;  %vm5517_vm13 = vweird.f32 %v5507_v10 }
0x1516   : > { %v5496_v41 = vpop.xlane.xlu2 %5495 }
0x1517   : > { %v5504_v13 = vmul.f32 %v5496_v41, %v8752_v47 }
0x1519   : > { %v6525_v46 = vpop.eup %6524  ;;  %v5508_v48 = vadd.f32 1e-05, %v5504_v13 }
0x151a   : > { %v5512_v52 = vmul.f32 %v6525_v46, %v5507_v10  ;;  %vm5518_vm12 = vweird.f32 %v6525_v46 }
0x151b   : > { %6526 = vrsqrt.f32 %v5508_v48  ;;  %vm5519_vm14 = vmor %vm5517_vm13, %vm5518_vm12  ;;  %vm5527_vm2 = vweird.f32 %v5508_v48 }
0x151c   : > { %v5513_v45 = vmul.f32 %v6525_v46, %v5512_v52 }
0x151e   : > { %v5514_v54 = vmul.f32 0.5, %v5513_v45  ;;  %v5499_v60 = vpop.xlane.xlu1 %5498 }
0x151f   : > { %v5505_v33 = vmul.f32 %v5499_v60, %v8752_v47 }
0x1520   : > { %v5515_v32 = vsub.f32 1.5, %v5514_v54 }
0x1521   : > { %v6527_v9 = vpop.eup %6526  ;;  %v5509_v12 = vadd.f32 1e-05, %v5505_v33 }
0x1522   : > { %v5516_v63 = vmul.f32 %v6525_v46, %v5515_v32  ;;  %v5522_v39 = vmul.f32 %v6527_v9, %v5508_v48  ;;  %vm5528_vm15 = vweird.f32 %v6527_v9 }
0x1523   : > { %6528 = vrsqrt.f32 %v5509_v12  ;;  %vm5529_vm4 = vmor %vm5527_vm2, %vm5528_vm15  ;;  %vm5537_vm6 = vweird.f32 %v5509_v12 }
0x1524   : > { %v5520_v40 = vsel %vm5519_vm14, %v6525_v46, %v5516_v63  ;;  %v5523_v24 = vmul.f32 %v6527_v9, %v5522_v39 }
0x1525   : > { %v5551_v53 = vmul.f32 %v5520_v40, %v8777_v28 }
0x1526   : > { %v5524_v29 = vmul.f32 0.5, %v5523_v24 }
0x1527   : > { %v5555_v51 = vmul.f32 %v5551_v53, %v8796_v5 }
0x1528   : > { %v5525_v20 = vsub.f32 1.5, %v5524_v29 }
0x1529   : > { %v6529_v0 = vpop.eup %6528  ;;  %v5559_v3 = vadd.f32 %v5555_v51, %v8799_v59 }
0x152a   : > { %v5526_v25 = vmul.f32 %v6527_v9, %v5525_v20  ;;  %v5532_v21 = vmul.f32 %v6529_v0, %v5509_v12  ;;  %vm5538_vm5 = vweird.f32 %v6529_v0 }
0x152b   : > { %5563 = vst.msk [vmem:[%s8806_s30 + $0x10] sm:$0xff] %vm536_vm0, %v5559_v3  ;;  %vm5539_vm1 = vmor %vm5537_vm6, %vm5538_vm5 }
0x152c   : > { %v5530_v34 = vsel %vm5529_vm4, %v6527_v9, %v5526_v25  ;;  %v5533_v16 = vmul.f32 %v6529_v0, %v5532_v21 }
0x152d   : > { %v5552_v28 = vmul.f32 %v5530_v34, %v8783_v50 }
0x152e   : > { %v5534_v26 = vmul.f32 0.5, %v5533_v16 }
0x152f   : > { %v5556_v11 = vmul.f32 %v5552_v28, %v8796_v5 }
0x1530   : > { %v5535_v30 = vsub.f32 1.5, %v5534_v26 }
0x1531   : > { %v5560_v1 = vadd.f32 %v5556_v11, %v8799_v59 }
0x1532   : > { %v5536_v44 = vmul.f32 %v6529_v0, %v5535_v30 }
0x1533   : > { %5564 = vst.msk [vmem:[%s8806_s30 + $0x18] sm:$0xff] %vm536_vm0, %v5560_v1 }
0x1534   : > { %v5540_v38 = vsel %vm5539_vm1, %v6529_v0, %v5536_v44 }
0x1535   : > { %v5553_v62 = vmul.f32 %v5540_v38, %v8790_v22 }
0x1537   : > { %v5557_v7 = vmul.f32 %v5553_v62, %v8796_v5 }
0x1539   : > { %v5561_v15 = vadd.f32 %v5557_v7, %v8799_v59 }
0x153b   : > { %5565 = vst.msk [vmem:[%s8806_s30 + $0x20] sm:$0xff] %vm536_vm0, %v5561_v15 }
0x1547   : > { %v5502_v50 = vpop.xlane.xlu0 %5501 }
0x1548   : > { %v5506_v57 = vmul.f32 %v5502_v50, %v8752_v47 }
0x154a   : > { %v5510_v2 = vadd.f32 1e-05, %v5506_v57 }
0x154c   : > { %6530 = vrsqrt.f32 %v5510_v2  ;;  %vm5547_vm11 = vweird.f32 %v5510_v2 }
0x1552   : > { %v6531_v61 = vpop.eup %6530 }
0x1553   : > { %v5542_v58 = vmul.f32 %v6531_v61, %v5510_v2  ;;  %vm5548_vm3 = vweird.f32 %v6531_v61 }
0x1554   : > { %vm5549_vm7 = vmor %vm5547_vm11, %vm5548_vm3 }
0x1555   : > { %v5543_v42 = vmul.f32 %v6531_v61, %v5542_v58 }
0x1557   : > { %v5544_v37 = vmul.f32 0.5, %v5543_v42 }
0x1559   : > { %v5545_v14 = vsub.f32 1.5, %v5544_v37 }
0x155b   : > { %v5546_v23 = vmul.f32 %v6531_v61, %v5545_v14 }
0x155d   : > { %v5550_v22 = vsel %vm5549_vm7, %v6531_v61, %v5546_v23 }
0x155e   : > { %v5554_v6 = vmul.f32 %v5550_v22, %v8818_v4 }
0x1560   : > { %v5558_v43 = vmul.f32 %v5554_v6, %v8796_v5 }
0x1562   : > { %v5562_v19 = vadd.f32 %v5558_v43, %v8799_v59 }
0x1564   : > { %5566 = vst.msk [vmem:[%s8806_s30 + $0x28] sm:$0xff] %vm536_vm0, %v5562_v19 }
0x1565 PF: > { %s19_s24 = sadd.s32 1, %s6639_s24  }
0x1566   : > { %p16_p7 = scmp.ge.s32.totalorder %s19_s24, 4  }
0x1568   :  { %18 = sbr.rel (!%p16_p7) target bundleno = 2 (0x2), region = 110 }
0x156d   :  { %5588 = vsyncpa [#allocation3], 1 }
0x156e   :  { %5590 = vsyncpa [#allocation3 + $0x1], 1 }
0x156f   :  { %5591 = vsyncpa [#allocation5], 1 }

</bundles_post_ra>
